<compile_context>
chip_gen: v7x
topology: tpu7x:2x2x1
jax: 0.10.0
libtpu: 0.0.40
codegen_flags: <defaults>
</compile_context>

<pallas_src>
import functools
import math

import jax
import jax.numpy as jnp
from jax import lax
from jax.experimental import pallas as pl
from jax.experimental.pallas import tpu as pltpu

EPS = 1e-5          # torch default layer_norm_eps
FF_CHUNK = 512      # dim_feedforward tile for the chunked FFN
DEC_PAD = 256       # decoder output padded to a 128-lane multiple


# ----------------------------- in-kernel helpers -----------------------------
def _ln(x, g, b):
    """LayerNorm over the last axis, single-pass stats (E[x^2]-E[x]^2), f32."""
    m1 = jnp.mean(x, axis=-1, keepdims=True)
    m2 = jnp.mean(x * x, axis=-1, keepdims=True)
    var = jnp.maximum(m2 - m1 * m1, 0.0)
    return (x - m1) * lax.rsqrt(var + EPS) * g + b


# ------------------------------- fused kernel --------------------------------
def _fused_kernel(x_ref, wqkv_ref, wo_ref, w1_ref, w2_ref, b1_ref,
                  lvec_ref, misc_ref, emb_w_ref, fc_w_ref, dec_w_ref,
                  o_ref, *, nhead, num_layers, d_model, dim_ff, ff_chunk,
                  misc_dec_off):
    d = d_model
    dh = d // nhead
    scale = 1.0 / math.sqrt(dh)

    # per-layer small-vector blob layout (f32):
    # [bqkv(3d) | bo(d) | b2(d) | g1(d) | be1(d) | g2(d) | be2(d)]
    o_bqkv, o_bo, o_b2 = 0, 3 * d, 4 * d
    o_g1, o_be1, o_g2, o_be2 = 5 * d, 6 * d, 7 * d, 8 * d

    def mm(x_bf, w, bias=None):
        out = jnp.dot(x_bf, w, preferred_element_type=jnp.float32)
        return out if bias is None else out + bias

    def enc_layer(h3, l):
        """Post-norm nn.TransformerEncoderLayer (ReLU FFN, eval-mode dropout)."""
        b, t, _ = h3.shape
        x2 = h3.reshape(b * t, d)

        # ---- fused QKV projection over all tokens ---------------------------
        qkv = mm(x2.astype(jnp.bfloat16), wqkv_ref[l],
                 lvec_ref[l:l + 1, o_bqkv:o_bqkv + 3 * d])        # (b*t, 3d) f32
        qkv = qkv.reshape(b, t, 3 * d)
        q = qkv[..., 0 * d:1 * d].astype(jnp.bfloat16)
        k = qkv[..., 1 * d:2 * d].astype(jnp.bfloat16)
        v = qkv[..., 2 * d:3 * d].astype(jnp.bfloat16)

        # ---- all heads folded onto the batch axis: one score einsum, one
        #      softmax chain, one context einsum --------------------------------
        def head_stack(a):                      # (b,t,d) -> (nhead*b, t, dh)
            return jnp.concatenate(
                [a[..., h * dh:(h + 1) * dh] for h in range(nhead)], axis=0)

        qs, ks, vs = head_stack(q), head_stack(k), head_stack(v)
        s = jnp.einsum('bqd,bkd->bqk', qs, ks,
                       preferred_element_type=jnp.float32) * scale
        s = s - jnp.max(s, axis=-1, keepdims=True)
        e = jnp.exp(s)
        p = e * pl.reciprocal(jnp.sum(e, axis=-1, keepdims=True), approx=True)
        ctx = jnp.einsum('bqk,bkd->bqd', p.astype(jnp.bfloat16), vs,
                         preferred_element_type=jnp.float32)      # (nhead*b,t,dh)

        # heads back onto the lane axis -> ONE output-projection matmul
        ctx = jnp.concatenate([ctx[h * b:(h + 1) * b] for h in range(nhead)],
                              axis=-1).reshape(b * t, d)
        attn = mm(ctx.astype(jnp.bfloat16), wo_ref[l],
                  lvec_ref[l:l + 1, o_bo:o_bo + d])

        y = _ln(x2 + attn,
                lvec_ref[l:l + 1, o_g1:o_g1 + d],
                lvec_ref[l:l + 1, o_be1:o_be1 + d])

        # ---- FFN chunked over dim_ff: live intermediate is (b*t, ff_chunk) ---
        y_bf = y.astype(jnp.bfloat16)
        acc = jnp.zeros((b * t, d), jnp.float32)
        for c in range(dim_ff // ff_chunk):
            c0 = c * ff_chunk
            h1 = jnp.maximum(
                mm(y_bf, w1_ref[l, :, c0:c0 + ff_chunk],
                   b1_ref[l:l + 1, c0:c0 + ff_chunk]), 0.0)        # ReLU
            acc = acc + mm(h1.astype(jnp.bfloat16),
                           w2_ref[l, c0:c0 + ff_chunk, :])
        ff = acc + lvec_ref[l:l + 1, o_b2:o_b2 + d]

        out = _ln(y + ff,
                  lvec_ref[l:l + 1, o_g2:o_g2 + d],
                  lvec_ref[l:l + 1, o_be2:o_be2 + d])
        return out.reshape(b, t, d)

    # ------------------------------ forward pass ------------------------------
    x = x_ref[0]                                                   # (B, S, F) f32
    bsz, seq, feat = x.shape

    # embedding: Linear(feature_num, d_model)
    h = mm(x.reshape(bsz * seq, feat).astype(jnp.bfloat16), emb_w_ref[...],
           misc_ref[:, 0:d])                                       # (B*S, D)

    # tf1.encoder: num_layers post-norm layers + final LayerNorm
    h3 = h.reshape(bsz, seq, d)
    for l in range(num_layers):
        h3 = enc_layer(h3, l)
    # final encoder LayerNorm is per-row; only the last position feeds the rest
    # of the network, so apply it to those rows only (identical result).
    h = _ln(h3[:, seq - 1, :],
            misc_ref[:, 2 * d:3 * d], misc_ref[:, 3 * d:4 * d])    # (B, D)

    # fc + dropout
    h = mm(h.astype(jnp.bfloat16), fc_w_ref[...], misc_ref[:, d:2 * d])
    # TODO(synk): nn.Dropout(0.5) after fc and dropout=0.1 inside each encoder
    # layer are identity here (eval/inference); training-mode Bernoulli masking
    # with torch RNG is not replayed.

    # tf2.encoder: the (B, D) tensor is an UNBATCHED sequence of length B
    h2 = h.reshape(1, bsz, d)
    for l in range(num_layers):
        h2 = enc_layer(h2, num_layers + l)
    h2 = _ln(h2.reshape(bsz, d),
             misc_ref[:, 4 * d:5 * d], misc_ref[:, 5 * d:6 * d])

    # decoder: Linear(d_model, 200), padded to 256 lanes -> unmasked store
    o_ref[0] = mm(h2.astype(jnp.bfloat16), dec_w_ref[...],
                  misc_ref[:, misc_dec_off:misc_dec_off + DEC_PAD])


# ------------------------------- host wrapper ---------------------------------
def _cost_estimate(G, B, S, F, D, nhead, num_layers, dim_ff, in_bytes, out_bytes):
    dh = D // nhead

    def enc(ntok, seqlen):
        mm = 2 * ntok * (D * 3 * D + D * D + 2 * D * dim_ff)
        attn = 4 * nhead * ntok * seqlen * dh
        return mm + attn

    flops = G * (2 * B * S * F * D
                 + num_layers * enc(B * S, S)
                 + 2 * B * D * D
                 + num_layers * enc(B, B)
                 + 2 * B * D * DEC_PAD)
    trans = G * num_layers * nhead * (B * S * S + B * B)   # exp() calls
    return pl.CostEstimate(flops=flops, transcendentals=trans,
                           bytes_accessed=in_bytes + out_bytes)


def transformer_forward(x, packed, nhead, num_layers, out_dim=200):
    """x: (B, S, F) or (G, B, S, F) stacked independent inputs."""
    squeeze = (x.ndim == 3)
    xg = x[None] if squeeze else x
    G, B, S, F = xg.shape
    d_model = packed['emb_w'].shape[1]
    dim_ff = packed['b1'].shape[1]
    misc_dec_off = packed['misc'].shape[1] - DEC_PAD
    ff_chunk = FF_CHUNK if dim_ff % FF_CHUNK == 0 else dim_ff

    kernel = functools.partial(
        _fused_kernel, nhead=nhead, num_layers=num_layers, d_model=d_model,
        dim_ff=dim_ff, ff_chunk=ff_chunk, misc_dec_off=misc_dec_off)

    def rep(a):     # full-array block, constant across the group grid
        nd = a.ndim
        return pl.BlockSpec(a.shape, lambda g, _nd=nd: (0,) * _nd)

    order = ('wqkv', 'wo', 'w1', 'w2', 'b1', 'lvec', 'misc',
             'emb_w', 'fc_w', 'dec_w')
    weights = [packed[k] for k in order]

    in_specs = [pl.BlockSpec((1, B, S, F), lambda g: (g, 0, 0, 0))]
    in_specs += [rep(a) for a in weights]
    out_spec = pl.BlockSpec((1, B, DEC_PAD), lambda g: (g, 0, 0))

    in_bytes = (xg.size * xg.dtype.itemsize
                + sum(a.size * a.dtype.itemsize for a in weights))
    out_bytes = G * B * DEC_PAD * 4
    cost = _cost_estimate(G, B, S, F, d_model, nhead, num_layers, dim_ff,
                          in_bytes, out_bytes)

    out = pl.pallas_call(
        kernel,
        grid=(G,),
        in_specs=in_specs,
        out_specs=out_spec,
        out_shape=jax.ShapeDtypeStruct((G, B, DEC_PAD), jnp.float32),
        compiler_params=pltpu.CompilerParams(
            dimension_semantics=("parallel",),
            vmem_limit_bytes=16 * 1024 * 1024),
        cost_estimate=cost,
    )(xg, *weights)

    out = out[..., :out_dim]
    return out[0] if squeeze else out


# ---------------------------- parameter handling ------------------------------
def init_params(key, feature_num, d_model, nhead, num_layers, dim_ff,
                out_dim=200):
    keys = iter(jax.random.split(key, 512))

    def w(din, dout, scale=0.05):
        # Stored pre-transposed (in_features, out_features), bf16 for the MXU.
        return (jax.random.normal(next(keys), (din, dout), jnp.float32)
                * scale).astype(jnp.bfloat16)

    def b(dout, scale=0.05):
        return jax.random.normal(next(keys), (1, dout), jnp.float32) * scale

    def enc_layer():
        return dict(
            wqkv=w(d_model, 3 * d_model), bqkv=b(3 * d_model),
            wo=w(d_model, d_model),       bo=b(d_model),
            w1=w(d_model, dim_ff),        b1=b(dim_ff),
            w2=w(dim_ff, d_model),        b2=b(d_model),
            g1=jnp.ones((1, d_model), jnp.float32),
            be1=jnp.zeros((1, d_model), jnp.float32),
            g2=jnp.ones((1, d_model), jnp.float32),
            be2=jnp.zeros((1, d_model), jnp.float32),
        )

    return dict(
        emb_w=w(feature_num, d_model), emb_b=b(d_model),
        fc_w=w(d_model, d_model),      fc_b=b(d_model),
        dec_w=w(d_model, out_dim),     dec_b=b(out_dim),
        tf1_layers=[enc_layer() for _ in range(num_layers)],
        tf1_norm_g=jnp.ones((1, d_model), jnp.float32),
        tf1_norm_b=jnp.zeros((1, d_model), jnp.float32),
        tf2_layers=[enc_layer() for _ in range(num_layers)],
        tf2_norm_g=jnp.ones((1, d_model), jnp.float32),
        tf2_norm_b=jnp.zeros((1, d_model), jnp.float32),
    )


def pack_params(p, num_layers, out_dim=200):
    """Pack ~62 parameter arrays into 10 stacked buffers (few prologue DMAs)."""
    d = p['emb_w'].shape[1]
    layers = list(p['tf1_layers']) + list(p['tf2_layers'])
    bf = lambda a: a.astype(jnp.bfloat16)
    f32 = lambda a: a.reshape(-1).astype(jnp.float32)

    wqkv = jnp.stack([bf(lp['wqkv']) for lp in layers])        # (2L, D, 3D) bf16
    wo = jnp.stack([bf(lp['wo']) for lp in layers])            # (2L, D, D)
    w1 = jnp.stack([bf(lp['w1']) for lp in layers])            # (2L, D, dim_ff)
    w2 = jnp.stack([bf(lp['w2']) for lp in layers])            # (2L, dim_ff, D)
    b1 = jnp.stack([f32(lp['b1']) for lp in layers])           # (2L, dim_ff) f32
    lvec = jnp.stack([jnp.concatenate(
        [f32(lp['bqkv']), f32(lp['bo']), f32(lp['b2']), f32(lp['g1']),
         f32(lp['be1']), f32(lp['g2']), f32(lp['be2'])]) for lp in layers])

    misc_dec_off = ((6 * d + 127) // 128) * 128
    misc = jnp.zeros((misc_dec_off + DEC_PAD,), jnp.float32)
    off = 0
    for v in (p['emb_b'], p['fc_b'], p['tf1_norm_g'], p['tf1_norm_b'],
              p['tf2_norm_g'], p['tf2_norm_b']):
        v = f32(v)
        misc = misc.at[off:off + v.shape[0]].set(v)
        off += v.shape[0]
    misc = misc.at[misc_dec_off:misc_dec_off + out_dim].set(f32(p['dec_b']))
    misc = misc.reshape(1, -1)

    dec_w = jnp.zeros((d, DEC_PAD), jnp.bfloat16)
    dec_w = dec_w.at[:, :out_dim].set(bf(p['dec_w']))

    return dict(wqkv=wqkv, wo=wo, w1=w1, w2=w2, b1=b1, lvec=lvec, misc=misc,
                emb_w=bf(p['emb_w']), fc_w=bf(p['fc_w']), dec_w=dec_w)


# ------------------------------------ main ------------------------------------
if __name__ == "__main__":
    FEATURE_NUM, D_MODEL, NHEAD, NUM_LAYERS = 16, 32, 4, 2
    DIM_FF = 2048                 # nn.Transformer default dim_feedforward
    B, S = 2, 8

    key = jax.random.PRNGKey(0)
    kx, kp = jax.random.split(key)
    x = jax.random.normal(kx, (B, S, FEATURE_NUM), jnp.float32)
    params = init_params(kp, FEATURE_NUM, D_MODEL, NHEAD, NUM_LAYERS, DIM_FF)
    packed = pack_params(params, NUM_LAYERS)

    fwd = jax.jit(functools.partial(transformer_forward, nhead=NHEAD,
                                    num_layers=NUM_LAYERS))
    out = fwd(x, packed)
    jax.block_until_ready(out)
    assert out.shape == (B, 200) and out.dtype == jnp.float32
    assert bool(jnp.all(jnp.isfinite(out)))
    print("KERNEL_OK")
</pallas_src>

<mosaic_0001>
module attributes {stable_mosaic.version = 11 : i64} {
  func.func @_fused_kernel(%arg0: i32, %arg1: memref<1x2x8x16xf32, #tpu.memory_space<vmem>>, %arg2: memref<4x32x96xbf16, #tpu.memory_space<vmem>>, %arg3: memref<4x32x32xbf16, #tpu.memory_space<vmem>>, %arg4: memref<4x32x2048xbf16, #tpu.memory_space<vmem>>, %arg5: memref<4x2048x32xbf16, #tpu.memory_space<vmem>>, %arg6: memref<4x2048xf32, #tpu.memory_space<vmem>>, %arg7: memref<4x288xf32, #tpu.memory_space<vmem>>, %arg8: memref<1x512xf32, #tpu.memory_space<vmem>>, %arg9: memref<16x32xbf16, #tpu.memory_space<vmem>>, %arg10: memref<32x32xbf16, #tpu.memory_space<vmem>>, %arg11: memref<32x256xbf16, #tpu.memory_space<vmem>>, %arg12: memref<1x2x256xf32, #tpu.memory_space<vmem>>) attributes {dimension_semantics = [#tpu.dimension_semantics<parallel>], iteration_bounds = array<i64: 1>, scalar_prefetch = 0 : i64, scratch_operands = 0 : i64, tpu.core_type = #tpu.core_type<tc>, window_params = [{transform_indices = @transform_0, window_bounds = array<i64: 1, 2, 8, 16>}, {pipeline_mode = #tpu.pipeline_mode<synchronous>, transform_indices = @transform_1, window_bounds = array<i64: 4, 32, 96>}, {pipeline_mode = #tpu.pipeline_mode<synchronous>, transform_indices = @transform_2, window_bounds = array<i64: 4, 32, 32>}, {pipeline_mode = #tpu.pipeline_mode<synchronous>, transform_indices = @transform_3, window_bounds = array<i64: 4, 32, 2048>}, {pipeline_mode = #tpu.pipeline_mode<synchronous>, transform_indices = @transform_4, window_bounds = array<i64: 4, 2048, 32>}, {pipeline_mode = #tpu.pipeline_mode<synchronous>, transform_indices = @transform_5, window_bounds = array<i64: 4, 2048>}, {pipeline_mode = #tpu.pipeline_mode<synchronous>, transform_indices = @transform_6, window_bounds = array<i64: 4, 288>}, {pipeline_mode = #tpu.pipeline_mode<synchronous>, transform_indices = @transform_7, window_bounds = array<i64: 1, 512>}, {pipeline_mode = #tpu.pipeline_mode<synchronous>, transform_indices = @transform_8, window_bounds = array<i64: 16, 32>}, {pipeline_mode = #tpu.pipeline_mode<synchronous>, transform_indices = @transform_9, window_bounds = array<i64: 32, 32>}, {pipeline_mode = #tpu.pipeline_mode<synchronous>, transform_indices = @transform_10, window_bounds = array<i64: 32, 256>}, {transform_indices = @transform_11, window_bounds = array<i64: 1, 2, 256>}]} {
    %c0 = arith.constant 0 : index
    %c0_0 = arith.constant 0 : index
    %c0_1 = arith.constant 0 : index
    %c0_2 = arith.constant 0 : index
    %0 = vector.load %arg1[%c0, %c0_0, %c0_1, %c0_2] : memref<1x2x8x16xf32, #tpu.memory_space<vmem>>, vector<1x2x8x16xf32>
    %1 = vector.shape_cast %0 : vector<1x2x8x16xf32> to vector<2x8x16xf32>
    %2 = vector.shape_cast %1 : vector<2x8x16xf32> to vector<16x16xf32>
    %3 = arith.truncf %2 : vector<16x16xf32> to vector<16x16xbf16>
    %c0_3 = arith.constant 0 : index
    %c0_4 = arith.constant 0 : index
    %4 = vector.load %arg9[%c0_3, %c0_4] : memref<16x32xbf16, #tpu.memory_space<vmem>>, vector<16x32xbf16>
    %c0_5 = arith.constant 0 : index
    %c0_6 = arith.constant 0 : index
    %5 = vector.load %arg8[%c0_5, %c0_6] : memref<1x512xf32, #tpu.memory_space<vmem>>, vector<1x32xf32>
    %cst = arith.constant dense<0.000000e+00> : vector<16x32xf32>
    %6 = tpu.matmul %3, %4, %cst {dimension_numbers = #tpu.dot_dimension_numbers<[1], [0], [0], [1], [0, 0, 1, 1], [], []>} : vector<16x16xbf16>, vector<16x32xbf16>, vector<16x32xf32> -> vector<16x32xf32>
    %7 = vector.broadcast %5 : vector<1x32xf32> to vector<16x32xf32>
    %8 = arith.addf %6, %7 : vector<16x32xf32>
    %9 = vector.shape_cast %8 : vector<16x32xf32> to vector<2x8x32xf32>
    %10 = vector.shape_cast %9 : vector<2x8x32xf32> to vector<16x32xf32>
    %11 = arith.truncf %10 : vector<16x32xf32> to vector<16x32xbf16>
    %c0_7 = arith.constant 0 : index
    %c0_8 = arith.constant 0 : index
    %c0_9 = arith.constant 0 : index
    %12 = vector.load %arg2[%c0_7, %c0_8, %c0_9] : memref<4x32x96xbf16, #tpu.memory_space<vmem>>, vector<1x32x96xbf16>
    %13 = vector.shape_cast %12 : vector<1x32x96xbf16> to vector<32x96xbf16>
    %c0_10 = arith.constant 0 : index
    %c0_11 = arith.constant 0 : index
    %14 = vector.load %arg7[%c0_10, %c0_11] : memref<4x288xf32, #tpu.memory_space<vmem>>, vector<1x96xf32>
    %cst_12 = arith.constant dense<0.000000e+00> : vector<16x96xf32>
    %15 = tpu.matmul %11, %13, %cst_12 {dimension_numbers = #tpu.dot_dimension_numbers<[1], [0], [0], [1], [0, 0, 1, 1], [], []>} : vector<16x32xbf16>, vector<32x96xbf16>, vector<16x96xf32> -> vector<16x96xf32>
    %16 = vector.broadcast %14 : vector<1x96xf32> to vector<16x96xf32>
    %17 = arith.addf %15, %16 : vector<16x96xf32>
    %18 = vector.shape_cast %17 : vector<16x96xf32> to vector<2x8x96xf32>
    %19 = vector.extract_strided_slice %18 {offsets = [0, 0, 0], sizes = [2, 8, 32], strides = [1, 1, 1]} : vector<2x8x96xf32> to vector<2x8x32xf32>
    %20 = arith.truncf %19 : vector<2x8x32xf32> to vector<2x8x32xbf16>
    %21 = vector.extract_strided_slice %18 {offsets = [0, 0, 32], sizes = [2, 8, 32], strides = [1, 1, 1]} : vector<2x8x96xf32> to vector<2x8x32xf32>
    %22 = arith.truncf %21 : vector<2x8x32xf32> to vector<2x8x32xbf16>
    %23 = vector.extract_strided_slice %18 {offsets = [0, 0, 64], sizes = [2, 8, 32], strides = [1, 1, 1]} : vector<2x8x96xf32> to vector<2x8x32xf32>
    %24 = arith.truncf %23 : vector<2x8x32xf32> to vector<2x8x32xbf16>
    %25 = vector.extract_strided_slice %20 {offsets = [0, 0, 0], sizes = [2, 8, 8], strides = [1, 1, 1]} : vector<2x8x32xbf16> to vector<2x8x8xbf16>
    %26 = vector.extract_strided_slice %20 {offsets = [0, 0, 8], sizes = [2, 8, 8], strides = [1, 1, 1]} : vector<2x8x32xbf16> to vector<2x8x8xbf16>
    %27 = vector.extract_strided_slice %20 {offsets = [0, 0, 16], sizes = [2, 8, 8], strides = [1, 1, 1]} : vector<2x8x32xbf16> to vector<2x8x8xbf16>
    %28 = vector.extract_strided_slice %20 {offsets = [0, 0, 24], sizes = [2, 8, 8], strides = [1, 1, 1]} : vector<2x8x32xbf16> to vector<2x8x8xbf16>
    %29 = tpu.concatenate %25, %26, %27, %28 in 0 : vector<2x8x8xbf16>, vector<2x8x8xbf16>, vector<2x8x8xbf16>, vector<2x8x8xbf16> -> vector<8x8x8xbf16>
    %30 = vector.extract_strided_slice %22 {offsets = [0, 0, 0], sizes = [2, 8, 8], strides = [1, 1, 1]} : vector<2x8x32xbf16> to vector<2x8x8xbf16>
    %31 = vector.extract_strided_slice %22 {offsets = [0, 0, 8], sizes = [2, 8, 8], strides = [1, 1, 1]} : vector<2x8x32xbf16> to vector<2x8x8xbf16>
    %32 = vector.extract_strided_slice %22 {offsets = [0, 0, 16], sizes = [2, 8, 8], strides = [1, 1, 1]} : vector<2x8x32xbf16> to vector<2x8x8xbf16>
    %33 = vector.extract_strided_slice %22 {offsets = [0, 0, 24], sizes = [2, 8, 8], strides = [1, 1, 1]} : vector<2x8x32xbf16> to vector<2x8x8xbf16>
    %34 = tpu.concatenate %30, %31, %32, %33 in 0 : vector<2x8x8xbf16>, vector<2x8x8xbf16>, vector<2x8x8xbf16>, vector<2x8x8xbf16> -> vector<8x8x8xbf16>
    %35 = vector.extract_strided_slice %24 {offsets = [0, 0, 0], sizes = [2, 8, 8], strides = [1, 1, 1]} : vector<2x8x32xbf16> to vector<2x8x8xbf16>
    %36 = vector.extract_strided_slice %24 {offsets = [0, 0, 8], sizes = [2, 8, 8], strides = [1, 1, 1]} : vector<2x8x32xbf16> to vector<2x8x8xbf16>
    %37 = vector.extract_strided_slice %24 {offsets = [0, 0, 16], sizes = [2, 8, 8], strides = [1, 1, 1]} : vector<2x8x32xbf16> to vector<2x8x8xbf16>
    %38 = vector.extract_strided_slice %24 {offsets = [0, 0, 24], sizes = [2, 8, 8], strides = [1, 1, 1]} : vector<2x8x32xbf16> to vector<2x8x8xbf16>
    %39 = tpu.concatenate %35, %36, %37, %38 in 0 : vector<2x8x8xbf16>, vector<2x8x8xbf16>, vector<2x8x8xbf16>, vector<2x8x8xbf16> -> vector<8x8x8xbf16>
    "tpu.trace_start"() <{level = 10 : i32, message = "bqd,bkd->bqk"}> : () -> ()
    %cst_13 = arith.constant dense<0.000000e+00> : vector<8x8x8xf32>
    %40 = tpu.matmul %29, %34, %cst_13 {dimension_numbers = #tpu.dot_dimension_numbers<[2], [2], [1], [1], [0, 0, 0, 1, 1, 1], [0], [0]>} : vector<8x8x8xbf16>, vector<8x8x8xbf16>, vector<8x8x8xf32> -> vector<8x8x8xf32>
    "tpu.trace_stop"() : () -> ()
    %cst_14 = arith.constant 0.353553385 : f32
    %41 = vector.broadcast %cst_14 : f32 to vector<8x8x8xf32>
    %42 = arith.mulf %40, %41 : vector<8x8x8xf32>
    %cst_15 = arith.constant dense<0xFF800000> : vector<8x8xf32>
    %43 = vector.multi_reduction <maximumf>, %42, %cst_15 [2] : vector<8x8x8xf32> to vector<8x8xf32>
    %44 = vector.shape_cast %43 : vector<8x8xf32> to vector<8x8x1xf32>
    %45 = vector.broadcast %44 : vector<8x8x1xf32> to vector<8x8x8xf32>
    %46 = arith.subf %42, %45 : vector<8x8x8xf32>
    %47 = math.exp %46 : vector<8x8x8xf32>
    %cst_16 = arith.constant dense<0.000000e+00> : vector<8x8xf32>
    %48 = vector.multi_reduction <add>, %47, %cst_16 [2] : vector<8x8x8xf32> to vector<8x8xf32>
    %49 = vector.shape_cast %48 : vector<8x8xf32> to vector<8x8x1xf32>
    %50 = tpu.reciprocal %49 {approx = true} : vector<8x8x1xf32> -> vector<8x8x1xf32>
    %51 = vector.broadcast %50 : vector<8x8x1xf32> to vector<8x8x8xf32>
    %52 = arith.mulf %47, %51 : vector<8x8x8xf32>
    %53 = arith.truncf %52 : vector<8x8x8xf32> to vector<8x8x8xbf16>
    "tpu.trace_start"() <{level = 10 : i32, message = "bqk,bkd->bqd"}> : () -> ()
    %cst_17 = arith.constant dense<0.000000e+00> : vector<8x8x8xf32>
    %54 = tpu.matmul %53, %39, %cst_17 {dimension_numbers = #tpu.dot_dimension_numbers<[2], [1], [1], [2], [0, 0, 0, 1, 1, 2], [0], [0]>} : vector<8x8x8xbf16>, vector<8x8x8xbf16>, vector<8x8x8xf32> -> vector<8x8x8xf32>
    "tpu.trace_stop"() : () -> ()
    %55 = vector.extract_strided_slice %54 {offsets = [0, 0, 0], sizes = [2, 8, 8], strides = [1, 1, 1]} : vector<8x8x8xf32> to vector<2x8x8xf32>
    %56 = vector.extract_strided_slice %54 {offsets = [2, 0, 0], sizes = [2, 8, 8], strides = [1, 1, 1]} : vector<8x8x8xf32> to vector<2x8x8xf32>
    %57 = vector.extract_strided_slice %54 {offsets = [4, 0, 0], sizes = [2, 8, 8], strides = [1, 1, 1]} : vector<8x8x8xf32> to vector<2x8x8xf32>
    %58 = vector.extract_strided_slice %54 {offsets = [6, 0, 0], sizes = [2, 8, 8], strides = [1, 1, 1]} : vector<8x8x8xf32> to vector<2x8x8xf32>
    %59 = tpu.concatenate %55, %56, %57, %58 in 2 : vector<2x8x8xf32>, vector<2x8x8xf32>, vector<2x8x8xf32>, vector<2x8x8xf32> -> vector<2x8x32xf32>
    %60 = vector.shape_cast %59 : vector<2x8x32xf32> to vector<16x32xf32>
    %61 = arith.truncf %60 : vector<16x32xf32> to vector<16x32xbf16>
    %c0_18 = arith.constant 0 : index
    %c0_19 = arith.constant 0 : index
    %c0_20 = arith.constant 0 : index
    %62 = vector.load %arg3[%c0_18, %c0_19, %c0_20] : memref<4x32x32xbf16, #tpu.memory_space<vmem>>, vector<1x32x32xbf16>
    %63 = vector.shape_cast %62 : vector<1x32x32xbf16> to vector<32x32xbf16>
    %c0_21 = arith.constant 0 : index
    %c96 = arith.constant 96 : index
    %64 = vector.load %arg7[%c0_21, %c96] : memref<4x288xf32, #tpu.memory_space<vmem>>, vector<1x32xf32>
    %cst_22 = arith.constant dense<0.000000e+00> : vector<16x32xf32>
    %65 = tpu.matmul %61, %63, %cst_22 {dimension_numbers = #tpu.dot_dimension_numbers<[1], [0], [0], [1], [0, 0, 1, 1], [], []>} : vector<16x32xbf16>, vector<32x32xbf16>, vector<16x32xf32> -> vector<16x32xf32>
    %66 = vector.broadcast %64 : vector<1x32xf32> to vector<16x32xf32>
    %67 = arith.addf %65, %66 : vector<16x32xf32>
    %68 = arith.addf %10, %67 : vector<16x32xf32>
    %c0_23 = arith.constant 0 : index
    %c160 = arith.constant 160 : index
    %69 = vector.load %arg7[%c0_23, %c160] : memref<4x288xf32, #tpu.memory_space<vmem>>, vector<1x32xf32>
    %c0_24 = arith.constant 0 : index
    %c192 = arith.constant 192 : index
    %70 = vector.load %arg7[%c0_24, %c192] : memref<4x288xf32, #tpu.memory_space<vmem>>, vector<1x32xf32>
    %cst_25 = arith.constant dense<0.000000e+00> : vector<16xf32>
    %71 = vector.multi_reduction <add>, %68, %cst_25 [1] : vector<16x32xf32> to vector<16xf32>
    %72 = vector.shape_cast %71 : vector<16xf32> to vector<16x1xf32>
    %cst_26 = arith.constant 3.200000e+01 : f32
    %73 = vector.broadcast %cst_26 : f32 to vector<16x1xf32>
    %74 = arith.divf %72, %73 : vector<16x1xf32>
    %75 = arith.mulf %68, %68 : vector<16x32xf32>
    %cst_27 = arith.constant dense<0.000000e+00> : vector<16xf32>
    %76 = vector.multi_reduction <add>, %75, %cst_27 [1] : vector<16x32xf32> to vector<16xf32>
    %77 = vector.shape_cast %76 : vector<16xf32> to vector<16x1xf32>
    %cst_28 = arith.constant 3.200000e+01 : f32
    %78 = vector.broadcast %cst_28 : f32 to vector<16x1xf32>
    %79 = arith.divf %77, %78 : vector<16x1xf32>
    %80 = arith.mulf %74, %74 : vector<16x1xf32>
    %81 = arith.subf %79, %80 : vector<16x1xf32>
    %cst_29 = arith.constant 0.000000e+00 : f32
    %82 = vector.broadcast %cst_29 : f32 to vector<16x1xf32>
    %83 = arith.maximumf %81, %82 : vector<16x1xf32>
    %84 = vector.broadcast %74 : vector<16x1xf32> to vector<16x32xf32>
    %85 = arith.subf %68, %84 : vector<16x32xf32>
    %cst_30 = arith.constant 9.99999974E-6 : f32
    %86 = vector.broadcast %cst_30 : f32 to vector<16x1xf32>
    %87 = arith.addf %83, %86 : vector<16x1xf32>
    %88 = math.rsqrt %87 : vector<16x1xf32>
    %89 = vector.broadcast %88 : vector<16x1xf32> to vector<16x32xf32>
    %90 = arith.mulf %85, %89 : vector<16x32xf32>
    %91 = vector.broadcast %69 : vector<1x32xf32> to vector<16x32xf32>
    %92 = arith.mulf %90, %91 : vector<16x32xf32>
    %93 = vector.broadcast %70 : vector<1x32xf32> to vector<16x32xf32>
    %94 = arith.addf %92, %93 : vector<16x32xf32>
    %95 = arith.truncf %94 : vector<16x32xf32> to vector<16x32xbf16>
    %cst_31 = arith.constant 0.000000e+00 : f32
    %96 = vector.broadcast %cst_31 : f32 to vector<16x32xf32>
    %c0_32 = arith.constant 0 : index
    %c0_33 = arith.constant 0 : index
    %c0_34 = arith.constant 0 : index
    %97 = vector.load %arg4[%c0_32, %c0_33, %c0_34] : memref<4x32x2048xbf16, #tpu.memory_space<vmem>>, vector<1x32x512xbf16>
    %98 = vector.shape_cast %97 : vector<1x32x512xbf16> to vector<32x512xbf16>
    %c0_35 = arith.constant 0 : index
    %c0_36 = arith.constant 0 : index
    %99 = vector.load %arg6[%c0_35, %c0_36] : memref<4x2048xf32, #tpu.memory_space<vmem>>, vector<1x512xf32>
    %cst_37 = arith.constant dense<0.000000e+00> : vector<16x512xf32>
    %100 = tpu.matmul %95, %98, %cst_37 {dimension_numbers = #tpu.dot_dimension_numbers<[1], [0], [0], [1], [0, 0, 1, 1], [], []>} : vector<16x32xbf16>, vector<32x512xbf16>, vector<16x512xf32> -> vector<16x512xf32>
    %101 = vector.broadcast %99 : vector<1x512xf32> to vector<16x512xf32>
    %102 = arith.addf %100, %101 : vector<16x512xf32>
    %cst_38 = arith.constant 0.000000e+00 : f32
    %103 = vector.broadcast %cst_38 : f32 to vector<16x512xf32>
    %104 = arith.maximumf %102, %103 : vector<16x512xf32>
    %105 = arith.truncf %104 : vector<16x512xf32> to vector<16x512xbf16>
    %c0_39 = arith.constant 0 : index
    %c0_40 = arith.constant 0 : index
    %c0_41 = arith.constant 0 : index
    %106 = vector.load %arg5[%c0_39, %c0_40, %c0_41] : memref<4x2048x32xbf16, #tpu.memory_space<vmem>>, vector<1x512x32xbf16>
    %107 = vector.shape_cast %106 : vector<1x512x32xbf16> to vector<512x32xbf16>
    %cst_42 = arith.constant dense<0.000000e+00> : vector<16x32xf32>
    %108 = tpu.matmul %105, %107, %cst_42 {dimension_numbers = #tpu.dot_dimension_numbers<[1], [0], [0], [1], [0, 0, 1, 1], [], []>} : vector<16x512xbf16>, vector<512x32xbf16>, vector<16x32xf32> -> vector<16x32xf32>
    %109 = arith.addf %96, %108 : vector<16x32xf32>
    %c0_43 = arith.constant 0 : index
    %c0_44 = arith.constant 0 : index
    %c512 = arith.constant 512 : index
    %110 = vector.load %arg4[%c0_43, %c0_44, %c512] : memref<4x32x2048xbf16, #tpu.memory_space<vmem>>, vector<1x32x512xbf16>
    %111 = vector.shape_cast %110 : vector<1x32x512xbf16> to vector<32x512xbf16>
    %c0_45 = arith.constant 0 : index
    %c512_46 = arith.constant 512 : index
    %112 = vector.load %arg6[%c0_45, %c512_46] : memref<4x2048xf32, #tpu.memory_space<vmem>>, vector<1x512xf32>
    %cst_47 = arith.constant dense<0.000000e+00> : vector<16x512xf32>
    %113 = tpu.matmul %95, %111, %cst_47 {dimension_numbers = #tpu.dot_dimension_numbers<[1], [0], [0], [1], [0, 0, 1, 1], [], []>} : vector<16x32xbf16>, vector<32x512xbf16>, vector<16x512xf32> -> vector<16x512xf32>
    %114 = vector.broadcast %112 : vector<1x512xf32> to vector<16x512xf32>
    %115 = arith.addf %113, %114 : vector<16x512xf32>
    %cst_48 = arith.constant 0.000000e+00 : f32
    %116 = vector.broadcast %cst_48 : f32 to vector<16x512xf32>
    %117 = arith.maximumf %115, %116 : vector<16x512xf32>
    %118 = arith.truncf %117 : vector<16x512xf32> to vector<16x512xbf16>
    %c0_49 = arith.constant 0 : index
    %c512_50 = arith.constant 512 : index
    %c0_51 = arith.constant 0 : index
    %119 = vector.load %arg5[%c0_49, %c512_50, %c0_51] : memref<4x2048x32xbf16, #tpu.memory_space<vmem>>, vector<1x512x32xbf16>
    %120 = vector.shape_cast %119 : vector<1x512x32xbf16> to vector<512x32xbf16>
    %cst_52 = arith.constant dense<0.000000e+00> : vector<16x32xf32>
    %121 = tpu.matmul %118, %120, %cst_52 {dimension_numbers = #tpu.dot_dimension_numbers<[1], [0], [0], [1], [0, 0, 1, 1], [], []>} : vector<16x512xbf16>, vector<512x32xbf16>, vector<16x32xf32> -> vector<16x32xf32>
    %122 = arith.addf %109, %121 : vector<16x32xf32>
    %c0_53 = arith.constant 0 : index
    %c0_54 = arith.constant 0 : index
    %c1024 = arith.constant 1024 : index
    %123 = vector.load %arg4[%c0_53, %c0_54, %c1024] : memref<4x32x2048xbf16, #tpu.memory_space<vmem>>, vector<1x32x512xbf16>
    %124 = vector.shape_cast %123 : vector<1x32x512xbf16> to vector<32x512xbf16>
    %c0_55 = arith.constant 0 : index
    %c1024_56 = arith.constant 1024 : index
    %125 = vector.load %arg6[%c0_55, %c1024_56] : memref<4x2048xf32, #tpu.memory_space<vmem>>, vector<1x512xf32>
    %cst_57 = arith.constant dense<0.000000e+00> : vector<16x512xf32>
    %126 = tpu.matmul %95, %124, %cst_57 {dimension_numbers = #tpu.dot_dimension_numbers<[1], [0], [0], [1], [0, 0, 1, 1], [], []>} : vector<16x32xbf16>, vector<32x512xbf16>, vector<16x512xf32> -> vector<16x512xf32>
    %127 = vector.broadcast %125 : vector<1x512xf32> to vector<16x512xf32>
    %128 = arith.addf %126, %127 : vector<16x512xf32>
    %cst_58 = arith.constant 0.000000e+00 : f32
    %129 = vector.broadcast %cst_58 : f32 to vector<16x512xf32>
    %130 = arith.maximumf %128, %129 : vector<16x512xf32>
    %131 = arith.truncf %130 : vector<16x512xf32> to vector<16x512xbf16>
    %c0_59 = arith.constant 0 : index
    %c1024_60 = arith.constant 1024 : index
    %c0_61 = arith.constant 0 : index
    %132 = vector.load %arg5[%c0_59, %c1024_60, %c0_61] : memref<4x2048x32xbf16, #tpu.memory_space<vmem>>, vector<1x512x32xbf16>
    %133 = vector.shape_cast %132 : vector<1x512x32xbf16> to vector<512x32xbf16>
    %cst_62 = arith.constant dense<0.000000e+00> : vector<16x32xf32>
    %134 = tpu.matmul %131, %133, %cst_62 {dimension_numbers = #tpu.dot_dimension_numbers<[1], [0], [0], [1], [0, 0, 1, 1], [], []>} : vector<16x512xbf16>, vector<512x32xbf16>, vector<16x32xf32> -> vector<16x32xf32>
    %135 = arith.addf %122, %134 : vector<16x32xf32>
    %c0_63 = arith.constant 0 : index
    %c0_64 = arith.constant 0 : index
    %c1536 = arith.constant 1536 : index
    %136 = vector.load %arg4[%c0_63, %c0_64, %c1536] : memref<4x32x2048xbf16, #tpu.memory_space<vmem>>, vector<1x32x512xbf16>
    %137 = vector.shape_cast %136 : vector<1x32x512xbf16> to vector<32x512xbf16>
    %c0_65 = arith.constant 0 : index
    %c1536_66 = arith.constant 1536 : index
    %138 = vector.load %arg6[%c0_65, %c1536_66] : memref<4x2048xf32, #tpu.memory_space<vmem>>, vector<1x512xf32>
    %cst_67 = arith.constant dense<0.000000e+00> : vector<16x512xf32>
    %139 = tpu.matmul %95, %137, %cst_67 {dimension_numbers = #tpu.dot_dimension_numbers<[1], [0], [0], [1], [0, 0, 1, 1], [], []>} : vector<16x32xbf16>, vector<32x512xbf16>, vector<16x512xf32> -> vector<16x512xf32>
    %140 = vector.broadcast %138 : vector<1x512xf32> to vector<16x512xf32>
    %141 = arith.addf %139, %140 : vector<16x512xf32>
    %cst_68 = arith.constant 0.000000e+00 : f32
    %142 = vector.broadcast %cst_68 : f32 to vector<16x512xf32>
    %143 = arith.maximumf %141, %142 : vector<16x512xf32>
    %144 = arith.truncf %143 : vector<16x512xf32> to vector<16x512xbf16>
    %c0_69 = arith.constant 0 : index
    %c1536_70 = arith.constant 1536 : index
    %c0_71 = arith.constant 0 : index
    %145 = vector.load %arg5[%c0_69, %c1536_70, %c0_71] : memref<4x2048x32xbf16, #tpu.memory_space<vmem>>, vector<1x512x32xbf16>
    %146 = vector.shape_cast %145 : vector<1x512x32xbf16> to vector<512x32xbf16>
    %cst_72 = arith.constant dense<0.000000e+00> : vector<16x32xf32>
    %147 = tpu.matmul %144, %146, %cst_72 {dimension_numbers = #tpu.dot_dimension_numbers<[1], [0], [0], [1], [0, 0, 1, 1], [], []>} : vector<16x512xbf16>, vector<512x32xbf16>, vector<16x32xf32> -> vector<16x32xf32>
    %148 = arith.addf %135, %147 : vector<16x32xf32>
    %c0_73 = arith.constant 0 : index
    %c128 = arith.constant 128 : index
    %149 = vector.load %arg7[%c0_73, %c128] : memref<4x288xf32, #tpu.memory_space<vmem>>, vector<1x32xf32>
    %150 = vector.broadcast %149 : vector<1x32xf32> to vector<16x32xf32>
    %151 = arith.addf %148, %150 : vector<16x32xf32>
    %152 = arith.addf %94, %151 : vector<16x32xf32>
    %c0_74 = arith.constant 0 : index
    %c224 = arith.constant 224 : index
    %153 = vector.load %arg7[%c0_74, %c224] : memref<4x288xf32, #tpu.memory_space<vmem>>, vector<1x32xf32>
    %c0_75 = arith.constant 0 : index
    %c256 = arith.constant 256 : index
    %154 = vector.load %arg7[%c0_75, %c256] : memref<4x288xf32, #tpu.memory_space<vmem>>, vector<1x32xf32>
    %cst_76 = arith.constant dense<0.000000e+00> : vector<16xf32>
    %155 = vector.multi_reduction <add>, %152, %cst_76 [1] : vector<16x32xf32> to vector<16xf32>
    %156 = vector.shape_cast %155 : vector<16xf32> to vector<16x1xf32>
    %cst_77 = arith.constant 3.200000e+01 : f32
    %157 = vector.broadcast %cst_77 : f32 to vector<16x1xf32>
    %158 = arith.divf %156, %157 : vector<16x1xf32>
    %159 = arith.mulf %152, %152 : vector<16x32xf32>
    %cst_78 = arith.constant dense<0.000000e+00> : vector<16xf32>
    %160 = vector.multi_reduction <add>, %159, %cst_78 [1] : vector<16x32xf32> to vector<16xf32>
    %161 = vector.shape_cast %160 : vector<16xf32> to vector<16x1xf32>
    %cst_79 = arith.constant 3.200000e+01 : f32
    %162 = vector.broadcast %cst_79 : f32 to vector<16x1xf32>
    %163 = arith.divf %161, %162 : vector<16x1xf32>
    %164 = arith.mulf %158, %158 : vector<16x1xf32>
    %165 = arith.subf %163, %164 : vector<16x1xf32>
    %cst_80 = arith.constant 0.000000e+00 : f32
    %166 = vector.broadcast %cst_80 : f32 to vector<16x1xf32>
    %167 = arith.maximumf %165, %166 : vector<16x1xf32>
    %168 = vector.broadcast %158 : vector<16x1xf32> to vector<16x32xf32>
    %169 = arith.subf %152, %168 : vector<16x32xf32>
    %cst_81 = arith.constant 9.99999974E-6 : f32
    %170 = vector.broadcast %cst_81 : f32 to vector<16x1xf32>
    %171 = arith.addf %167, %170 : vector<16x1xf32>
    %172 = math.rsqrt %171 : vector<16x1xf32>
    %173 = vector.broadcast %172 : vector<16x1xf32> to vector<16x32xf32>
    %174 = arith.mulf %169, %173 : vector<16x32xf32>
    %175 = vector.broadcast %153 : vector<1x32xf32> to vector<16x32xf32>
    %176 = arith.mulf %174, %175 : vector<16x32xf32>
    %177 = vector.broadcast %154 : vector<1x32xf32> to vector<16x32xf32>
    %178 = arith.addf %176, %177 : vector<16x32xf32>
    %179 = vector.shape_cast %178 : vector<16x32xf32> to vector<2x8x32xf32>
    %180 = vector.shape_cast %179 : vector<2x8x32xf32> to vector<16x32xf32>
    %181 = arith.truncf %180 : vector<16x32xf32> to vector<16x32xbf16>
    %c1 = arith.constant 1 : index
    %c0_82 = arith.constant 0 : index
    %c0_83 = arith.constant 0 : index
    %182 = vector.load %arg2[%c1, %c0_82, %c0_83] : memref<4x32x96xbf16, #tpu.memory_space<vmem>>, vector<1x32x96xbf16>
    %183 = vector.shape_cast %182 : vector<1x32x96xbf16> to vector<32x96xbf16>
    %c1_84 = arith.constant 1 : index
    %c0_85 = arith.constant 0 : index
    %184 = vector.load %arg7[%c1_84, %c0_85] : memref<4x288xf32, #tpu.memory_space<vmem>>, vector<1x96xf32>
    %cst_86 = arith.constant dense<0.000000e+00> : vector<16x96xf32>
    %185 = tpu.matmul %181, %183, %cst_86 {dimension_numbers = #tpu.dot_dimension_numbers<[1], [0], [0], [1], [0, 0, 1, 1], [], []>} : vector<16x32xbf16>, vector<32x96xbf16>, vector<16x96xf32> -> vector<16x96xf32>
    %186 = vector.broadcast %184 : vector<1x96xf32> to vector<16x96xf32>
    %187 = arith.addf %185, %186 : vector<16x96xf32>
    %188 = vector.shape_cast %187 : vector<16x96xf32> to vector<2x8x96xf32>
    %189 = vector.extract_strided_slice %188 {offsets = [0, 0, 0], sizes = [2, 8, 32], strides = [1, 1, 1]} : vector<2x8x96xf32> to vector<2x8x32xf32>
    %190 = arith.truncf %189 : vector<2x8x32xf32> to vector<2x8x32xbf16>
    %191 = vector.extract_strided_slice %188 {offsets = [0, 0, 32], sizes = [2, 8, 32], strides = [1, 1, 1]} : vector<2x8x96xf32> to vector<2x8x32xf32>
    %192 = arith.truncf %191 : vector<2x8x32xf32> to vector<2x8x32xbf16>
    %193 = vector.extract_strided_slice %188 {offsets = [0, 0, 64], sizes = [2, 8, 32], strides = [1, 1, 1]} : vector<2x8x96xf32> to vector<2x8x32xf32>
    %194 = arith.truncf %193 : vector<2x8x32xf32> to vector<2x8x32xbf16>
    %195 = vector.extract_strided_slice %190 {offsets = [0, 0, 0], sizes = [2, 8, 8], strides = [1, 1, 1]} : vector<2x8x32xbf16> to vector<2x8x8xbf16>
    %196 = vector.extract_strided_slice %190 {offsets = [0, 0, 8], sizes = [2, 8, 8], strides = [1, 1, 1]} : vector<2x8x32xbf16> to vector<2x8x8xbf16>
    %197 = vector.extract_strided_slice %190 {offsets = [0, 0, 16], sizes = [2, 8, 8], strides = [1, 1, 1]} : vector<2x8x32xbf16> to vector<2x8x8xbf16>
    %198 = vector.extract_strided_slice %190 {offsets = [0, 0, 24], sizes = [2, 8, 8], strides = [1, 1, 1]} : vector<2x8x32xbf16> to vector<2x8x8xbf16>
    %199 = tpu.concatenate %195, %196, %197, %198 in 0 : vector<2x8x8xbf16>, vector<2x8x8xbf16>, vector<2x8x8xbf16>, vector<2x8x8xbf16> -> vector<8x8x8xbf16>
    %200 = vector.extract_strided_slice %192 {offsets = [0, 0, 0], sizes = [2, 8, 8], strides = [1, 1, 1]} : vector<2x8x32xbf16> to vector<2x8x8xbf16>
    %201 = vector.extract_strided_slice %192 {offsets = [0, 0, 8], sizes = [2, 8, 8], strides = [1, 1, 1]} : vector<2x8x32xbf16> to vector<2x8x8xbf16>
    %202 = vector.extract_strided_slice %192 {offsets = [0, 0, 16], sizes = [2, 8, 8], strides = [1, 1, 1]} : vector<2x8x32xbf16> to vector<2x8x8xbf16>
    %203 = vector.extract_strided_slice %192 {offsets = [0, 0, 24], sizes = [2, 8, 8], strides = [1, 1, 1]} : vector<2x8x32xbf16> to vector<2x8x8xbf16>
    %204 = tpu.concatenate %200, %201, %202, %203 in 0 : vector<2x8x8xbf16>, vector<2x8x8xbf16>, vector<2x8x8xbf16>, vector<2x8x8xbf16> -> vector<8x8x8xbf16>
    %205 = vector.extract_strided_slice %194 {offsets = [0, 0, 0], sizes = [2, 8, 8], strides = [1, 1, 1]} : vector<2x8x32xbf16> to vector<2x8x8xbf16>
    %206 = vector.extract_strided_slice %194 {offsets = [0, 0, 8], sizes = [2, 8, 8], strides = [1, 1, 1]} : vector<2x8x32xbf16> to vector<2x8x8xbf16>
    %207 = vector.extract_strided_slice %194 {offsets = [0, 0, 16], sizes = [2, 8, 8], strides = [1, 1, 1]} : vector<2x8x32xbf16> to vector<2x8x8xbf16>
    %208 = vector.extract_strided_slice %194 {offsets = [0, 0, 24], sizes = [2, 8, 8], strides = [1, 1, 1]} : vector<2x8x32xbf16> to vector<2x8x8xbf16>
    %209 = tpu.concatenate %205, %206, %207, %208 in 0 : vector<2x8x8xbf16>, vector<2x8x8xbf16>, vector<2x8x8xbf16>, vector<2x8x8xbf16> -> vector<8x8x8xbf16>
    "tpu.trace_start"() <{level = 10 : i32, message = "bqd,bkd->bqk"}> : () -> ()
    %cst_87 = arith.constant dense<0.000000e+00> : vector<8x8x8xf32>
    %210 = tpu.matmul %199, %204, %cst_87 {dimension_numbers = #tpu.dot_dimension_numbers<[2], [2], [1], [1], [0, 0, 0, 1, 1, 1], [0], [0]>} : vector<8x8x8xbf16>, vector<8x8x8xbf16>, vector<8x8x8xf32> -> vector<8x8x8xf32>
    "tpu.trace_stop"() : () -> ()
    %cst_88 = arith.constant 0.353553385 : f32
    %211 = vector.broadcast %cst_88 : f32 to vector<8x8x8xf32>
    %212 = arith.mulf %210, %211 : vector<8x8x8xf32>
    %cst_89 = arith.constant dense<0xFF800000> : vector<8x8xf32>
    %213 = vector.multi_reduction <maximumf>, %212, %cst_89 [2] : vector<8x8x8xf32> to vector<8x8xf32>
    %214 = vector.shape_cast %213 : vector<8x8xf32> to vector<8x8x1xf32>
    %215 = vector.broadcast %214 : vector<8x8x1xf32> to vector<8x8x8xf32>
    %216 = arith.subf %212, %215 : vector<8x8x8xf32>
    %217 = math.exp %216 : vector<8x8x8xf32>
    %cst_90 = arith.constant dense<0.000000e+00> : vector<8x8xf32>
    %218 = vector.multi_reduction <add>, %217, %cst_90 [2] : vector<8x8x8xf32> to vector<8x8xf32>
    %219 = vector.shape_cast %218 : vector<8x8xf32> to vector<8x8x1xf32>
    %220 = tpu.reciprocal %219 {approx = true} : vector<8x8x1xf32> -> vector<8x8x1xf32>
    %221 = vector.broadcast %220 : vector<8x8x1xf32> to vector<8x8x8xf32>
    %222 = arith.mulf %217, %221 : vector<8x8x8xf32>
    %223 = arith.truncf %222 : vector<8x8x8xf32> to vector<8x8x8xbf16>
    "tpu.trace_start"() <{level = 10 : i32, message = "bqk,bkd->bqd"}> : () -> ()
    %cst_91 = arith.constant dense<0.000000e+00> : vector<8x8x8xf32>
    %224 = tpu.matmul %223, %209, %cst_91 {dimension_numbers = #tpu.dot_dimension_numbers<[2], [1], [1], [2], [0, 0, 0, 1, 1, 2], [0], [0]>} : vector<8x8x8xbf16>, vector<8x8x8xbf16>, vector<8x8x8xf32> -> vector<8x8x8xf32>
    "tpu.trace_stop"() : () -> ()
    %225 = vector.extract_strided_slice %224 {offsets = [0, 0, 0], sizes = [2, 8, 8], strides = [1, 1, 1]} : vector<8x8x8xf32> to vector<2x8x8xf32>
    %226 = vector.extract_strided_slice %224 {offsets = [2, 0, 0], sizes = [2, 8, 8], strides = [1, 1, 1]} : vector<8x8x8xf32> to vector<2x8x8xf32>
    %227 = vector.extract_strided_slice %224 {offsets = [4, 0, 0], sizes = [2, 8, 8], strides = [1, 1, 1]} : vector<8x8x8xf32> to vector<2x8x8xf32>
    %228 = vector.extract_strided_slice %224 {offsets = [6, 0, 0], sizes = [2, 8, 8], strides = [1, 1, 1]} : vector<8x8x8xf32> to vector<2x8x8xf32>
    %229 = tpu.concatenate %225, %226, %227, %228 in 2 : vector<2x8x8xf32>, vector<2x8x8xf32>, vector<2x8x8xf32>, vector<2x8x8xf32> -> vector<2x8x32xf32>
    %230 = vector.shape_cast %229 : vector<2x8x32xf32> to vector<16x32xf32>
    %231 = arith.truncf %230 : vector<16x32xf32> to vector<16x32xbf16>
    %c1_92 = arith.constant 1 : index
    %c0_93 = arith.constant 0 : index
    %c0_94 = arith.constant 0 : index
    %232 = vector.load %arg3[%c1_92, %c0_93, %c0_94] : memref<4x32x32xbf16, #tpu.memory_space<vmem>>, vector<1x32x32xbf16>
    %233 = vector.shape_cast %232 : vector<1x32x32xbf16> to vector<32x32xbf16>
    %c1_95 = arith.constant 1 : index
    %c96_96 = arith.constant 96 : index
    %234 = vector.load %arg7[%c1_95, %c96_96] : memref<4x288xf32, #tpu.memory_space<vmem>>, vector<1x32xf32>
    %cst_97 = arith.constant dense<0.000000e+00> : vector<16x32xf32>
    %235 = tpu.matmul %231, %233, %cst_97 {dimension_numbers = #tpu.dot_dimension_numbers<[1], [0], [0], [1], [0, 0, 1, 1], [], []>} : vector<16x32xbf16>, vector<32x32xbf16>, vector<16x32xf32> -> vector<16x32xf32>
    %236 = vector.broadcast %234 : vector<1x32xf32> to vector<16x32xf32>
    %237 = arith.addf %235, %236 : vector<16x32xf32>
    %238 = arith.addf %180, %237 : vector<16x32xf32>
    %c1_98 = arith.constant 1 : index
    %c160_99 = arith.constant 160 : index
    %239 = vector.load %arg7[%c1_98, %c160_99] : memref<4x288xf32, #tpu.memory_space<vmem>>, vector<1x32xf32>
    %c1_100 = arith.constant 1 : index
    %c192_101 = arith.constant 192 : index
    %240 = vector.load %arg7[%c1_100, %c192_101] : memref<4x288xf32, #tpu.memory_space<vmem>>, vector<1x32xf32>
    %cst_102 = arith.constant dense<0.000000e+00> : vector<16xf32>
    %241 = vector.multi_reduction <add>, %238, %cst_102 [1] : vector<16x32xf32> to vector<16xf32>
    %242 = vector.shape_cast %241 : vector<16xf32> to vector<16x1xf32>
    %cst_103 = arith.constant 3.200000e+01 : f32
    %243 = vector.broadcast %cst_103 : f32 to vector<16x1xf32>
    %244 = arith.divf %242, %243 : vector<16x1xf32>
    %245 = arith.mulf %238, %238 : vector<16x32xf32>
    %cst_104 = arith.constant dense<0.000000e+00> : vector<16xf32>
    %246 = vector.multi_reduction <add>, %245, %cst_104 [1] : vector<16x32xf32> to vector<16xf32>
    %247 = vector.shape_cast %246 : vector<16xf32> to vector<16x1xf32>
    %cst_105 = arith.constant 3.200000e+01 : f32
    %248 = vector.broadcast %cst_105 : f32 to vector<16x1xf32>
    %249 = arith.divf %247, %248 : vector<16x1xf32>
    %250 = arith.mulf %244, %244 : vector<16x1xf32>
    %251 = arith.subf %249, %250 : vector<16x1xf32>
    %cst_106 = arith.constant 0.000000e+00 : f32
    %252 = vector.broadcast %cst_106 : f32 to vector<16x1xf32>
    %253 = arith.maximumf %251, %252 : vector<16x1xf32>
    %254 = vector.broadcast %244 : vector<16x1xf32> to vector<16x32xf32>
    %255 = arith.subf %238, %254 : vector<16x32xf32>
    %cst_107 = arith.constant 9.99999974E-6 : f32
    %256 = vector.broadcast %cst_107 : f32 to vector<16x1xf32>
    %257 = arith.addf %253, %256 : vector<16x1xf32>
    %258 = math.rsqrt %257 : vector<16x1xf32>
    %259 = vector.broadcast %258 : vector<16x1xf32> to vector<16x32xf32>
    %260 = arith.mulf %255, %259 : vector<16x32xf32>
    %261 = vector.broadcast %239 : vector<1x32xf32> to vector<16x32xf32>
    %262 = arith.mulf %260, %261 : vector<16x32xf32>
    %263 = vector.broadcast %240 : vector<1x32xf32> to vector<16x32xf32>
    %264 = arith.addf %262, %263 : vector<16x32xf32>
    %265 = arith.truncf %264 : vector<16x32xf32> to vector<16x32xbf16>
    %cst_108 = arith.constant 0.000000e+00 : f32
    %266 = vector.broadcast %cst_108 : f32 to vector<16x32xf32>
    %c1_109 = arith.constant 1 : index
    %c0_110 = arith.constant 0 : index
    %c0_111 = arith.constant 0 : index
    %267 = vector.load %arg4[%c1_109, %c0_110, %c0_111] : memref<4x32x2048xbf16, #tpu.memory_space<vmem>>, vector<1x32x512xbf16>
    %268 = vector.shape_cast %267 : vector<1x32x512xbf16> to vector<32x512xbf16>
    %c1_112 = arith.constant 1 : index
    %c0_113 = arith.constant 0 : index
    %269 = vector.load %arg6[%c1_112, %c0_113] : memref<4x2048xf32, #tpu.memory_space<vmem>>, vector<1x512xf32>
    %cst_114 = arith.constant dense<0.000000e+00> : vector<16x512xf32>
    %270 = tpu.matmul %265, %268, %cst_114 {dimension_numbers = #tpu.dot_dimension_numbers<[1], [0], [0], [1], [0, 0, 1, 1], [], []>} : vector<16x32xbf16>, vector<32x512xbf16>, vector<16x512xf32> -> vector<16x512xf32>
    %271 = vector.broadcast %269 : vector<1x512xf32> to vector<16x512xf32>
    %272 = arith.addf %270, %271 : vector<16x512xf32>
    %cst_115 = arith.constant 0.000000e+00 : f32
    %273 = vector.broadcast %cst_115 : f32 to vector<16x512xf32>
    %274 = arith.maximumf %272, %273 : vector<16x512xf32>
    %275 = arith.truncf %274 : vector<16x512xf32> to vector<16x512xbf16>
    %c1_116 = arith.constant 1 : index
    %c0_117 = arith.constant 0 : index
    %c0_118 = arith.constant 0 : index
    %276 = vector.load %arg5[%c1_116, %c0_117, %c0_118] : memref<4x2048x32xbf16, #tpu.memory_space<vmem>>, vector<1x512x32xbf16>
    %277 = vector.shape_cast %276 : vector<1x512x32xbf16> to vector<512x32xbf16>
    %cst_119 = arith.constant dense<0.000000e+00> : vector<16x32xf32>
    %278 = tpu.matmul %275, %277, %cst_119 {dimension_numbers = #tpu.dot_dimension_numbers<[1], [0], [0], [1], [0, 0, 1, 1], [], []>} : vector<16x512xbf16>, vector<512x32xbf16>, vector<16x32xf32> -> vector<16x32xf32>
    %279 = arith.addf %266, %278 : vector<16x32xf32>
    %c1_120 = arith.constant 1 : index
    %c0_121 = arith.constant 0 : index
    %c512_122 = arith.constant 512 : index
    %280 = vector.load %arg4[%c1_120, %c0_121, %c512_122] : memref<4x32x2048xbf16, #tpu.memory_space<vmem>>, vector<1x32x512xbf16>
    %281 = vector.shape_cast %280 : vector<1x32x512xbf16> to vector<32x512xbf16>
    %c1_123 = arith.constant 1 : index
    %c512_124 = arith.constant 512 : index
    %282 = vector.load %arg6[%c1_123, %c512_124] : memref<4x2048xf32, #tpu.memory_space<vmem>>, vector<1x512xf32>
    %cst_125 = arith.constant dense<0.000000e+00> : vector<16x512xf32>
    %283 = tpu.matmul %265, %281, %cst_125 {dimension_numbers = #tpu.dot_dimension_numbers<[1], [0], [0], [1], [0, 0, 1, 1], [], []>} : vector<16x32xbf16>, vector<32x512xbf16>, vector<16x512xf32> -> vector<16x512xf32>
    %284 = vector.broadcast %282 : vector<1x512xf32> to vector<16x512xf32>
    %285 = arith.addf %283, %284 : vector<16x512xf32>
    %cst_126 = arith.constant 0.000000e+00 : f32
    %286 = vector.broadcast %cst_126 : f32 to vector<16x512xf32>
    %287 = arith.maximumf %285, %286 : vector<16x512xf32>
    %288 = arith.truncf %287 : vector<16x512xf32> to vector<16x512xbf16>
    %c1_127 = arith.constant 1 : index
    %c512_128 = arith.constant 512 : index
    %c0_129 = arith.constant 0 : index
    %289 = vector.load %arg5[%c1_127, %c512_128, %c0_129] : memref<4x2048x32xbf16, #tpu.memory_space<vmem>>, vector<1x512x32xbf16>
    %290 = vector.shape_cast %289 : vector<1x512x32xbf16> to vector<512x32xbf16>
    %cst_130 = arith.constant dense<0.000000e+00> : vector<16x32xf32>
    %291 = tpu.matmul %288, %290, %cst_130 {dimension_numbers = #tpu.dot_dimension_numbers<[1], [0], [0], [1], [0, 0, 1, 1], [], []>} : vector<16x512xbf16>, vector<512x32xbf16>, vector<16x32xf32> -> vector<16x32xf32>
    %292 = arith.addf %279, %291 : vector<16x32xf32>
    %c1_131 = arith.constant 1 : index
    %c0_132 = arith.constant 0 : index
    %c1024_133 = arith.constant 1024 : index
    %293 = vector.load %arg4[%c1_131, %c0_132, %c1024_133] : memref<4x32x2048xbf16, #tpu.memory_space<vmem>>, vector<1x32x512xbf16>
    %294 = vector.shape_cast %293 : vector<1x32x512xbf16> to vector<32x512xbf16>
    %c1_134 = arith.constant 1 : index
    %c1024_135 = arith.constant 1024 : index
    %295 = vector.load %arg6[%c1_134, %c1024_135] : memref<4x2048xf32, #tpu.memory_space<vmem>>, vector<1x512xf32>
    %cst_136 = arith.constant dense<0.000000e+00> : vector<16x512xf32>
    %296 = tpu.matmul %265, %294, %cst_136 {dimension_numbers = #tpu.dot_dimension_numbers<[1], [0], [0], [1], [0, 0, 1, 1], [], []>} : vector<16x32xbf16>, vector<32x512xbf16>, vector<16x512xf32> -> vector<16x512xf32>
    %297 = vector.broadcast %295 : vector<1x512xf32> to vector<16x512xf32>
    %298 = arith.addf %296, %297 : vector<16x512xf32>
    %cst_137 = arith.constant 0.000000e+00 : f32
    %299 = vector.broadcast %cst_137 : f32 to vector<16x512xf32>
    %300 = arith.maximumf %298, %299 : vector<16x512xf32>
    %301 = arith.truncf %300 : vector<16x512xf32> to vector<16x512xbf16>
    %c1_138 = arith.constant 1 : index
    %c1024_139 = arith.constant 1024 : index
    %c0_140 = arith.constant 0 : index
    %302 = vector.load %arg5[%c1_138, %c1024_139, %c0_140] : memref<4x2048x32xbf16, #tpu.memory_space<vmem>>, vector<1x512x32xbf16>
    %303 = vector.shape_cast %302 : vector<1x512x32xbf16> to vector<512x32xbf16>
    %cst_141 = arith.constant dense<0.000000e+00> : vector<16x32xf32>
    %304 = tpu.matmul %301, %303, %cst_141 {dimension_numbers = #tpu.dot_dimension_numbers<[1], [0], [0], [1], [0, 0, 1, 1], [], []>} : vector<16x512xbf16>, vector<512x32xbf16>, vector<16x32xf32> -> vector<16x32xf32>
    %305 = arith.addf %292, %304 : vector<16x32xf32>
    %c1_142 = arith.constant 1 : index
    %c0_143 = arith.constant 0 : index
    %c1536_144 = arith.constant 1536 : index
    %306 = vector.load %arg4[%c1_142, %c0_143, %c1536_144] : memref<4x32x2048xbf16, #tpu.memory_space<vmem>>, vector<1x32x512xbf16>
    %307 = vector.shape_cast %306 : vector<1x32x512xbf16> to vector<32x512xbf16>
    %c1_145 = arith.constant 1 : index
    %c1536_146 = arith.constant 1536 : index
    %308 = vector.load %arg6[%c1_145, %c1536_146] : memref<4x2048xf32, #tpu.memory_space<vmem>>, vector<1x512xf32>
    %cst_147 = arith.constant dense<0.000000e+00> : vector<16x512xf32>
    %309 = tpu.matmul %265, %307, %cst_147 {dimension_numbers = #tpu.dot_dimension_numbers<[1], [0], [0], [1], [0, 0, 1, 1], [], []>} : vector<16x32xbf16>, vector<32x512xbf16>, vector<16x512xf32> -> vector<16x512xf32>
    %310 = vector.broadcast %308 : vector<1x512xf32> to vector<16x512xf32>
    %311 = arith.addf %309, %310 : vector<16x512xf32>
    %cst_148 = arith.constant 0.000000e+00 : f32
    %312 = vector.broadcast %cst_148 : f32 to vector<16x512xf32>
    %313 = arith.maximumf %311, %312 : vector<16x512xf32>
    %314 = arith.truncf %313 : vector<16x512xf32> to vector<16x512xbf16>
    %c1_149 = arith.constant 1 : index
    %c1536_150 = arith.constant 1536 : index
    %c0_151 = arith.constant 0 : index
    %315 = vector.load %arg5[%c1_149, %c1536_150, %c0_151] : memref<4x2048x32xbf16, #tpu.memory_space<vmem>>, vector<1x512x32xbf16>
    %316 = vector.shape_cast %315 : vector<1x512x32xbf16> to vector<512x32xbf16>
    %cst_152 = arith.constant dense<0.000000e+00> : vector<16x32xf32>
    %317 = tpu.matmul %314, %316, %cst_152 {dimension_numbers = #tpu.dot_dimension_numbers<[1], [0], [0], [1], [0, 0, 1, 1], [], []>} : vector<16x512xbf16>, vector<512x32xbf16>, vector<16x32xf32> -> vector<16x32xf32>
    %318 = arith.addf %305, %317 : vector<16x32xf32>
    %c1_153 = arith.constant 1 : index
    %c128_154 = arith.constant 128 : index
    %319 = vector.load %arg7[%c1_153, %c128_154] : memref<4x288xf32, #tpu.memory_space<vmem>>, vector<1x32xf32>
    %320 = vector.broadcast %319 : vector<1x32xf32> to vector<16x32xf32>
    %321 = arith.addf %318, %320 : vector<16x32xf32>
    %322 = arith.addf %264, %321 : vector<16x32xf32>
    %c1_155 = arith.constant 1 : index
    %c224_156 = arith.constant 224 : index
    %323 = vector.load %arg7[%c1_155, %c224_156] : memref<4x288xf32, #tpu.memory_space<vmem>>, vector<1x32xf32>
    %c1_157 = arith.constant 1 : index
    %c256_158 = arith.constant 256 : index
    %324 = vector.load %arg7[%c1_157, %c256_158] : memref<4x288xf32, #tpu.memory_space<vmem>>, vector<1x32xf32>
    %cst_159 = arith.constant dense<0.000000e+00> : vector<16xf32>
    %325 = vector.multi_reduction <add>, %322, %cst_159 [1] : vector<16x32xf32> to vector<16xf32>
    %326 = vector.shape_cast %325 : vector<16xf32> to vector<16x1xf32>
    %cst_160 = arith.constant 3.200000e+01 : f32
    %327 = vector.broadcast %cst_160 : f32 to vector<16x1xf32>
    %328 = arith.divf %326, %327 : vector<16x1xf32>
    %329 = arith.mulf %322, %322 : vector<16x32xf32>
    %cst_161 = arith.constant dense<0.000000e+00> : vector<16xf32>
    %330 = vector.multi_reduction <add>, %329, %cst_161 [1] : vector<16x32xf32> to vector<16xf32>
    %331 = vector.shape_cast %330 : vector<16xf32> to vector<16x1xf32>
    %cst_162 = arith.constant 3.200000e+01 : f32
    %332 = vector.broadcast %cst_162 : f32 to vector<16x1xf32>
    %333 = arith.divf %331, %332 : vector<16x1xf32>
    %334 = arith.mulf %328, %328 : vector<16x1xf32>
    %335 = arith.subf %333, %334 : vector<16x1xf32>
    %cst_163 = arith.constant 0.000000e+00 : f32
    %336 = vector.broadcast %cst_163 : f32 to vector<16x1xf32>
    %337 = arith.maximumf %335, %336 : vector<16x1xf32>
    %338 = vector.broadcast %328 : vector<16x1xf32> to vector<16x32xf32>
    %339 = arith.subf %322, %338 : vector<16x32xf32>
    %cst_164 = arith.constant 9.99999974E-6 : f32
    %340 = vector.broadcast %cst_164 : f32 to vector<16x1xf32>
    %341 = arith.addf %337, %340 : vector<16x1xf32>
    %342 = math.rsqrt %341 : vector<16x1xf32>
    %343 = vector.broadcast %342 : vector<16x1xf32> to vector<16x32xf32>
    %344 = arith.mulf %339, %343 : vector<16x32xf32>
    %345 = vector.broadcast %323 : vector<1x32xf32> to vector<16x32xf32>
    %346 = arith.mulf %344, %345 : vector<16x32xf32>
    %347 = vector.broadcast %324 : vector<1x32xf32> to vector<16x32xf32>
    %348 = arith.addf %346, %347 : vector<16x32xf32>
    %349 = vector.shape_cast %348 : vector<16x32xf32> to vector<2x8x32xf32>
    %350 = vector.extract_strided_slice %349 {offsets = [0, 7, 0], sizes = [2, 1, 32], strides = [1, 1, 1]} : vector<2x8x32xf32> to vector<2x1x32xf32>
    %351 = vector.shape_cast %350 : vector<2x1x32xf32> to vector<2x32xf32>
    %c0_165 = arith.constant 0 : index
    %c64 = arith.constant 64 : index
    %352 = vector.load %arg8[%c0_165, %c64] : memref<1x512xf32, #tpu.memory_space<vmem>>, vector<1x32xf32>
    %c0_166 = arith.constant 0 : index
    %c96_167 = arith.constant 96 : index
    %353 = vector.load %arg8[%c0_166, %c96_167] : memref<1x512xf32, #tpu.memory_space<vmem>>, vector<1x32xf32>
    %cst_168 = arith.constant dense<0.000000e+00> : vector<2xf32>
    %354 = vector.multi_reduction <add>, %351, %cst_168 [1] : vector<2x32xf32> to vector<2xf32>
    %355 = vector.shape_cast %354 : vector<2xf32> to vector<2x1xf32>
    %cst_169 = arith.constant 3.200000e+01 : f32
    %356 = vector.broadcast %cst_169 : f32 to vector<2x1xf32>
    %357 = arith.divf %355, %356 : vector<2x1xf32>
    %358 = arith.mulf %351, %351 : vector<2x32xf32>
    %cst_170 = arith.constant dense<0.000000e+00> : vector<2xf32>
    %359 = vector.multi_reduction <add>, %358, %cst_170 [1] : vector<2x32xf32> to vector<2xf32>
    %360 = vector.shape_cast %359 : vector<2xf32> to vector<2x1xf32>
    %cst_171 = arith.constant 3.200000e+01 : f32
    %361 = vector.broadcast %cst_171 : f32 to vector<2x1xf32>
    %362 = arith.divf %360, %361 : vector<2x1xf32>
    %363 = arith.mulf %357, %357 : vector<2x1xf32>
    %364 = arith.subf %362, %363 : vector<2x1xf32>
    %cst_172 = arith.constant 0.000000e+00 : f32
    %365 = vector.broadcast %cst_172 : f32 to vector<2x1xf32>
    %366 = arith.maximumf %364, %365 : vector<2x1xf32>
    %367 = vector.broadcast %357 : vector<2x1xf32> to vector<2x32xf32>
    %368 = arith.subf %351, %367 : vector<2x32xf32>
    %cst_173 = arith.constant 9.99999974E-6 : f32
    %369 = vector.broadcast %cst_173 : f32 to vector<2x1xf32>
    %370 = arith.addf %366, %369 : vector<2x1xf32>
    %371 = math.rsqrt %370 : vector<2x1xf32>
    %372 = vector.broadcast %371 : vector<2x1xf32> to vector<2x32xf32>
    %373 = arith.mulf %368, %372 : vector<2x32xf32>
    %374 = vector.broadcast %352 : vector<1x32xf32> to vector<2x32xf32>
    %375 = arith.mulf %373, %374 : vector<2x32xf32>
    %376 = vector.broadcast %353 : vector<1x32xf32> to vector<2x32xf32>
    %377 = arith.addf %375, %376 : vector<2x32xf32>
    %378 = arith.truncf %377 : vector<2x32xf32> to vector<2x32xbf16>
    %c0_174 = arith.constant 0 : index
    %c0_175 = arith.constant 0 : index
    %379 = vector.load %arg10[%c0_174, %c0_175] : memref<32x32xbf16, #tpu.memory_space<vmem>>, vector<32x32xbf16>
    %c0_176 = arith.constant 0 : index
    %c32 = arith.constant 32 : index
    %380 = vector.load %arg8[%c0_176, %c32] : memref<1x512xf32, #tpu.memory_space<vmem>>, vector<1x32xf32>
    %cst_177 = arith.constant dense<0.000000e+00> : vector<2x32xf32>
    %381 = tpu.matmul %378, %379, %cst_177 {dimension_numbers = #tpu.dot_dimension_numbers<[1], [0], [0], [1], [0, 0, 1, 1], [], []>} : vector<2x32xbf16>, vector<32x32xbf16>, vector<2x32xf32> -> vector<2x32xf32>
    %382 = vector.broadcast %380 : vector<1x32xf32> to vector<2x32xf32>
    %383 = arith.addf %381, %382 : vector<2x32xf32>
    %384 = vector.shape_cast %383 : vector<2x32xf32> to vector<1x2x32xf32>
    %385 = vector.shape_cast %384 : vector<1x2x32xf32> to vector<2x32xf32>
    %386 = arith.truncf %385 : vector<2x32xf32> to vector<2x32xbf16>
    %c2 = arith.constant 2 : index
    %c0_178 = arith.constant 0 : index
    %c0_179 = arith.constant 0 : index
    %387 = vector.load %arg2[%c2, %c0_178, %c0_179] : memref<4x32x96xbf16, #tpu.memory_space<vmem>>, vector<1x32x96xbf16>
    %388 = vector.shape_cast %387 : vector<1x32x96xbf16> to vector<32x96xbf16>
    %c2_180 = arith.constant 2 : index
    %c0_181 = arith.constant 0 : index
    %389 = vector.load %arg7[%c2_180, %c0_181] : memref<4x288xf32, #tpu.memory_space<vmem>>, vector<1x96xf32>
    %cst_182 = arith.constant dense<0.000000e+00> : vector<2x96xf32>
    %390 = tpu.matmul %386, %388, %cst_182 {dimension_numbers = #tpu.dot_dimension_numbers<[1], [0], [0], [1], [0, 0, 1, 1], [], []>} : vector<2x32xbf16>, vector<32x96xbf16>, vector<2x96xf32> -> vector<2x96xf32>
    %391 = vector.broadcast %389 : vector<1x96xf32> to vector<2x96xf32>
    %392 = arith.addf %390, %391 : vector<2x96xf32>
    %393 = vector.shape_cast %392 : vector<2x96xf32> to vector<1x2x96xf32>
    %394 = vector.extract_strided_slice %393 {offsets = [0, 0, 0], sizes = [1, 2, 32], strides = [1, 1, 1]} : vector<1x2x96xf32> to vector<1x2x32xf32>
    %395 = arith.truncf %394 : vector<1x2x32xf32> to vector<1x2x32xbf16>
    %396 = vector.extract_strided_slice %393 {offsets = [0, 0, 32], sizes = [1, 2, 32], strides = [1, 1, 1]} : vector<1x2x96xf32> to vector<1x2x32xf32>
    %397 = arith.truncf %396 : vector<1x2x32xf32> to vector<1x2x32xbf16>
    %398 = vector.extract_strided_slice %393 {offsets = [0, 0, 64], sizes = [1, 2, 32], strides = [1, 1, 1]} : vector<1x2x96xf32> to vector<1x2x32xf32>
    %399 = arith.truncf %398 : vector<1x2x32xf32> to vector<1x2x32xbf16>
    %400 = vector.extract_strided_slice %395 {offsets = [0, 0, 0], sizes = [1, 2, 8], strides = [1, 1, 1]} : vector<1x2x32xbf16> to vector<1x2x8xbf16>
    %401 = vector.extract_strided_slice %395 {offsets = [0, 0, 8], sizes = [1, 2, 8], strides = [1, 1, 1]} : vector<1x2x32xbf16> to vector<1x2x8xbf16>
    %402 = vector.extract_strided_slice %395 {offsets = [0, 0, 16], sizes = [1, 2, 8], strides = [1, 1, 1]} : vector<1x2x32xbf16> to vector<1x2x8xbf16>
    %403 = vector.extract_strided_slice %395 {offsets = [0, 0, 24], sizes = [1, 2, 8], strides = [1, 1, 1]} : vector<1x2x32xbf16> to vector<1x2x8xbf16>
    %404 = tpu.concatenate %400, %401, %402, %403 in 0 : vector<1x2x8xbf16>, vector<1x2x8xbf16>, vector<1x2x8xbf16>, vector<1x2x8xbf16> -> vector<4x2x8xbf16>
    %405 = vector.extract_strided_slice %397 {offsets = [0, 0, 0], sizes = [1, 2, 8], strides = [1, 1, 1]} : vector<1x2x32xbf16> to vector<1x2x8xbf16>
    %406 = vector.extract_strided_slice %397 {offsets = [0, 0, 8], sizes = [1, 2, 8], strides = [1, 1, 1]} : vector<1x2x32xbf16> to vector<1x2x8xbf16>
    %407 = vector.extract_strided_slice %397 {offsets = [0, 0, 16], sizes = [1, 2, 8], strides = [1, 1, 1]} : vector<1x2x32xbf16> to vector<1x2x8xbf16>
    %408 = vector.extract_strided_slice %397 {offsets = [0, 0, 24], sizes = [1, 2, 8], strides = [1, 1, 1]} : vector<1x2x32xbf16> to vector<1x2x8xbf16>
    %409 = tpu.concatenate %405, %406, %407, %408 in 0 : vector<1x2x8xbf16>, vector<1x2x8xbf16>, vector<1x2x8xbf16>, vector<1x2x8xbf16> -> vector<4x2x8xbf16>
    %410 = vector.extract_strided_slice %399 {offsets = [0, 0, 0], sizes = [1, 2, 8], strides = [1, 1, 1]} : vector<1x2x32xbf16> to vector<1x2x8xbf16>
    %411 = vector.extract_strided_slice %399 {offsets = [0, 0, 8], sizes = [1, 2, 8], strides = [1, 1, 1]} : vector<1x2x32xbf16> to vector<1x2x8xbf16>
    %412 = vector.extract_strided_slice %399 {offsets = [0, 0, 16], sizes = [1, 2, 8], strides = [1, 1, 1]} : vector<1x2x32xbf16> to vector<1x2x8xbf16>
    %413 = vector.extract_strided_slice %399 {offsets = [0, 0, 24], sizes = [1, 2, 8], strides = [1, 1, 1]} : vector<1x2x32xbf16> to vector<1x2x8xbf16>
    %414 = tpu.concatenate %410, %411, %412, %413 in 0 : vector<1x2x8xbf16>, vector<1x2x8xbf16>, vector<1x2x8xbf16>, vector<1x2x8xbf16> -> vector<4x2x8xbf16>
    "tpu.trace_start"() <{level = 10 : i32, message = "bqd,bkd->bqk"}> : () -> ()
    %cst_183 = arith.constant dense<0.000000e+00> : vector<4x2x2xf32>
    %415 = tpu.matmul %404, %409, %cst_183 {dimension_numbers = #tpu.dot_dimension_numbers<[2], [2], [1], [1], [0, 0, 0, 1, 1, 1], [0], [0]>} : vector<4x2x8xbf16>, vector<4x2x8xbf16>, vector<4x2x2xf32> -> vector<4x2x2xf32>
    "tpu.trace_stop"() : () -> ()
    %cst_184 = arith.constant 0.353553385 : f32
    %416 = vector.broadcast %cst_184 : f32 to vector<4x2x2xf32>
    %417 = arith.mulf %415, %416 : vector<4x2x2xf32>
    %cst_185 = arith.constant dense<0xFF800000> : vector<4x2xf32>
    %418 = vector.multi_reduction <maximumf>, %417, %cst_185 [2] : vector<4x2x2xf32> to vector<4x2xf32>
    %419 = vector.shape_cast %418 : vector<4x2xf32> to vector<4x2x1xf32>
    %420 = vector.broadcast %419 : vector<4x2x1xf32> to vector<4x2x2xf32>
    %421 = arith.subf %417, %420 : vector<4x2x2xf32>
    %422 = math.exp %421 : vector<4x2x2xf32>
    %cst_186 = arith.constant dense<0.000000e+00> : vector<4x2xf32>
    %423 = vector.multi_reduction <add>, %422, %cst_186 [2] : vector<4x2x2xf32> to vector<4x2xf32>
    %424 = vector.shape_cast %423 : vector<4x2xf32> to vector<4x2x1xf32>
    %425 = tpu.reciprocal %424 {approx = true} : vector<4x2x1xf32> -> vector<4x2x1xf32>
    %426 = vector.broadcast %425 : vector<4x2x1xf32> to vector<4x2x2xf32>
    %427 = arith.mulf %422, %426 : vector<4x2x2xf32>
    %428 = arith.truncf %427 : vector<4x2x2xf32> to vector<4x2x2xbf16>
    "tpu.trace_start"() <{level = 10 : i32, message = "bqk,bkd->bqd"}> : () -> ()
    %cst_187 = arith.constant dense<0.000000e+00> : vector<4x2x8xf32>
    %429 = tpu.matmul %428, %414, %cst_187 {dimension_numbers = #tpu.dot_dimension_numbers<[2], [1], [1], [2], [0, 0, 0, 1, 1, 2], [0], [0]>} : vector<4x2x2xbf16>, vector<4x2x8xbf16>, vector<4x2x8xf32> -> vector<4x2x8xf32>
    "tpu.trace_stop"() : () -> ()
    %430 = vector.extract_strided_slice %429 {offsets = [0, 0, 0], sizes = [1, 2, 8], strides = [1, 1, 1]} : vector<4x2x8xf32> to vector<1x2x8xf32>
    %431 = vector.extract_strided_slice %429 {offsets = [1, 0, 0], sizes = [1, 2, 8], strides = [1, 1, 1]} : vector<4x2x8xf32> to vector<1x2x8xf32>
    %432 = vector.extract_strided_slice %429 {offsets = [2, 0, 0], sizes = [1, 2, 8], strides = [1, 1, 1]} : vector<4x2x8xf32> to vector<1x2x8xf32>
    %433 = vector.extract_strided_slice %429 {offsets = [3, 0, 0], sizes = [1, 2, 8], strides = [1, 1, 1]} : vector<4x2x8xf32> to vector<1x2x8xf32>
    %434 = tpu.concatenate %430, %431, %432, %433 in 2 : vector<1x2x8xf32>, vector<1x2x8xf32>, vector<1x2x8xf32>, vector<1x2x8xf32> -> vector<1x2x32xf32>
    %435 = vector.shape_cast %434 : vector<1x2x32xf32> to vector<2x32xf32>
    %436 = arith.truncf %435 : vector<2x32xf32> to vector<2x32xbf16>
    %c2_188 = arith.constant 2 : index
    %c0_189 = arith.constant 0 : index
    %c0_190 = arith.constant 0 : index
    %437 = vector.load %arg3[%c2_188, %c0_189, %c0_190] : memref<4x32x32xbf16, #tpu.memory_space<vmem>>, vector<1x32x32xbf16>
    %438 = vector.shape_cast %437 : vector<1x32x32xbf16> to vector<32x32xbf16>
    %c2_191 = arith.constant 2 : index
    %c96_192 = arith.constant 96 : index
    %439 = vector.load %arg7[%c2_191, %c96_192] : memref<4x288xf32, #tpu.memory_space<vmem>>, vector<1x32xf32>
    %cst_193 = arith.constant dense<0.000000e+00> : vector<2x32xf32>
    %440 = tpu.matmul %436, %438, %cst_193 {dimension_numbers = #tpu.dot_dimension_numbers<[1], [0], [0], [1], [0, 0, 1, 1], [], []>} : vector<2x32xbf16>, vector<32x32xbf16>, vector<2x32xf32> -> vector<2x32xf32>
    %441 = vector.broadcast %439 : vector<1x32xf32> to vector<2x32xf32>
    %442 = arith.addf %440, %441 : vector<2x32xf32>
    %443 = arith.addf %385, %442 : vector<2x32xf32>
    %c2_194 = arith.constant 2 : index
    %c160_195 = arith.constant 160 : index
    %444 = vector.load %arg7[%c2_194, %c160_195] : memref<4x288xf32, #tpu.memory_space<vmem>>, vector<1x32xf32>
    %c2_196 = arith.constant 2 : index
    %c192_197 = arith.constant 192 : index
    %445 = vector.load %arg7[%c2_196, %c192_197] : memref<4x288xf32, #tpu.memory_space<vmem>>, vector<1x32xf32>
    %cst_198 = arith.constant dense<0.000000e+00> : vector<2xf32>
    %446 = vector.multi_reduction <add>, %443, %cst_198 [1] : vector<2x32xf32> to vector<2xf32>
    %447 = vector.shape_cast %446 : vector<2xf32> to vector<2x1xf32>
    %cst_199 = arith.constant 3.200000e+01 : f32
    %448 = vector.broadcast %cst_199 : f32 to vector<2x1xf32>
    %449 = arith.divf %447, %448 : vector<2x1xf32>
    %450 = arith.mulf %443, %443 : vector<2x32xf32>
    %cst_200 = arith.constant dense<0.000000e+00> : vector<2xf32>
    %451 = vector.multi_reduction <add>, %450, %cst_200 [1] : vector<2x32xf32> to vector<2xf32>
    %452 = vector.shape_cast %451 : vector<2xf32> to vector<2x1xf32>
    %cst_201 = arith.constant 3.200000e+01 : f32
    %453 = vector.broadcast %cst_201 : f32 to vector<2x1xf32>
    %454 = arith.divf %452, %453 : vector<2x1xf32>
    %455 = arith.mulf %449, %449 : vector<2x1xf32>
    %456 = arith.subf %454, %455 : vector<2x1xf32>
    %cst_202 = arith.constant 0.000000e+00 : f32
    %457 = vector.broadcast %cst_202 : f32 to vector<2x1xf32>
    %458 = arith.maximumf %456, %457 : vector<2x1xf32>
    %459 = vector.broadcast %449 : vector<2x1xf32> to vector<2x32xf32>
    %460 = arith.subf %443, %459 : vector<2x32xf32>
    %cst_203 = arith.constant 9.99999974E-6 : f32
    %461 = vector.broadcast %cst_203 : f32 to vector<2x1xf32>
    %462 = arith.addf %458, %461 : vector<2x1xf32>
    %463 = math.rsqrt %462 : vector<2x1xf32>
    %464 = vector.broadcast %463 : vector<2x1xf32> to vector<2x32xf32>
    %465 = arith.mulf %460, %464 : vector<2x32xf32>
    %466 = vector.broadcast %444 : vector<1x32xf32> to vector<2x32xf32>
    %467 = arith.mulf %465, %466 : vector<2x32xf32>
    %468 = vector.broadcast %445 : vector<1x32xf32> to vector<2x32xf32>
    %469 = arith.addf %467, %468 : vector<2x32xf32>
    %470 = arith.truncf %469 : vector<2x32xf32> to vector<2x32xbf16>
    %cst_204 = arith.constant 0.000000e+00 : f32
    %471 = vector.broadcast %cst_204 : f32 to vector<2x32xf32>
    %c2_205 = arith.constant 2 : index
    %c0_206 = arith.constant 0 : index
    %c0_207 = arith.constant 0 : index
    %472 = vector.load %arg4[%c2_205, %c0_206, %c0_207] : memref<4x32x2048xbf16, #tpu.memory_space<vmem>>, vector<1x32x512xbf16>
    %473 = vector.shape_cast %472 : vector<1x32x512xbf16> to vector<32x512xbf16>
    %c2_208 = arith.constant 2 : index
    %c0_209 = arith.constant 0 : index
    %474 = vector.load %arg6[%c2_208, %c0_209] : memref<4x2048xf32, #tpu.memory_space<vmem>>, vector<1x512xf32>
    %cst_210 = arith.constant dense<0.000000e+00> : vector<2x512xf32>
    %475 = tpu.matmul %470, %473, %cst_210 {dimension_numbers = #tpu.dot_dimension_numbers<[1], [0], [0], [1], [0, 0, 1, 1], [], []>} : vector<2x32xbf16>, vector<32x512xbf16>, vector<2x512xf32> -> vector<2x512xf32>
    %476 = vector.broadcast %474 : vector<1x512xf32> to vector<2x512xf32>
    %477 = arith.addf %475, %476 : vector<2x512xf32>
    %cst_211 = arith.constant 0.000000e+00 : f32
    %478 = vector.broadcast %cst_211 : f32 to vector<2x512xf32>
    %479 = arith.maximumf %477, %478 : vector<2x512xf32>
    %480 = arith.truncf %479 : vector<2x512xf32> to vector<2x512xbf16>
    %c2_212 = arith.constant 2 : index
    %c0_213 = arith.constant 0 : index
    %c0_214 = arith.constant 0 : index
    %481 = vector.load %arg5[%c2_212, %c0_213, %c0_214] : memref<4x2048x32xbf16, #tpu.memory_space<vmem>>, vector<1x512x32xbf16>
    %482 = vector.shape_cast %481 : vector<1x512x32xbf16> to vector<512x32xbf16>
    %cst_215 = arith.constant dense<0.000000e+00> : vector<2x32xf32>
    %483 = tpu.matmul %480, %482, %cst_215 {dimension_numbers = #tpu.dot_dimension_numbers<[1], [0], [0], [1], [0, 0, 1, 1], [], []>} : vector<2x512xbf16>, vector<512x32xbf16>, vector<2x32xf32> -> vector<2x32xf32>
    %484 = arith.addf %471, %483 : vector<2x32xf32>
    %c2_216 = arith.constant 2 : index
    %c0_217 = arith.constant 0 : index
    %c512_218 = arith.constant 512 : index
    %485 = vector.load %arg4[%c2_216, %c0_217, %c512_218] : memref<4x32x2048xbf16, #tpu.memory_space<vmem>>, vector<1x32x512xbf16>
    %486 = vector.shape_cast %485 : vector<1x32x512xbf16> to vector<32x512xbf16>
    %c2_219 = arith.constant 2 : index
    %c512_220 = arith.constant 512 : index
    %487 = vector.load %arg6[%c2_219, %c512_220] : memref<4x2048xf32, #tpu.memory_space<vmem>>, vector<1x512xf32>
    %cst_221 = arith.constant dense<0.000000e+00> : vector<2x512xf32>
    %488 = tpu.matmul %470, %486, %cst_221 {dimension_numbers = #tpu.dot_dimension_numbers<[1], [0], [0], [1], [0, 0, 1, 1], [], []>} : vector<2x32xbf16>, vector<32x512xbf16>, vector<2x512xf32> -> vector<2x512xf32>
    %489 = vector.broadcast %487 : vector<1x512xf32> to vector<2x512xf32>
    %490 = arith.addf %488, %489 : vector<2x512xf32>
    %cst_222 = arith.constant 0.000000e+00 : f32
    %491 = vector.broadcast %cst_222 : f32 to vector<2x512xf32>
    %492 = arith.maximumf %490, %491 : vector<2x512xf32>
    %493 = arith.truncf %492 : vector<2x512xf32> to vector<2x512xbf16>
    %c2_223 = arith.constant 2 : index
    %c512_224 = arith.constant 512 : index
    %c0_225 = arith.constant 0 : index
    %494 = vector.load %arg5[%c2_223, %c512_224, %c0_225] : memref<4x2048x32xbf16, #tpu.memory_space<vmem>>, vector<1x512x32xbf16>
    %495 = vector.shape_cast %494 : vector<1x512x32xbf16> to vector<512x32xbf16>
    %cst_226 = arith.constant dense<0.000000e+00> : vector<2x32xf32>
    %496 = tpu.matmul %493, %495, %cst_226 {dimension_numbers = #tpu.dot_dimension_numbers<[1], [0], [0], [1], [0, 0, 1, 1], [], []>} : vector<2x512xbf16>, vector<512x32xbf16>, vector<2x32xf32> -> vector<2x32xf32>
    %497 = arith.addf %484, %496 : vector<2x32xf32>
    %c2_227 = arith.constant 2 : index
    %c0_228 = arith.constant 0 : index
    %c1024_229 = arith.constant 1024 : index
    %498 = vector.load %arg4[%c2_227, %c0_228, %c1024_229] : memref<4x32x2048xbf16, #tpu.memory_space<vmem>>, vector<1x32x512xbf16>
    %499 = vector.shape_cast %498 : vector<1x32x512xbf16> to vector<32x512xbf16>
    %c2_230 = arith.constant 2 : index
    %c1024_231 = arith.constant 1024 : index
    %500 = vector.load %arg6[%c2_230, %c1024_231] : memref<4x2048xf32, #tpu.memory_space<vmem>>, vector<1x512xf32>
    %cst_232 = arith.constant dense<0.000000e+00> : vector<2x512xf32>
    %501 = tpu.matmul %470, %499, %cst_232 {dimension_numbers = #tpu.dot_dimension_numbers<[1], [0], [0], [1], [0, 0, 1, 1], [], []>} : vector<2x32xbf16>, vector<32x512xbf16>, vector<2x512xf32> -> vector<2x512xf32>
    %502 = vector.broadcast %500 : vector<1x512xf32> to vector<2x512xf32>
    %503 = arith.addf %501, %502 : vector<2x512xf32>
    %cst_233 = arith.constant 0.000000e+00 : f32
    %504 = vector.broadcast %cst_233 : f32 to vector<2x512xf32>
    %505 = arith.maximumf %503, %504 : vector<2x512xf32>
    %506 = arith.truncf %505 : vector<2x512xf32> to vector<2x512xbf16>
    %c2_234 = arith.constant 2 : index
    %c1024_235 = arith.constant 1024 : index
    %c0_236 = arith.constant 0 : index
    %507 = vector.load %arg5[%c2_234, %c1024_235, %c0_236] : memref<4x2048x32xbf16, #tpu.memory_space<vmem>>, vector<1x512x32xbf16>
    %508 = vector.shape_cast %507 : vector<1x512x32xbf16> to vector<512x32xbf16>
    %cst_237 = arith.constant dense<0.000000e+00> : vector<2x32xf32>
    %509 = tpu.matmul %506, %508, %cst_237 {dimension_numbers = #tpu.dot_dimension_numbers<[1], [0], [0], [1], [0, 0, 1, 1], [], []>} : vector<2x512xbf16>, vector<512x32xbf16>, vector<2x32xf32> -> vector<2x32xf32>
    %510 = arith.addf %497, %509 : vector<2x32xf32>
    %c2_238 = arith.constant 2 : index
    %c0_239 = arith.constant 0 : index
    %c1536_240 = arith.constant 1536 : index
    %511 = vector.load %arg4[%c2_238, %c0_239, %c1536_240] : memref<4x32x2048xbf16, #tpu.memory_space<vmem>>, vector<1x32x512xbf16>
    %512 = vector.shape_cast %511 : vector<1x32x512xbf16> to vector<32x512xbf16>
    %c2_241 = arith.constant 2 : index
    %c1536_242 = arith.constant 1536 : index
    %513 = vector.load %arg6[%c2_241, %c1536_242] : memref<4x2048xf32, #tpu.memory_space<vmem>>, vector<1x512xf32>
    %cst_243 = arith.constant dense<0.000000e+00> : vector<2x512xf32>
    %514 = tpu.matmul %470, %512, %cst_243 {dimension_numbers = #tpu.dot_dimension_numbers<[1], [0], [0], [1], [0, 0, 1, 1], [], []>} : vector<2x32xbf16>, vector<32x512xbf16>, vector<2x512xf32> -> vector<2x512xf32>
    %515 = vector.broadcast %513 : vector<1x512xf32> to vector<2x512xf32>
    %516 = arith.addf %514, %515 : vector<2x512xf32>
    %cst_244 = arith.constant 0.000000e+00 : f32
    %517 = vector.broadcast %cst_244 : f32 to vector<2x512xf32>
    %518 = arith.maximumf %516, %517 : vector<2x512xf32>
    %519 = arith.truncf %518 : vector<2x512xf32> to vector<2x512xbf16>
    %c2_245 = arith.constant 2 : index
    %c1536_246 = arith.constant 1536 : index
    %c0_247 = arith.constant 0 : index
    %520 = vector.load %arg5[%c2_245, %c1536_246, %c0_247] : memref<4x2048x32xbf16, #tpu.memory_space<vmem>>, vector<1x512x32xbf16>
    %521 = vector.shape_cast %520 : vector<1x512x32xbf16> to vector<512x32xbf16>
    %cst_248 = arith.constant dense<0.000000e+00> : vector<2x32xf32>
    %522 = tpu.matmul %519, %521, %cst_248 {dimension_numbers = #tpu.dot_dimension_numbers<[1], [0], [0], [1], [0, 0, 1, 1], [], []>} : vector<2x512xbf16>, vector<512x32xbf16>, vector<2x32xf32> -> vector<2x32xf32>
    %523 = arith.addf %510, %522 : vector<2x32xf32>
    %c2_249 = arith.constant 2 : index
    %c128_250 = arith.constant 128 : index
    %524 = vector.load %arg7[%c2_249, %c128_250] : memref<4x288xf32, #tpu.memory_space<vmem>>, vector<1x32xf32>
    %525 = vector.broadcast %524 : vector<1x32xf32> to vector<2x32xf32>
    %526 = arith.addf %523, %525 : vector<2x32xf32>
    %527 = arith.addf %469, %526 : vector<2x32xf32>
    %c2_251 = arith.constant 2 : index
    %c224_252 = arith.constant 224 : index
    %528 = vector.load %arg7[%c2_251, %c224_252] : memref<4x288xf32, #tpu.memory_space<vmem>>, vector<1x32xf32>
    %c2_253 = arith.constant 2 : index
    %c256_254 = arith.constant 256 : index
    %529 = vector.load %arg7[%c2_253, %c256_254] : memref<4x288xf32, #tpu.memory_space<vmem>>, vector<1x32xf32>
    %cst_255 = arith.constant dense<0.000000e+00> : vector<2xf32>
    %530 = vector.multi_reduction <add>, %527, %cst_255 [1] : vector<2x32xf32> to vector<2xf32>
    %531 = vector.shape_cast %530 : vector<2xf32> to vector<2x1xf32>
    %cst_256 = arith.constant 3.200000e+01 : f32
    %532 = vector.broadcast %cst_256 : f32 to vector<2x1xf32>
    %533 = arith.divf %531, %532 : vector<2x1xf32>
    %534 = arith.mulf %527, %527 : vector<2x32xf32>
    %cst_257 = arith.constant dense<0.000000e+00> : vector<2xf32>
    %535 = vector.multi_reduction <add>, %534, %cst_257 [1] : vector<2x32xf32> to vector<2xf32>
    %536 = vector.shape_cast %535 : vector<2xf32> to vector<2x1xf32>
    %cst_258 = arith.constant 3.200000e+01 : f32
    %537 = vector.broadcast %cst_258 : f32 to vector<2x1xf32>
    %538 = arith.divf %536, %537 : vector<2x1xf32>
    %539 = arith.mulf %533, %533 : vector<2x1xf32>
    %540 = arith.subf %538, %539 : vector<2x1xf32>
    %cst_259 = arith.constant 0.000000e+00 : f32
    %541 = vector.broadcast %cst_259 : f32 to vector<2x1xf32>
    %542 = arith.maximumf %540, %541 : vector<2x1xf32>
    %543 = vector.broadcast %533 : vector<2x1xf32> to vector<2x32xf32>
    %544 = arith.subf %527, %543 : vector<2x32xf32>
    %cst_260 = arith.constant 9.99999974E-6 : f32
    %545 = vector.broadcast %cst_260 : f32 to vector<2x1xf32>
    %546 = arith.addf %542, %545 : vector<2x1xf32>
    %547 = math.rsqrt %546 : vector<2x1xf32>
    %548 = vector.broadcast %547 : vector<2x1xf32> to vector<2x32xf32>
    %549 = arith.mulf %544, %548 : vector<2x32xf32>
    %550 = vector.broadcast %528 : vector<1x32xf32> to vector<2x32xf32>
    %551 = arith.mulf %549, %550 : vector<2x32xf32>
    %552 = vector.broadcast %529 : vector<1x32xf32> to vector<2x32xf32>
    %553 = arith.addf %551, %552 : vector<2x32xf32>
    %554 = vector.shape_cast %553 : vector<2x32xf32> to vector<1x2x32xf32>
    %555 = vector.shape_cast %554 : vector<1x2x32xf32> to vector<2x32xf32>
    %556 = arith.truncf %555 : vector<2x32xf32> to vector<2x32xbf16>
    %c3 = arith.constant 3 : index
    %c0_261 = arith.constant 0 : index
    %c0_262 = arith.constant 0 : index
    %557 = vector.load %arg2[%c3, %c0_261, %c0_262] : memref<4x32x96xbf16, #tpu.memory_space<vmem>>, vector<1x32x96xbf16>
    %558 = vector.shape_cast %557 : vector<1x32x96xbf16> to vector<32x96xbf16>
    %c3_263 = arith.constant 3 : index
    %c0_264 = arith.constant 0 : index
    %559 = vector.load %arg7[%c3_263, %c0_264] : memref<4x288xf32, #tpu.memory_space<vmem>>, vector<1x96xf32>
    %cst_265 = arith.constant dense<0.000000e+00> : vector<2x96xf32>
    %560 = tpu.matmul %556, %558, %cst_265 {dimension_numbers = #tpu.dot_dimension_numbers<[1], [0], [0], [1], [0, 0, 1, 1], [], []>} : vector<2x32xbf16>, vector<32x96xbf16>, vector<2x96xf32> -> vector<2x96xf32>
    %561 = vector.broadcast %559 : vector<1x96xf32> to vector<2x96xf32>
    %562 = arith.addf %560, %561 : vector<2x96xf32>
    %563 = vector.shape_cast %562 : vector<2x96xf32> to vector<1x2x96xf32>
    %564 = vector.extract_strided_slice %563 {offsets = [0, 0, 0], sizes = [1, 2, 32], strides = [1, 1, 1]} : vector<1x2x96xf32> to vector<1x2x32xf32>
    %565 = arith.truncf %564 : vector<1x2x32xf32> to vector<1x2x32xbf16>
    %566 = vector.extract_strided_slice %563 {offsets = [0, 0, 32], sizes = [1, 2, 32], strides = [1, 1, 1]} : vector<1x2x96xf32> to vector<1x2x32xf32>
    %567 = arith.truncf %566 : vector<1x2x32xf32> to vector<1x2x32xbf16>
    %568 = vector.extract_strided_slice %563 {offsets = [0, 0, 64], sizes = [1, 2, 32], strides = [1, 1, 1]} : vector<1x2x96xf32> to vector<1x2x32xf32>
    %569 = arith.truncf %568 : vector<1x2x32xf32> to vector<1x2x32xbf16>
    %570 = vector.extract_strided_slice %565 {offsets = [0, 0, 0], sizes = [1, 2, 8], strides = [1, 1, 1]} : vector<1x2x32xbf16> to vector<1x2x8xbf16>
    %571 = vector.extract_strided_slice %565 {offsets = [0, 0, 8], sizes = [1, 2, 8], strides = [1, 1, 1]} : vector<1x2x32xbf16> to vector<1x2x8xbf16>
    %572 = vector.extract_strided_slice %565 {offsets = [0, 0, 16], sizes = [1, 2, 8], strides = [1, 1, 1]} : vector<1x2x32xbf16> to vector<1x2x8xbf16>
    %573 = vector.extract_strided_slice %565 {offsets = [0, 0, 24], sizes = [1, 2, 8], strides = [1, 1, 1]} : vector<1x2x32xbf16> to vector<1x2x8xbf16>
    %574 = tpu.concatenate %570, %571, %572, %573 in 0 : vector<1x2x8xbf16>, vector<1x2x8xbf16>, vector<1x2x8xbf16>, vector<1x2x8xbf16> -> vector<4x2x8xbf16>
    %575 = vector.extract_strided_slice %567 {offsets = [0, 0, 0], sizes = [1, 2, 8], strides = [1, 1, 1]} : vector<1x2x32xbf16> to vector<1x2x8xbf16>
    %576 = vector.extract_strided_slice %567 {offsets = [0, 0, 8], sizes = [1, 2, 8], strides = [1, 1, 1]} : vector<1x2x32xbf16> to vector<1x2x8xbf16>
    %577 = vector.extract_strided_slice %567 {offsets = [0, 0, 16], sizes = [1, 2, 8], strides = [1, 1, 1]} : vector<1x2x32xbf16> to vector<1x2x8xbf16>
    %578 = vector.extract_strided_slice %567 {offsets = [0, 0, 24], sizes = [1, 2, 8], strides = [1, 1, 1]} : vector<1x2x32xbf16> to vector<1x2x8xbf16>
    %579 = tpu.concatenate %575, %576, %577, %578 in 0 : vector<1x2x8xbf16>, vector<1x2x8xbf16>, vector<1x2x8xbf16>, vector<1x2x8xbf16> -> vector<4x2x8xbf16>
    %580 = vector.extract_strided_slice %569 {offsets = [0, 0, 0], sizes = [1, 2, 8], strides = [1, 1, 1]} : vector<1x2x32xbf16> to vector<1x2x8xbf16>
    %581 = vector.extract_strided_slice %569 {offsets = [0, 0, 8], sizes = [1, 2, 8], strides = [1, 1, 1]} : vector<1x2x32xbf16> to vector<1x2x8xbf16>
    %582 = vector.extract_strided_slice %569 {offsets = [0, 0, 16], sizes = [1, 2, 8], strides = [1, 1, 1]} : vector<1x2x32xbf16> to vector<1x2x8xbf16>
    %583 = vector.extract_strided_slice %569 {offsets = [0, 0, 24], sizes = [1, 2, 8], strides = [1, 1, 1]} : vector<1x2x32xbf16> to vector<1x2x8xbf16>
    %584 = tpu.concatenate %580, %581, %582, %583 in 0 : vector<1x2x8xbf16>, vector<1x2x8xbf16>, vector<1x2x8xbf16>, vector<1x2x8xbf16> -> vector<4x2x8xbf16>
    "tpu.trace_start"() <{level = 10 : i32, message = "bqd,bkd->bqk"}> : () -> ()
    %cst_266 = arith.constant dense<0.000000e+00> : vector<4x2x2xf32>
    %585 = tpu.matmul %574, %579, %cst_266 {dimension_numbers = #tpu.dot_dimension_numbers<[2], [2], [1], [1], [0, 0, 0, 1, 1, 1], [0], [0]>} : vector<4x2x8xbf16>, vector<4x2x8xbf16>, vector<4x2x2xf32> -> vector<4x2x2xf32>
    "tpu.trace_stop"() : () -> ()
    %cst_267 = arith.constant 0.353553385 : f32
    %586 = vector.broadcast %cst_267 : f32 to vector<4x2x2xf32>
    %587 = arith.mulf %585, %586 : vector<4x2x2xf32>
    %cst_268 = arith.constant dense<0xFF800000> : vector<4x2xf32>
    %588 = vector.multi_reduction <maximumf>, %587, %cst_268 [2] : vector<4x2x2xf32> to vector<4x2xf32>
    %589 = vector.shape_cast %588 : vector<4x2xf32> to vector<4x2x1xf32>
    %590 = vector.broadcast %589 : vector<4x2x1xf32> to vector<4x2x2xf32>
    %591 = arith.subf %587, %590 : vector<4x2x2xf32>
    %592 = math.exp %591 : vector<4x2x2xf32>
    %cst_269 = arith.constant dense<0.000000e+00> : vector<4x2xf32>
    %593 = vector.multi_reduction <add>, %592, %cst_269 [2] : vector<4x2x2xf32> to vector<4x2xf32>
    %594 = vector.shape_cast %593 : vector<4x2xf32> to vector<4x2x1xf32>
    %595 = tpu.reciprocal %594 {approx = true} : vector<4x2x1xf32> -> vector<4x2x1xf32>
    %596 = vector.broadcast %595 : vector<4x2x1xf32> to vector<4x2x2xf32>
    %597 = arith.mulf %592, %596 : vector<4x2x2xf32>
    %598 = arith.truncf %597 : vector<4x2x2xf32> to vector<4x2x2xbf16>
    "tpu.trace_start"() <{level = 10 : i32, message = "bqk,bkd->bqd"}> : () -> ()
    %cst_270 = arith.constant dense<0.000000e+00> : vector<4x2x8xf32>
    %599 = tpu.matmul %598, %584, %cst_270 {dimension_numbers = #tpu.dot_dimension_numbers<[2], [1], [1], [2], [0, 0, 0, 1, 1, 2], [0], [0]>} : vector<4x2x2xbf16>, vector<4x2x8xbf16>, vector<4x2x8xf32> -> vector<4x2x8xf32>
    "tpu.trace_stop"() : () -> ()
    %600 = vector.extract_strided_slice %599 {offsets = [0, 0, 0], sizes = [1, 2, 8], strides = [1, 1, 1]} : vector<4x2x8xf32> to vector<1x2x8xf32>
    %601 = vector.extract_strided_slice %599 {offsets = [1, 0, 0], sizes = [1, 2, 8], strides = [1, 1, 1]} : vector<4x2x8xf32> to vector<1x2x8xf32>
    %602 = vector.extract_strided_slice %599 {offsets = [2, 0, 0], sizes = [1, 2, 8], strides = [1, 1, 1]} : vector<4x2x8xf32> to vector<1x2x8xf32>
    %603 = vector.extract_strided_slice %599 {offsets = [3, 0, 0], sizes = [1, 2, 8], strides = [1, 1, 1]} : vector<4x2x8xf32> to vector<1x2x8xf32>
    %604 = tpu.concatenate %600, %601, %602, %603 in 2 : vector<1x2x8xf32>, vector<1x2x8xf32>, vector<1x2x8xf32>, vector<1x2x8xf32> -> vector<1x2x32xf32>
    %605 = vector.shape_cast %604 : vector<1x2x32xf32> to vector<2x32xf32>
    %606 = arith.truncf %605 : vector<2x32xf32> to vector<2x32xbf16>
    %c3_271 = arith.constant 3 : index
    %c0_272 = arith.constant 0 : index
    %c0_273 = arith.constant 0 : index
    %607 = vector.load %arg3[%c3_271, %c0_272, %c0_273] : memref<4x32x32xbf16, #tpu.memory_space<vmem>>, vector<1x32x32xbf16>
    %608 = vector.shape_cast %607 : vector<1x32x32xbf16> to vector<32x32xbf16>
    %c3_274 = arith.constant 3 : index
    %c96_275 = arith.constant 96 : index
    %609 = vector.load %arg7[%c3_274, %c96_275] : memref<4x288xf32, #tpu.memory_space<vmem>>, vector<1x32xf32>
    %cst_276 = arith.constant dense<0.000000e+00> : vector<2x32xf32>
    %610 = tpu.matmul %606, %608, %cst_276 {dimension_numbers = #tpu.dot_dimension_numbers<[1], [0], [0], [1], [0, 0, 1, 1], [], []>} : vector<2x32xbf16>, vector<32x32xbf16>, vector<2x32xf32> -> vector<2x32xf32>
    %611 = vector.broadcast %609 : vector<1x32xf32> to vector<2x32xf32>
    %612 = arith.addf %610, %611 : vector<2x32xf32>
    %613 = arith.addf %555, %612 : vector<2x32xf32>
    %c3_277 = arith.constant 3 : index
    %c160_278 = arith.constant 160 : index
    %614 = vector.load %arg7[%c3_277, %c160_278] : memref<4x288xf32, #tpu.memory_space<vmem>>, vector<1x32xf32>
    %c3_279 = arith.constant 3 : index
    %c192_280 = arith.constant 192 : index
    %615 = vector.load %arg7[%c3_279, %c192_280] : memref<4x288xf32, #tpu.memory_space<vmem>>, vector<1x32xf32>
    %cst_281 = arith.constant dense<0.000000e+00> : vector<2xf32>
    %616 = vector.multi_reduction <add>, %613, %cst_281 [1] : vector<2x32xf32> to vector<2xf32>
    %617 = vector.shape_cast %616 : vector<2xf32> to vector<2x1xf32>
    %cst_282 = arith.constant 3.200000e+01 : f32
    %618 = vector.broadcast %cst_282 : f32 to vector<2x1xf32>
    %619 = arith.divf %617, %618 : vector<2x1xf32>
    %620 = arith.mulf %613, %613 : vector<2x32xf32>
    %cst_283 = arith.constant dense<0.000000e+00> : vector<2xf32>
    %621 = vector.multi_reduction <add>, %620, %cst_283 [1] : vector<2x32xf32> to vector<2xf32>
    %622 = vector.shape_cast %621 : vector<2xf32> to vector<2x1xf32>
    %cst_284 = arith.constant 3.200000e+01 : f32
    %623 = vector.broadcast %cst_284 : f32 to vector<2x1xf32>
    %624 = arith.divf %622, %623 : vector<2x1xf32>
    %625 = arith.mulf %619, %619 : vector<2x1xf32>
    %626 = arith.subf %624, %625 : vector<2x1xf32>
    %cst_285 = arith.constant 0.000000e+00 : f32
    %627 = vector.broadcast %cst_285 : f32 to vector<2x1xf32>
    %628 = arith.maximumf %626, %627 : vector<2x1xf32>
    %629 = vector.broadcast %619 : vector<2x1xf32> to vector<2x32xf32>
    %630 = arith.subf %613, %629 : vector<2x32xf32>
    %cst_286 = arith.constant 9.99999974E-6 : f32
    %631 = vector.broadcast %cst_286 : f32 to vector<2x1xf32>
    %632 = arith.addf %628, %631 : vector<2x1xf32>
    %633 = math.rsqrt %632 : vector<2x1xf32>
    %634 = vector.broadcast %633 : vector<2x1xf32> to vector<2x32xf32>
    %635 = arith.mulf %630, %634 : vector<2x32xf32>
    %636 = vector.broadcast %614 : vector<1x32xf32> to vector<2x32xf32>
    %637 = arith.mulf %635, %636 : vector<2x32xf32>
    %638 = vector.broadcast %615 : vector<1x32xf32> to vector<2x32xf32>
    %639 = arith.addf %637, %638 : vector<2x32xf32>
    %640 = arith.truncf %639 : vector<2x32xf32> to vector<2x32xbf16>
    %cst_287 = arith.constant 0.000000e+00 : f32
    %641 = vector.broadcast %cst_287 : f32 to vector<2x32xf32>
    %c3_288 = arith.constant 3 : index
    %c0_289 = arith.constant 0 : index
    %c0_290 = arith.constant 0 : index
    %642 = vector.load %arg4[%c3_288, %c0_289, %c0_290] : memref<4x32x2048xbf16, #tpu.memory_space<vmem>>, vector<1x32x512xbf16>
    %643 = vector.shape_cast %642 : vector<1x32x512xbf16> to vector<32x512xbf16>
    %c3_291 = arith.constant 3 : index
    %c0_292 = arith.constant 0 : index
    %644 = vector.load %arg6[%c3_291, %c0_292] : memref<4x2048xf32, #tpu.memory_space<vmem>>, vector<1x512xf32>
    %cst_293 = arith.constant dense<0.000000e+00> : vector<2x512xf32>
    %645 = tpu.matmul %640, %643, %cst_293 {dimension_numbers = #tpu.dot_dimension_numbers<[1], [0], [0], [1], [0, 0, 1, 1], [], []>} : vector<2x32xbf16>, vector<32x512xbf16>, vector<2x512xf32> -> vector<2x512xf32>
    %646 = vector.broadcast %644 : vector<1x512xf32> to vector<2x512xf32>
    %647 = arith.addf %645, %646 : vector<2x512xf32>
    %cst_294 = arith.constant 0.000000e+00 : f32
    %648 = vector.broadcast %cst_294 : f32 to vector<2x512xf32>
    %649 = arith.maximumf %647, %648 : vector<2x512xf32>
    %650 = arith.truncf %649 : vector<2x512xf32> to vector<2x512xbf16>
    %c3_295 = arith.constant 3 : index
    %c0_296 = arith.constant 0 : index
    %c0_297 = arith.constant 0 : index
    %651 = vector.load %arg5[%c3_295, %c0_296, %c0_297] : memref<4x2048x32xbf16, #tpu.memory_space<vmem>>, vector<1x512x32xbf16>
    %652 = vector.shape_cast %651 : vector<1x512x32xbf16> to vector<512x32xbf16>
    %cst_298 = arith.constant dense<0.000000e+00> : vector<2x32xf32>
    %653 = tpu.matmul %650, %652, %cst_298 {dimension_numbers = #tpu.dot_dimension_numbers<[1], [0], [0], [1], [0, 0, 1, 1], [], []>} : vector<2x512xbf16>, vector<512x32xbf16>, vector<2x32xf32> -> vector<2x32xf32>
    %654 = arith.addf %641, %653 : vector<2x32xf32>
    %c3_299 = arith.constant 3 : index
    %c0_300 = arith.constant 0 : index
    %c512_301 = arith.constant 512 : index
    %655 = vector.load %arg4[%c3_299, %c0_300, %c512_301] : memref<4x32x2048xbf16, #tpu.memory_space<vmem>>, vector<1x32x512xbf16>
    %656 = vector.shape_cast %655 : vector<1x32x512xbf16> to vector<32x512xbf16>
    %c3_302 = arith.constant 3 : index
    %c512_303 = arith.constant 512 : index
    %657 = vector.load %arg6[%c3_302, %c512_303] : memref<4x2048xf32, #tpu.memory_space<vmem>>, vector<1x512xf32>
    %cst_304 = arith.constant dense<0.000000e+00> : vector<2x512xf32>
    %658 = tpu.matmul %640, %656, %cst_304 {dimension_numbers = #tpu.dot_dimension_numbers<[1], [0], [0], [1], [0, 0, 1, 1], [], []>} : vector<2x32xbf16>, vector<32x512xbf16>, vector<2x512xf32> -> vector<2x512xf32>
    %659 = vector.broadcast %657 : vector<1x512xf32> to vector<2x512xf32>
    %660 = arith.addf %658, %659 : vector<2x512xf32>
    %cst_305 = arith.constant 0.000000e+00 : f32
    %661 = vector.broadcast %cst_305 : f32 to vector<2x512xf32>
    %662 = arith.maximumf %660, %661 : vector<2x512xf32>
    %663 = arith.truncf %662 : vector<2x512xf32> to vector<2x512xbf16>
    %c3_306 = arith.constant 3 : index
    %c512_307 = arith.constant 512 : index
    %c0_308 = arith.constant 0 : index
    %664 = vector.load %arg5[%c3_306, %c512_307, %c0_308] : memref<4x2048x32xbf16, #tpu.memory_space<vmem>>, vector<1x512x32xbf16>
    %665 = vector.shape_cast %664 : vector<1x512x32xbf16> to vector<512x32xbf16>
    %cst_309 = arith.constant dense<0.000000e+00> : vector<2x32xf32>
    %666 = tpu.matmul %663, %665, %cst_309 {dimension_numbers = #tpu.dot_dimension_numbers<[1], [0], [0], [1], [0, 0, 1, 1], [], []>} : vector<2x512xbf16>, vector<512x32xbf16>, vector<2x32xf32> -> vector<2x32xf32>
    %667 = arith.addf %654, %666 : vector<2x32xf32>
    %c3_310 = arith.constant 3 : index
    %c0_311 = arith.constant 0 : index
    %c1024_312 = arith.constant 1024 : index
    %668 = vector.load %arg4[%c3_310, %c0_311, %c1024_312] : memref<4x32x2048xbf16, #tpu.memory_space<vmem>>, vector<1x32x512xbf16>
    %669 = vector.shape_cast %668 : vector<1x32x512xbf16> to vector<32x512xbf16>
    %c3_313 = arith.constant 3 : index
    %c1024_314 = arith.constant 1024 : index
    %670 = vector.load %arg6[%c3_313, %c1024_314] : memref<4x2048xf32, #tpu.memory_space<vmem>>, vector<1x512xf32>
    %cst_315 = arith.constant dense<0.000000e+00> : vector<2x512xf32>
    %671 = tpu.matmul %640, %669, %cst_315 {dimension_numbers = #tpu.dot_dimension_numbers<[1], [0], [0], [1], [0, 0, 1, 1], [], []>} : vector<2x32xbf16>, vector<32x512xbf16>, vector<2x512xf32> -> vector<2x512xf32>
    %672 = vector.broadcast %670 : vector<1x512xf32> to vector<2x512xf32>
    %673 = arith.addf %671, %672 : vector<2x512xf32>
    %cst_316 = arith.constant 0.000000e+00 : f32
    %674 = vector.broadcast %cst_316 : f32 to vector<2x512xf32>
    %675 = arith.maximumf %673, %674 : vector<2x512xf32>
    %676 = arith.truncf %675 : vector<2x512xf32> to vector<2x512xbf16>
    %c3_317 = arith.constant 3 : index
    %c1024_318 = arith.constant 1024 : index
    %c0_319 = arith.constant 0 : index
    %677 = vector.load %arg5[%c3_317, %c1024_318, %c0_319] : memref<4x2048x32xbf16, #tpu.memory_space<vmem>>, vector<1x512x32xbf16>
    %678 = vector.shape_cast %677 : vector<1x512x32xbf16> to vector<512x32xbf16>
    %cst_320 = arith.constant dense<0.000000e+00> : vector<2x32xf32>
    %679 = tpu.matmul %676, %678, %cst_320 {dimension_numbers = #tpu.dot_dimension_numbers<[1], [0], [0], [1], [0, 0, 1, 1], [], []>} : vector<2x512xbf16>, vector<512x32xbf16>, vector<2x32xf32> -> vector<2x32xf32>
    %680 = arith.addf %667, %679 : vector<2x32xf32>
    %c3_321 = arith.constant 3 : index
    %c0_322 = arith.constant 0 : index
    %c1536_323 = arith.constant 1536 : index
    %681 = vector.load %arg4[%c3_321, %c0_322, %c1536_323] : memref<4x32x2048xbf16, #tpu.memory_space<vmem>>, vector<1x32x512xbf16>
    %682 = vector.shape_cast %681 : vector<1x32x512xbf16> to vector<32x512xbf16>
    %c3_324 = arith.constant 3 : index
    %c1536_325 = arith.constant 1536 : index
    %683 = vector.load %arg6[%c3_324, %c1536_325] : memref<4x2048xf32, #tpu.memory_space<vmem>>, vector<1x512xf32>
    %cst_326 = arith.constant dense<0.000000e+00> : vector<2x512xf32>
    %684 = tpu.matmul %640, %682, %cst_326 {dimension_numbers = #tpu.dot_dimension_numbers<[1], [0], [0], [1], [0, 0, 1, 1], [], []>} : vector<2x32xbf16>, vector<32x512xbf16>, vector<2x512xf32> -> vector<2x512xf32>
    %685 = vector.broadcast %683 : vector<1x512xf32> to vector<2x512xf32>
    %686 = arith.addf %684, %685 : vector<2x512xf32>
    %cst_327 = arith.constant 0.000000e+00 : f32
    %687 = vector.broadcast %cst_327 : f32 to vector<2x512xf32>
    %688 = arith.maximumf %686, %687 : vector<2x512xf32>
    %689 = arith.truncf %688 : vector<2x512xf32> to vector<2x512xbf16>
    %c3_328 = arith.constant 3 : index
    %c1536_329 = arith.constant 1536 : index
    %c0_330 = arith.constant 0 : index
    %690 = vector.load %arg5[%c3_328, %c1536_329, %c0_330] : memref<4x2048x32xbf16, #tpu.memory_space<vmem>>, vector<1x512x32xbf16>
    %691 = vector.shape_cast %690 : vector<1x512x32xbf16> to vector<512x32xbf16>
    %cst_331 = arith.constant dense<0.000000e+00> : vector<2x32xf32>
    %692 = tpu.matmul %689, %691, %cst_331 {dimension_numbers = #tpu.dot_dimension_numbers<[1], [0], [0], [1], [0, 0, 1, 1], [], []>} : vector<2x512xbf16>, vector<512x32xbf16>, vector<2x32xf32> -> vector<2x32xf32>
    %693 = arith.addf %680, %692 : vector<2x32xf32>
    %c3_332 = arith.constant 3 : index
    %c128_333 = arith.constant 128 : index
    %694 = vector.load %arg7[%c3_332, %c128_333] : memref<4x288xf32, #tpu.memory_space<vmem>>, vector<1x32xf32>
    %695 = vector.broadcast %694 : vector<1x32xf32> to vector<2x32xf32>
    %696 = arith.addf %693, %695 : vector<2x32xf32>
    %697 = arith.addf %639, %696 : vector<2x32xf32>
    %c3_334 = arith.constant 3 : index
    %c224_335 = arith.constant 224 : index
    %698 = vector.load %arg7[%c3_334, %c224_335] : memref<4x288xf32, #tpu.memory_space<vmem>>, vector<1x32xf32>
    %c3_336 = arith.constant 3 : index
    %c256_337 = arith.constant 256 : index
    %699 = vector.load %arg7[%c3_336, %c256_337] : memref<4x288xf32, #tpu.memory_space<vmem>>, vector<1x32xf32>
    %cst_338 = arith.constant dense<0.000000e+00> : vector<2xf32>
    %700 = vector.multi_reduction <add>, %697, %cst_338 [1] : vector<2x32xf32> to vector<2xf32>
    %701 = vector.shape_cast %700 : vector<2xf32> to vector<2x1xf32>
    %cst_339 = arith.constant 3.200000e+01 : f32
    %702 = vector.broadcast %cst_339 : f32 to vector<2x1xf32>
    %703 = arith.divf %701, %702 : vector<2x1xf32>
    %704 = arith.mulf %697, %697 : vector<2x32xf32>
    %cst_340 = arith.constant dense<0.000000e+00> : vector<2xf32>
    %705 = vector.multi_reduction <add>, %704, %cst_340 [1] : vector<2x32xf32> to vector<2xf32>
    %706 = vector.shape_cast %705 : vector<2xf32> to vector<2x1xf32>
    %cst_341 = arith.constant 3.200000e+01 : f32
    %707 = vector.broadcast %cst_341 : f32 to vector<2x1xf32>
    %708 = arith.divf %706, %707 : vector<2x1xf32>
    %709 = arith.mulf %703, %703 : vector<2x1xf32>
    %710 = arith.subf %708, %709 : vector<2x1xf32>
    %cst_342 = arith.constant 0.000000e+00 : f32
    %711 = vector.broadcast %cst_342 : f32 to vector<2x1xf32>
    %712 = arith.maximumf %710, %711 : vector<2x1xf32>
    %713 = vector.broadcast %703 : vector<2x1xf32> to vector<2x32xf32>
    %714 = arith.subf %697, %713 : vector<2x32xf32>
    %cst_343 = arith.constant 9.99999974E-6 : f32
    %715 = vector.broadcast %cst_343 : f32 to vector<2x1xf32>
    %716 = arith.addf %712, %715 : vector<2x1xf32>
    %717 = math.rsqrt %716 : vector<2x1xf32>
    %718 = vector.broadcast %717 : vector<2x1xf32> to vector<2x32xf32>
    %719 = arith.mulf %714, %718 : vector<2x32xf32>
    %720 = vector.broadcast %698 : vector<1x32xf32> to vector<2x32xf32>
    %721 = arith.mulf %719, %720 : vector<2x32xf32>
    %722 = vector.broadcast %699 : vector<1x32xf32> to vector<2x32xf32>
    %723 = arith.addf %721, %722 : vector<2x32xf32>
    %724 = vector.shape_cast %723 : vector<2x32xf32> to vector<1x2x32xf32>
    %725 = vector.shape_cast %724 : vector<1x2x32xf32> to vector<2x32xf32>
    %c0_344 = arith.constant 0 : index
    %c128_345 = arith.constant 128 : index
    %726 = vector.load %arg8[%c0_344, %c128_345] : memref<1x512xf32, #tpu.memory_space<vmem>>, vector<1x32xf32>
    %c0_346 = arith.constant 0 : index
    %c160_347 = arith.constant 160 : index
    %727 = vector.load %arg8[%c0_346, %c160_347] : memref<1x512xf32, #tpu.memory_space<vmem>>, vector<1x32xf32>
    %cst_348 = arith.constant dense<0.000000e+00> : vector<2xf32>
    %728 = vector.multi_reduction <add>, %725, %cst_348 [1] : vector<2x32xf32> to vector<2xf32>
    %729 = vector.shape_cast %728 : vector<2xf32> to vector<2x1xf32>
    %cst_349 = arith.constant 3.200000e+01 : f32
    %730 = vector.broadcast %cst_349 : f32 to vector<2x1xf32>
    %731 = arith.divf %729, %730 : vector<2x1xf32>
    %732 = arith.mulf %725, %725 : vector<2x32xf32>
    %cst_350 = arith.constant dense<0.000000e+00> : vector<2xf32>
    %733 = vector.multi_reduction <add>, %732, %cst_350 [1] : vector<2x32xf32> to vector<2xf32>
    %734 = vector.shape_cast %733 : vector<2xf32> to vector<2x1xf32>
    %cst_351 = arith.constant 3.200000e+01 : f32
    %735 = vector.broadcast %cst_351 : f32 to vector<2x1xf32>
    %736 = arith.divf %734, %735 : vector<2x1xf32>
    %737 = arith.mulf %731, %731 : vector<2x1xf32>
    %738 = arith.subf %736, %737 : vector<2x1xf32>
    %cst_352 = arith.constant 0.000000e+00 : f32
    %739 = vector.broadcast %cst_352 : f32 to vector<2x1xf32>
    %740 = arith.maximumf %738, %739 : vector<2x1xf32>
    %741 = vector.broadcast %731 : vector<2x1xf32> to vector<2x32xf32>
    %742 = arith.subf %725, %741 : vector<2x32xf32>
    %cst_353 = arith.constant 9.99999974E-6 : f32
    %743 = vector.broadcast %cst_353 : f32 to vector<2x1xf32>
    %744 = arith.addf %740, %743 : vector<2x1xf32>
    %745 = math.rsqrt %744 : vector<2x1xf32>
    %746 = vector.broadcast %745 : vector<2x1xf32> to vector<2x32xf32>
    %747 = arith.mulf %742, %746 : vector<2x32xf32>
    %748 = vector.broadcast %726 : vector<1x32xf32> to vector<2x32xf32>
    %749 = arith.mulf %747, %748 : vector<2x32xf32>
    %750 = vector.broadcast %727 : vector<1x32xf32> to vector<2x32xf32>
    %751 = arith.addf %749, %750 : vector<2x32xf32>
    %752 = arith.truncf %751 : vector<2x32xf32> to vector<2x32xbf16>
    %c0_354 = arith.constant 0 : index
    %c0_355 = arith.constant 0 : index
    %753 = vector.load %arg11[%c0_354, %c0_355] : memref<32x256xbf16, #tpu.memory_space<vmem>>, vector<32x256xbf16>
    %c0_356 = arith.constant 0 : index
    %c256_357 = arith.constant 256 : index
    %754 = vector.load %arg8[%c0_356, %c256_357] : memref<1x512xf32, #tpu.memory_space<vmem>>, vector<1x256xf32>
    %cst_358 = arith.constant dense<0.000000e+00> : vector<2x256xf32>
    %755 = tpu.matmul %752, %753, %cst_358 {dimension_numbers = #tpu.dot_dimension_numbers<[1], [0], [0], [1], [0, 0, 1, 1], [], []>} : vector<2x32xbf16>, vector<32x256xbf16>, vector<2x256xf32> -> vector<2x256xf32>
    %756 = vector.broadcast %754 : vector<1x256xf32> to vector<2x256xf32>
    %757 = arith.addf %755, %756 : vector<2x256xf32>
    %c0_359 = arith.constant 0 : index
    %c0_360 = arith.constant 0 : index
    %c0_361 = arith.constant 0 : index
    %758 = vector.load %arg12[%c0_359, %c0_360, %c0_361] : memref<1x2x256xf32, #tpu.memory_space<vmem>>, vector<1x2x256xf32>
    %759 = vector.shape_cast %758 : vector<1x2x256xf32> to vector<2x256xf32>
    %760 = vector.shape_cast %757 : vector<2x256xf32> to vector<1x2x256xf32>
    tpu.vector_store %arg12[%c0_359, %c0_360, %c0_361], %760 {strides = array<i32>} : memref<1x2x256xf32, #tpu.memory_space<vmem>>, vector<1x2x256xf32>,
    return
  }
  func.func @transform_0(%arg0: i32) -> (i32, i32, i32, i32) {
    %c0_i32 = arith.constant 0 : i32
    %c0_i32_0 = arith.constant 0 : i32
    %c0_i32_1 = arith.constant 0 : i32
    %c0_i32_2 = arith.constant 0 : i32
    return %arg0, %c0_i32, %c0_i32_0, %c0_i32_1 : i32, i32, i32, i32
  }
  func.func @transform_1(%arg0: i32) -> (i32, i32, i32) {
    %c0_i32 = arith.constant 0 : i32
    %c0_i32_0 = arith.constant 0 : i32
    %c0_i32_1 = arith.constant 0 : i32
    %c0_i32_2 = arith.constant 0 : i32
    return %c0_i32, %c0_i32_0, %c0_i32_1 : i32, i32, i32
  }
  func.func @transform_2(%arg0: i32) -> (i32, i32, i32) {
    %c0_i32 = arith.constant 0 : i32
    %c0_i32_0 = arith.constant 0 : i32
    %c0_i32_1 = arith.constant 0 : i32
    %c0_i32_2 = arith.constant 0 : i32
    return %c0_i32, %c0_i32_0, %c0_i32_1 : i32, i32, i32
  }
  func.func @transform_3(%arg0: i32) -> (i32, i32, i32) {
    %c0_i32 = arith.constant 0 : i32
    %c0_i32_0 = arith.constant 0 : i32
    %c0_i32_1 = arith.constant 0 : i32
    %c0_i32_2 = arith.constant 0 : i32
    return %c0_i32, %c0_i32_0, %c0_i32_1 : i32, i32, i32
  }
  func.func @transform_4(%arg0: i32) -> (i32, i32, i32) {
    %c0_i32 = arith.constant 0 : i32
    %c0_i32_0 = arith.constant 0 : i32
    %c0_i32_1 = arith.constant 0 : i32
    %c0_i32_2 = arith.constant 0 : i32
    return %c0_i32, %c0_i32_0, %c0_i32_1 : i32, i32, i32
  }
  func.func @transform_5(%arg0: i32) -> (i32, i32) {
    %c0_i32 = arith.constant 0 : i32
    %c0_i32_0 = arith.constant 0 : i32
    %c0_i32_1 = arith.constant 0 : i32
    return %c0_i32, %c0_i32_0 : i32, i32
  }
  func.func @transform_6(%arg0: i32) -> (i32, i32) {
    %c0_i32 = arith.constant 0 : i32
    %c0_i32_0 = arith.constant 0 : i32
    %c0_i32_1 = arith.constant 0 : i32
    return %c0_i32, %c0_i32_0 : i32, i32
  }
  func.func @transform_7(%arg0: i32) -> (i32, i32) {
    %c0_i32 = arith.constant 0 : i32
    %c0_i32_0 = arith.constant 0 : i32
    %c0_i32_1 = arith.constant 0 : i32
    return %c0_i32, %c0_i32_0 : i32, i32
  }
  func.func @transform_8(%arg0: i32) -> (i32, i32) {
    %c0_i32 = arith.constant 0 : i32
    %c0_i32_0 = arith.constant 0 : i32
    %c0_i32_1 = arith.constant 0 : i32
    return %c0_i32, %c0_i32_0 : i32, i32
  }
  func.func @transform_9(%arg0: i32) -> (i32, i32) {
    %c0_i32 = arith.constant 0 : i32
    %c0_i32_0 = arith.constant 0 : i32
    %c0_i32_1 = arith.constant 0 : i32
    return %c0_i32, %c0_i32_0 : i32, i32
  }
  func.func @transform_10(%arg0: i32) -> (i32, i32) {
    %c0_i32 = arith.constant 0 : i32
    %c0_i32_0 = arith.constant 0 : i32
    %c0_i32_1 = arith.constant 0 : i32
    return %c0_i32, %c0_i32_0 : i32, i32
  }
  func.func @transform_11(%arg0: i32) -> (i32, i32, i32) {
    %c0_i32 = arith.constant 0 : i32
    %c0_i32_0 = arith.constant 0 : i32
    %c0_i32_1 = arith.constant 0 : i32
    return %arg0, %c0_i32, %c0_i32_0 : i32, i32, i32
  }
}

</mosaic_0001>

<bundles_post_ra>
// kernel: transformer_forward.1
= control target key start
LH: loop header
LB: loop body
LE: loop exit
PB: predicated region body
PF: predicated region fallthrough
CT: control target
= control target key end

     0   :  { %v15639_v0 = vmov 0.0   ;;  %vm15640_vm0 = vmmov 0   ;;  %vm57_vm1 = vcmask 130048   ;;  %vm124_vm2 = vcmask 261120   ;;  %s15641_s29 = smov 112   ;;  %s15642_s30 = smov 120   ;;  %s18878_s8 = inlined_call_operand.vmem [shape: bf16[16,32], index: 8, kind: input, shape index: {}]   ;;  %s18879_s0 = inlined_call_operand.vmem [shape: f32[1,2,8,16], index: 0, kind: input, shape index: {}]   ;;  %s18880_s1 = inlined_call_operand.vmem [shape: bf16[4,32,96], index: 1, kind: input, shape index: {}]   ;;  %s18881_s7 = inlined_call_operand.vmem [shape: f32[1,512], index: 7, kind: input, shape index: {}]   ;;  %s18882_s6 = inlined_call_operand.vmem [shape: f32[4,288], index: 6, kind: input, shape index: {}]   ;;  %s18883_s2 = inlined_call_operand.vmem [shape: bf16[4,32,32], index: 2, kind: input, shape index: {}]   ;;  %s18884_s3 = inlined_call_operand.vmem [shape: bf16[4,32,2048], index: 3, kind: input, shape index: {}]   ;;  %s18885_s4 = inlined_call_operand.vmem [shape: bf16[4,2048,32], index: 4, kind: input, shape index: {}]   ;;  %s18886_s5 = inlined_call_operand.vmem [shape: f32[4,2048], index: 5, kind: input, shape index: {}]   ;;  %s18887_s9 = inlined_call_operand.vmem [shape: bf16[32,32], index: 9, kind: input, shape index: {}]   ;;  %s18888_s10 = inlined_call_operand.vmem [shape: bf16[32,256], index: 10, kind: input, shape index: {}]   ;;  %s18889_s11 = inlined_call_operand.vmem [shape: f32[1,2,256], index: 11, kind: output, shape index: {}]  }
   0x1   :  { %14564 = vmatprep.subr.bf16.mxu0 %v15639_v0  ;;  %v14972_v1 = vld [vmem:[%s18878_s8] sm:$0xff]   ;;  %14566 = vmatprep.mubr.msk.bf16.mxu0 %vm15640_vm0, %v15639_v0  ;;  %v40_v3 = vld [vmem:[%s18879_s0 + $0x8] sm:$0xff]  ;;  %s15643_s12 = smov 104   ;;  %s15644_s13 = smov 96   ;;  %vm187_vm3 = vcmask 64512   ;;  %vm679_vm4 = vcmask 1043456  }
   0x2   :  { %v39_v2 = vld [vmem:[%s18879_s0] sm:$0xff]  ;;  %14570 = vmatprep.subr.bf16.mxu1 %v15639_v0  ;;  %14574 = vmatprep.mubr.msk.bf16.mxu1 %vm15640_vm0, %v15639_v0  ;;  %v14974_v6 = vld [vmem:[%s18880_s1 + $0x8] sm:$0xff]   ;;  %s15645_s14 = smov 64   ;;  %s15646_s15 = smov 8   ;;  %vm1087_vm5 = vcmask 195584   ;;  %vm6492_vm6 = vcmask 261127  }
   0x3   :  { %14565 = vmatpush3.bf16.msra.mxu0 %v14972_v1  ;;  %v41_v4 = vpack.c.bf16 %v40_v3, %v39_v2  ;;  %v14973_v5 = vld [vmem:[%s18880_s1] sm:$0xff]   ;;  %s15647_s20 = smov 16   ;;  %s15648_s21 = smov 32   ;;  %vm6496_vm7 = vcmask 253952   ;;  %vm6568_vm8 = vcmask 1041409   ;;  %vm6899_vm9 = vcmask 9216  }
   0x4   :  { %14578 = vmatprep.subr.bf16.mxu0 %v15639_v0  ;;  %14571 = vmatpush3.bf16.msra.mxu1 %v14973_v5  ;;  %v12058_v7 = vld [vmem:[%s18881_s7] ss:$0 sm:$0xff]  ;;  %s15649_s22 = smov 24   ;;  %vm6954_vm10 = vcmask 1040384   ;;  %vm6950_vm11 = vcmask 15360   ;;  %vm7229_vm12 = vcmask 254976  }
   0x5   :  { %14572 = vmatprep.subr.bf16.mxu1 %v15639_v0  ;;  %v15753_v15 = vld [vmem:[%s18882_s6] ss:$0 sm:$0xff] }
   0x6   :  { %14567 = vmatmul.mubr.msk.bf16.vlgmr.msra.gmra.mrb[0].mxu0 %vm57_vm1, %v41_v4 }
   0x7   :  { %14580 = vmatprep.mubr.msk.bf16.mxu0 %vm15640_vm0, %v15639_v0 }
   0x8   :  { %14573 = vmatpush3.bf16.msra.mxu1 %v14974_v6 }
   0x9   :  { %14584 = vmatprep.subr.bf16.mxu1 %v15639_v0 }
  0xd9   :  { %v95_v8 = vpop.f32.mrb[0].mxu0 }
  0xda   :  { %v14568_v9 = vpop.f32.mrb[1].mxu0  ;;  %v15741_v11 = vadd.f32 %v12058_v7, %v95_v8 }
  0xdb   :  { %v98_v10 = vpop.f32.mrb[2].mxu0 }
  0xdc   :  { %v15743_v12 = vadd.f32 %v12058_v7, %v98_v10  ;;  %v14569_v13 = vpop.f32.mrb[3].mxu0 }
  0xde   :  { %v102_v14 = vpack.c.bf16 %v15743_v12, %v15741_v11 }
  0xe0   :  { %14575 = vmatmul.mubr.msk.bf16.vlgmr.msra.gmra.mrb[0].mxu1 %vm124_vm2, %v102_v14 }
  0xe1   :  { %14586 = vmatprep.mubr.msk.bf16.mxu1 %vm15640_vm0, %v15639_v0 }
 0x1b3   :  { %v162_v16 = vpop.f32.mrb[0].mxu1 }
 0x1b4   :  { %v163_v17 = vadd.f32 %v15753_v15, %v162_v16  ;;  %v14576_v18 = vpop.f32.mrb[1].mxu1 }
 0x1b5   :  { %v165_v19 = vpop.f32.mrb[2].mxu1 }
 0x1b6   :  { %v169_v20 = vpack.c.bf16 %v163_v17, %v163_v17  ;;  %v166_v21 = vadd.f32 %v15753_v15, %v165_v19  ;;  %v14577_v22 = vpop.f32.mrb[3].mxu1 }
 0x1b8   :  { %177 = vrot.lane.b32.xlu1 %v169_v20, %s15641_s29  ;;  %173 = vrot.lane.b32.xlu0 %v169_v20, %s15642_s30  ;;  %v15759_v23 = vpack.c.bf16 %v166_v21, %v166_v21 }
 0x1bc   :  { %179 = vrot.lane.b32.xlu1 %v15759_v23, %s15641_s29  ;;  %175 = vrot.lane.b32.xlu0 %v15759_v23, %s15642_s30 }
 0x1c0   :  { %183 = vrot.lane.b32.xlu1 %v15759_v23, %s15643_s12  ;;  %181 = vrot.lane.b32.xlu0 %v169_v20, %s15643_s12 }
 0x1c4   :  { %234 = vrot.lane.b32.xlu1 %v15759_v23, %s15644_s13  ;;  %185 = vrot.lane.b32.xlu0 %v169_v20, %s15644_s13 }
 0x22a   :  { %v15771_v24 = vpop.permute.xlu1 %177  ;;  %v15773_v25 = vpop.permute.xlu0 %173 }
 0x22b   :  { %282 = vrot.lane.b32.xlu0 %v15773_v25, %s15644_s13 }
 0x22e   :  { %v15777_v26 = vpop.permute.xlu1 %179  ;;  %v15779_v27 = vpop.permute.xlu0 %175 }
 0x22f   :  { %378 = vrot.lane.b32.xlu0 %v15771_v24, %s15644_s13  ;;  %330 = vrot.lane.b32.xlu1 %v15779_v27, %s15644_s13 }
 0x232   :  { %v15785_v28 = vpop.permute.xlu1 %183  ;;  %v15787_v29 = vpop.permute.xlu0 %181 }
 0x233   :  { %426 = vrot.lane.b32.xlu1 %v15777_v26, %s15644_s13  ;;  %474 = vrot.lane.b32.xlu0 %v15787_v29, %s15644_s13 }
 0x236   :  { %v235_v30 = vpop.permute.xlu1 %234  ;;  %v186_v31 = vpop.permute.xlu0 %185 }
 0x237   :  { %v240_v32 = vsel %vm187_vm3, %v235_v30, 0  ;;  %v192_v33 = vsel %vm187_vm3, %v186_v31, 0  ;;  %522 = vrot.lane.b32.xlu1 %v15785_v28, %s15644_s13 }
 0x238   :  { %14579 = vmatpush3.bf16.xpose.msra.mxu0 %v192_v33  ;;  %14585 = vmatpush3.bf16.xpose.msra.mxu1 %v240_v32 }
 0x239   :  { %14590 = vmatprep.subr.bf16.mxu0 %v15639_v0  ;;  %14596 = vmatprep.subr.bf16.mxu1 %v15639_v0 }
 0x23b   :  { %674 = vrot.lane.b32.xlu1 %v169_v20, %s15645_s14 }
 0x23f   :  { %14581 = vmatmul.mubr.msk.bf16.vlgmr.msra.gmra.mrb[4].mxu0 %vm187_vm3, %v169_v20  ;;  %14587 = vmatmul.mubr.msk.bf16.vlgmr.msra.gmra.mrb[4].mxu1 %vm187_vm3, %v15759_v23 }
 0x240   :  { %14592 = vmatprep.mubr.msk.bf16.mxu0 %vm15640_vm0, %v15639_v0  ;;  %14598 = vmatprep.mubr.msk.bf16.mxu1 %vm15640_vm0, %v15639_v0 }
 0x29d   :  { %v283_v34 = vpop.permute.xlu0 %282 }
 0x29e   :  { %v288_v35 = vsel %vm187_vm3, %v283_v34, 0 }
 0x29f   :  { %14591 = vmatpush3.bf16.xpose.msra.mxu0 %v288_v35 }
 0x2a0   :  { %14602 = vmatprep.subr.bf16.mxu0 %v15639_v0 }
 0x2a1   :  { %v331_v36 = vpop.permute.xlu1 %330  ;;  %v379_v38 = vpop.permute.xlu0 %378 }
 0x2a2   :  { %v336_v37 = vsel %vm187_vm3, %v331_v36, 0  ;;  %v384_v39 = vsel %vm187_vm3, %v379_v38, 0 }
 0x2a3   :  { %14597 = vmatpush3.bf16.xpose.msra.mxu1 %v336_v37 }
 0x2a4   :  { %14608 = vmatprep.subr.bf16.mxu1 %v15639_v0 }
 0x2a5   :  { %v427_v40 = vpop.permute.xlu1 %426  ;;  %v475_v42 = vpop.permute.xlu0 %474 }
 0x2a6   :  { %14593 = vmatmul.mubr.msk.bf16.vlgmr.msra.gmra.mrb[8].mxu0 %vm187_vm3, %v15773_v25  ;;  %v432_v41 = vsel %vm187_vm3, %v427_v40, 0  ;;  %v480_v44 = vsel %vm187_vm3, %v475_v42, 0 }
 0x2a7   :  { %14603 = vmatpush3.bf16.xpose.msra.mxu0 %v384_v39  ;;  %14604 = vmatprep.mubr.msk.bf16.mxu0 %vm15640_vm0, %v15639_v0 }
 0x2a8   :  { %14614 = vmatprep.subr.bf16.mxu0 %v15639_v0 }
 0x2a9   :  { %v523_v43 = vpop.permute.xlu1 %522 }
 0x2aa   :  { %14599 = vmatmul.mubr.msk.bf16.vlgmr.msra.gmra.mrb[8].mxu1 %vm187_vm3, %v15779_v27  ;;  %v528_v45 = vsel %vm187_vm3, %v523_v43, 0 }
 0x2ab   :  { %14609 = vmatpush3.bf16.xpose.msra.mxu1 %v432_v41  ;;  %14610 = vmatprep.mubr.msk.bf16.mxu1 %vm15640_vm0, %v15639_v0 }
 0x2ac   :  { %14620 = vmatprep.subr.bf16.mxu1 %v15639_v0 }
 0x2ad   :  { %v675_v46 = vpop.permute.xlu1 %674 }
 0x2ae   :  { %14605 = vmatmul.mubr.msk.bf16.vlgmr.msra.gmra.mrb[12].mxu0 %vm187_vm3, %v15771_v24  ;;  %v681_v47 = vsel %vm679_vm4, %v675_v46, 0 }
 0x2af   :  { %14615 = vmatpush3.bf16.xpose.msra.mxu0 %v480_v44  ;;  %14616 = vmatprep.mubr.msk.bf16.mxu0 %vm15640_vm0, %v15639_v0 }
 0x2b0   :  { %14626 = vmatprep.subr.bf16.mxu0 %v15639_v0 }
 0x2b2   :  { %14611 = vmatmul.mubr.msk.bf16.vlgmr.msra.gmra.mrb[12].mxu1 %vm187_vm3, %v15777_v26 }
 0x2b3   :  { %14621 = vmatpush3.bf16.xpose.msra.mxu1 %v528_v45  ;;  %14622 = vmatprep.mubr.msk.bf16.mxu1 %vm15640_vm0, %v15639_v0 }
 0x2b4   :  { %14632 = vmatprep.subr.bf16.mxu1 %v15639_v0 }
 0x2b6   :  { %14617 = vmatmul.mubr.msk.bf16.vlgmr.msra.gmra.mrb[16].mxu0 %vm187_vm3, %v15787_v29 }
 0x2b7   :  { %14627 = vmatpush3.bf16.msra.mxu0 %v681_v47  ;;  %14628 = vmatprep.mubr.msk.bf16.mxu0 %vm15640_vm0, %v15639_v0 }
 0x2b8   :  { %14638 = vmatprep.subr.bf16.mxu0 %v15639_v0 }
 0x2ba   :  { %14623 = vmatmul.mubr.msk.bf16.vlgmr.msra.gmra.mrb[16].mxu1 %vm187_vm3, %v15785_v28 }
 0x2bb   :  { %14634 = vmatprep.mubr.msk.bf16.mxu1 %vm15640_vm0, %v15639_v0 }
 0x312   :  { %v228_v48 = vpop.f32.mrb[4].mxu0  ;;  %v276_v49 = vpop.f32.mrb[4].mxu1 }
 0x313   :  { %v570_v50 = vmul.f32 0.35355338, %v228_v48  ;;  %v571_v51 = vmul.f32 0.35355338, %v276_v49  ;;  %v14582_v52 = vpop.f32.mrb[5].mxu0  ;;  %v14588_v53 = vpop.f32.mrb[5].mxu1 }
 0x314   :  { %v231_v54 = vpop.f32.mrb[6].mxu0  ;;  %v279_v55 = vpop.f32.mrb[6].mxu1 }
 0x315   :  { %v14583_v56 = vpop.f32.mrb[7].mxu0  ;;  %v14589_v57 = vpop.f32.mrb[7].mxu1  ;;  %v581_v58 = vsel %vm187_vm3, %v571_v51, -inf  ;;  %v578_v59 = vsel %vm187_vm3, %v570_v50, -inf }
 0x316   :  { %582 = vmax.xlane.f32.xlu1 %v581_v58  ;;  %579 = vmax.xlane.f32.xlu0 %v578_v59 }
 0x379   :  { %v324_v60 = vpop.f32.mrb[8].mxu0 }
 0x37a   :  { %v572_v61 = vmul.f32 0.35355338, %v324_v60  ;;  %v14594_v62 = vpop.f32.mrb[9].mxu0 }
 0x37b   :  { %v327_v63 = vpop.f32.mrb[10].mxu0 }
 0x37c   :  { %v14595_v1 = vpop.f32.mrb[11].mxu0  ;;  %v584_v2 = vsel %vm187_vm3, %v572_v61, -inf }
 0x37d   :  { %v372_v3 = vpop.f32.mrb[8].mxu1  ;;  %585 = vmax.xlane.f32.xlu0 %v584_v2 }
 0x37e   :  { %v573_v4 = vmul.f32 0.35355338, %v372_v3  ;;  %v14600_v5 = vpop.f32.mrb[9].mxu1 }
 0x37f   :  { %v375_v6 = vpop.f32.mrb[10].mxu1 }
 0x380   :  { %v14601_v7 = vpop.f32.mrb[11].mxu1  ;;  %v587_v8 = vsel %vm187_vm3, %v573_v4, -inf }
 0x381   :  { %588 = vmax.xlane.f32.xlu0 %v587_v8  ;;  %v420_v9 = vpop.f32.mrb[12].mxu0 }
 0x382   :  { %v15849_v10 = vmul.f32 0.35355338, %v420_v9  ;;  %v14606_v13 = vpop.f32.mrb[13].mxu0 }
 0x383   :  { %v423_v14 = vpop.f32.mrb[14].mxu0 }
 0x384   :  { %v14607_v16 = vpop.f32.mrb[15].mxu0  ;;  %v590_v17 = vsel %vm187_vm3, %v15849_v10, -inf }
 0x385   :  { %v468_v18 = vpop.f32.mrb[12].mxu1  ;;  %591 = vmax.xlane.f32.xlu1 %v590_v17 }
 0x386   :  { %v15853_v19 = vmul.f32 0.35355338, %v468_v18  ;;  %v14612_v20 = vpop.f32.mrb[13].mxu1 }
 0x387   :  { %v471_v21 = vpop.f32.mrb[14].mxu1 }
 0x388   :  { %v14613_v22 = vpop.f32.mrb[15].mxu1  ;;  %v593_v30 = vsel %vm187_vm3, %v15853_v19, -inf }
 0x389   :  { %594 = vmax.xlane.f32.xlu0 %v593_v30  ;;  %v516_v31 = vpop.f32.mrb[16].mxu0 }
 0x38a   :  { %v576_v32 = vmul.f32 0.35355338, %v516_v31  ;;  %v14618_v33 = vpop.f32.mrb[17].mxu0 }
 0x38b   :  { %v519_v34 = vpop.f32.mrb[18].mxu0 }
 0x38c   :  { %v14619_v35 = vpop.f32.mrb[19].mxu0  ;;  %v596_v36 = vsel %vm187_vm3, %v576_v32, -inf }
 0x38d   :  { %v564_v37 = vpop.f32.mrb[16].mxu1  ;;  %597 = vmax.xlane.f32.xlu1 %v596_v36 }
 0x38e   :  { %v577_v38 = vmul.f32 0.35355338, %v564_v37  ;;  %v14624_v39 = vpop.f32.mrb[17].mxu1 }
 0x38f   :  { %v567_v40 = vpop.f32.mrb[18].mxu1 }
 0x390   :  { %v14625_v41 = vpop.f32.mrb[19].mxu1  ;;  %v599_v42 = vsel %vm187_vm3, %v577_v38, -inf }
 0x391   :  { %600 = vmax.xlane.f32.xlu0 %v599_v42 }
 0x39e   :  { %771 = vrot.lane.b32.xlu1 %v15773_v25, %s15645_s14 }
 0x3a2   :  { %819 = vrot.lane.b32.xlu1 %v15779_v27, %s15645_s14 }
 0x3a3   :  { %v583_v43 = vpop.xlane.xlu1 %582  ;;  %v580_v44 = vpop.xlane.xlu0 %579 }
 0x3a4   :  { %v603_v45 = vsub.f32 %v571_v51, %v583_v43  ;;  %v602_v46 = vsub.f32 %v570_v50, %v580_v44 }
 0x3a6   :  { %v612_v47 = vmul.f32 1.442695, %v603_v45  ;;  %v610_v48 = vmul.f32 1.442695, %v602_v46 }
 0x3a7   :  { %723 = vrot.lane.b32.xlu0 %v15759_v23, %s15645_s14 }
 0x3a8   :  { %15509 = vpow2.f32 %v612_v47 }
 0x3a9   :  { %15511 = vpow2.f32 %v610_v48 }
 0x3b2   :  { %v15510_v49 = vpop.eup %15509 }
 0x3b3   :  { %v15512_v52 = vpop.eup %15511  ;;  %v629_v53 = vsel %vm187_vm3, %v15510_v49, 0.0 }
 0x3b4   :  { %v626_v25 = vsel %vm187_vm3, %v15512_v52, 0.0 }
 0x3c6   :  { %630 = vadd.xlane.f32.xlu0 %v629_v53  ;;  %627 = vadd.xlane.f32.xlu1 %v626_v25 }
 0x40a   :  { %v586_v27 = vpop.xlane.xlu0 %585 }
 0x40b   :  { %v604_v54 = vsub.f32 %v572_v61, %v586_v27 }
 0x40d   :  { %v614_v55 = vmul.f32 1.442695, %v604_v54 }
 0x40e   :  { %v589_v23 = vpop.xlane.xlu0 %588 }
 0x40f   :  { %15513 = vpow2.f32 %v614_v55  ;;  %v605_v56 = vsub.f32 %v573_v4, %v589_v23 }
 0x411   :  { %v616_v51 = vmul.f32 1.442695, %v605_v56 }
 0x412   :  { %v592_v1 = vpop.xlane.xlu1 %591 }
 0x413   :  { %15515 = vpow2.f32 %v616_v51  ;;  %v606_v2 = vsub.f32 %v15849_v10, %v592_v1 }
 0x415   :  { %v618_v5 = vmul.f32 1.442695, %v606_v2 }
 0x416   :  { %v595_v57 = vpop.xlane.xlu0 %594 }
 0x417   :  { %v607_v4 = vsub.f32 %v15853_v19, %v595_v57  ;;  %15517 = vpow2.f32 %v618_v5 }
 0x419   :  { %v15867_v50 = vpop.eup %15513  ;;  %v620_v7 = vmul.f32 1.442695, %v607_v4 }
 0x41a   :  { %v632_v58 = vsel %vm187_vm3, %v15867_v50, 0.0  ;;  %v598_v3 = vpop.xlane.xlu1 %597 }
 0x41b   :  { %633 = vadd.xlane.f32.xlu1 %v632_v58  ;;  %v608_v6 = vsub.f32 %v576_v32, %v598_v3  ;;  %15519 = vpow2.f32 %v620_v7 }
 0x41d   :  { %v15871_v59 = vpop.eup %15515  ;;  %v622_v8 = vmul.f32 1.442695, %v608_v6 }
 0x41e   :  { %v601_v60 = vpop.xlane.xlu0 %600  ;;  %v635_v62 = vsel %vm187_vm3, %v15871_v59, 0.0  ;;  %v772_v14 = vpop.permute.xlu1 %771 }
 0x41f   :  { %636 = vadd.xlane.f32.xlu0 %v635_v62  ;;  %v609_v9 = vsub.f32 %v577_v38, %v601_v60  ;;  %15521 = vpow2.f32 %v622_v8  ;;  %v777_v38 = vsel %vm679_vm4, %v772_v14, 0 }
 0x421   :  { %v624_v13 = vmul.f32 1.442695, %v609_v9 }
 0x422   :  { %v724_v61 = vpop.permute.xlu0 %723  ;;  %v820_v16 = vpop.permute.xlu1 %819 }
 0x423   :  { %v729_v63 = vsel %vm679_vm4, %v724_v61, 0  ;;  %15523 = vpow2.f32 %v624_v13  ;;  %v825_v37 = vsel %vm679_vm4, %v820_v16, 0 }
 0x424   :  { %14633 = vmatpush3.bf16.msra.mxu1 %v729_v63 }
 0x425   :  { %14644 = vmatprep.subr.bf16.mxu1 %v15639_v0 }
 0x42c   :  { %915 = vrot.lane.b32.xlu1 %v15777_v26, %s15645_s14  ;;  %v15883_v26 = vpop.eup %15517 }
 0x42d   :  { %v638_v10 = vsel %vm187_vm3, %v15883_v26, 0.0 }
 0x435   :  { %867 = vrot.lane.b32.xlu0 %v15771_v24, %s15645_s14  ;;  %v15885_v24 = vpop.eup %15519 }
 0x436   :  { %v15889_v17 = vpop.eup %15521  ;;  %v641_v20 = vsel %vm187_vm3, %v15885_v24, 0.0 }
 0x437   :  { %v644_v21 = vsel %vm187_vm3, %v15889_v17, 0.0  ;;  %v15895_v22 = vpop.eup %15523 }
 0x438   :  { %v647_v30 = vsel %vm187_vm3, %v15895_v22, 0.0 }
 0x450   :  { %639 = vadd.xlane.f32.xlu1 %v638_v10 }
 0x453   :  { %v631_v18 = vpop.xlane.xlu0 %630  ;;  %v628_v19 = vpop.xlane.xlu1 %627 }
 0x454   :  { %15525 = vrcp.f32 %v631_v18  ;;  %642 = vadd.xlane.f32.xlu0 %v641_v20  ;;  %645 = vadd.xlane.f32.xlu1 %v644_v21  ;;  %v14975_v21 = vld [vmem:[%s18883_s2] sm:$0xff]  }
 0x455   :  { %15527 = vrcp.f32 %v628_v19 }
 0x458   :  { %648 = vadd.xlane.f32.xlu0 %v647_v30 }
 0x45e   :  { %v15526_v31 = vpop.eup %15525 }
 0x45f   :  { %v15528_v32 = vpop.eup %15527  ;;  %v659_v33 = vmul.f32 %v15526_v31, %v15510_v49 }
 0x460   :  { %v658_v34 = vmul.f32 %v15528_v32, %v15512_v52 }
 0x461   :  { %v667_v35 = vpack.c.bf16 %v659_v33, %v659_v33 }
 0x462   :  { %v666_v36 = vpack.c.bf16 %v658_v34, %v658_v34  ;;  %v14976_v34 = vld [vmem:[%s18883_s2 + $0x8] sm:$0xff]  }
 0x463   :  { %14635 = vmatmul.mubr.msk.bf16.vlgmr.msra.gmra.mrb[20].mxu1 %vm187_vm3, %v667_v35 }
 0x464   :  { %14629 = vmatmul.mubr.msk.bf16.vlgmr.msra.gmra.mrb[20].mxu0 %vm187_vm3, %v666_v36  ;;  %14645 = vmatpush3.bf16.msra.mxu1 %v825_v37 }
 0x465   :  { %14639 = vmatpush3.bf16.msra.mxu0 %v777_v38  ;;  %1011 = vrot.lane.b32.xlu1 %v15785_v28, %s15645_s14 }
 0x466   :  { %14640 = vmatprep.mubr.msk.bf16.mxu0 %vm15640_vm0, %v15639_v0  ;;  %14650 = vmatprep.subr.bf16.mxu0 %v15639_v0 }
 0x467   :  { %14646 = vmatprep.mubr.msk.bf16.mxu1 %vm15640_vm0, %v15639_v0  ;;  %14656 = vmatprep.subr.bf16.mxu1 %v15639_v0 }
 0x46e   :  { %963 = vrot.lane.b32.xlu0 %v15787_v29, %s15645_s14 }
 0x4a8   :  { %v634_v39 = vpop.xlane.xlu1 %633 }
 0x4a9   :  { %15529 = vrcp.f32 %v634_v39 }
 0x4ac   :  { %v637_v40 = vpop.xlane.xlu0 %636  ;;  %v916_v47 = vpop.permute.xlu1 %915 }
 0x4ad   :  { %15531 = vrcp.f32 %v637_v40  ;;  %v921_v48 = vsel %vm679_vm4, %v916_v47, 0 }
 0x4b0   :  { %v868_v42 = vpop.permute.xlu0 %867 }
 0x4b1   :  { %v873_v45 = vsel %vm679_vm4, %v868_v42, 0 }
 0x4b3   :  { %v15530_v41 = vpop.eup %15529 }
 0x4b4   :  { %v660_v28 = vmul.f32 %v15530_v41, %v15867_v50 }
 0x4b6   :  { %v668_v43 = vpack.c.bf16 %v660_v28, %v660_v28 }
 0x4b7   :  { %v15532_v44 = vpop.eup %15531 }
 0x4b8   :  { %14641 = vmatmul.mubr.msk.bf16.vlgmr.msra.gmra.mrb[24].mxu0 %vm187_vm3, %v668_v43  ;;  %v661_v46 = vmul.f32 %v15532_v44, %v15871_v59 }
 0x4b9   :  { %14651 = vmatpush3.bf16.msra.mxu0 %v873_v45  ;;  %14652 = vmatprep.mubr.msk.bf16.mxu0 %vm15640_vm0, %v15639_v0 }
 0x4ba   :  { %v669_v29 = vpack.c.bf16 %v661_v46, %v661_v46  ;;  %14662 = vmatprep.subr.bf16.mxu0 %v15639_v0 }
 0x4bc   :  { %14647 = vmatmul.mubr.msk.bf16.vlgmr.msra.gmra.mrb[24].mxu1 %vm187_vm3, %v669_v29 }
 0x4bd   :  { %14657 = vmatpush3.bf16.msra.mxu1 %v921_v48  ;;  %14658 = vmatprep.mubr.msk.bf16.mxu1 %vm15640_vm0, %v15639_v0 }
 0x4be   :  { %14668 = vmatprep.subr.bf16.mxu1 %v15639_v0 }
 0x4dd   :  { %v640_v49 = vpop.xlane.xlu1 %639 }
 0x4de   :  { %15533 = vrcp.f32 %v640_v49 }
 0x4e1   :  { %v643_v52 = vpop.xlane.xlu0 %642  ;;  %v646_v53 = vpop.xlane.xlu1 %645 }
 0x4e2   :  { %15535 = vrcp.f32 %v643_v52 }
 0x4e3   :  { %15537 = vrcp.f32 %v646_v53 }
 0x4e5   :  { %v649_v25 = vpop.xlane.xlu0 %648  ;;  %v1012_v58 = vpop.permute.xlu1 %1011 }
 0x4e6   :  { %15539 = vrcp.f32 %v649_v25  ;;  %v1017_v61 = vsel %vm679_vm4, %v1012_v58, 0 }
 0x4e8   :  { %v15534_v27 = vpop.eup %15533 }
 0x4e9   :  { %v662_v54 = vmul.f32 %v15534_v27, %v15883_v26  ;;  %v964_v55 = vpop.permute.xlu0 %963 }
 0x4ea   :  { %v969_v50 = vsel %vm679_vm4, %v964_v55, 0 }
 0x4eb   :  { %v670_v23 = vpack.c.bf16 %v662_v54, %v662_v54 }
 0x4ec   :  { %v15536_v56 = vpop.eup %15535 }
 0x4ed   :  { %v15538_v51 = vpop.eup %15537  ;;  %14653 = vmatmul.mubr.msk.bf16.vlgmr.msra.gmra.mrb[28].mxu0 %vm187_vm3, %v670_v23  ;;  %v663_v57 = vmul.f32 %v15536_v56, %v15885_v24 }
 0x4ee   :  { %14663 = vmatpush3.bf16.msra.mxu0 %v969_v50  ;;  %14664 = vmatprep.mubr.msk.bf16.mxu0 %vm15640_vm0, %v15639_v0  ;;  %v664_v60 = vmul.f32 %v15538_v51, %v15889_v17 }
 0x4ef   :  { %v671_v59 = vpack.c.bf16 %v663_v57, %v663_v57  ;;  %14674 = vmatprep.subr.bf16.mxu0 %v15639_v0 }
 0x4f0   :  { %v15540_v62 = vpop.eup %15539  ;;  %v672_v63 = vpack.c.bf16 %v664_v60, %v664_v60 }
 0x4f1   :  { %14659 = vmatmul.mubr.msk.bf16.vlgmr.msra.gmra.mrb[28].mxu1 %vm187_vm3, %v671_v59  ;;  %v665_v1 = vmul.f32 %v15540_v62, %v15895_v22 }
 0x4f2   :  { %14669 = vmatpush3.bf16.msra.mxu1 %v1017_v61  ;;  %14670 = vmatprep.mubr.msk.bf16.mxu1 %vm15640_vm0, %v15639_v0 }
 0x4f3   :  { %v673_v2 = vpack.c.bf16 %v665_v1, %v665_v1 }
 0x4f5   :  { %14665 = vmatmul.mubr.msk.bf16.vlgmr.msra.gmra.mrb[32].mxu0 %vm187_vm3, %v672_v63 }
 0x4f6   :  { %14678 = vmatprep.mubr.msk.bf16.mxu0 %vm15640_vm0, %v15639_v0  ;;  %14675 = vmatpush3.bf16.msra.mxu0 %v14975_v21 }
 0x4f7   :  { %14676 = vmatprep.subr.bf16.mxu0 %v15639_v0 }
 0x4f9   :  { %14671 = vmatmul.mubr.msk.bf16.vlgmr.msra.gmra.mrb[32].mxu1 %vm187_vm3, %v673_v2 }
 0x4fa   :  { %14677 = vmatpush3.bf16.msra.mxu0 %v14976_v34  ;;  %v1449_v34 = vld [vmem:[%s18884_s3 + $0x50] sm:$0xff] }
 0x536   :  { %v765_v3 = vpop.f32.mrb[20].mxu1 }
 0x537   :  { %v717_v4 = vpop.f32.mrb[20].mxu0  ;;  %v14636_v5 = vpop.f32.mrb[21].mxu1 }
 0x538   :  { %v14630_v6 = vpop.f32.mrb[21].mxu0  ;;  %v768_v7 = vpop.f32.mrb[22].mxu1 }
 0x539   :  { %v720_v8 = vpop.f32.mrb[22].mxu0  ;;  %v14637_v9 = vpop.f32.mrb[23].mxu1 }
 0x53a   :  { %v14631_v13 = vpop.f32.mrb[23].mxu0  ;;  %v12085_v8 = vld [vmem:[%s18882_s6 + $0x4] ss:$0 sm:$0xff] }
 0x53b   :  { %v1212_v9 = vld [vmem:[%s18884_s3] sm:$0xff] }
 0x53c   :  { %v1214_v13 = vld [vmem:[%s18884_s3 + $0x40] sm:$0xff] }
 0x58b   :  { %v813_v14 = vpop.f32.mrb[24].mxu0 }
 0x58c   :  { %v14642_v26 = vpop.f32.mrb[25].mxu0 }
 0x58d   :  { %v816_v24 = vpop.f32.mrb[26].mxu0  ;;  %v12087_v26 = vcombine.high %v1212_v9, %v1214_v13 }
 0x58e   :  { %v14643_v16 = vpop.f32.mrb[27].mxu0  ;;  %v1215_v24 = vld [vmem:[%s18884_s3 + $0x48] sm:$0xff] }
 0x58f   :  { %v861_v10 = vpop.f32.mrb[24].mxu1  ;;  %v12086_v16 = vcombine.low %v1212_v9, %v1214_v13  ;;  %1285 = vmatprep.subr.bf16.mxu1 %v12087_v26  ;;  %v14979_v13 = vld [vmem:[%s18885_s4 + $0x100] sm:$0xff]   ;;  %v14981_v26 = vld [vmem:[%s18885_s4 + $0x148] sm:$0xff]  }
 0x590   :  { %v14942_v17 = vpack.i.bf16 %v861_v10, %v813_v14  ;;  %v14648_v18 = vpop.f32.mrb[25].mxu1  ;;  %v1213_v14 = vld [vmem:[%s18884_s3 + $0x8] sm:$0xff] }
 0x591   :  { %v864_v19 = vpop.f32.mrb[26].mxu1  ;;  %v12088_v10 = vcombine.low %v1213_v14, %v1215_v24  ;;  %1286 = vmatpush1.bf16.msra.mxu1 %v12086_v16  ;;  %v1216_v18 = vld [vmem:[%s18884_s3 + $0x80] sm:$0xff]  ;;  %v14983_v16 = vld [vmem:[%s18885_s4 + $0x108] sm:$0xff]  }
 0x592   :  { %v14649_v20 = vpop.f32.mrb[27].mxu1  ;;  %14943 = vrot.lane.b32.xlu0 %v14942_v17, %s15646_s15  ;;  %v12089_v17 = vcombine.high %v1213_v14, %v1215_v24  ;;  %v1218_v19 = vld [vmem:[%s18884_s3 + $0xc0] sm:$0xff]  ;;  %v14982_v24 = vld [vmem:[%s18885_s4 + $0x1c8] sm:$0xff]  }
 0x593   :  { %v1217_v20 = vld [vmem:[%s18884_s3 + $0x88] sm:$0xff]  ;;  %v12091_v21 = vcombine.high %v1216_v18, %v1218_v19  ;;  %v14980_v14 = vld [vmem:[%s18885_s4 + $0x180] sm:$0xff]  }
 0x594   :  { %1328 = vmatprep.subr.bf16.mxu0 %v12089_v17  ;;  %v14985_v17 = vld [vmem:[%s18885_s4 + $0x150] sm:$0xff]  }
 0x595   :  { %1287 = vmatprep.subr.bf16.mxu1 %v12091_v21  ;;  %v14989_v21 = vld [vmem:[%s18885_s4 + $0x158] sm:$0xff]  }
 0x5c0   :  { %v909_v22 = vpop.f32.mrb[28].mxu0 }
 0x5c1   :  { %v14654_v30 = vpop.f32.mrb[29].mxu0 }
 0x5c2   :  { %v912_v31 = vpop.f32.mrb[30].mxu0  ;;  %v12090_v30 = vcombine.low %v1216_v18, %v1218_v19  ;;  %v14986_v18 = vld [vmem:[%s18885_s4 + $0x1d0] sm:$0xff]  }
 0x5c3   :  { %v14655_v32 = vpop.f32.mrb[31].mxu0  ;;  %v14987_v19 = vld [vmem:[%s18885_s4 + $0x110] sm:$0xff]  }
 0x5c4   :  { %v957_v33 = vpop.f32.mrb[28].mxu1  ;;  %1288 = vmatpush1.bf16.msra.mxu1 %v12090_v30  ;;  %v14991_v30 = vld [vmem:[%s18885_s4 + $0x118] sm:$0xff]  }
 0x5c5   :  { %v14947_v35 = vpack.i.bf16 %v957_v33, %v909_v22  ;;  %v14660_v36 = vpop.f32.mrb[29].mxu1  ;;  %v1219_v22 = vld [vmem:[%s18884_s3 + $0xc8] sm:$0xff]  ;;  %v1447_v33 = vld [vmem:[%s18884_s3 + $0x10] sm:$0xff] }
 0x5c6   :  { %v960_v37 = vpop.f32.mrb[30].mxu1  ;;  %v12092_v31 = vcombine.low %v1217_v20, %v1219_v22  ;;  %v12093_v32 = vcombine.high %v1217_v20, %v1219_v22  ;;  %v15650_v36 = vmov 0   ;;  %v14988_v20 = vld [vmem:[%s18885_s4 + $0x190] sm:$0xff]   ;;  %v14990_v22 = vld [vmem:[%s18885_s4 + $0x1d8] sm:$0xff]  }
 0x5c7   :  { %v14661_v38 = vpop.f32.mrb[31].mxu1  ;;  %14948 = vrot.lane.b32.xlu1 %v14947_v35, %s15647_s20  ;;  %v1448_v35 = vld [vmem:[%s18884_s3 + $0x18] sm:$0xff]  ;;  %1317 = vmatprep.mubr.bf16.mxu1 %v15650_v36  ;;  %v12097_v37 = vcombine.low %v1447_v33, %v1449_v34 }
 0x5c8   :  { %v1005_v39 = vpop.f32.mrb[32].mxu0  ;;  %v12098_v38 = vcombine.high %v1447_v33, %v1449_v34  ;;  %v14994_v33 = vld [vmem:[%s18885_s4 + $0x1e0] sm:$0xff]  }
 0x5c9   :  { %v14666_v40 = vpop.f32.mrb[33].mxu0  ;;  %v14995_v34 = vld [vmem:[%s18885_s4 + $0x120] sm:$0xff]  }
 0x5ca   :  { %v1008_v41 = vpop.f32.mrb[34].mxu0  ;;  %1518 = vmatprep.subr.bf16.mxu1 %v12098_v38  ;;  %v14998_v38 = vld [vmem:[%s18885_s4 + $0x1e8] sm:$0xff]  }
 0x5cb   :  { %v14667_v28 = vpop.f32.mrb[35].mxu0  ;;  %1113 = vrot.lane.b32.xlu1 %v15753_v15, %s15648_s21 }
 0x5cc   :  { %v1053_v42 = vpop.f32.mrb[32].mxu1 }
 0x5cd   :  { %v14952_v43 = vpack.i.bf16 %v1053_v42, %v1005_v39  ;;  %v14672_v44 = vpop.f32.mrb[33].mxu1  ;;  %v1450_v39 = vld [vmem:[%s18884_s3 + $0x58] sm:$0xff] }
 0x5ce   :  { %v1056_v45 = vpop.f32.mrb[34].mxu1  ;;  %v12099_v40 = vcombine.low %v1448_v35, %v1450_v39  ;;  %v12100_v41 = vcombine.high %v1448_v35, %v1450_v39  ;;  %v14996_v35 = vld [vmem:[%s18885_s4 + $0x1a0] sm:$0xff]   ;;  %v14999_v39 = vld [vmem:[%s18885_s4 + $0x128] sm:$0xff]  }
 0x5cf   :  { %v14673_v46 = vpop.f32.mrb[35].mxu1  ;;  %14953 = vrot.lane.b32.xlu0 %v14952_v43, %s15649_s22 }
 0x604   :  { %v14944_v47 = vpop.permute.xlu0 %14943 }
 0x605   :  { %v14946_v48 = vunpack.i.h.bf16 %v14944_v47  ;;  %v14945_v49 = vunpack.i.l.bf16 %v14944_v47 }
 0x607   :  { %v1084_v27 = vsel %vm187_vm3, %v765_v3, %v14946_v48  ;;  %v1083_v15 = vsel %vm187_vm3, %v717_v4, %v14945_v49 }
 0x639   :  { %v14949_v29 = vpop.permute.xlu1 %14948 }
 0x63a   :  { %v14951_v52 = vunpack.i.h.bf16 %v14949_v29  ;;  %v14950_v53 = vunpack.i.l.bf16 %v14949_v29 }
 0x63c   :  { %v1086_v23 = vsel %vm57_vm1, %v1084_v27, %v14951_v52  ;;  %v1085_v56 = vsel %vm57_vm1, %v1083_v15, %v14950_v53 }
 0x63d   :  { %v1114_v58 = vpop.permute.xlu1 %1113 }
 0x641   :  { %v14954_v25 = vpop.permute.xlu0 %14953 }
 0x642   :  { %v14956_v54 = vunpack.i.h.bf16 %v14954_v25  ;;  %v14955_v55 = vunpack.i.l.bf16 %v14954_v25 }
 0x644   :  { %v1089_v51 = vsel %vm1087_vm5, %v1086_v23, %v14956_v54  ;;  %v1088_v50 = vsel %vm1087_vm5, %v1085_v56, %v14955_v55 }
 0x645   :  { %v1090_v57 = vpack.c.bf16 %v1089_v51, %v1088_v50 }
 0x647   :  { %14679 = vmatmul.mubr.msk.bf16.vlgmr.msra.gmra.mrb[36].mxu0 %vm124_vm2, %v1090_v57 }
 0x648   :  { %1329 = vmatpush1.bf16.msra.mxu0 %v12088_v10  ;;  %1360 = vmatprep.mubr.bf16.mxu0 %v15650_v36  ;;  %v14984_v10 = vld [vmem:[%s18885_s4 + $0x188] sm:$0xff]  }
 0x649   :  { %1330 = vmatprep.subr.bf16.mxu0 %v12093_v32  ;;  %v14993_v32 = vld [vmem:[%s18885_s4 + $0x160] sm:$0xff]  }
 0x64c   :  { %1331 = vmatpush1.bf16.msra.mxu0 %v12092_v31  ;;  %v14992_v31 = vld [vmem:[%s18885_s4 + $0x198] sm:$0xff]  }
 0x64d   :  { %1561 = vmatprep.subr.bf16.mxu0 %v12100_v41  ;;  %v15001_v41 = vld [vmem:[%s18885_s4 + $0x170] sm:$0xff]  }
 0x71a   :  { %v1153_v59 = vpop.f32.mrb[36].mxu0 }
 0x71b   :  { %v1154_v60 = vadd.f32 %v1153_v59, %v1114_v58  ;;  %v14680_v62 = vpop.f32.mrb[37].mxu0 }
 0x71c   :  { %v1156_v61 = vpop.f32.mrb[38].mxu0  ;;  %v1451_v62 = vld [vmem:[%s18884_s3 + $0x90] sm:$0xff] }
 0x71d   :  { %v15962_v63 = vadd.f32 %v1154_v60, %v15741_v11  ;;  %v1157_v1 = vadd.f32 %v1156_v61, %v1114_v58  ;;  %v14681_v2 = vpop.f32.mrb[39].mxu0  ;;  %v1453_v61 = vld [vmem:[%s18884_s3 + $0xd0] sm:$0xff] }
 0x71f   :  { %v15965_v3 = vadd.f32 %v1157_v1, %v15743_v12  ;;  %v1163_v4 = vsel %vm124_vm2, %v15962_v63, 0.0  ;;  %v1172_v5 = vmul.f32 %v15962_v63, %v15962_v63  ;;  %v1454_v1 = vld [vmem:[%s18884_s3 + $0xd8] sm:$0xff] }
 0x720   :  { %1164 = vadd.xlane.f32.xlu0 %v1163_v4 }
 0x721   :  { %v1166_v6 = vsel %vm124_vm2, %v15965_v3, 0.0  ;;  %v1174_v7 = vsel %vm124_vm2, %v1172_v5, 0.0  ;;  %v1173_v11 = vmul.f32 %v15965_v3, %v15965_v3 }
 0x722   :  { %1167 = vadd.xlane.f32.xlu1 %v1166_v6  ;;  %v12102_v6 = vcombine.high %v1451_v62, %v1453_v61 }
 0x723   :  { %v1177_v12 = vsel %vm124_vm2, %v1173_v11, 0.0  ;;  %v14977_v11 = vld [vmem:[%s18885_s4 + $0x140] sm:$0xff]  }
 0x724   :  { %1175 = vadd.xlane.f32.xlu0 %v1174_v7 }
 0x728   :  { %1178 = vadd.xlane.f32.xlu0 %v1177_v12  ;;  %v14978_v12 = vld [vmem:[%s18885_s4 + $0x1c0] sm:$0xff]  }
 0x733   :  { %1201 = vrot.lane.b32.xlu1 %v12085_v8, %s15644_s13 }
 0x73e   :  { %1206 = vrot.lane.b32.xlu0 %v12085_v8, %s15645_s14  ;;  %v12101_v8 = vcombine.low %v1451_v62, %v1453_v61 }
 0x7ad   :  { %v1165_v28 = vpop.xlane.xlu0 %1164 }
 0x7ae   :  { %v1170_v42 = vmul.f32 0.03125, %v1165_v28  ;;  %v15002_v28 = vld [vmem:[%s18885_s4 + $0x1f0] sm:$0xff]  }
 0x7af   :  { %v1168_v43 = vpop.xlane.xlu1 %1167 }
 0x7b0   :  { %v1182_v45 = vmul.f32 %v1170_v42, %v1170_v42  ;;  %v1171_v46 = vmul.f32 0.03125, %v1168_v43  ;;  %v1188_v55 = vsub.f32 %v15962_v63, %v1170_v42  ;;  %v1452_v63 = vld [vmem:[%s18884_s3 + $0x98] sm:$0xff]  ;;  %v15003_v42 = vld [vmem:[%s18885_s4 + $0x130] sm:$0xff]  }
 0x7b1   :  { %v1176_v44 = vpop.xlane.xlu0 %1175  ;;  %v12104_v7 = vcombine.high %v1452_v63, %v1454_v1  ;;  %v12103_v9 = vcombine.low %v1452_v63, %v1454_v1  ;;  %v15004_v43 = vld [vmem:[%s18885_s4 + $0x1b0] sm:$0xff]  }
 0x7b2   :  { %v1180_v47 = vmul.f32 0.03125, %v1176_v44  ;;  %v1183_v49 = vmul.f32 %v1171_v46, %v1171_v46  ;;  %v1189_v50 = vsub.f32 %v15965_v3, %v1171_v46  ;;  %v15005_v44 = vld [vmem:[%s18885_s4 + $0x178] sm:$0xff]  }
 0x7b3   :  { %v1202_v51 = vpop.permute.xlu1 %1201  ;;  %v15007_v46 = vld [vmem:[%s18885_s4 + $0x138] sm:$0xff]  }
 0x7b4   :  { %v1184_v29 = vsub.f32 %v1180_v47, %v1182_v45  ;;  %v15006_v45 = vld [vmem:[%s18885_s4 + $0x1f8] sm:$0xff]  }
 0x7b5   :  { %v1179_v48 = vpop.xlane.xlu0 %1178  ;;  %v15008_v47 = vld [vmem:[%s18885_s4 + $0x1b8] sm:$0xff]  }
 0x7b6   :  { %v1186_v52 = vmax.f32 %v1184_v29, 0.0  ;;  %v1181_v53 = vmul.f32 0.03125, %v1179_v48  ;;  %v15009_v29 = vld [vmem:[%s18885_s4 + $0x40] sm:$0xff]  }
 0x7b7   :  { %v15010_v48 = vld [vmem:[%s18885_s4 + $0xc0] sm:$0xff]  }
 0x7b8   :  { %v1190_v25 = vadd.f32 1e-05, %v1186_v52  ;;  %v1185_v27 = vsub.f32 %v1181_v53, %v1183_v49  ;;  %v1222_v49 = vlaneseq }
 0x7b9   :  { %v1207_v60 = vpop.permute.xlu0 %1206 }
 0x7ba   :  { %15541 = vrsqrt.f32 %v1190_v25  ;;  %v1187_v15 = vmax.f32 %v1185_v27, 0.0  ;;  %v1223_v52 = vshrl.u32 %v1222_v49, 7 }
 0x7bc   :  { %v1191_v54 = vadd.f32 1e-05, %v1187_v15  ;;  %v16154_v53 = vsub.s32 0, %v1223_v52  ;;  %v16156_v25 = vsub.s32 2, %v1223_v52  ;;  %v16158_v27 = vsub.s32 1, %v1223_v52 }
 0x7bd   :  { %v16160_v15 = vsub.s32 3, %v1223_v52 }
 0x7be   :  { %15543 = vrsqrt.f32 %v1191_v54  ;;  %v1220_v54 = vld [vmem:[%s18886_s5] ss:$4 sm:$0xf] }
 0x7c4   :  { %v15542_v23 = vpop.eup %15541 }
 0x7c5   :  { %v1194_v56 = vmul.f32 %v15542_v23, %v1188_v55  ;;  %v1225_v55 = vrot.slane %v1220_v54, %v16154_v53  ;;  %v1233_v23 = vrot.slane %v1220_v54, %v16156_v25 }
 0x7c7   :  { %v1204_v59 = vmul.f32 %v1202_v51, %v1194_v56  ;;  %v1229_v56 = vrot.slane %v1220_v54, %v16158_v27 }
 0x7c8   :  { %v15544_v57 = vpop.eup %15543 }
 0x7c9   :  { %v1195_v58 = vmul.f32 %v15544_v57, %v1189_v50  ;;  %v16034_v3 = vadd.f32 %v1207_v60, %v1204_v59 }
 0x7cb   :  { %v1205_v2 = vmul.f32 %v1202_v51, %v1195_v58  ;;  %v1237_v51 = vrot.slane %v1220_v54, %v16160_v15  ;;  %v12096_v58 = vld [vmem:[%s18886_s5 + $0x10] ss:$4 sm:$0xf] }
 0x7cd   :  { %v16036_v4 = vadd.f32 %v1207_v60, %v1205_v2 }
 0x7cf   :  { %v16040_v5 = vpack.c.bf16 %v16036_v4, %v16034_v3 }
 0x7d1   :  { %12094 = vmatmul.mubr.msk.bf16.vlgmr.msra.gmra.mrb[36].mxu1 %vm124_vm2, %v16040_v5  ;;  %12095 = vmatmul.mubr.msk.bf16.vlgmr.msra.gmra.mrb[40].mxu0 %vm124_vm2, %v16040_v5 }
 0x7d2   :  { %1519 = vmatpush1.bf16.msra.mxu1 %v12097_v37  ;;  %1562 = vmatpush1.bf16.msra.mxu0 %v12099_v40  ;;  %v14997_v37 = vld [vmem:[%s18885_s4 + $0x168] sm:$0xff]  }
 0x7d3   :  { %1520 = vmatprep.subr.bf16.mxu1 %v12102_v6  ;;  %1563 = vmatprep.subr.bf16.mxu0 %v12104_v7  ;;  %v15000_v40 = vld [vmem:[%s18885_s4 + $0x1a8] sm:$0xff]  }
 0x7d4   :  { %1550 = vmatprep.mubr.bf16.mxu1 %v15650_v36  ;;  %1593 = vmatprep.mubr.bf16.mxu0 %v15650_v36 }
 0x7d6   :  { %1521 = vmatpush1.bf16.msra.mxu1 %v12101_v8  ;;  %1564 = vmatpush1.bf16.msra.mxu0 %v12103_v9 }
 0x7d7   :  { %13775 = vmatprep.subr.bf16.mxu1 %v14977_v11  ;;  %13797 = vmatprep.subr.bf16.mxu0 %v14978_v12 }
 0x7d9   :  { %12105 = vmatmul.mubr.msk.bf16.vlgmr.msra.gmra.mrb[40].mxu1 %vm124_vm2, %v16040_v5  ;;  %12106 = vmatmul.mubr.msk.bf16.vlgmr.msra.gmra.mrb[44].mxu0 %vm124_vm2, %v16040_v5 }
 0x7da   :  { %13776 = vmatpush3.bf16.msra.mxu1 %v14979_v13  ;;  %13798 = vmatpush3.bf16.msra.mxu0 %v14980_v14 }
 0x7db   :  { %13777 = vmatprep.subr.bf16.mxu1 %v14981_v26  ;;  %13799 = vmatprep.subr.bf16.mxu0 %v14982_v24 }
 0x7de   :  { %13778 = vmatpush3.bf16.msra.mxu1 %v14983_v16  ;;  %13800 = vmatpush3.bf16.msra.mxu0 %v14984_v10 }
 0x7df   :  { %13779 = vmatprep.subr.bf16.mxu1 %v14985_v17  ;;  %13801 = vmatprep.subr.bf16.mxu0 %v14986_v18  ;;  %v1461_v18 = vrot.slane %v12096_v58, %v16154_v53 }
 0x7e2   :  { %13780 = vmatpush3.bf16.msra.mxu1 %v14987_v19  ;;  %13802 = vmatpush3.bf16.msra.mxu0 %v14988_v20  ;;  %v1469_v19 = vrot.slane %v12096_v58, %v16156_v25 }
 0x7e3   :  { %13781 = vmatprep.subr.bf16.mxu1 %v14989_v21  ;;  %13803 = vmatprep.subr.bf16.mxu0 %v14990_v22  ;;  %v1465_v22 = vrot.slane %v12096_v58, %v16158_v27 }
 0x7e6   :  { %13782 = vmatpush3.bf16.msra.mxu1 %v14991_v30  ;;  %13804 = vmatpush3.bf16.msra.mxu0 %v14992_v31  ;;  %v1473_v30 = vrot.slane %v12096_v58, %v16160_v15  ;;  %v15011_v58 = vld [vmem:[%s18885_s4] sm:$0xff]  }
 0x7e7   :  { %13783 = vmatprep.subr.bf16.mxu1 %v14993_v32  ;;  %13805 = vmatprep.subr.bf16.mxu0 %v14994_v33 }
 0x7ea   :  { %13784 = vmatpush3.bf16.msra.mxu1 %v14995_v34  ;;  %13806 = vmatpush3.bf16.msra.mxu0 %v14996_v35 }
 0x7eb   :  { %13785 = vmatprep.subr.bf16.mxu1 %v14997_v37  ;;  %13807 = vmatprep.subr.bf16.mxu0 %v14998_v38 }
 0x7ee   :  { %13786 = vmatpush3.bf16.msra.mxu1 %v14999_v39  ;;  %13808 = vmatpush3.bf16.msra.mxu0 %v15000_v40 }
 0x7ef   :  { %13787 = vmatprep.subr.bf16.mxu1 %v15001_v41  ;;  %13809 = vmatprep.subr.bf16.mxu0 %v15002_v28 }
 0x7f2   :  { %13788 = vmatpush3.bf16.msra.mxu1 %v15003_v42  ;;  %13810 = vmatpush3.bf16.msra.mxu0 %v15004_v43 }
 0x7f3   :  { %13789 = vmatprep.subr.bf16.mxu1 %v15005_v44  ;;  %13811 = vmatprep.subr.bf16.mxu0 %v15006_v45 }
 0x7f6   :  { %13790 = vmatpush3.bf16.msra.mxu1 %v15007_v46  ;;  %13812 = vmatpush3.bf16.msra.mxu0 %v15008_v47 }
 0x7f7   :  { %13819 = vmatprep.subr.bf16.mxu1 %v15009_v29  ;;  %13841 = vmatprep.subr.bf16.mxu0 %v15010_v48 }
 0x8a4   :  { %v1319_v50 = vpop.f32.mrb[36].mxu1  ;;  %v1362_v57 = vpop.f32.mrb[40].mxu0 }
 0x8a5   :  { %v1320_v59 = vadd.f32 %v1319_v50, %v1225_v55  ;;  %v1363_v60 = vadd.f32 %v1362_v57, %v1233_v23  ;;  %v1321_v62 = vpop.f32.mrb[37].mxu1  ;;  %v1364_v61 = vpop.f32.mrb[41].mxu0 }
 0x8a6   :  { %v1322_v63 = vadd.f32 %v1321_v62, %v1229_v56  ;;  %v1365_v1 = vadd.f32 %v1364_v61, %v1237_v51  ;;  %v1323_v2 = vpop.f32.mrb[38].mxu1  ;;  %v1366_v6 = vpop.f32.mrb[42].mxu0 }
 0x8a7   :  { %v1371_v7 = vmax.f32 %v1320_v59, 0.0  ;;  %v1373_v11 = vmax.f32 %v1363_v60, 0.0  ;;  %v1324_v12 = vadd.f32 %v1323_v2, %v1225_v55  ;;  %v1367_v8 = vadd.f32 %v1366_v6, %v1233_v23  ;;  %v1325_v9 = vpop.f32.mrb[39].mxu1  ;;  %v1368_v13 = vpop.f32.mrb[43].mxu0  ;;  %v15012_v59 = vld [vmem:[%s18885_s4 + $0x80] sm:$0xff]   ;;  %v15014_v2 = vld [vmem:[%s18885_s4 + $0xc8] sm:$0xff]  }
 0x8a8   :  { %v1372_v14 = vmax.f32 %v1322_v63, 0.0  ;;  %v1374_v26 = vmax.f32 %v1365_v1, 0.0  ;;  %v1326_v24 = vadd.f32 %v1325_v9, %v1229_v56  ;;  %v1369_v16 = vadd.f32 %v1368_v13, %v1237_v51  ;;  %v15013_v1 = vld [vmem:[%s18885_s4 + $0x48] sm:$0xff]   ;;  %v15020_v9 = vld [vmem:[%s18885_s4 + $0x90] sm:$0xff]   ;;  %v15021_v13 = vld [vmem:[%s18885_s4 + $0x58] sm:$0xff]  }
 0x8a9   :  { %v1375_v10 = vmax.f32 %v1324_v12, 0.0  ;;  %v1377_v17 = vmax.f32 %v1367_v8, 0.0  ;;  %v15015_v6 = vld [vmem:[%s18885_s4 + $0x8] sm:$0xff]   ;;  %v15018_v12 = vld [vmem:[%s18885_s4 + $0xd0] sm:$0xff]  }
 0x8aa   :  { %v1376_v20 = vmax.f32 %v1326_v24, 0.0  ;;  %v1378_v21 = vmax.f32 %v1369_v16, 0.0  ;;  %v15019_v8 = vld [vmem:[%s18885_s4 + $0x10] sm:$0xff]   ;;  %v15024_v24 = vld [vmem:[%s18885_s4 + $0x98] sm:$0xff]   ;;  %v15025_v16 = vld [vmem:[%s18885_s4 + $0x60] sm:$0xff]  }
 0x8ab   :  { %v16176_v31 = vpack.c.bf16 %v1375_v10, %v1371_v7  ;;  %v16178_v32 = vpack.c.bf16 %v1377_v17, %v1373_v11  ;;  %v15016_v7 = vld [vmem:[%s18885_s4 + $0x88] sm:$0xff]   ;;  %v15017_v11 = vld [vmem:[%s18885_s4 + $0x50] sm:$0xff]   ;;  %v15026_v10 = vld [vmem:[%s18885_s4 + $0xe0] sm:$0xff]  }
 0x8ac   :  { %v1380_v33 = vpack.c.bf16 %v1376_v20, %v1372_v14  ;;  %v1382_v34 = vpack.c.bf16 %v1378_v21, %v1374_v26  ;;  %v1552_v35 = vpop.f32.mrb[40].mxu1  ;;  %v1595_v37 = vpop.f32.mrb[44].mxu0  ;;  %v15022_v14 = vld [vmem:[%s18885_s4 + $0xd8] sm:$0xff]   ;;  %v15027_v17 = vld [vmem:[%s18885_s4 + $0x20] sm:$0xff]   ;;  %v15030_v20 = vld [vmem:[%s18885_s4 + $0xe8] sm:$0xff]  }
 0x8ad   :  { %v1553_v38 = vadd.f32 %v1552_v35, %v1461_v18  ;;  %v1596_v39 = vadd.f32 %v1595_v37, %v1469_v19  ;;  %v1554_v40 = vpop.f32.mrb[41].mxu1  ;;  %v1597_v41 = vpop.f32.mrb[45].mxu0  ;;  %v15023_v26 = vld [vmem:[%s18885_s4 + $0x18] sm:$0xff]   ;;  %v15031_v21 = vld [vmem:[%s18885_s4 + $0x28] sm:$0xff]   ;;  %v15036_v35 = vld [vmem:[%s18885_s4 + $0xb0] sm:$0xff]  }
 0x8ae   :  { %v1555_v28 = vadd.f32 %v1554_v40, %v1465_v22  ;;  %v1598_v42 = vadd.f32 %v1597_v41, %v1473_v30  ;;  %v1556_v43 = vpop.f32.mrb[42].mxu1  ;;  %v1599_v44 = vpop.f32.mrb[46].mxu0  ;;  %v15037_v37 = vld [vmem:[%s18885_s4 + $0x78] sm:$0xff]   ;;  %v2230_v40 = vld [vmem:[%s18884_s3 + $0x60] sm:$0xff]  ;;  %v2229_v41 = vld [vmem:[%s18884_s3 + $0x28] sm:$0xff] }
 0x8af   :  { %v1604_v45 = vmax.f32 %v1553_v38, 0.0  ;;  %v1606_v46 = vmax.f32 %v1596_v39, 0.0  ;;  %v1557_v47 = vadd.f32 %v1556_v43, %v1461_v18  ;;  %v1600_v29 = vadd.f32 %v1599_v44, %v1469_v19  ;;  %v1558_v48 = vpop.f32.mrb[43].mxu1  ;;  %v1601_v49 = vpop.f32.mrb[47].mxu0  ;;  %v15028_v18 = vld [vmem:[%s18885_s4 + $0xa0] sm:$0xff]   ;;  %v15029_v19 = vld [vmem:[%s18885_s4 + $0x68] sm:$0xff]  }
 0x8b0   :  { %v1605_v52 = vmax.f32 %v1555_v28, 0.0  ;;  %v1607_v54 = vmax.f32 %v1598_v42, 0.0  ;;  %v1559_v55 = vadd.f32 %v1558_v48, %v1465_v22  ;;  %v1602_v23 = vadd.f32 %v1601_v49, %v1473_v30  ;;  %v15032_v22 = vld [vmem:[%s18885_s4 + $0xa8] sm:$0xff]   ;;  %v15033_v30 = vld [vmem:[%s18885_s4 + $0x70] sm:$0xff]   ;;  %v15038_v38 = vld [vmem:[%s18885_s4 + $0xf8] sm:$0xff]  }
 0x8b1   :  { %v1608_v56 = vmax.f32 %v1557_v47, 0.0  ;;  %v1610_v51 = vmax.f32 %v1600_v29, 0.0  ;;  %v2228_v39 = vld [vmem:[%s18884_s3 + $0x20] sm:$0xff]  ;;  %v2231_v28 = vld [vmem:[%s18884_s3 + $0x68] sm:$0xff]  ;;  %v15039_v42 = vld [vmem:[%s18885_s4 + $0x38] sm:$0xff]  }
 0x8b2   :  { %v1609_v50 = vmax.f32 %v1559_v55, 0.0  ;;  %v1611_v57 = vmax.f32 %v1602_v23, 0.0  ;;  %v15040_v43 = vld [vmem:[%s18885_s4 + $0xb8] sm:$0xff]   ;;  %v12173_v44 = vcombine.high %v2228_v39, %v2230_v40  ;;  %v2234_v47 = vld [vmem:[%s18884_s3 + $0xe0] sm:$0xff]  ;;  %v2233_v29 = vld [vmem:[%s18884_s3 + $0xa8] sm:$0xff]  ;;  %v12172_v49 = vcombine.low %v2228_v39, %v2230_v40 }
 0x8b3   :  { %v1612_v60 = vpack.c.bf16 %v1608_v56, %v1604_v45  ;;  %v1614_v62 = vpack.c.bf16 %v1610_v51, %v1606_v46  ;;  %v12175_v45 = vcombine.high %v2229_v41, %v2231_v28  ;;  %v2232_v46 = vld [vmem:[%s18884_s3 + $0xa0] sm:$0xff]  ;;  %v2235_v48 = vld [vmem:[%s18884_s3 + $0xe8] sm:$0xff] }
 0x8b4   :  { %v1613_v61 = vpack.c.bf16 %v1609_v50, %v1605_v52  ;;  %v1615_v63 = vpack.c.bf16 %v1611_v57, %v1607_v54  ;;  %v12174_v52 = vcombine.low %v2229_v41, %v2231_v28  ;;  %v12177_v54 = vcombine.high %v2232_v46, %v2234_v47  ;;  %v15043_v51 = vld [vmem:[%s18885_s4 + $0x200] sm:$0xff]   ;;  %v15045_v57 = vld [vmem:[%s18885_s4 + $0x248] sm:$0xff]  }
 0x8b5   :  { %v12179_v55 = vcombine.high %v2233_v29, %v2235_v48  ;;  %v12176_v23 = vcombine.low %v2232_v46, %v2234_v47  ;;  %v12178_v56 = vcombine.low %v2233_v29, %v2235_v48  ;;  %v15044_v50 = vld [vmem:[%s18885_s4 + $0x280] sm:$0xff]  }
 0x8b6   :  { %1904 = vmatprep.mubr.bf16.mxu1 %v1613_v61  ;;  %1945 = vmatprep.mubr.bf16.mxu0 %v1615_v63  ;;  %v15050_v61 = vld [vmem:[%s18885_s4 + $0x2d0] sm:$0xff]  }
 0x8b7   :  { %1905 = vmatmul.mubr.bf16.vlgmr.msra.gmra.mrb[44].mxu1 %v1612_v60  ;;  %1946 = vmatmul.mubr.bf16.vlgmr.msra.gmra.mrb[48].mxu0 %v1614_v62  ;;  %v15048_v60 = vld [vmem:[%s18885_s4 + $0x288] sm:$0xff]   ;;  %v15049_v62 = vld [vmem:[%s18885_s4 + $0x250] sm:$0xff]  }
 0x8b8   :  { %13820 = vmatpush3.bf16.msra.mxu1 %v15011_v58  ;;  %13842 = vmatpush3.bf16.msra.mxu0 %v15012_v59  ;;  %v15046_v58 = vld [vmem:[%s18885_s4 + $0x2c8] sm:$0xff]   ;;  %v15051_v63 = vld [vmem:[%s18885_s4 + $0x210] sm:$0xff]  }
 0x8b9   :  { %2178 = vmatprep.mubr.bf16.mxu1 %v1380_v33  ;;  %2219 = vmatprep.mubr.bf16.mxu0 %v1382_v34  ;;  %v15034_v33 = vld [vmem:[%s18885_s4 + $0xf0] sm:$0xff]   ;;  %v15047_v59 = vld [vmem:[%s18885_s4 + $0x208] sm:$0xff]  }
 0x8ba   :  { %13821 = vmatprep.subr.bf16.mxu1 %v15013_v1  ;;  %13843 = vmatprep.subr.bf16.mxu0 %v15014_v2  ;;  %v15035_v34 = vld [vmem:[%s18885_s4 + $0x30] sm:$0xff]   ;;  %v15053_v2 = vld [vmem:[%s18885_s4 + $0x258] sm:$0xff]  }
 0x8bb   :  { %v15052_v1 = vld [vmem:[%s18885_s4 + $0x290] sm:$0xff]  }
 0x8bc   :  { %13822 = vmatpush3.bf16.msra.mxu1 %v15015_v6  ;;  %13844 = vmatpush3.bf16.msra.mxu0 %v15016_v7  ;;  %v15054_v6 = vld [vmem:[%s18885_s4 + $0x2d8] sm:$0xff]  }
 0x8bd   :  { %13823 = vmatprep.subr.bf16.mxu1 %v15017_v11  ;;  %13845 = vmatprep.subr.bf16.mxu0 %v15018_v12  ;;  %v15055_v7 = vld [vmem:[%s18885_s4 + $0x218] sm:$0xff]   ;;  %v15057_v12 = vld [vmem:[%s18885_s4 + $0x260] sm:$0xff]  }
 0x8be   :  { %v15056_v11 = vld [vmem:[%s18885_s4 + $0x298] sm:$0xff]  }
 0x8c0   :  { %13824 = vmatpush3.bf16.msra.mxu1 %v15019_v8  ;;  %13846 = vmatpush3.bf16.msra.mxu0 %v15020_v9  ;;  %v15058_v8 = vld [vmem:[%s18885_s4 + $0x2e0] sm:$0xff]  }
 0x8c1   :  { %13825 = vmatprep.subr.bf16.mxu1 %v15021_v13  ;;  %13847 = vmatprep.subr.bf16.mxu0 %v15022_v14  ;;  %v15059_v9 = vld [vmem:[%s18885_s4 + $0x220] sm:$0xff]   ;;  %v15061_v14 = vld [vmem:[%s18885_s4 + $0x268] sm:$0xff]  }
 0x8c2   :  { %v15060_v13 = vld [vmem:[%s18885_s4 + $0x2a0] sm:$0xff]  }
 0x8c4   :  { %13826 = vmatpush3.bf16.msra.mxu1 %v15023_v26  ;;  %13848 = vmatpush3.bf16.msra.mxu0 %v15024_v24  ;;  %v15062_v26 = vld [vmem:[%s18885_s4 + $0x2e8] sm:$0xff]  }
 0x8c5   :  { %13827 = vmatprep.subr.bf16.mxu1 %v15025_v16  ;;  %13849 = vmatprep.subr.bf16.mxu0 %v15026_v10  ;;  %v15063_v24 = vld [vmem:[%s18885_s4 + $0x228] sm:$0xff]   ;;  %v15065_v10 = vld [vmem:[%s18885_s4 + $0x270] sm:$0xff]  }
 0x8c6   :  { %v15064_v16 = vld [vmem:[%s18885_s4 + $0x2a8] sm:$0xff]  }
 0x8c8   :  { %13828 = vmatpush3.bf16.msra.mxu1 %v15027_v17  ;;  %13850 = vmatpush3.bf16.msra.mxu0 %v15028_v18  ;;  %v15066_v17 = vld [vmem:[%s18885_s4 + $0x2f0] sm:$0xff]  }
 0x8c9   :  { %13829 = vmatprep.subr.bf16.mxu1 %v15029_v19  ;;  %13851 = vmatprep.subr.bf16.mxu0 %v15030_v20  ;;  %v15067_v18 = vld [vmem:[%s18885_s4 + $0x230] sm:$0xff]   ;;  %v15069_v20 = vld [vmem:[%s18885_s4 + $0x278] sm:$0xff]  }
 0x8ca   :  { %v15068_v19 = vld [vmem:[%s18885_s4 + $0x2b0] sm:$0xff]  }
 0x8cc   :  { %13830 = vmatpush3.bf16.msra.mxu1 %v15031_v21  ;;  %13852 = vmatpush3.bf16.msra.mxu0 %v15032_v22  ;;  %v15070_v21 = vld [vmem:[%s18885_s4 + $0x2f8] sm:$0xff]  }
 0x8cd   :  { %13831 = vmatprep.subr.bf16.mxu1 %v15033_v30  ;;  %13853 = vmatprep.subr.bf16.mxu0 %v15034_v33  ;;  %v15071_v22 = vld [vmem:[%s18885_s4 + $0x238] sm:$0xff]   ;;  %v16401_v33 = vld [vmem:[%s18884_s3 + $0x30] sm:$0xff] }
 0x8ce   :  { %v15072_v30 = vld [vmem:[%s18885_s4 + $0x2b8] sm:$0xff]  }
 0x8d0   :  { %13832 = vmatpush3.bf16.msra.mxu1 %v15035_v34  ;;  %13854 = vmatpush3.bf16.msra.mxu0 %v15036_v35  ;;  %v16406_v34 = vld [vmem:[%s18884_s3 + $0x70] sm:$0xff]  ;;  %v16411_v35 = vld [vmem:[%s18884_s3 + $0x38] sm:$0xff] }
 0x8d1   :  { %13833 = vmatprep.subr.bf16.mxu1 %v15037_v37  ;;  %13855 = vmatprep.subr.bf16.mxu0 %v15038_v38  ;;  %v12216_v37 = vcombine.high %v16401_v33, %v16406_v34  ;;  %v16418_v38 = vld [vmem:[%s18884_s3 + $0x78] sm:$0xff]  ;;  %v12215_v39 = vcombine.low %v16401_v33, %v16406_v34  ;;  %v15075_v33 = vld [vmem:[%s18885_s4 + $0x300] sm:$0xff]  }
 0x8d2   :  { %v12217_v40 = vcombine.low %v16411_v35, %v16418_v38  ;;  %v12218_v41 = vcombine.high %v16411_v35, %v16418_v38  ;;  %v15076_v34 = vld [vmem:[%s18885_s4 + $0x380] sm:$0xff]   ;;  %v15077_v35 = vld [vmem:[%s18885_s4 + $0x348] sm:$0xff]  }
 0x8d3   :  { %v15078_v38 = vld [vmem:[%s18885_s4 + $0x3c8] sm:$0xff]  }
 0x8d4   :  { %13834 = vmatpush3.bf16.msra.mxu1 %v15039_v42  ;;  %13856 = vmatpush3.bf16.msra.mxu0 %v15040_v43 }
 0x8d5   :  { %2299 = vmatprep.subr.bf16.mxu1 %v12173_v44  ;;  %2342 = vmatprep.subr.bf16.mxu0 %v12175_v45 }
 0x8d7   :  { %2179 = vmatmul.mubr.bf16.vlgmr.msra.gmra.mrb[48].mxu1 %v16176_v31  ;;  %2220 = vmatmul.mubr.bf16.vlgmr.msra.gmra.mrb[52].mxu0 %v16178_v32  ;;  %v15041_v31 = vld [vmem:[%s18885_s4 + $0x240] sm:$0xff]  }
 0x8d8   :  { %2300 = vmatpush1.bf16.msra.mxu1 %v12172_v49  ;;  %2343 = vmatpush1.bf16.msra.mxu0 %v12174_v52  ;;  %v15042_v32 = vld [vmem:[%s18885_s4 + $0x2c0] sm:$0xff]  }
 0x8d9   :  { %2301 = vmatprep.subr.bf16.mxu1 %v12177_v54  ;;  %2344 = vmatprep.subr.bf16.mxu0 %v12179_v55 }
 0x8da   :  { %2331 = vmatprep.mubr.bf16.mxu1 %v15650_v36  ;;  %2374 = vmatprep.mubr.bf16.mxu0 %v15650_v36 }
 0x8dc   :  { %2302 = vmatpush1.bf16.msra.mxu1 %v12176_v23  ;;  %2345 = vmatpush1.bf16.msra.mxu0 %v12178_v56 }
 0x8dd   :  { %13863 = vmatprep.subr.bf16.mxu1 %v15041_v31  ;;  %13885 = vmatprep.subr.bf16.mxu0 %v15042_v32 }
 0x8df   :  { %12180 = vmatmul.mubr.msk.bf16.vlgmr.msra.gmra.mrb[52].mxu1 %vm124_vm2, %v16040_v5  ;;  %12181 = vmatmul.mubr.msk.bf16.vlgmr.msra.gmra.mrb[56].mxu0 %vm124_vm2, %v16040_v5 }
 0x8e0   :  { %13864 = vmatpush3.bf16.msra.mxu1 %v15043_v51  ;;  %13886 = vmatpush3.bf16.msra.mxu0 %v15044_v50 }
 0x8e1   :  { %13865 = vmatprep.subr.bf16.mxu1 %v15045_v57  ;;  %13887 = vmatprep.subr.bf16.mxu0 %v15046_v58 }
 0x8e4   :  { %13866 = vmatpush3.bf16.msra.mxu1 %v15047_v59  ;;  %13888 = vmatpush3.bf16.msra.mxu0 %v15048_v60  ;;  %v12171_v60 = vld [vmem:[%s18886_s5 + $0x20] ss:$4 sm:$0xf] }
 0x8e5   :  { %13867 = vmatprep.subr.bf16.mxu1 %v15049_v62  ;;  %13889 = vmatprep.subr.bf16.mxu0 %v15050_v61 }
 0x8e8   :  { %13868 = vmatpush3.bf16.msra.mxu1 %v15051_v63  ;;  %13890 = vmatpush3.bf16.msra.mxu0 %v15052_v1 }
 0x8e9   :  { %13869 = vmatprep.subr.bf16.mxu1 %v15053_v2  ;;  %13891 = vmatprep.subr.bf16.mxu0 %v15054_v6  ;;  %v2242_v6 = vrot.slane %v12171_v60, %v16154_v53 }
 0x8ec   :  { %13870 = vmatpush3.bf16.msra.mxu1 %v15055_v7  ;;  %13892 = vmatpush3.bf16.msra.mxu0 %v15056_v11  ;;  %v2250_v7 = vrot.slane %v12171_v60, %v16156_v25 }
 0x8ed   :  { %13871 = vmatprep.subr.bf16.mxu1 %v15057_v12  ;;  %13893 = vmatprep.subr.bf16.mxu0 %v15058_v8  ;;  %v2246_v8 = vrot.slane %v12171_v60, %v16158_v27 }
 0x8f0   :  { %13872 = vmatpush3.bf16.msra.mxu1 %v15059_v9  ;;  %13894 = vmatpush3.bf16.msra.mxu0 %v15060_v13  ;;  %v2254_v9 = vrot.slane %v12171_v60, %v16160_v15  ;;  %v15073_v60 = vld [vmem:[%s18885_s4 + $0x340] sm:$0xff]  }
 0x8f1   :  { %13873 = vmatprep.subr.bf16.mxu1 %v15061_v14  ;;  %13895 = vmatprep.subr.bf16.mxu0 %v15062_v26 }
 0x8f4   :  { %13874 = vmatpush3.bf16.msra.mxu1 %v15063_v24  ;;  %13896 = vmatpush3.bf16.msra.mxu0 %v15064_v16 }
 0x8f5   :  { %13875 = vmatprep.subr.bf16.mxu1 %v15065_v10  ;;  %13897 = vmatprep.subr.bf16.mxu0 %v15066_v17 }
 0x8f8   :  { %13876 = vmatpush3.bf16.msra.mxu1 %v15067_v18  ;;  %13898 = vmatpush3.bf16.msra.mxu0 %v15068_v19 }
 0x8f9   :  { %13877 = vmatprep.subr.bf16.mxu1 %v15069_v20  ;;  %13899 = vmatprep.subr.bf16.mxu0 %v15070_v21 }
 0x8fc   :  { %13878 = vmatpush3.bf16.msra.mxu1 %v15071_v22  ;;  %13900 = vmatpush3.bf16.msra.mxu0 %v15072_v30 }
 0x8fd   :  { %2808 = vmatprep.subr.bf16.mxu1 %v12216_v37  ;;  %2851 = vmatprep.subr.bf16.mxu0 %v12218_v41 }
 0x98a   :  { %v13791_v28 = vpop.f32.mrb[44].mxu1  ;;  %v13813_v42 = vpop.f32.mrb[48].mxu0 }
 0x98b   :  { %v13792_v43 = vpop.f32.mrb[45].mxu1  ;;  %v13814_v44 = vpop.f32.mrb[49].mxu0 }
 0x98c   :  { %v13793_v45 = vadd.f32 %v13792_v43, %v13791_v28  ;;  %v13815_v46 = vadd.f32 %v13814_v44, %v13813_v42  ;;  %v13794_v47 = vpop.f32.mrb[46].mxu1  ;;  %v13816_v29 = vpop.f32.mrb[50].mxu0 }
 0x98d   :  { %v13795_v48 = vpop.f32.mrb[47].mxu1  ;;  %v13817_v49 = vpop.f32.mrb[51].mxu0 }
 0x98e   :  { %v1948_v52 = vadd.f32 %v13815_v46, %v13793_v45  ;;  %v13796_v54 = vadd.f32 %v13795_v48, %v13794_v47  ;;  %v13818_v55 = vadd.f32 %v13817_v49, %v13816_v29  ;;  %v2741_v47 = vld [vmem:[%s18884_s3 + $0xb0] sm:$0xff] }
 0x98f   :  { %v2743_v29 = vld [vmem:[%s18884_s3 + $0xf0] sm:$0xff] }
 0x990   :  { %v1951_v23 = vadd.f32 %v13818_v55, %v13796_v54  ;;  %v2742_v55 = vld [vmem:[%s18884_s3 + $0xb8] sm:$0xff] }
 0x9aa   :  { %v13835_v56 = vpop.f32.mrb[48].mxu1  ;;  %v13857_v31 = vpop.f32.mrb[52].mxu0 }
 0x9ab   :  { %v13836_v32 = vpop.f32.mrb[49].mxu1  ;;  %v13858_v51 = vpop.f32.mrb[53].mxu0 }
 0x9ac   :  { %v13837_v50 = vadd.f32 %v13836_v32, %v13835_v56  ;;  %v13859_v57 = vadd.f32 %v13858_v51, %v13857_v31  ;;  %v13838_v58 = vpop.f32.mrb[50].mxu1  ;;  %v13860_v59 = vpop.f32.mrb[54].mxu0 }
 0x9ad   :  { %v13839_v62 = vpop.f32.mrb[51].mxu1  ;;  %v13861_v61 = vpop.f32.mrb[55].mxu0 }
 0x9ae   :  { %v2181_v63 = vadd.f32 %v13837_v50, %v1948_v52  ;;  %v13840_v1 = vadd.f32 %v13839_v62, %v13838_v58  ;;  %v13862_v2 = vadd.f32 %v13861_v61, %v13860_v59  ;;  %v12220_v50 = vcombine.high %v2741_v47, %v2743_v29  ;;  %v15074_v62 = vld [vmem:[%s18885_s4 + $0x3c0] sm:$0xff]   ;;  %v15081_v61 = vld [vmem:[%s18885_s4 + $0x350] sm:$0xff]  }
 0x9af   :  { %v12219_v58 = vcombine.low %v2741_v47, %v2743_v29 }
 0x9b0   :  { %v16431_v11 = vadd.f32 %v13859_v57, %v2181_v63  ;;  %v2184_v12 = vadd.f32 %v13840_v1, %v1951_v23  ;;  %v2744_v23 = vld [vmem:[%s18884_s3 + $0xf8] sm:$0xff]  ;;  %v15083_v63 = vld [vmem:[%s18885_s4 + $0x310] sm:$0xff]  }
 0x9b1   :  { %v12222_v57 = vcombine.high %v2742_v55, %v2744_v23  ;;  %v12221_v59 = vcombine.low %v2742_v55, %v2744_v23  ;;  %v15084_v1 = vld [vmem:[%s18885_s4 + $0x390] sm:$0xff]  }
 0x9b2   :  { %v16435_v13 = vadd.f32 %v13862_v2, %v2184_v12  ;;  %v2333_v14 = vpop.f32.mrb[52].mxu1  ;;  %v2376_v26 = vpop.f32.mrb[56].mxu0  ;;  %v15085_v2 = vld [vmem:[%s18885_s4 + $0x358] sm:$0xff]  }
 0x9b3   :  { %v2334_v24 = vadd.f32 %v2333_v14, %v2242_v6  ;;  %v2377_v16 = vadd.f32 %v2376_v26, %v2250_v7  ;;  %v2335_v10 = vpop.f32.mrb[53].mxu1  ;;  %v2378_v17 = vpop.f32.mrb[57].mxu0  ;;  %v15088_v12 = vld [vmem:[%s18885_s4 + $0x398] sm:$0xff]   ;;  %v15091_v14 = vld [vmem:[%s18885_s4 + $0x320] sm:$0xff]  }
 0x9b4   :  { %v2336_v18 = vadd.f32 %v2335_v10, %v2246_v8  ;;  %v2379_v19 = vadd.f32 %v2378_v17, %v2254_v9  ;;  %v2337_v20 = vpop.f32.mrb[54].mxu1  ;;  %v2380_v21 = vpop.f32.mrb[58].mxu0  ;;  %v15092_v26 = vld [vmem:[%s18885_s4 + $0x3a0] sm:$0xff]   ;;  %v15095_v10 = vld [vmem:[%s18885_s4 + $0x328] sm:$0xff]  }
 0x9b5   :  { %v2338_v22 = vadd.f32 %v2337_v20, %v2242_v6  ;;  %v2381_v30 = vadd.f32 %v2380_v21, %v2250_v7  ;;  %v2339_v37 = vpop.f32.mrb[55].mxu1  ;;  %v2382_v41 = vpop.f32.mrb[59].mxu0  ;;  %v2385_v43 = vmax.f32 %v2334_v24, 0.0  ;;  %v2387_v44 = vmax.f32 %v2377_v16, 0.0  ;;  %v15086_v6 = vld [vmem:[%s18885_s4 + $0x3d8] sm:$0xff]   ;;  %v15093_v24 = vld [vmem:[%s18885_s4 + $0x368] sm:$0xff]  }
 0x9b6   :  { %v2340_v28 = vadd.f32 %v2339_v37, %v2246_v8  ;;  %v2383_v42 = vadd.f32 %v2382_v41, %v2254_v9  ;;  %v2386_v48 = vmax.f32 %v2336_v18, 0.0  ;;  %v2388_v49 = vmax.f32 %v2379_v19, 0.0  ;;  %v15087_v7 = vld [vmem:[%s18885_s4 + $0x318] sm:$0xff]   ;;  %v15089_v8 = vld [vmem:[%s18885_s4 + $0x360] sm:$0xff]   ;;  %v15094_v16 = vld [vmem:[%s18885_s4 + $0x3e8] sm:$0xff]  }
 0x9b7   :  { %v2389_v45 = vmax.f32 %v2338_v22, 0.0  ;;  %v2391_v46 = vmax.f32 %v2381_v30, 0.0  ;;  %v15090_v9 = vld [vmem:[%s18885_s4 + $0x3e0] sm:$0xff]   ;;  %v15096_v17 = vld [vmem:[%s18885_s4 + $0x3a8] sm:$0xff]   ;;  %v15097_v18 = vld [vmem:[%s18885_s4 + $0x370] sm:$0xff]  }
 0x9b8   :  { %v2390_v52 = vmax.f32 %v2340_v28, 0.0  ;;  %v2392_v54 = vmax.f32 %v2383_v42, 0.0  ;;  %v15098_v19 = vld [vmem:[%s18885_s4 + $0x3f0] sm:$0xff]   ;;  %v15101_v22 = vld [vmem:[%s18885_s4 + $0x378] sm:$0xff]  }
 0x9b9   :  { %v2393_v56 = vpack.c.bf16 %v2389_v45, %v2385_v43  ;;  %v2395_v31 = vpack.c.bf16 %v2391_v46, %v2387_v44  ;;  %v15099_v20 = vld [vmem:[%s18885_s4 + $0x330] sm:$0xff]   ;;  %v15102_v30 = vld [vmem:[%s18885_s4 + $0x3f8] sm:$0xff]  }
 0x9ba   :  { %v2394_v32 = vpack.c.bf16 %v2390_v52, %v2386_v48  ;;  %v2396_v51 = vpack.c.bf16 %v2392_v54, %v2388_v49  ;;  %v15100_v21 = vld [vmem:[%s18885_s4 + $0x3b0] sm:$0xff]   ;;  %v15103_v37 = vld [vmem:[%s18885_s4 + $0x338] sm:$0xff]  }
 0x9bb   :  { %v15104_v41 = vld [vmem:[%s18885_s4 + $0x3b8] sm:$0xff]  }
 0x9bc   :  { %2685 = vmatprep.mubr.bf16.mxu1 %v2394_v32  ;;  %2726 = vmatprep.mubr.bf16.mxu0 %v2396_v51  ;;  %v12214_v48 = vld [vmem:[%s18886_s5 + $0x30] ss:$4 sm:$0xf] }
 0x9bd   :  { %2686 = vmatmul.mubr.bf16.vlgmr.msra.gmra.mrb[56].mxu1 %v2393_v56  ;;  %2727 = vmatmul.mubr.bf16.vlgmr.msra.gmra.mrb[60].mxu0 %v2395_v31  ;;  %v2751_v56 = vrot.slane %v12214_v48, %v16154_v53  ;;  %v2759_v31 = vrot.slane %v12214_v48, %v16156_v25 }
 0x9be   :  { %2809 = vmatpush1.bf16.msra.mxu1 %v12215_v39  ;;  %2852 = vmatpush1.bf16.msra.mxu0 %v12217_v40  ;;  %v15079_v39 = vld [vmem:[%s18885_s4 + $0x308] sm:$0xff]  }
 0x9bf   :  { %2810 = vmatprep.subr.bf16.mxu1 %v12220_v50  ;;  %2853 = vmatprep.subr.bf16.mxu0 %v12222_v57  ;;  %v15080_v40 = vld [vmem:[%s18885_s4 + $0x388] sm:$0xff]   ;;  %v2755_v50 = vrot.slane %v12214_v48, %v16158_v27  ;;  %v2763_v57 = vrot.slane %v12214_v48, %v16160_v15  ;;  %v15635_v48 = vld [vmem:[%s18882_s6 + $0x4] ss:$0 sm:$0xff] }
 0x9c0   :  { %2840 = vmatprep.mubr.bf16.mxu1 %v15650_v36  ;;  %2883 = vmatprep.mubr.bf16.mxu0 %v15650_v36 }
 0x9c2   :  { %2811 = vmatpush1.bf16.msra.mxu1 %v12219_v58  ;;  %2854 = vmatpush1.bf16.msra.mxu0 %v12221_v59 }
 0x9c3   :  { %13907 = vmatprep.subr.bf16.mxu1 %v15073_v60  ;;  %13929 = vmatprep.subr.bf16.mxu0 %v15074_v62 }
 0x9c5   :  { %12223 = vmatmul.mubr.msk.bf16.vlgmr.msra.gmra.mrb[60].mxu1 %vm124_vm2, %v16040_v5  ;;  %12224 = vmatmul.mubr.msk.bf16.vlgmr.msra.gmra.mrb[64].mxu0 %vm124_vm2, %v16040_v5  ;;  %v15082_v5 = vld [vmem:[%s18885_s4 + $0x3d0] sm:$0xff]  }
 0x9c6   :  { %13908 = vmatpush3.bf16.msra.mxu1 %v15075_v33  ;;  %13930 = vmatpush3.bf16.msra.mxu0 %v15076_v34 }
 0x9c7   :  { %13909 = vmatprep.subr.bf16.mxu1 %v15077_v35  ;;  %13931 = vmatprep.subr.bf16.mxu0 %v15078_v38 }
 0x9ca   :  { %13910 = vmatpush3.bf16.msra.mxu1 %v15079_v39  ;;  %13932 = vmatpush3.bf16.msra.mxu0 %v15080_v40 }
 0x9cb   :  { %13911 = vmatprep.subr.bf16.mxu1 %v15081_v61  ;;  %13933 = vmatprep.subr.bf16.mxu0 %v15082_v5 }
 0x9ce   :  { %13912 = vmatpush3.bf16.msra.mxu1 %v15083_v63  ;;  %13934 = vmatpush3.bf16.msra.mxu0 %v15084_v1 }
 0x9cf   :  { %13913 = vmatprep.subr.bf16.mxu1 %v15085_v2  ;;  %13935 = vmatprep.subr.bf16.mxu0 %v15086_v6 }
 0x9d2   :  { %13914 = vmatpush3.bf16.msra.mxu1 %v15087_v7  ;;  %13936 = vmatpush3.bf16.msra.mxu0 %v15088_v12 }
 0x9d3   :  { %13915 = vmatprep.subr.bf16.mxu1 %v15089_v8  ;;  %13937 = vmatprep.subr.bf16.mxu0 %v15090_v9 }
 0x9d6   :  { %13916 = vmatpush3.bf16.msra.mxu1 %v15091_v14  ;;  %13938 = vmatpush3.bf16.msra.mxu0 %v15092_v26 }
 0x9d7   :  { %13917 = vmatprep.subr.bf16.mxu1 %v15093_v24  ;;  %13939 = vmatprep.subr.bf16.mxu0 %v15094_v16 }
 0x9da   :  { %13918 = vmatpush3.bf16.msra.mxu1 %v15095_v10  ;;  %13940 = vmatpush3.bf16.msra.mxu0 %v15096_v17 }
 0x9db   :  { %13919 = vmatprep.subr.bf16.mxu1 %v15097_v18  ;;  %13941 = vmatprep.subr.bf16.mxu0 %v15098_v19 }
 0x9de   :  { %13920 = vmatpush3.bf16.msra.mxu1 %v15099_v20  ;;  %13942 = vmatpush3.bf16.msra.mxu0 %v15100_v21 }
 0x9df   :  { %13921 = vmatprep.subr.bf16.mxu1 %v15101_v22  ;;  %13943 = vmatprep.subr.bf16.mxu0 %v15102_v30 }
 0x9e2   :  { %13922 = vmatpush3.bf16.msra.mxu1 %v15103_v37  ;;  %13944 = vmatpush3.bf16.msra.mxu0 %v15104_v41 }
 0x9e3   :  { %14682 = vmatprep.subr.bf16.mxu1 %v15639_v0  ;;  %14690 = vmatprep.subr.bf16.mxu0 %v15639_v0 }
 0xa90   :  { %v13879_v28 = vpop.f32.mrb[56].mxu1  ;;  %v13901_v42 = vpop.f32.mrb[60].mxu0 }
 0xa91   :  { %v13880_v43 = vpop.f32.mrb[57].mxu1  ;;  %v13902_v44 = vpop.f32.mrb[61].mxu0 }
 0xa92   :  { %v13881_v45 = vadd.f32 %v13880_v43, %v13879_v28  ;;  %v13903_v46 = vadd.f32 %v13902_v44, %v13901_v42  ;;  %v13882_v47 = vpop.f32.mrb[58].mxu1  ;;  %v13904_v29 = vpop.f32.mrb[62].mxu0 }
 0xa93   :  { %v13883_v49 = vpop.f32.mrb[59].mxu1  ;;  %v13905_v52 = vpop.f32.mrb[63].mxu0 }
 0xa94   :  { %v2729_v54 = vadd.f32 %v13903_v46, %v13881_v45  ;;  %v13884_v55 = vadd.f32 %v13883_v49, %v13882_v47  ;;  %v13906_v23 = vadd.f32 %v13905_v52, %v13904_v29 }
 0xa96   :  { %v2735_v32 = vadd.f32 %v2729_v54, %v16431_v11  ;;  %v2732_v51 = vadd.f32 %v13906_v23, %v13884_v55 }
 0xa98   :  { %v2736_v58 = vadd.f32 %v2732_v51, %v16435_v13  ;;  %v2842_v59 = vpop.f32.mrb[60].mxu1  ;;  %v2885_v60 = vpop.f32.mrb[64].mxu0 }
 0xa99   :  { %v2843_v62 = vadd.f32 %v2842_v59, %v2751_v56  ;;  %v2886_v33 = vadd.f32 %v2885_v60, %v2759_v31  ;;  %v2844_v34 = vpop.f32.mrb[61].mxu1  ;;  %v2887_v35 = vpop.f32.mrb[65].mxu0 }
 0xa9a   :  { %v2845_v38 = vadd.f32 %v2844_v34, %v2755_v50  ;;  %v2888_v39 = vadd.f32 %v2887_v35, %v2763_v57  ;;  %v2846_v40 = vpop.f32.mrb[62].mxu1  ;;  %v2889_v61 = vpop.f32.mrb[66].mxu0 }
 0xa9b   :  { %v2847_v5 = vadd.f32 %v2846_v40, %v2751_v56  ;;  %v2890_v63 = vadd.f32 %v2889_v61, %v2759_v31  ;;  %v2848_v11 = vpop.f32.mrb[63].mxu1  ;;  %v2891_v1 = vpop.f32.mrb[67].mxu0  ;;  %v2894_v7 = vmax.f32 %v2843_v62, 0.0  ;;  %v2896_v12 = vmax.f32 %v2886_v33, 0.0 }
 0xa9c   :  { %v2849_v2 = vadd.f32 %v2848_v11, %v2755_v50  ;;  %v2892_v6 = vadd.f32 %v2891_v1, %v2763_v57  ;;  %v2895_v9 = vmax.f32 %v2845_v38, 0.0  ;;  %v2897_v14 = vmax.f32 %v2888_v39, 0.0 }
 0xa9d   :  { %v2898_v8 = vmax.f32 %v2847_v5, 0.0  ;;  %v2900_v13 = vmax.f32 %v2890_v63, 0.0 }
 0xa9e   :  { %v2899_v26 = vmax.f32 %v2849_v2, 0.0  ;;  %v2901_v24 = vmax.f32 %v2892_v6, 0.0 }
 0xa9f   :  { %v2902_v16 = vpack.c.bf16 %v2898_v8, %v2894_v7  ;;  %v2904_v10 = vpack.c.bf16 %v2900_v13, %v2896_v12 }
 0xaa0   :  { %v2903_v17 = vpack.c.bf16 %v2899_v26, %v2895_v9  ;;  %v2905_v18 = vpack.c.bf16 %v2901_v24, %v2897_v14  ;;  %v12257_v24 = vld [vmem:[%s18882_s6 + $0x8] ss:$0 sm:$0xff] }
 0xaa2   :  { %3194 = vmatprep.mubr.bf16.mxu1 %v2903_v17  ;;  %3235 = vmatprep.mubr.bf16.mxu0 %v2905_v18 }
 0xaa3   :  { %3195 = vmatmul.mubr.bf16.vlgmr.msra.gmra.mrb[64].mxu1 %v2902_v16  ;;  %3236 = vmatmul.mubr.bf16.vlgmr.msra.gmra.mrb[68].mxu0 %v2904_v10 }
 0xaa4   :  { %14686 = vmatprep.mubr.msk.bf16.mxu1 %vm15640_vm0, %v15639_v0  ;;  %14692 = vmatprep.mubr.msk.bf16.mxu0 %vm15640_vm0, %v15639_v0 }
 0xb76   :  { %v13923_v19 = vpop.f32.mrb[64].mxu1  ;;  %v13945_v20 = vpop.f32.mrb[68].mxu0 }
 0xb77   :  { %v13924_v21 = vpop.f32.mrb[65].mxu1  ;;  %v13946_v22 = vpop.f32.mrb[69].mxu0 }
 0xb78   :  { %v13925_v30 = vadd.f32 %v13924_v21, %v13923_v19  ;;  %v13947_v37 = vadd.f32 %v13946_v22, %v13945_v20  ;;  %v13926_v41 = vpop.f32.mrb[66].mxu1  ;;  %v13948_v28 = vpop.f32.mrb[70].mxu0  ;;  %v16605_v19 = vld [vmem:[%s18882_s6 + $0x1] ss:$0 sm:$0xff] }
 0xb79   :  { %v13927_v42 = vpop.f32.mrb[67].mxu1  ;;  %v13949_v43 = vpop.f32.mrb[71].mxu0 }
 0xb7a   :  { %v3238_v44 = vadd.f32 %v13947_v37, %v13925_v30  ;;  %v13928_v45 = vadd.f32 %v13927_v42, %v13926_v41  ;;  %v13950_v46 = vadd.f32 %v13949_v43, %v13948_v28 }
 0xb7c   :  { %v3244_v47 = vadd.f32 %v3238_v44, %v2735_v32  ;;  %v3241_v29 = vadd.f32 %v13950_v46, %v13928_v45 }
 0xb7e   :  { %v3246_v49 = vadd.f32 %v15635_v48, %v3244_v47  ;;  %v3245_v52 = vadd.f32 %v3241_v29, %v2736_v58 }
 0xb80   :  { %v3247_v54 = vadd.f32 %v15635_v48, %v3245_v52  ;;  %v3248_v55 = vadd.f32 %v3246_v49, %v16034_v3  ;;  %v15105_v3 = vld [vmem:[%s18880_s1 + $0x10] sm:$0xff]  }
 0xb81   :  { %14683 = vmatpush3.bf16.msra.mxu1 %v15105_v3 }
 0xb82   :  { %v3251_v23 = vsel %vm124_vm2, %v3248_v55, 0.0  ;;  %v3249_v56 = vadd.f32 %v3247_v54, %v16036_v4  ;;  %v3259_v31 = vmul.f32 %v3248_v55, %v3248_v55  ;;  %14684 = vmatprep.subr.bf16.mxu1 %v15639_v0  ;;  %v15106_v4 = vld [vmem:[%s18880_s1 + $0x18] sm:$0xff]  }
 0xb83   :  { %3252 = vadd.xlane.f32.xlu1 %v3251_v23 }
 0xb84   :  { %v3254_v51 = vsel %vm124_vm2, %v3249_v56, 0.0  ;;  %v3260_v50 = vmul.f32 %v3249_v56, %v3249_v56  ;;  %v3261_v32 = vsel %vm124_vm2, %v3259_v31, 0.0 }
 0xb85   :  { %3255 = vadd.xlane.f32.xlu0 %v3254_v51  ;;  %14685 = vmatpush3.bf16.msra.mxu1 %v15106_v4 }
 0xb86   :  { %v3264_v57 = vsel %vm124_vm2, %v3260_v50, 0.0  ;;  %14696 = vmatprep.subr.bf16.mxu1 %v15639_v0 }
 0xb87   :  { %3262 = vadd.xlane.f32.xlu1 %v3261_v32 }
 0xb89   :  { %3265 = vadd.xlane.f32.xlu0 %v3264_v57 }
 0xb98   :  { %3283 = vrot.lane.b32.xlu1 %v15635_v48, %s15648_s21 }
 0xc10   :  { %v3253_v58 = vpop.xlane.xlu1 %3252 }
 0xc11   :  { %v3257_v59 = vmul.f32 0.03125, %v3253_v58 }
 0xc12   :  { %v3256_v60 = vpop.xlane.xlu0 %3255 }
 0xc13   :  { %v3258_v62 = vmul.f32 0.03125, %v3256_v60  ;;  %v3269_v34 = vmul.f32 %v3257_v59, %v3257_v59  ;;  %v3275_v6 = vsub.f32 %v3248_v55, %v3257_v59 }
 0xc14   :  { %v3263_v33 = vpop.xlane.xlu1 %3262 }
 0xc15   :  { %v3267_v35 = vmul.f32 0.03125, %v3263_v33  ;;  %v3270_v39 = vmul.f32 %v3258_v62, %v3258_v62  ;;  %v3276_v8 = vsub.f32 %v3249_v56, %v3258_v62 }
 0xc16   :  { %v3266_v38 = vpop.xlane.xlu0 %3265 }
 0xc17   :  { %v3271_v40 = vsub.f32 %v3267_v35, %v3269_v34  ;;  %v3268_v61 = vmul.f32 0.03125, %v3266_v38 }
 0xc18   :  { %v3284_v12 = vpop.permute.xlu1 %3283 }
 0xc19   :  { %v3273_v5 = vmax.f32 %v3271_v40, 0.0  ;;  %v3272_v63 = vsub.f32 %v3268_v61, %v3270_v39 }
 0xc1b   :  { %v3277_v11 = vadd.f32 1e-05, %v3273_v5  ;;  %v3274_v1 = vmax.f32 %v3272_v63, 0.0 }
 0xc1d   :  { %15545 = vrsqrt.f32 %v3277_v11  ;;  %v3278_v2 = vadd.f32 1e-05, %v3274_v1 }
 0xc1f   :  { %15547 = vrsqrt.f32 %v3278_v2 }
 0xc27   :  { %v15546_v7 = vpop.eup %15545 }
 0xc28   :  { %v3281_v13 = vmul.f32 %v15546_v7, %v3275_v6 }
 0xc29   :  { %v15548_v9 = vpop.eup %15547 }
 0xc2a   :  { %v3282_v14 = vmul.f32 %v15548_v9, %v3276_v8  ;;  %v3286_v26 = vmul.f32 %v3284_v12, %v3281_v13 }
 0xc2c   :  { %v3287_v16 = vmul.f32 %v3284_v12, %v3282_v14  ;;  %v16593_v10 = vadd.f32 %v12257_v24, %v3286_v26 }
 0xc2e   :  { %v16595_v17 = vadd.f32 %v12257_v24, %v3287_v16 }
 0xc30   :  { %v3294_v18 = vpack.c.bf16 %v16595_v17, %v16593_v10 }
 0xc32   :  { %14687 = vmatmul.mubr.msk.bf16.vlgmr.msra.gmra.mrb[68].mxu1 %vm124_vm2, %v3294_v18 }
 0xc33   :  { %14698 = vmatprep.mubr.msk.bf16.mxu1 %vm15640_vm0, %v15639_v0 }
 0xd05   :  { %v3354_v20 = vpop.f32.mrb[68].mxu1 }
 0xd06   :  { %v3355_v21 = vadd.f32 %v16605_v19, %v3354_v20  ;;  %v14688_v22 = vpop.f32.mrb[69].mxu1 }
 0xd07   :  { %v3357_v30 = vpop.f32.mrb[70].mxu1 }
 0xd08   :  { %v3361_v37 = vpack.c.bf16 %v3355_v21, %v3355_v21  ;;  %v3358_v41 = vadd.f32 %v16605_v19, %v3357_v30  ;;  %v14689_v28 = vpop.f32.mrb[71].mxu1 }
 0xd0a   :  { %v3362_v42 = vpack.c.bf16 %v3358_v41, %v3358_v41  ;;  %3365 = vrot.lane.b32.xlu0 %v3361_v37, %s15642_s30 }
 0xd0c   :  { %3367 = vrot.lane.b32.xlu1 %v3362_v42, %s15642_s30 }
 0xd0e   :  { %3371 = vrot.lane.b32.xlu0 %v3362_v42, %s15641_s29 }
 0xd10   :  { %3369 = vrot.lane.b32.xlu1 %v3361_v37, %s15641_s29 }
 0xd12   :  { %3375 = vrot.lane.b32.xlu0 %v3362_v42, %s15643_s12 }
 0xd14   :  { %3373 = vrot.lane.b32.xlu1 %v3361_v37, %s15643_s12 }
 0xd16   :  { %3425 = vrot.lane.b32.xlu0 %v3362_v42, %s15644_s13 }
 0xd18   :  { %3377 = vrot.lane.b32.xlu1 %v3361_v37, %s15644_s13 }
 0xd7c   :  { %v16617_v43 = vpop.permute.xlu0 %3365 }
 0xd7d   :  { %3473 = vrot.lane.b32.xlu1 %v16617_v43, %s15644_s13 }
 0xd7e   :  { %v16621_v44 = vpop.permute.xlu1 %3367 }
 0xd7f   :  { %3521 = vrot.lane.b32.xlu0 %v16621_v44, %s15644_s13 }
 0xd80   :  { %v16625_v45 = vpop.permute.xlu0 %3371 }
 0xd82   :  { %v16627_v46 = vpop.permute.xlu1 %3369 }
 0xd83   :  { %3617 = vrot.lane.b32.xlu0 %v16625_v45, %s15644_s13  ;;  %3569 = vrot.lane.b32.xlu1 %v16627_v46, %s15644_s13 }
 0xd84   :  { %v16633_v47 = vpop.permute.xlu0 %3375 }
 0xd86   :  { %v16635_v29 = vpop.permute.xlu1 %3373 }
 0xd87   :  { %3713 = vrot.lane.b32.xlu0 %v16633_v47, %s15644_s13  ;;  %3665 = vrot.lane.b32.xlu1 %v16635_v29, %s15644_s13 }
 0xd88   :  { %v3426_v48 = vpop.permute.xlu0 %3425 }
 0xd89   :  { %v3431_v49 = vsel %vm187_vm3, %v3426_v48, 0 }
 0xd8a   :  { %14697 = vmatpush3.bf16.xpose.msra.mxu1 %v3431_v49  ;;  %v3378_v52 = vpop.permute.xlu1 %3377 }
 0xd8b   :  { %v3383_v54 = vsel %vm187_vm3, %v3378_v52, 0  ;;  %3865 = vrot.lane.b32.xlu0 %v3361_v37, %s15645_s14  ;;  %3913 = vrot.lane.b32.xlu1 %v3362_v42, %s15645_s14 }
 0xd8c   :  { %14691 = vmatpush3.bf16.xpose.msra.mxu0 %v3383_v54  ;;  %14708 = vmatprep.subr.bf16.mxu1 %v15639_v0 }
 0xd8d   :  { %14702 = vmatprep.subr.bf16.mxu0 %v15639_v0 }
 0xd91   :  { %14699 = vmatmul.mubr.msk.bf16.vlgmr.msra.gmra.mrb[72].mxu1 %vm187_vm3, %v3362_v42 }
 0xd92   :  { %14710 = vmatprep.mubr.msk.bf16.mxu1 %vm15640_vm0, %v15639_v0 }
 0xd93   :  { %14693 = vmatmul.mubr.msk.bf16.vlgmr.msra.gmra.mrb[72].mxu0 %vm187_vm3, %v3361_v37 }
 0xd94   :  { %14704 = vmatprep.mubr.msk.bf16.mxu0 %vm15640_vm0, %v15639_v0 }
 0xdef   :  { %v3474_v55 = vpop.permute.xlu1 %3473 }
 0xdf0   :  { %v3479_v23 = vsel %vm187_vm3, %v3474_v55, 0 }
 0xdf1   :  { %v3522_v56 = vpop.permute.xlu0 %3521  ;;  %14703 = vmatpush3.bf16.xpose.msra.mxu0 %v3479_v23 }
 0xdf2   :  { %v3527_v31 = vsel %vm187_vm3, %v3522_v56, 0  ;;  %14714 = vmatprep.subr.bf16.mxu0 %v15639_v0 }
 0xdf3   :  { %14709 = vmatpush3.bf16.xpose.msra.mxu1 %v3527_v31 }
 0xdf4   :  { %14720 = vmatprep.subr.bf16.mxu1 %v15639_v0 }
 0xdf5   :  { %v3570_v51 = vpop.permute.xlu1 %3569  ;;  %v3618_v50 = vpop.permute.xlu0 %3617 }
 0xdf6   :  { %v3575_v32 = vsel %vm187_vm3, %v3570_v51, 0  ;;  %v3623_v57 = vsel %vm187_vm3, %v3618_v50, 0 }
 0xdf8   :  { %14705 = vmatmul.mubr.msk.bf16.vlgmr.msra.gmra.mrb[76].mxu0 %vm187_vm3, %v16617_v43 }
 0xdf9   :  { %14715 = vmatpush3.bf16.xpose.msra.mxu0 %v3575_v32  ;;  %14716 = vmatprep.mubr.msk.bf16.mxu0 %vm15640_vm0, %v15639_v0  ;;  %v3666_v3 = vpop.permute.xlu1 %3665  ;;  %v3714_v4 = vpop.permute.xlu0 %3713 }
 0xdfa   :  { %14711 = vmatmul.mubr.msk.bf16.vlgmr.msra.gmra.mrb[76].mxu1 %vm187_vm3, %v16621_v44  ;;  %14726 = vmatprep.subr.bf16.mxu0 %v15639_v0  ;;  %v3671_v58 = vsel %vm187_vm3, %v3666_v3, 0  ;;  %v3719_v59 = vsel %vm187_vm3, %v3714_v4, 0 }
 0xdfb   :  { %14721 = vmatpush3.bf16.xpose.msra.mxu1 %v3623_v57  ;;  %14722 = vmatprep.mubr.msk.bf16.mxu1 %vm15640_vm0, %v15639_v0 }
 0xdfc   :  { %14732 = vmatprep.subr.bf16.mxu1 %v15639_v0 }
 0xdfd   :  { %v3866_v60 = vpop.permute.xlu0 %3865  ;;  %v3914_v62 = vpop.permute.xlu1 %3913 }
 0xdfe   :  { %v3871_v33 = vsel %vm679_vm4, %v3866_v60, 0  ;;  %v3919_v34 = vsel %vm679_vm4, %v3914_v62, 0 }
 0xe00   :  { %14717 = vmatmul.mubr.msk.bf16.vlgmr.msra.gmra.mrb[80].mxu0 %vm187_vm3, %v16627_v46 }
 0xe01   :  { %14727 = vmatpush3.bf16.xpose.msra.mxu0 %v3671_v58  ;;  %14728 = vmatprep.mubr.msk.bf16.mxu0 %vm15640_vm0, %v15639_v0 }
 0xe02   :  { %14723 = vmatmul.mubr.msk.bf16.vlgmr.msra.gmra.mrb[80].mxu1 %vm187_vm3, %v16625_v45  ;;  %14738 = vmatprep.subr.bf16.mxu0 %v15639_v0 }
 0xe03   :  { %14733 = vmatpush3.bf16.xpose.msra.mxu1 %v3719_v59  ;;  %14734 = vmatprep.mubr.msk.bf16.mxu1 %vm15640_vm0, %v15639_v0 }
 0xe04   :  { %14744 = vmatprep.subr.bf16.mxu1 %v15639_v0 }
 0xe08   :  { %14729 = vmatmul.mubr.msk.bf16.vlgmr.msra.gmra.mrb[84].mxu0 %vm187_vm3, %v16635_v29 }
 0xe09   :  { %14739 = vmatpush3.bf16.msra.mxu0 %v3871_v33  ;;  %14740 = vmatprep.mubr.msk.bf16.mxu0 %vm15640_vm0, %v15639_v0 }
 0xe0a   :  { %14735 = vmatmul.mubr.msk.bf16.vlgmr.msra.gmra.mrb[84].mxu1 %vm187_vm3, %v16633_v47  ;;  %14750 = vmatprep.subr.bf16.mxu0 %v15639_v0 }
 0xe0b   :  { %14745 = vmatpush3.bf16.msra.mxu1 %v3919_v34  ;;  %14746 = vmatprep.mubr.msk.bf16.mxu1 %vm15640_vm0, %v15639_v0 }
 0xe0c   :  { %14756 = vmatprep.subr.bf16.mxu1 %v15639_v0 }
 0xe64   :  { %v3467_v35 = vpop.f32.mrb[72].mxu1 }
 0xe65   :  { %v3762_v38 = vmul.f32 0.35355338, %v3467_v35  ;;  %v14700_v39 = vpop.f32.mrb[73].mxu1 }
 0xe66   :  { %v3419_v40 = vpop.f32.mrb[72].mxu0  ;;  %v3470_v61 = vpop.f32.mrb[74].mxu1 }
 0xe67   :  { %v3761_v5 = vmul.f32 0.35355338, %v3419_v40  ;;  %v14694_v63 = vpop.f32.mrb[73].mxu0  ;;  %v14701_v11 = vpop.f32.mrb[75].mxu1  ;;  %v3772_v1 = vsel %vm187_vm3, %v3762_v38, -inf }
 0xe68   :  { %v3422_v2 = vpop.f32.mrb[74].mxu0  ;;  %3773 = vmax.xlane.f32.xlu0 %v3772_v1 }
 0xe69   :  { %v14695_v6 = vpop.f32.mrb[75].mxu0  ;;  %v3769_v7 = vsel %vm187_vm3, %v3761_v5, -inf }
 0xe6a   :  { %3770 = vmax.xlane.f32.xlu1 %v3769_v7 }
 0xecb   :  { %v3515_v12 = vpop.f32.mrb[76].mxu0 }
 0xecc   :  { %v3763_v8 = vmul.f32 0.35355338, %v3515_v12  ;;  %v14706_v13 = vpop.f32.mrb[77].mxu0 }
 0xecd   :  { %v3518_v9 = vpop.f32.mrb[78].mxu0  ;;  %v3563_v14 = vpop.f32.mrb[76].mxu1 }
 0xece   :  { %v3764_v26 = vmul.f32 0.35355338, %v3563_v14  ;;  %v14707_v24 = vpop.f32.mrb[79].mxu0  ;;  %v14712_v16 = vpop.f32.mrb[77].mxu1  ;;  %v3775_v18 = vsel %vm187_vm3, %v3763_v8, -inf }
 0xecf   :  { %3776 = vmax.xlane.f32.xlu0 %v3775_v18  ;;  %v3566_v20 = vpop.f32.mrb[78].mxu1 }
 0xed0   :  { %v14713_v21 = vpop.f32.mrb[79].mxu1  ;;  %v3778_v22 = vsel %vm187_vm3, %v3764_v26, -inf }
 0xed1   :  { %3779 = vmax.xlane.f32.xlu1 %v3778_v22 }
 0xed3   :  { %v3611_v30 = vpop.f32.mrb[80].mxu0 }
 0xed4   :  { %v16697_v37 = vmul.f32 0.35355338, %v3611_v30  ;;  %v14718_v41 = vpop.f32.mrb[81].mxu0 }
 0xed5   :  { %v3614_v28 = vpop.f32.mrb[82].mxu0  ;;  %v3659_v42 = vpop.f32.mrb[80].mxu1 }
 0xed6   :  { %v3766_v48 = vmul.f32 0.35355338, %v3659_v42  ;;  %v14719_v49 = vpop.f32.mrb[83].mxu0  ;;  %v14724_v52 = vpop.f32.mrb[81].mxu1  ;;  %v3781_v54 = vsel %vm187_vm3, %v16697_v37, -inf }
 0xed7   :  { %3782 = vmax.xlane.f32.xlu0 %v3781_v54  ;;  %v3662_v55 = vpop.f32.mrb[82].mxu1 }
 0xed8   :  { %v14725_v23 = vpop.f32.mrb[83].mxu1  ;;  %v3784_v56 = vsel %vm187_vm3, %v3766_v48, -inf }
 0xed9   :  { %3785 = vmax.xlane.f32.xlu1 %v3784_v56 }
 0xedb   :  { %v3707_v31 = vpop.f32.mrb[84].mxu0 }
 0xedc   :  { %v16702_v51 = vmul.f32 0.35355338, %v3707_v31  ;;  %v14730_v50 = vpop.f32.mrb[85].mxu0 }
 0xedd   :  { %v3710_v32 = vpop.f32.mrb[86].mxu0  ;;  %v3755_v57 = vpop.f32.mrb[84].mxu1 }
 0xede   :  { %v3768_v3 = vmul.f32 0.35355338, %v3755_v57  ;;  %v14731_v4 = vpop.f32.mrb[87].mxu0  ;;  %v14736_v58 = vpop.f32.mrb[85].mxu1  ;;  %v3787_v59 = vsel %vm187_vm3, %v16702_v51, -inf }
 0xedf   :  { %3788 = vmax.xlane.f32.xlu0 %v3787_v59  ;;  %v3758_v60 = vpop.f32.mrb[86].mxu1 }
 0xee0   :  { %v14737_v62 = vpop.f32.mrb[87].mxu1  ;;  %v3790_v33 = vsel %vm187_vm3, %v3768_v3, -inf }
 0xee1   :  { %3791 = vmax.xlane.f32.xlu1 %v3790_v33 }
 0xef2   :  { %3961 = vrot.lane.b32.xlu1 %v16617_v43, %s15645_s14 }
 0xef5   :  { %4009 = vrot.lane.b32.xlu0 %v16621_v44, %s15645_s14  ;;  %v3774_v35 = vpop.xlane.xlu0 %3773 }
 0xef6   :  { %v3794_v40 = vsub.f32 %v3762_v38, %v3774_v35 }
 0xef7   :  { %v3771_v34 = vpop.xlane.xlu1 %3770 }
 0xef8   :  { %v3793_v39 = vsub.f32 %v3761_v5, %v3771_v34  ;;  %v3803_v63 = vmul.f32 1.442695, %v3794_v40 }
 0xefa   :  { %v3801_v61 = vmul.f32 1.442695, %v3793_v39 }
 0xefc   :  { %15549 = vpow2.f32 %v3801_v61 }
 0xefd   :  { %15551 = vpow2.f32 %v3803_v63 }
 0xf06   :  { %v15550_v11 = vpop.eup %15549 }
 0xf07   :  { %v15552_v1 = vpop.eup %15551  ;;  %v3817_v2 = vsel %vm187_vm3, %v15550_v11, 0.0 }
 0xf08   :  { %v3820_v6 = vsel %vm187_vm3, %v15552_v1, 0.0 }
 0xf14   :  { %3818 = vadd.xlane.f32.xlu0 %v3817_v2 }
 0xf16   :  { %3821 = vadd.xlane.f32.xlu1 %v3820_v6 }
 0xf27   :  { %4057 = vrot.lane.b32.xlu1 %v16627_v46, %s15645_s14 }
 0xf5c   :  { %v3777_v43 = vpop.xlane.xlu0 %3776 }
 0xf5d   :  { %v3795_v44 = vsub.f32 %v3763_v8, %v3777_v43 }
 0xf5e   :  { %v3780_v7 = vpop.xlane.xlu1 %3779 }
 0xf5f   :  { %v3805_v5 = vmul.f32 1.442695, %v3795_v44  ;;  %v3796_v38 = vsub.f32 %v3764_v26, %v3780_v7 }
 0xf61   :  { %15553 = vpow2.f32 %v3805_v5  ;;  %v3807_v12 = vmul.f32 1.442695, %v3796_v38 }
 0xf63   :  { %15555 = vpow2.f32 %v3807_v12 }
 0xf64   :  { %v3783_v28 = vpop.xlane.xlu0 %3782 }
 0xf65   :  { %v3797_v42 = vsub.f32 %v16697_v37, %v3783_v28 }
 0xf66   :  { %v3786_v13 = vpop.xlane.xlu1 %3785 }
 0xf67   :  { %v3798_v9 = vsub.f32 %v3766_v48, %v3786_v13  ;;  %v3809_v49 = vmul.f32 1.442695, %v3797_v42 }
 0xf69   :  { %v3811_v14 = vmul.f32 1.442695, %v3798_v9 }
 0xf6b   :  { %v16715_v24 = vpop.eup %15553  ;;  %15557 = vpow2.f32 %v3811_v14 }
 0xf6c   :  { %v3823_v16 = vsel %vm187_vm3, %v16715_v24, 0.0  ;;  %v3789_v48 = vpop.xlane.xlu0 %3788 }
 0xf6d   :  { %v16719_v18 = vpop.eup %15555  ;;  %3824 = vadd.xlane.f32.xlu0 %v3823_v16  ;;  %v3799_v52 = vsub.f32 %v16702_v51, %v3789_v48 }
 0xf6e   :  { %v3792_v46 = vpop.xlane.xlu1 %3791  ;;  %v3826_v8 = vsel %vm187_vm3, %v16719_v18, 0.0 }
 0xf6f   :  { %v3800_v26 = vsub.f32 %v3768_v3, %v3792_v46  ;;  %3827 = vadd.xlane.f32.xlu1 %v3826_v8  ;;  %v3813_v54 = vmul.f32 1.442695, %v3799_v52 }
 0xf70   :  { %v4010_v55 = vpop.permute.xlu0 %4009 }
 0xf71   :  { %v3815_v20 = vmul.f32 1.442695, %v3800_v26  ;;  %v4015_v60 = vsel %vm679_vm4, %v4010_v55, 0 }
 0xf72   :  { %v3962_v56 = vpop.permute.xlu1 %3961 }
 0xf73   :  { %15559 = vpow2.f32 %v3815_v20  ;;  %v3967_v58 = vsel %vm679_vm4, %v3962_v56, 0 }
 0xf74   :  { %15561 = vpow2.f32 %v3809_v49 }
 0xf75   :  { %v16723_v21 = vpop.eup %15557  ;;  %15563 = vpow2.f32 %v3813_v54 }
 0xf76   :  { %v3832_v22 = vsel %vm187_vm3, %v16723_v21, 0.0 }
 0xf77   :  { %3833 = vadd.xlane.f32.xlu1 %v3832_v22 }
 0xf7d   :  { %v16727_v30 = vpop.eup %15559 }
 0xf7e   :  { %v3838_v41 = vsel %vm187_vm3, %v16727_v30, 0.0  ;;  %v16737_v23 = vpop.eup %15561 }
 0xf7f   :  { %3839 = vadd.xlane.f32.xlu1 %v3838_v41  ;;  %v16741_v50 = vpop.eup %15563 }
 0xf83   :  { %4105 = vrot.lane.b32.xlu0 %v16625_v45, %s15645_s14  ;;  %v3829_v45 = vsel %vm187_vm3, %v16737_v23, 0.0 }
 0xf90   :  { %4153 = vrot.lane.b32.xlu1 %v16635_v29, %s15645_s14  ;;  %v3835_v29 = vsel %vm187_vm3, %v16741_v50, 0.0 }
 0xfa1   :  { %v3819_v31 = vpop.xlane.xlu0 %3818 }
 0xfa2   :  { %15565 = vrcp.f32 %v3819_v31  ;;  %3830 = vadd.xlane.f32.xlu0 %v3829_v45 }
 0xfa3   :  { %v3822_v37 = vpop.xlane.xlu1 %3821 }
 0xfa4   :  { %15567 = vrcp.f32 %v3822_v37 }
 0xfa6   :  { %3836 = vadd.xlane.f32.xlu0 %v3835_v29 }
 0xfa7   :  { %v4058_v62 = vpop.permute.xlu1 %4057 }
 0xfa8   :  { %v4063_v2 = vsel %vm679_vm4, %v4058_v62, 0 }
 0xfac   :  { %v15566_v51 = vpop.eup %15565 }
 0xfad   :  { %v3849_v32 = vmul.f32 %v15566_v51, %v15550_v11 }
 0xfae   :  { %v15568_v57 = vpop.eup %15567 }
 0xfaf   :  { %v3857_v3 = vpack.c.bf16 %v3849_v32, %v3849_v32  ;;  %v3850_v4 = vmul.f32 %v15568_v57, %v15552_v1 }
 0xfb1   :  { %14741 = vmatmul.mubr.msk.bf16.vlgmr.msra.gmra.mrb[88].mxu0 %vm187_vm3, %v3857_v3  ;;  %v3858_v59 = vpack.c.bf16 %v3850_v4, %v3850_v4 }
 0xfb2   :  { %14751 = vmatpush3.bf16.msra.mxu0 %v3967_v58  ;;  %14752 = vmatprep.mubr.msk.bf16.mxu0 %vm15640_vm0, %v15639_v0 }
 0xfb3   :  { %14747 = vmatmul.mubr.msk.bf16.vlgmr.msra.gmra.mrb[88].mxu1 %vm187_vm3, %v3858_v59  ;;  %14762 = vmatprep.subr.bf16.mxu0 %v15639_v0  ;;  %v15107_v59 = vld [vmem:[%s18883_s2 + $0x10] sm:$0xff]  }
 0xfb4   :  { %14757 = vmatpush3.bf16.msra.mxu1 %v4015_v60  ;;  %14758 = vmatprep.mubr.msk.bf16.mxu1 %vm15640_vm0, %v15639_v0 }
 0xfb5   :  { %14768 = vmatprep.subr.bf16.mxu1 %v15639_v0 }
 0xfbc   :  { %4201 = vrot.lane.b32.xlu0 %v16633_v47, %s15645_s14 }
 0xffa   :  { %v3825_v33 = vpop.xlane.xlu0 %3824 }
 0xffb   :  { %15569 = vrcp.f32 %v3825_v33 }
 0xffc   :  { %v3828_v34 = vpop.xlane.xlu1 %3827 }
 0xffd   :  { %15571 = vrcp.f32 %v3828_v34  ;;  %v15108_v34 = vld [vmem:[%s18883_s2 + $0x18] sm:$0xff]  }
 0xffe   :  { %v4106_v1 = vpop.permute.xlu0 %4105 }
 0xfff   :  { %v4111_v6 = vsel %vm679_vm4, %v4106_v1, 0 }
0x1004   :  { %v3834_v35 = vpop.xlane.xlu1 %3833 }
0x1005   :  { %v15570_v39 = vpop.eup %15569  ;;  %15573 = vrcp.f32 %v3834_v35 }
0x1006   :  { %v3851_v40 = vmul.f32 %v15570_v39, %v16715_v24 }
0x1007   :  { %v15572_v61 = vpop.eup %15571 }
0x1008   :  { %v3852_v63 = vmul.f32 %v15572_v61, %v16719_v18  ;;  %v3859_v11 = vpack.c.bf16 %v3851_v40, %v3851_v40 }
0x100a   :  { %14753 = vmatmul.mubr.msk.bf16.vlgmr.msra.gmra.mrb[92].mxu0 %vm187_vm3, %v3859_v11  ;;  %v3860_v47 = vpack.c.bf16 %v3852_v63, %v3852_v63 }
0x100b   :  { %14763 = vmatpush3.bf16.msra.mxu0 %v4063_v2  ;;  %14764 = vmatprep.mubr.msk.bf16.mxu0 %vm15640_vm0, %v15639_v0 }
0x100c   :  { %14759 = vmatmul.mubr.msk.bf16.vlgmr.msra.gmra.mrb[92].mxu1 %vm187_vm3, %v3860_v47  ;;  %14774 = vmatprep.subr.bf16.mxu0 %v15639_v0  ;;  %v3840_v5 = vpop.xlane.xlu1 %3839 }
0x100d   :  { %14769 = vmatpush3.bf16.msra.mxu1 %v4111_v6  ;;  %14770 = vmatprep.mubr.msk.bf16.mxu1 %vm15640_vm0, %v15639_v0  ;;  %15575 = vrcp.f32 %v3840_v5 }
0x100e   :  { %14780 = vmatprep.subr.bf16.mxu1 %v15639_v0 }
0x100f   :  { %v15574_v43 = vpop.eup %15573 }
0x1010   :  { %v3854_v44 = vmul.f32 %v15574_v43, %v16723_v21  ;;  %v4154_v8 = vpop.permute.xlu1 %4153 }
0x1011   :  { %v4159_v21 = vsel %vm679_vm4, %v4154_v8, 0 }
0x1012   :  { %v3862_v7 = vpack.c.bf16 %v3854_v44, %v3854_v44 }
0x1014   :  { %14771 = vmatmul.mubr.msk.bf16.vlgmr.msra.gmra.mrb[96].mxu1 %vm187_vm3, %v3862_v7 }
0x1015   :  { %14782 = vmatprep.mubr.msk.bf16.mxu1 %vm15640_vm0, %v15639_v0 }
0x1017   :  { %v15576_v12 = vpop.eup %15575 }
0x1018   :  { %v3856_v9 = vmul.f32 %v15576_v12, %v16727_v30 }
0x101a   :  { %v3864_v18 = vpack.c.bf16 %v3856_v9, %v3856_v9 }
0x102f   :  { %v3831_v38 = vpop.xlane.xlu0 %3830 }
0x1030   :  { %15577 = vrcp.f32 %v3831_v38 }
0x1033   :  { %v3837_v13 = vpop.xlane.xlu0 %3836 }
0x1034   :  { %15579 = vrcp.f32 %v3837_v13 }
0x1037   :  { %v4202_v14 = vpop.permute.xlu0 %4201 }
0x1038   :  { %v4207_v24 = vsel %vm679_vm4, %v4202_v14, 0 }
0x1039   :  { %14781 = vmatpush3.bf16.msra.mxu1 %v4207_v24 }
0x103a   :  { %v15578_v16 = vpop.eup %15577 }
0x103b   :  { %v3853_v46 = vmul.f32 %v15578_v16, %v16737_v23 }
0x103c   :  { %14783 = vmatmul.mubr.msk.bf16.vlgmr.msra.gmra.mrb[100].mxu1 %vm187_vm3, %v3864_v18 }
0x103d   :  { %v3861_v26 = vpack.c.bf16 %v3853_v46, %v3853_v46  ;;  %4508 = vmatprep.mubr.bf16.mxu1 %v15650_v36 }
0x103e   :  { %v15580_v20 = vpop.eup %15579 }
0x103f   :  { %14765 = vmatmul.mubr.msk.bf16.vlgmr.msra.gmra.mrb[96].mxu0 %vm187_vm3, %v3861_v26  ;;  %v3855_v22 = vmul.f32 %v15580_v20, %v16741_v50 }
0x1040   :  { %14775 = vmatpush3.bf16.msra.mxu0 %v4159_v21  ;;  %14776 = vmatprep.mubr.msk.bf16.mxu0 %vm15640_vm0, %v15639_v0 }
0x1041   :  { %14786 = vmatprep.subr.bf16.mxu0 %v15639_v0  ;;  %v3863_v30 = vpack.c.bf16 %v3855_v22, %v3855_v22 }
0x1047   :  { %14777 = vmatmul.mubr.msk.bf16.vlgmr.msra.gmra.mrb[100].mxu0 %vm187_vm3, %v3863_v30 }
0x1048   :  { %14790 = vmatprep.mubr.msk.bf16.mxu0 %vm15640_vm0, %v15639_v0  ;;  %14787 = vmatpush3.bf16.msra.mxu0 %v15107_v59  ;;  %v12296_v59 = vld [vmem:[%s18884_s3 + $0x188] sm:$0xff] }
0x1049   :  { %14788 = vmatprep.subr.bf16.mxu0 %v15639_v0 }
0x104c   :  { %14789 = vmatpush3.bf16.msra.mxu0 %v15108_v34 }
0x1084   :  { %v3907_v41 = vpop.f32.mrb[88].mxu0 }
0x1085   :  { %v14742_v28 = vpop.f32.mrb[89].mxu0 }
0x1086   :  { %v3910_v42 = vpop.f32.mrb[90].mxu0  ;;  %v3955_v48 = vpop.f32.mrb[88].mxu1 }
0x1087   :  { %v14743_v49 = vpop.f32.mrb[91].mxu0  ;;  %v14748_v52 = vpop.f32.mrb[89].mxu1 }
0x1088   :  { %v3958_v54 = vpop.f32.mrb[90].mxu1 }
0x1089   :  { %v14749_v55 = vpop.f32.mrb[91].mxu1 }
0x10dd   :  { %v4003_v23 = vpop.f32.mrb[92].mxu0 }
0x10de   :  { %v14754_v56 = vpop.f32.mrb[93].mxu0 }
0x10df   :  { %v4006_v31 = vpop.f32.mrb[94].mxu0  ;;  %v4051_v45 = vpop.f32.mrb[92].mxu1 }
0x10e0   :  { %v14957_v50 = vpack.i.bf16 %v4051_v45, %v4003_v23  ;;  %v14755_v37 = vpop.f32.mrb[95].mxu0  ;;  %v14760_v29 = vpop.f32.mrb[93].mxu1  ;;  %v12290_v31 = vld [vmem:[%s18882_s6 + $0x5] ss:$0 sm:$0xff] }
0x10e1   :  { %v4054_v51 = vpop.f32.mrb[94].mxu1  ;;  %v12291_v45 = vld [vmem:[%s18884_s3 + $0x100] sm:$0xff]  ;;  %v12292_v37 = vld [vmem:[%s18884_s3 + $0x108] sm:$0xff] }
0x10e2   :  { %14958 = vrot.lane.b32.xlu1 %v14957_v50, %s15646_s15  ;;  %v14761_v32 = vpop.f32.mrb[95].mxu1  ;;  %v12293_v50 = vld [vmem:[%s18884_s3 + $0x140] sm:$0xff]  ;;  %v12294_v51 = vld [vmem:[%s18884_s3 + $0x148] sm:$0xff] }
0x10e3   :  { %v12301_v29 = vcombine.high %v12291_v45, %v12293_v50  ;;  %v12300_v32 = vcombine.low %v12291_v45, %v12293_v50 }
0x10e5   :  { %4476 = vmatprep.subr.bf16.mxu1 %v12301_v29  ;;  %v15109_v29 = vld [vmem:[%s18885_s4 + $0x540] sm:$0xff]  }
0x10e6   :  { %4477 = vmatpush1.bf16.msra.mxu1 %v12300_v32  ;;  %v15111_v32 = vld [vmem:[%s18885_s4 + $0x500] sm:$0xff]  }
0x10e7   :  { %v4147_v57 = vpop.f32.mrb[96].mxu1 }
0x10e8   :  { %v14772_v3 = vpop.f32.mrb[97].mxu1 }
0x10e9   :  { %v4150_v4 = vpop.f32.mrb[98].mxu1  ;;  %v12303_v3 = vcombine.high %v12292_v37, %v12294_v51 }
0x10ea   :  { %v14773_v58 = vpop.f32.mrb[99].mxu1  ;;  %v12295_v4 = vld [vmem:[%s18884_s3 + $0x180] sm:$0xff] }
0x10eb   :  { %4519 = vmatprep.subr.bf16.mxu0 %v12303_v3  ;;  %v12297_v58 = vld [vmem:[%s18884_s3 + $0x1c0] sm:$0xff]  ;;  %v15113_v3 = vld [vmem:[%s18885_s4 + $0x548] sm:$0xff]  }
0x110f   :  { %v4243_v60 = vpop.f32.mrb[100].mxu1 }
0x1110   :  { %v14784_v62 = vpop.f32.mrb[101].mxu1 }
0x1111   :  { %v4246_v33 = vpop.f32.mrb[102].mxu1  ;;  %v12298_v62 = vld [vmem:[%s18884_s3 + $0x1c8] sm:$0xff] }
0x1112   :  { %v4099_v35 = vpop.f32.mrb[96].mxu0  ;;  %v14785_v39 = vpop.f32.mrb[103].mxu1  ;;  %v12304_v33 = vcombine.low %v12295_v4, %v12297_v58  ;;  %v12306_v34 = vcombine.low %v12296_v59, %v12298_v62 }
0x1113   :  { %v14962_v40 = vpack.i.bf16 %v4147_v57, %v4099_v35  ;;  %v14766_v61 = vpop.f32.mrb[97].mxu0  ;;  %v12302_v57 = vcombine.low %v12292_v37, %v12294_v51  ;;  %v12307_v35 = vcombine.high %v12296_v59, %v12298_v62  ;;  %v12374_v39 = vld [vmem:[%s18884_s3 + $0x110] sm:$0xff]  ;;  %v15110_v51 = vld [vmem:[%s18885_s4 + $0x5c0] sm:$0xff]   ;;  %v15116_v59 = vld [vmem:[%s18885_s4 + $0x588] sm:$0xff]  }
0x1114   :  { %v4102_v63 = vpop.f32.mrb[98].mxu0  ;;  %v12375_v61 = vld [vmem:[%s18884_s3 + $0x118] sm:$0xff]  ;;  %v15118_v62 = vld [vmem:[%s18885_s4 + $0x5d0] sm:$0xff]  }
0x1115   :  { %v14767_v11 = vpop.f32.mrb[99].mxu0  ;;  %14963 = vrot.lane.b32.xlu0 %v14962_v40, %s15647_s20  ;;  %v12376_v40 = vld [vmem:[%s18884_s3 + $0x150] sm:$0xff] }
0x1116   :  { %v12384_v63 = vcombine.high %v12374_v39, %v12376_v40  ;;  %v12377_v11 = vld [vmem:[%s18884_s3 + $0x158] sm:$0xff] }
0x1119   :  { %4303 = vrot.lane.b32.xlu0 %v16605_v19, %s15648_s21 }
0x111a   :  { %v4195_v1 = vpop.f32.mrb[100].mxu0 }
0x111b   :  { %v14967_v2 = vpack.i.bf16 %v4243_v60, %v4195_v1  ;;  %v14778_v47 = vpop.f32.mrb[101].mxu0  ;;  %v12305_v60 = vcombine.high %v12295_v4, %v12297_v58  ;;  %v12383_v1 = vcombine.low %v12374_v39, %v12376_v40  ;;  %v15114_v4 = vld [vmem:[%s18885_s4 + $0x5c8] sm:$0xff]   ;;  %v15122_v39 = vld [vmem:[%s18885_s4 + $0x5d8] sm:$0xff]  }
0x111c   :  { %v4198_v6 = vpop.f32.mrb[102].mxu0  ;;  %v12386_v47 = vcombine.high %v12375_v61, %v12377_v11  ;;  %v15115_v58 = vld [vmem:[%s18885_s4 + $0x508] sm:$0xff]   ;;  %v15123_v40 = vld [vmem:[%s18885_s4 + $0x518] sm:$0xff]  }
0x111d   :  { %v14779_v43 = vpop.f32.mrb[103].mxu0  ;;  %14968 = vrot.lane.b32.xlu1 %v14967_v2, %s15649_s22  ;;  %4478 = vmatprep.subr.bf16.mxu1 %v12305_v60  ;;  %v12385_v2 = vcombine.low %v12375_v61, %v12377_v11  ;;  %v15117_v60 = vld [vmem:[%s18885_s4 + $0x550] sm:$0xff]   ;;  %v15124_v61 = vld [vmem:[%s18885_s4 + $0x598] sm:$0xff]   ;;  %v15126_v11 = vld [vmem:[%s18885_s4 + $0x5e0] sm:$0xff]  }
0x111e   :  { %4479 = vmatpush1.bf16.msra.mxu1 %v12304_v33  ;;  %v15119_v33 = vld [vmem:[%s18885_s4 + $0x510] sm:$0xff]  }
0x111f   :  { %4710 = vmatprep.subr.bf16.mxu1 %v12384_v63  ;;  %v15125_v63 = vld [vmem:[%s18885_s4 + $0x560] sm:$0xff]  }
0x1154   :  { %v14959_v44 = vpop.permute.xlu1 %14958 }
0x1155   :  { %v14961_v5 = vunpack.i.h.bf16 %v14959_v44  ;;  %v14960_v38 = vunpack.i.l.bf16 %v14959_v44 }
0x1157   :  { %v4274_v14 = vsel %vm187_vm3, %v3955_v48, %v14961_v5  ;;  %v4273_v24 = vsel %vm187_vm3, %v3907_v41, %v14960_v38 }
0x1187   :  { %v14964_v7 = vpop.permute.xlu0 %14963 }
0x1188   :  { %v14966_v12 = vunpack.i.h.bf16 %v14964_v7  ;;  %v14965_v13 = vunpack.i.l.bf16 %v14964_v7 }
0x118a   :  { %v4276_v18 = vsel %vm57_vm1, %v4274_v14, %v14966_v12  ;;  %v4275_v46 = vsel %vm57_vm1, %v4273_v24, %v14965_v13 }
0x118b   :  { %v4304_v21 = vpop.permute.xlu0 %4303 }
0x118f   :  { %v14969_v9 = vpop.permute.xlu1 %14968 }
0x1190   :  { %v14971_v16 = vunpack.i.h.bf16 %v14969_v9  ;;  %v14970_v19 = vunpack.i.l.bf16 %v14969_v9 }
0x1192   :  { %v4278_v8 = vsel %vm1087_vm5, %v4276_v18, %v14971_v16  ;;  %v4277_v26 = vsel %vm1087_vm5, %v4275_v46, %v14970_v19 }
0x1193   :  { %v4279_v20 = vpack.c.bf16 %v4278_v8, %v4277_v26 }
0x1195   :  { %14791 = vmatmul.mubr.msk.bf16.vlgmr.msra.gmra.mrb[104].mxu0 %vm124_vm2, %v4279_v20 }
0x1196   :  { %4551 = vmatprep.mubr.bf16.mxu0 %v15650_v36  ;;  %4520 = vmatpush1.bf16.msra.mxu0 %v12302_v57  ;;  %v15112_v57 = vld [vmem:[%s18885_s4 + $0x580] sm:$0xff]  }
0x1197   :  { %4521 = vmatprep.subr.bf16.mxu0 %v12307_v35  ;;  %v15121_v35 = vld [vmem:[%s18885_s4 + $0x558] sm:$0xff]  }
0x119a   :  { %4522 = vmatpush1.bf16.msra.mxu0 %v12306_v34  ;;  %v15120_v34 = vld [vmem:[%s18885_s4 + $0x590] sm:$0xff]  }
0x119b   :  { %4753 = vmatprep.subr.bf16.mxu0 %v12386_v47  ;;  %v15129_v47 = vld [vmem:[%s18885_s4 + $0x568] sm:$0xff]  }
0x1268   :  { %v4343_v22 = vpop.f32.mrb[104].mxu0 }
0x1269   :  { %v4344_v30 = vadd.f32 %v4343_v22, %v4304_v21  ;;  %v14792_v28 = vpop.f32.mrb[105].mxu0 }
0x126a   :  { %v4346_v41 = vpop.f32.mrb[106].mxu0 }
0x126b   :  { %v16808_v42 = vadd.f32 %v4344_v30, %v16593_v10  ;;  %v4347_v48 = vadd.f32 %v4346_v41, %v4304_v21  ;;  %v14793_v49 = vpop.f32.mrb[107].mxu0 }
0x126d   :  { %v16811_v52 = vadd.f32 %v4347_v48, %v16595_v17  ;;  %v4353_v54 = vsel %vm124_vm2, %v16808_v42, 0.0  ;;  %v4361_v56 = vmul.f32 %v16808_v42, %v16808_v42 }
0x126e   :  { %4354 = vadd.xlane.f32.xlu1 %v4353_v54 }
0x126f   :  { %v4356_v55 = vsel %vm124_vm2, %v16811_v52, 0.0  ;;  %v4362_v23 = vmul.f32 %v16811_v52, %v16811_v52  ;;  %v4363_v17 = vsel %vm124_vm2, %v4361_v56, 0.0 }
0x1270   :  { %4357 = vadd.xlane.f32.xlu0 %v4356_v55  ;;  %v12378_v55 = vld [vmem:[%s18884_s3 + $0x190] sm:$0xff] }
0x1271   :  { %v4366_v10 = vsel %vm124_vm2, %v4362_v23, 0.0  ;;  %v12380_v23 = vld [vmem:[%s18884_s3 + $0x1d0] sm:$0xff] }
0x1272   :  { %4367 = vadd.xlane.f32.xlu1 %v4366_v10  ;;  %v12387_v50 = vcombine.low %v12378_v55, %v12380_v23 }
0x1274   :  { %4364 = vadd.xlane.f32.xlu0 %v4363_v17 }
0x1283   :  { %4395 = vrot.lane.b32.xlu1 %v12290_v31, %s15645_s14 }
0x128a   :  { %4390 = vrot.lane.b32.xlu0 %v12290_v31, %s15644_s13  ;;  %v12388_v31 = vcombine.high %v12378_v55, %v12380_v23 }
0x12fb   :  { %v4355_v6 = vpop.xlane.xlu1 %4354 }
0x12fc   :  { %v4359_v44 = vmul.f32 0.03125, %v4355_v6  ;;  %v15130_v6 = vld [vmem:[%s18885_s4 + $0x5e8] sm:$0xff]  }
0x12fd   :  { %v4358_v43 = vpop.xlane.xlu0 %4357 }
0x12fe   :  { %v4360_v7 = vmul.f32 0.03125, %v4358_v43  ;;  %v4371_v9 = vmul.f32 %v4359_v44, %v4359_v44  ;;  %v4377_v22 = vsub.f32 %v16808_v42, %v4359_v44  ;;  %v12381_v42 = vld [vmem:[%s18884_s3 + $0x1d8] sm:$0xff]  ;;  %v15131_v43 = vld [vmem:[%s18885_s4 + $0x528] sm:$0xff]  }
0x12ff   :  { %v4368_v5 = vpop.xlane.xlu1 %4367  ;;  %v15132_v44 = vld [vmem:[%s18885_s4 + $0x5a8] sm:$0xff]  }
0x1300   :  { %v4372_v38 = vmul.f32 %v4360_v7, %v4360_v7  ;;  %v4370_v12 = vmul.f32 0.03125, %v4368_v5  ;;  %v4378_v26 = vsub.f32 %v16811_v52, %v4360_v7  ;;  %v12379_v52 = vld [vmem:[%s18884_s3 + $0x198] sm:$0xff]  ;;  %v15133_v7 = vld [vmem:[%s18885_s4 + $0x570] sm:$0xff]  }
0x1301   :  { %v4365_v13 = vpop.xlane.xlu0 %4364  ;;  %v12390_v45 = vcombine.high %v12379_v52, %v12381_v42  ;;  %v12389_v37 = vcombine.low %v12379_v52, %v12381_v42  ;;  %v15134_v5 = vld [vmem:[%s18885_s4 + $0x5f0] sm:$0xff]  }
0x1302   :  { %v4374_v14 = vsub.f32 %v4370_v12, %v4372_v38  ;;  %v4369_v24 = vmul.f32 0.03125, %v4365_v13  ;;  %v15135_v38 = vld [vmem:[%s18885_s4 + $0x530] sm:$0xff]   ;;  %v15137_v13 = vld [vmem:[%s18885_s4 + $0x578] sm:$0xff]  }
0x1303   :  { %v4396_v49 = vpop.permute.xlu1 %4395  ;;  %v15136_v12 = vld [vmem:[%s18885_s4 + $0x5b0] sm:$0xff]  }
0x1304   :  { %v4376_v16 = vmax.f32 %v4374_v14, 0.0  ;;  %v4373_v19 = vsub.f32 %v4369_v24, %v4371_v9  ;;  %v15138_v9 = vld [vmem:[%s18885_s4 + $0x5f8] sm:$0xff]  }
0x1305   :  { %v4391_v21 = vpop.permute.xlu0 %4390  ;;  %v15139_v14 = vld [vmem:[%s18885_s4 + $0x538] sm:$0xff]  }
0x1306   :  { %v4380_v18 = vadd.f32 1e-05, %v4376_v16  ;;  %v4375_v46 = vmax.f32 %v4373_v19, 0.0  ;;  %v15140_v24 = vld [vmem:[%s18885_s4 + $0x5b8] sm:$0xff]   ;;  %v15141_v16 = vld [vmem:[%s18885_s4 + $0x440] sm:$0xff]  }
0x1307   :  { %v15142_v19 = vld [vmem:[%s18885_s4 + $0x4c0] sm:$0xff]  }
0x1308   :  { %15581 = vrsqrt.f32 %v4380_v18  ;;  %v4379_v8 = vadd.f32 1e-05, %v4375_v46  ;;  %v12299_v18 = vld [vmem:[%s18886_s5 + $0x1] ss:$4 sm:$0xf] }
0x1309   :  { %v4416_v46 = vrot.slane %v12299_v18, %v16154_v53 }
0x130a   :  { %15583 = vrsqrt.f32 %v4379_v8  ;;  %v4424_v8 = vrot.slane %v12299_v18, %v16156_v25 }
0x1312   :  { %v15582_v20 = vpop.eup %15581 }
0x1313   :  { %v4384_v30 = vmul.f32 %v15582_v20, %v4378_v26  ;;  %v4420_v26 = vrot.slane %v12299_v18, %v16158_v27  ;;  %v4428_v20 = vrot.slane %v12299_v18, %v16160_v15 }
0x1314   :  { %v15584_v28 = vpop.eup %15583 }
0x1315   :  { %v4383_v41 = vmul.f32 %v15584_v28, %v4377_v22  ;;  %v4394_v48 = vmul.f32 %v4391_v21, %v4384_v30  ;;  %v12382_v30 = vld [vmem:[%s18886_s5 + $0x11] ss:$4 sm:$0xf] }
0x1317   :  { %v4393_v54 = vmul.f32 %v4391_v21, %v4383_v41  ;;  %v16880_v10 = vadd.f32 %v4396_v49, %v4394_v48 }
0x1319   :  { %v16878_v56 = vadd.f32 %v4396_v49, %v4393_v54 }
0x131b   :  { %v16884_v17 = vpack.c.bf16 %v16880_v10, %v16878_v56 }
0x131d   :  { %12308 = vmatmul.mubr.msk.bf16.vlgmr.msra.gmra.mrb[104].mxu1 %vm124_vm2, %v16884_v17  ;;  %12309 = vmatmul.mubr.msk.bf16.vlgmr.msra.gmra.mrb[108].mxu0 %vm124_vm2, %v16884_v17 }
0x131e   :  { %4711 = vmatpush1.bf16.msra.mxu1 %v12383_v1  ;;  %4754 = vmatpush1.bf16.msra.mxu0 %v12385_v2  ;;  %v15127_v1 = vld [vmem:[%s18885_s4 + $0x520] sm:$0xff]  }
0x131f   :  { %4712 = vmatprep.subr.bf16.mxu1 %v12388_v31  ;;  %4755 = vmatprep.subr.bf16.mxu0 %v12390_v45  ;;  %v15128_v2 = vld [vmem:[%s18885_s4 + $0x5a0] sm:$0xff]  }
0x1320   :  { %4742 = vmatprep.mubr.bf16.mxu1 %v15650_v36  ;;  %4785 = vmatprep.mubr.bf16.mxu0 %v15650_v36 }
0x1322   :  { %4713 = vmatpush1.bf16.msra.mxu1 %v12387_v50  ;;  %4756 = vmatpush1.bf16.msra.mxu0 %v12389_v37  ;;  %v4653_v37 = vrot.slane %v12382_v30, %v16154_v53 }
0x1323   :  { %13989 = vmatprep.subr.bf16.mxu1 %v15109_v29  ;;  %14011 = vmatprep.subr.bf16.mxu0 %v15110_v51  ;;  %v4661_v29 = vrot.slane %v12382_v30, %v16156_v25 }
0x1325   :  { %12391 = vmatmul.mubr.msk.bf16.vlgmr.msra.gmra.mrb[108].mxu1 %vm124_vm2, %v16884_v17  ;;  %12392 = vmatmul.mubr.msk.bf16.vlgmr.msra.gmra.mrb[112].mxu0 %vm124_vm2, %v16884_v17 }
0x1326   :  { %13990 = vmatpush3.bf16.msra.mxu1 %v15111_v32  ;;  %14012 = vmatpush3.bf16.msra.mxu0 %v15112_v57  ;;  %v4657_v57 = vrot.slane %v12382_v30, %v16158_v27 }
0x1327   :  { %13991 = vmatprep.subr.bf16.mxu1 %v15113_v3  ;;  %14013 = vmatprep.subr.bf16.mxu0 %v15114_v4  ;;  %v4665_v3 = vrot.slane %v12382_v30, %v16160_v15 }
0x132a   :  { %13992 = vmatpush3.bf16.msra.mxu1 %v15115_v58  ;;  %14014 = vmatpush3.bf16.msra.mxu0 %v15116_v59 }
0x132b   :  { %13993 = vmatprep.subr.bf16.mxu1 %v15117_v60  ;;  %14015 = vmatprep.subr.bf16.mxu0 %v15118_v62 }
0x132e   :  { %13994 = vmatpush3.bf16.msra.mxu1 %v15119_v33  ;;  %14016 = vmatpush3.bf16.msra.mxu0 %v15120_v34 }
0x132f   :  { %13995 = vmatprep.subr.bf16.mxu1 %v15121_v35  ;;  %14017 = vmatprep.subr.bf16.mxu0 %v15122_v39 }
0x1332   :  { %13996 = vmatpush3.bf16.msra.mxu1 %v15123_v40  ;;  %14018 = vmatpush3.bf16.msra.mxu0 %v15124_v61 }
0x1333   :  { %13997 = vmatprep.subr.bf16.mxu1 %v15125_v63  ;;  %14019 = vmatprep.subr.bf16.mxu0 %v15126_v11 }
0x1336   :  { %13998 = vmatpush3.bf16.msra.mxu1 %v15127_v1  ;;  %14020 = vmatpush3.bf16.msra.mxu0 %v15128_v2 }
0x1337   :  { %13999 = vmatprep.subr.bf16.mxu1 %v15129_v47  ;;  %14021 = vmatprep.subr.bf16.mxu0 %v15130_v6 }
0x133a   :  { %14000 = vmatpush3.bf16.msra.mxu1 %v15131_v43  ;;  %14022 = vmatpush3.bf16.msra.mxu0 %v15132_v44 }
0x133b   :  { %14001 = vmatprep.subr.bf16.mxu1 %v15133_v7  ;;  %14023 = vmatprep.subr.bf16.mxu0 %v15134_v5 }
0x133e   :  { %14002 = vmatpush3.bf16.msra.mxu1 %v15135_v38  ;;  %14024 = vmatpush3.bf16.msra.mxu0 %v15136_v12 }
0x133f   :  { %14003 = vmatprep.subr.bf16.mxu1 %v15137_v13  ;;  %14025 = vmatprep.subr.bf16.mxu0 %v15138_v9 }
0x1342   :  { %14004 = vmatpush3.bf16.msra.mxu1 %v15139_v14  ;;  %14026 = vmatpush3.bf16.msra.mxu0 %v15140_v24 }
0x1343   :  { %14033 = vmatprep.subr.bf16.mxu1 %v15141_v16  ;;  %14055 = vmatprep.subr.bf16.mxu0 %v15142_v19 }
0x13f0   :  { %v4510_v21 = vpop.f32.mrb[104].mxu1  ;;  %v4553_v22 = vpop.f32.mrb[108].mxu0 }
0x13f1   :  { %v4511_v28 = vadd.f32 %v4510_v21, %v4416_v46  ;;  %v4554_v41 = vadd.f32 %v4553_v22, %v4424_v8  ;;  %v4512_v48 = vpop.f32.mrb[105].mxu1  ;;  %v4555_v49 = vpop.f32.mrb[109].mxu0 }
0x13f2   :  { %v4513_v54 = vadd.f32 %v4512_v48, %v4420_v26  ;;  %v4556_v55 = vadd.f32 %v4555_v49, %v4428_v20  ;;  %v4514_v23 = vpop.f32.mrb[106].mxu1  ;;  %v4557_v52 = vpop.f32.mrb[110].mxu0  ;;  %v15143_v49 = vld [vmem:[%s18885_s4 + $0x400] sm:$0xff]  }
0x13f3   :  { %v4515_v42 = vadd.f32 %v4514_v23, %v4416_v46  ;;  %v4558_v31 = vadd.f32 %v4557_v52, %v4424_v8  ;;  %v4516_v45 = vpop.f32.mrb[107].mxu1  ;;  %v4559_v50 = vpop.f32.mrb[111].mxu0  ;;  %v4562_v4 = vmax.f32 %v4511_v28, 0.0  ;;  %v4564_v58 = vmax.f32 %v4554_v41, 0.0  ;;  %v15146_v23 = vld [vmem:[%s18885_s4 + $0x4c8] sm:$0xff]  }
0x13f4   :  { %v4517_v51 = vadd.f32 %v4516_v45, %v4420_v26  ;;  %v4560_v32 = vadd.f32 %v4559_v50, %v4428_v20  ;;  %v4563_v62 = vmax.f32 %v4513_v54, 0.0  ;;  %v4565_v33 = vmax.f32 %v4556_v55, 0.0  ;;  %v15144_v54 = vld [vmem:[%s18885_s4 + $0x480] sm:$0xff]   ;;  %v15145_v55 = vld [vmem:[%s18885_s4 + $0x448] sm:$0xff]   ;;  %v15150_v45 = vld [vmem:[%s18885_s4 + $0x4d0] sm:$0xff]  }
0x13f5   :  { %v4566_v59 = vmax.f32 %v4515_v42, 0.0  ;;  %v4568_v60 = vmax.f32 %v4558_v31, 0.0  ;;  %v15147_v52 = vld [vmem:[%s18885_s4 + $0x408] sm:$0xff]   ;;  %v15149_v31 = vld [vmem:[%s18885_s4 + $0x450] sm:$0xff]  }
0x13f6   :  { %v4567_v34 = vmax.f32 %v4517_v51, 0.0  ;;  %v4569_v35 = vmax.f32 %v4560_v32, 0.0  ;;  %v15148_v42 = vld [vmem:[%s18885_s4 + $0x488] sm:$0xff]   ;;  %v15151_v50 = vld [vmem:[%s18885_s4 + $0x410] sm:$0xff]   ;;  %v15154_v51 = vld [vmem:[%s18885_s4 + $0x4d8] sm:$0xff]  }
0x13f7   :  { %v17012_v39 = vpack.c.bf16 %v4566_v59, %v4562_v4  ;;  %v17014_v40 = vpack.c.bf16 %v4568_v60, %v4564_v58  ;;  %v15155_v32 = vld [vmem:[%s18885_s4 + $0x418] sm:$0xff]   ;;  %v15158_v4 = vld [vmem:[%s18885_s4 + $0x4e0] sm:$0xff]   ;;  %v15161_v60 = vld [vmem:[%s18885_s4 + $0x468] sm:$0xff]  }
0x13f8   :  { %v4571_v61 = vpack.c.bf16 %v4567_v34, %v4563_v62  ;;  %v4573_v63 = vpack.c.bf16 %v4569_v35, %v4565_v33  ;;  %v4744_v11 = vpop.f32.mrb[108].mxu1  ;;  %v4787_v1 = vpop.f32.mrb[112].mxu0  ;;  %v15159_v58 = vld [vmem:[%s18885_s4 + $0x420] sm:$0xff]   ;;  %v15162_v62 = vld [vmem:[%s18885_s4 + $0x4e8] sm:$0xff]   ;;  %v15165_v35 = vld [vmem:[%s18885_s4 + $0x470] sm:$0xff]  }
0x13f9   :  { %v4745_v2 = vadd.f32 %v4744_v11, %v4653_v37  ;;  %v4788_v47 = vadd.f32 %v4787_v1, %v4661_v29  ;;  %v4746_v6 = vpop.f32.mrb[109].mxu1  ;;  %v4789_v43 = vpop.f32.mrb[113].mxu0  ;;  %v15160_v59 = vld [vmem:[%s18885_s4 + $0x4a0] sm:$0xff]   ;;  %v15163_v33 = vld [vmem:[%s18885_s4 + $0x428] sm:$0xff]   ;;  %v15168_v11 = vld [vmem:[%s18885_s4 + $0x4b0] sm:$0xff]  }
0x13fa   :  { %v4747_v44 = vadd.f32 %v4746_v6, %v4657_v57  ;;  %v4790_v7 = vadd.f32 %v4789_v43, %v4665_v3  ;;  %v4748_v5 = vpop.f32.mrb[110].mxu1  ;;  %v4791_v38 = vpop.f32.mrb[114].mxu0  ;;  %v15164_v34 = vld [vmem:[%s18885_s4 + $0x4a8] sm:$0xff]   ;;  %v15169_v1 = vld [vmem:[%s18885_s4 + $0x478] sm:$0xff]   ;;  %v12523_v6 = vld [vmem:[%s18884_s3 + $0x160] sm:$0xff] }
0x13fb   :  { %v4749_v12 = vadd.f32 %v4748_v5, %v4653_v37  ;;  %v4792_v13 = vadd.f32 %v4791_v38, %v4661_v29  ;;  %v4750_v9 = vpop.f32.mrb[111].mxu1  ;;  %v4793_v14 = vpop.f32.mrb[115].mxu0  ;;  %v4796_v19 = vmax.f32 %v4745_v2, 0.0  ;;  %v4798_v18 = vmax.f32 %v4788_v47, 0.0  ;;  %v15152_v37 = vld [vmem:[%s18885_s4 + $0x490] sm:$0xff]   ;;  %v15153_v29 = vld [vmem:[%s18885_s4 + $0x458] sm:$0xff]  }
0x13fc   :  { %v4751_v24 = vadd.f32 %v4750_v9, %v4657_v57  ;;  %v4794_v16 = vadd.f32 %v4793_v14, %v4665_v3  ;;  %v4797_v26 = vmax.f32 %v4747_v44, 0.0  ;;  %v4799_v20 = vmax.f32 %v4790_v7, 0.0  ;;  %v15156_v57 = vld [vmem:[%s18885_s4 + $0x498] sm:$0xff]   ;;  %v15157_v3 = vld [vmem:[%s18885_s4 + $0x460] sm:$0xff]   ;;  %v12522_v43 = vld [vmem:[%s18884_s3 + $0x128] sm:$0xff] }
0x13fd   :  { %v4800_v46 = vmax.f32 %v4749_v12, 0.0  ;;  %v4802_v8 = vmax.f32 %v4792_v13, 0.0  ;;  %v15170_v2 = vld [vmem:[%s18885_s4 + $0x4f8] sm:$0xff]   ;;  %v12521_v47 = vld [vmem:[%s18884_s3 + $0x120] sm:$0xff]  ;;  %v12524_v44 = vld [vmem:[%s18884_s3 + $0x168] sm:$0xff] }
0x13fe   :  { %v4801_v21 = vmax.f32 %v4751_v24, 0.0  ;;  %v4803_v22 = vmax.f32 %v4794_v16, 0.0  ;;  %v15171_v7 = vld [vmem:[%s18885_s4 + $0x438] sm:$0xff]   ;;  %v12531_v38 = vcombine.high %v12521_v47, %v12523_v6  ;;  %v12533_v12 = vcombine.high %v12522_v43, %v12524_v44  ;;  %v12525_v13 = vld [vmem:[%s18884_s3 + $0x1a0] sm:$0xff]  ;;  %v12526_v14 = vld [vmem:[%s18884_s3 + $0x1a8] sm:$0xff] }
0x13ff   :  { %v4804_v30 = vpack.c.bf16 %v4800_v46, %v4796_v19  ;;  %v4806_v28 = vpack.c.bf16 %v4802_v8, %v4798_v18  ;;  %v15172_v5 = vld [vmem:[%s18885_s4 + $0x4b8] sm:$0xff]   ;;  %v12527_v9 = vld [vmem:[%s18884_s3 + $0x1e0] sm:$0xff]  ;;  %v12528_v24 = vld [vmem:[%s18884_s3 + $0x1e8] sm:$0xff]  ;;  %v12530_v16 = vcombine.low %v12521_v47, %v12523_v6  ;;  %v12532_v19 = vcombine.low %v12522_v43, %v12524_v44 }
0x1400   :  { %v4805_v41 = vpack.c.bf16 %v4801_v21, %v4797_v26  ;;  %v4807_v48 = vpack.c.bf16 %v4803_v22, %v4799_v20  ;;  %v12535_v18 = vcombine.high %v12525_v13, %v12527_v9  ;;  %v12537_v46 = vcombine.high %v12526_v14, %v12528_v24  ;;  %v15175_v20 = vld [vmem:[%s18885_s4 + $0x600] sm:$0xff]   ;;  %v15177_v22 = vld [vmem:[%s18885_s4 + $0x648] sm:$0xff]  }
0x1401   :  { %v12534_v8 = vcombine.low %v12525_v13, %v12527_v9  ;;  %v12536_v26 = vcombine.low %v12526_v14, %v12528_v24  ;;  %v15176_v21 = vld [vmem:[%s18885_s4 + $0x680] sm:$0xff]  }
0x1402   :  { %5096 = vmatprep.mubr.bf16.mxu1 %v4805_v41  ;;  %5137 = vmatprep.mubr.bf16.mxu0 %v4807_v48  ;;  %v15180_v41 = vld [vmem:[%s18885_s4 + $0x688] sm:$0xff]   ;;  %v15181_v48 = vld [vmem:[%s18885_s4 + $0x650] sm:$0xff]  }
0x1403   :  { %5097 = vmatmul.mubr.bf16.vlgmr.msra.gmra.mrb[112].mxu1 %v4804_v30  ;;  %5138 = vmatmul.mubr.bf16.vlgmr.msra.gmra.mrb[116].mxu0 %v4806_v28  ;;  %v15178_v30 = vld [vmem:[%s18885_s4 + $0x6c8] sm:$0xff]  }
0x1404   :  { %14034 = vmatpush3.bf16.msra.mxu1 %v15143_v49  ;;  %14056 = vmatpush3.bf16.msra.mxu0 %v15144_v54  ;;  %v15179_v28 = vld [vmem:[%s18885_s4 + $0x608] sm:$0xff]   ;;  %v15182_v49 = vld [vmem:[%s18885_s4 + $0x6d0] sm:$0xff]  }
0x1405   :  { %5370 = vmatprep.mubr.bf16.mxu1 %v4571_v61  ;;  %5411 = vmatprep.mubr.bf16.mxu0 %v4573_v63  ;;  %v15166_v61 = vld [vmem:[%s18885_s4 + $0x4f0] sm:$0xff]  }
0x1406   :  { %14035 = vmatprep.subr.bf16.mxu1 %v15145_v55  ;;  %14057 = vmatprep.subr.bf16.mxu0 %v15146_v23  ;;  %v15167_v63 = vld [vmem:[%s18885_s4 + $0x430] sm:$0xff]   ;;  %v15185_v23 = vld [vmem:[%s18885_s4 + $0x658] sm:$0xff]  }
0x1407   :  { %v15183_v54 = vld [vmem:[%s18885_s4 + $0x610] sm:$0xff]  }
0x1408   :  { %14036 = vmatpush3.bf16.msra.mxu1 %v15147_v52  ;;  %14058 = vmatpush3.bf16.msra.mxu0 %v15148_v42  ;;  %v15184_v55 = vld [vmem:[%s18885_s4 + $0x690] sm:$0xff]   ;;  %v15186_v52 = vld [vmem:[%s18885_s4 + $0x6d8] sm:$0xff]  }
0x1409   :  { %14037 = vmatprep.subr.bf16.mxu1 %v15149_v31  ;;  %14059 = vmatprep.subr.bf16.mxu0 %v15150_v45  ;;  %v15187_v42 = vld [vmem:[%s18885_s4 + $0x618] sm:$0xff]   ;;  %v15189_v45 = vld [vmem:[%s18885_s4 + $0x660] sm:$0xff]  }
0x140a   :  { %v15188_v31 = vld [vmem:[%s18885_s4 + $0x698] sm:$0xff]  }
0x140c   :  { %14038 = vmatpush3.bf16.msra.mxu1 %v15151_v50  ;;  %14060 = vmatpush3.bf16.msra.mxu0 %v15152_v37  ;;  %v15190_v50 = vld [vmem:[%s18885_s4 + $0x6e0] sm:$0xff]  }
0x140d   :  { %14039 = vmatprep.subr.bf16.mxu1 %v15153_v29  ;;  %14061 = vmatprep.subr.bf16.mxu0 %v15154_v51  ;;  %v15191_v37 = vld [vmem:[%s18885_s4 + $0x620] sm:$0xff]   ;;  %v15193_v51 = vld [vmem:[%s18885_s4 + $0x668] sm:$0xff]  }
0x140e   :  { %v15192_v29 = vld [vmem:[%s18885_s4 + $0x6a0] sm:$0xff]  }
0x1410   :  { %14040 = vmatpush3.bf16.msra.mxu1 %v15155_v32  ;;  %14062 = vmatpush3.bf16.msra.mxu0 %v15156_v57  ;;  %v15194_v32 = vld [vmem:[%s18885_s4 + $0x6e8] sm:$0xff]  }
0x1411   :  { %14041 = vmatprep.subr.bf16.mxu1 %v15157_v3  ;;  %14063 = vmatprep.subr.bf16.mxu0 %v15158_v4  ;;  %v15195_v57 = vld [vmem:[%s18885_s4 + $0x628] sm:$0xff]   ;;  %v15197_v4 = vld [vmem:[%s18885_s4 + $0x670] sm:$0xff]  }
0x1412   :  { %v15196_v3 = vld [vmem:[%s18885_s4 + $0x6a8] sm:$0xff]  }
0x1414   :  { %14042 = vmatpush3.bf16.msra.mxu1 %v15159_v58  ;;  %14064 = vmatpush3.bf16.msra.mxu0 %v15160_v59  ;;  %v15198_v58 = vld [vmem:[%s18885_s4 + $0x6f0] sm:$0xff]  }
0x1415   :  { %14043 = vmatprep.subr.bf16.mxu1 %v15161_v60  ;;  %14065 = vmatprep.subr.bf16.mxu0 %v15162_v62  ;;  %v15199_v59 = vld [vmem:[%s18885_s4 + $0x630] sm:$0xff]   ;;  %v15201_v62 = vld [vmem:[%s18885_s4 + $0x678] sm:$0xff]  }
0x1416   :  { %v15200_v60 = vld [vmem:[%s18885_s4 + $0x6b0] sm:$0xff]  }
0x1418   :  { %14044 = vmatpush3.bf16.msra.mxu1 %v15163_v33  ;;  %14066 = vmatpush3.bf16.msra.mxu0 %v15164_v34  ;;  %v15202_v33 = vld [vmem:[%s18885_s4 + $0x6f8] sm:$0xff]  }
0x1419   :  { %14045 = vmatprep.subr.bf16.mxu1 %v15165_v35  ;;  %14067 = vmatprep.subr.bf16.mxu0 %v15166_v61  ;;  %v15203_v34 = vld [vmem:[%s18885_s4 + $0x638] sm:$0xff]   ;;  %v17237_v61 = vld [vmem:[%s18884_s3 + $0x130] sm:$0xff] }
0x141a   :  { %v15204_v35 = vld [vmem:[%s18885_s4 + $0x6b8] sm:$0xff]  }
0x141c   :  { %14046 = vmatpush3.bf16.msra.mxu1 %v15167_v63  ;;  %14068 = vmatpush3.bf16.msra.mxu0 %v15168_v11  ;;  %v17242_v63 = vld [vmem:[%s18884_s3 + $0x170] sm:$0xff]  ;;  %v17247_v11 = vld [vmem:[%s18884_s3 + $0x138] sm:$0xff] }
0x141d   :  { %14047 = vmatprep.subr.bf16.mxu1 %v15169_v1  ;;  %14069 = vmatprep.subr.bf16.mxu0 %v15170_v2  ;;  %v12646_v1 = vcombine.high %v17237_v61, %v17242_v63  ;;  %v17254_v2 = vld [vmem:[%s18884_s3 + $0x178] sm:$0xff]  ;;  %v12645_v47 = vcombine.low %v17237_v61, %v17242_v63  ;;  %v15207_v61 = vld [vmem:[%s18885_s4 + $0x700] sm:$0xff]  }
0x141e   :  { %v12647_v6 = vcombine.low %v17247_v11, %v17254_v2  ;;  %v12648_v43 = vcombine.high %v17247_v11, %v17254_v2  ;;  %v15208_v63 = vld [vmem:[%s18885_s4 + $0x780] sm:$0xff]   ;;  %v15209_v11 = vld [vmem:[%s18885_s4 + $0x748] sm:$0xff]  }
0x141f   :  { %v15210_v2 = vld [vmem:[%s18885_s4 + $0x7c8] sm:$0xff]  }
0x1420   :  { %14048 = vmatpush3.bf16.msra.mxu1 %v15171_v7  ;;  %14070 = vmatpush3.bf16.msra.mxu0 %v15172_v5 }
0x1421   :  { %5491 = vmatprep.subr.bf16.mxu1 %v12531_v38  ;;  %5534 = vmatprep.subr.bf16.mxu0 %v12533_v12 }
0x1423   :  { %5371 = vmatmul.mubr.bf16.vlgmr.msra.gmra.mrb[116].mxu1 %v17012_v39  ;;  %5412 = vmatmul.mubr.bf16.vlgmr.msra.gmra.mrb[120].mxu0 %v17014_v40  ;;  %v15173_v39 = vld [vmem:[%s18885_s4 + $0x640] sm:$0xff]  }
0x1424   :  { %5492 = vmatpush1.bf16.msra.mxu1 %v12530_v16  ;;  %5535 = vmatpush1.bf16.msra.mxu0 %v12532_v19  ;;  %v15174_v40 = vld [vmem:[%s18885_s4 + $0x6c0] sm:$0xff]  }
0x1425   :  { %5493 = vmatprep.subr.bf16.mxu1 %v12535_v18  ;;  %5536 = vmatprep.subr.bf16.mxu0 %v12537_v46 }
0x1426   :  { %5523 = vmatprep.mubr.bf16.mxu1 %v15650_v36  ;;  %5566 = vmatprep.mubr.bf16.mxu0 %v15650_v36 }
0x1428   :  { %5494 = vmatpush1.bf16.msra.mxu1 %v12534_v8  ;;  %5537 = vmatpush1.bf16.msra.mxu0 %v12536_v26 }
0x1429   :  { %14077 = vmatprep.subr.bf16.mxu1 %v15173_v39  ;;  %14099 = vmatprep.subr.bf16.mxu0 %v15174_v40 }
0x142b   :  { %12538 = vmatmul.mubr.msk.bf16.vlgmr.msra.gmra.mrb[120].mxu1 %vm124_vm2, %v16884_v17  ;;  %12539 = vmatmul.mubr.msk.bf16.vlgmr.msra.gmra.mrb[124].mxu0 %vm124_vm2, %v16884_v17 }
0x142c   :  { %14078 = vmatpush3.bf16.msra.mxu1 %v15175_v20  ;;  %14100 = vmatpush3.bf16.msra.mxu0 %v15176_v21 }
0x142d   :  { %14079 = vmatprep.subr.bf16.mxu1 %v15177_v22  ;;  %14101 = vmatprep.subr.bf16.mxu0 %v15178_v30 }
0x1430   :  { %14080 = vmatpush3.bf16.msra.mxu1 %v15179_v28  ;;  %14102 = vmatpush3.bf16.msra.mxu0 %v15180_v41  ;;  %v12529_v41 = vld [vmem:[%s18886_s5 + $0x21] ss:$4 sm:$0xf] }
0x1431   :  { %14081 = vmatprep.subr.bf16.mxu1 %v15181_v48  ;;  %14103 = vmatprep.subr.bf16.mxu0 %v15182_v49 }
0x1434   :  { %14082 = vmatpush3.bf16.msra.mxu1 %v15183_v54  ;;  %14104 = vmatpush3.bf16.msra.mxu0 %v15184_v55 }
0x1435   :  { %14083 = vmatprep.subr.bf16.mxu1 %v15185_v23  ;;  %14105 = vmatprep.subr.bf16.mxu0 %v15186_v52  ;;  %v5434_v52 = vrot.slane %v12529_v41, %v16154_v53 }
0x1438   :  { %14084 = vmatpush3.bf16.msra.mxu1 %v15187_v42  ;;  %14106 = vmatpush3.bf16.msra.mxu0 %v15188_v31  ;;  %v5442_v42 = vrot.slane %v12529_v41, %v16156_v25 }
0x1439   :  { %14085 = vmatprep.subr.bf16.mxu1 %v15189_v45  ;;  %14107 = vmatprep.subr.bf16.mxu0 %v15190_v50  ;;  %v5438_v50 = vrot.slane %v12529_v41, %v16158_v27 }
0x143c   :  { %14086 = vmatpush3.bf16.msra.mxu1 %v15191_v37  ;;  %14108 = vmatpush3.bf16.msra.mxu0 %v15192_v29  ;;  %v5446_v37 = vrot.slane %v12529_v41, %v16160_v15  ;;  %v15205_v41 = vld [vmem:[%s18885_s4 + $0x740] sm:$0xff]  }
0x143d   :  { %14087 = vmatprep.subr.bf16.mxu1 %v15193_v51  ;;  %14109 = vmatprep.subr.bf16.mxu0 %v15194_v32 }
0x1440   :  { %14088 = vmatpush3.bf16.msra.mxu1 %v15195_v57  ;;  %14110 = vmatpush3.bf16.msra.mxu0 %v15196_v3 }
0x1441   :  { %14089 = vmatprep.subr.bf16.mxu1 %v15197_v4  ;;  %14111 = vmatprep.subr.bf16.mxu0 %v15198_v58 }
0x1444   :  { %14090 = vmatpush3.bf16.msra.mxu1 %v15199_v59  ;;  %14112 = vmatpush3.bf16.msra.mxu0 %v15200_v60 }
0x1445   :  { %14091 = vmatprep.subr.bf16.mxu1 %v15201_v62  ;;  %14113 = vmatprep.subr.bf16.mxu0 %v15202_v33 }
0x1448   :  { %14092 = vmatpush3.bf16.msra.mxu1 %v15203_v34  ;;  %14114 = vmatpush3.bf16.msra.mxu0 %v15204_v35 }
0x1449   :  { %6000 = vmatprep.subr.bf16.mxu1 %v12646_v1  ;;  %6043 = vmatprep.subr.bf16.mxu0 %v12648_v43 }
0x14d6   :  { %v14005_v44 = vpop.f32.mrb[112].mxu1  ;;  %v14027_v7 = vpop.f32.mrb[116].mxu0 }
0x14d7   :  { %v14006_v5 = vpop.f32.mrb[113].mxu1  ;;  %v14028_v38 = vpop.f32.mrb[117].mxu0 }
0x14d8   :  { %v14007_v12 = vadd.f32 %v14006_v5, %v14005_v44  ;;  %v14029_v13 = vadd.f32 %v14028_v38, %v14027_v7  ;;  %v14008_v9 = vpop.f32.mrb[114].mxu1  ;;  %v14030_v14 = vpop.f32.mrb[118].mxu0 }
0x14d9   :  { %v14009_v24 = vpop.f32.mrb[115].mxu1  ;;  %v14031_v16 = vpop.f32.mrb[119].mxu0 }
0x14da   :  { %v5140_v19 = vadd.f32 %v14029_v13, %v14007_v12  ;;  %v14010_v18 = vadd.f32 %v14009_v24, %v14008_v9  ;;  %v14032_v46 = vadd.f32 %v14031_v16, %v14030_v14  ;;  %v12640_v9 = vld [vmem:[%s18884_s3 + $0x1b0] sm:$0xff] }
0x14db   :  { %v12642_v14 = vld [vmem:[%s18884_s3 + $0x1f0] sm:$0xff] }
0x14dc   :  { %v5143_v8 = vadd.f32 %v14032_v46, %v14010_v18  ;;  %v12641_v46 = vld [vmem:[%s18884_s3 + $0x1b8] sm:$0xff] }
0x14f6   :  { %v14049_v26 = vpop.f32.mrb[116].mxu1  ;;  %v14071_v39 = vpop.f32.mrb[120].mxu0 }
0x14f7   :  { %v14050_v40 = vpop.f32.mrb[117].mxu1  ;;  %v14072_v20 = vpop.f32.mrb[121].mxu0 }
0x14f8   :  { %v14051_v21 = vadd.f32 %v14050_v40, %v14049_v26  ;;  %v14073_v22 = vadd.f32 %v14072_v20, %v14071_v39  ;;  %v14052_v30 = vpop.f32.mrb[118].mxu1  ;;  %v14074_v28 = vpop.f32.mrb[122].mxu0 }
0x14f9   :  { %v14053_v48 = vpop.f32.mrb[119].mxu1  ;;  %v14075_v49 = vpop.f32.mrb[123].mxu0 }
0x14fa   :  { %v5373_v54 = vadd.f32 %v14051_v21, %v5140_v19  ;;  %v14054_v55 = vadd.f32 %v14053_v48, %v14052_v30  ;;  %v14076_v23 = vadd.f32 %v14075_v49, %v14074_v28  ;;  %v12650_v21 = vcombine.high %v12640_v9, %v12642_v14  ;;  %v15206_v48 = vld [vmem:[%s18885_s4 + $0x7c0] sm:$0xff]   ;;  %v15213_v49 = vld [vmem:[%s18885_s4 + $0x750] sm:$0xff]  }
0x14fb   :  { %v12649_v30 = vcombine.low %v12640_v9, %v12642_v14 }
0x14fc   :  { %v17267_v31 = vadd.f32 %v14073_v22, %v5373_v54  ;;  %v5376_v45 = vadd.f32 %v14054_v55, %v5143_v8  ;;  %v12643_v8 = vld [vmem:[%s18884_s3 + $0x1f8] sm:$0xff]  ;;  %v15215_v54 = vld [vmem:[%s18885_s4 + $0x710] sm:$0xff]  }
0x14fd   :  { %v12652_v22 = vcombine.high %v12641_v46, %v12643_v8  ;;  %v12651_v28 = vcombine.low %v12641_v46, %v12643_v8  ;;  %v15216_v55 = vld [vmem:[%s18885_s4 + $0x790] sm:$0xff]  }
0x14fe   :  { %v17271_v29 = vadd.f32 %v14076_v23, %v5376_v45  ;;  %v5525_v51 = vpop.f32.mrb[120].mxu1  ;;  %v5568_v32 = vpop.f32.mrb[124].mxu0  ;;  %v15217_v23 = vld [vmem:[%s18885_s4 + $0x758] sm:$0xff]  }
0x14ff   :  { %v5526_v57 = vadd.f32 %v5525_v51, %v5434_v52  ;;  %v5569_v3 = vadd.f32 %v5568_v32, %v5442_v42  ;;  %v5527_v4 = vpop.f32.mrb[121].mxu1  ;;  %v5570_v58 = vpop.f32.mrb[125].mxu0  ;;  %v15220_v45 = vld [vmem:[%s18885_s4 + $0x798] sm:$0xff]   ;;  %v15223_v51 = vld [vmem:[%s18885_s4 + $0x720] sm:$0xff]  }
0x1500   :  { %v5528_v59 = vadd.f32 %v5527_v4, %v5438_v50  ;;  %v5571_v60 = vadd.f32 %v5570_v58, %v5446_v37  ;;  %v5529_v62 = vpop.f32.mrb[122].mxu1  ;;  %v5572_v33 = vpop.f32.mrb[126].mxu0  ;;  %v15224_v32 = vld [vmem:[%s18885_s4 + $0x7a0] sm:$0xff]   ;;  %v15227_v4 = vld [vmem:[%s18885_s4 + $0x728] sm:$0xff]  }
0x1501   :  { %v5530_v34 = vadd.f32 %v5529_v62, %v5434_v52  ;;  %v5573_v35 = vadd.f32 %v5572_v33, %v5442_v42  ;;  %v5531_v1 = vpop.f32.mrb[123].mxu1  ;;  %v5574_v43 = vpop.f32.mrb[127].mxu0  ;;  %v5577_v5 = vmax.f32 %v5526_v57, 0.0  ;;  %v5579_v38 = vmax.f32 %v5569_v3, 0.0  ;;  %v15218_v52 = vld [vmem:[%s18885_s4 + $0x7d8] sm:$0xff]   ;;  %v15225_v57 = vld [vmem:[%s18885_s4 + $0x768] sm:$0xff]  }
0x1502   :  { %v5532_v44 = vadd.f32 %v5531_v1, %v5438_v50  ;;  %v5575_v7 = vadd.f32 %v5574_v43, %v5446_v37  ;;  %v5578_v24 = vmax.f32 %v5528_v59, 0.0  ;;  %v5580_v16 = vmax.f32 %v5571_v60, 0.0  ;;  %v15219_v42 = vld [vmem:[%s18885_s4 + $0x718] sm:$0xff]   ;;  %v15221_v50 = vld [vmem:[%s18885_s4 + $0x760] sm:$0xff]   ;;  %v15226_v3 = vld [vmem:[%s18885_s4 + $0x7e8] sm:$0xff]  }
0x1503   :  { %v5581_v12 = vmax.f32 %v5530_v34, 0.0  ;;  %v5583_v13 = vmax.f32 %v5573_v35, 0.0  ;;  %v15222_v37 = vld [vmem:[%s18885_s4 + $0x7e0] sm:$0xff]   ;;  %v15228_v58 = vld [vmem:[%s18885_s4 + $0x7a8] sm:$0xff]   ;;  %v15229_v59 = vld [vmem:[%s18885_s4 + $0x770] sm:$0xff]  }
0x1504   :  { %v5582_v19 = vmax.f32 %v5532_v44, 0.0  ;;  %v5584_v18 = vmax.f32 %v5575_v7, 0.0  ;;  %v15230_v60 = vld [vmem:[%s18885_s4 + $0x7f0] sm:$0xff]   ;;  %v15233_v34 = vld [vmem:[%s18885_s4 + $0x778] sm:$0xff]  }
0x1505   :  { %v5585_v26 = vpack.c.bf16 %v5581_v12, %v5577_v5  ;;  %v5587_v39 = vpack.c.bf16 %v5583_v13, %v5579_v38  ;;  %v15231_v62 = vld [vmem:[%s18885_s4 + $0x730] sm:$0xff]   ;;  %v15234_v35 = vld [vmem:[%s18885_s4 + $0x7f8] sm:$0xff]  }
0x1506   :  { %v5586_v40 = vpack.c.bf16 %v5582_v19, %v5578_v24  ;;  %v5588_v20 = vpack.c.bf16 %v5584_v18, %v5580_v16  ;;  %v15232_v33 = vld [vmem:[%s18885_s4 + $0x7b0] sm:$0xff]   ;;  %v15235_v1 = vld [vmem:[%s18885_s4 + $0x738] sm:$0xff]  }
0x1507   :  { %v15236_v43 = vld [vmem:[%s18885_s4 + $0x7b8] sm:$0xff]  }
0x1508   :  { %5877 = vmatprep.mubr.bf16.mxu1 %v5586_v40  ;;  %5918 = vmatprep.mubr.bf16.mxu0 %v5588_v20  ;;  %v12644_v24 = vld [vmem:[%s18886_s5 + $0x31] ss:$4 sm:$0xf] }
0x1509   :  { %5878 = vmatmul.mubr.bf16.vlgmr.msra.gmra.mrb[124].mxu1 %v5585_v26  ;;  %5919 = vmatmul.mubr.bf16.vlgmr.msra.gmra.mrb[128].mxu0 %v5587_v39  ;;  %v5943_v26 = vrot.slane %v12644_v24, %v16154_v53  ;;  %v5951_v39 = vrot.slane %v12644_v24, %v16156_v25 }
0x150a   :  { %6001 = vmatpush1.bf16.msra.mxu1 %v12645_v47  ;;  %6044 = vmatpush1.bf16.msra.mxu0 %v12647_v6  ;;  %v15211_v47 = vld [vmem:[%s18885_s4 + $0x708] sm:$0xff]  }
0x150b   :  { %6002 = vmatprep.subr.bf16.mxu1 %v12650_v21  ;;  %6045 = vmatprep.subr.bf16.mxu0 %v12652_v22  ;;  %v15212_v6 = vld [vmem:[%s18885_s4 + $0x788] sm:$0xff]   ;;  %v5947_v21 = vrot.slane %v12644_v24, %v16158_v27  ;;  %v5955_v22 = vrot.slane %v12644_v24, %v16160_v15  ;;  %v15636_v24 = vld [vmem:[%s18882_s6 + $0x5] ss:$0 sm:$0xff] }
0x150c   :  { %6032 = vmatprep.mubr.bf16.mxu1 %v15650_v36  ;;  %6075 = vmatprep.mubr.bf16.mxu0 %v15650_v36 }
0x150e   :  { %6003 = vmatpush1.bf16.msra.mxu1 %v12649_v30  ;;  %6046 = vmatpush1.bf16.msra.mxu0 %v12651_v28 }
0x150f   :  { %14121 = vmatprep.subr.bf16.mxu1 %v15205_v41  ;;  %14143 = vmatprep.subr.bf16.mxu0 %v15206_v48 }
0x1511   :  { %12653 = vmatmul.mubr.msk.bf16.vlgmr.msra.gmra.mrb[128].mxu1 %vm124_vm2, %v16884_v17  ;;  %12654 = vmatmul.mubr.msk.bf16.vlgmr.msra.gmra.mrb[132].mxu0 %vm124_vm2, %v16884_v17  ;;  %v15214_v17 = vld [vmem:[%s18885_s4 + $0x7d0] sm:$0xff]  }
0x1512   :  { %14122 = vmatpush3.bf16.msra.mxu1 %v15207_v61  ;;  %14144 = vmatpush3.bf16.msra.mxu0 %v15208_v63 }
0x1513   :  { %14123 = vmatprep.subr.bf16.mxu1 %v15209_v11  ;;  %14145 = vmatprep.subr.bf16.mxu0 %v15210_v2 }
0x1516   :  { %14124 = vmatpush3.bf16.msra.mxu1 %v15211_v47  ;;  %14146 = vmatpush3.bf16.msra.mxu0 %v15212_v6 }
0x1517   :  { %14125 = vmatprep.subr.bf16.mxu1 %v15213_v49  ;;  %14147 = vmatprep.subr.bf16.mxu0 %v15214_v17 }
0x151a   :  { %14126 = vmatpush3.bf16.msra.mxu1 %v15215_v54  ;;  %14148 = vmatpush3.bf16.msra.mxu0 %v15216_v55 }
0x151b   :  { %14127 = vmatprep.subr.bf16.mxu1 %v15217_v23  ;;  %14149 = vmatprep.subr.bf16.mxu0 %v15218_v52 }
0x151e   :  { %14128 = vmatpush3.bf16.msra.mxu1 %v15219_v42  ;;  %14150 = vmatpush3.bf16.msra.mxu0 %v15220_v45 }
0x151f   :  { %14129 = vmatprep.subr.bf16.mxu1 %v15221_v50  ;;  %14151 = vmatprep.subr.bf16.mxu0 %v15222_v37 }
0x1522   :  { %14130 = vmatpush3.bf16.msra.mxu1 %v15223_v51  ;;  %14152 = vmatpush3.bf16.msra.mxu0 %v15224_v32 }
0x1523   :  { %14131 = vmatprep.subr.bf16.mxu1 %v15225_v57  ;;  %14153 = vmatprep.subr.bf16.mxu0 %v15226_v3 }
0x1526   :  { %14132 = vmatpush3.bf16.msra.mxu1 %v15227_v4  ;;  %14154 = vmatpush3.bf16.msra.mxu0 %v15228_v58 }
0x1527   :  { %14133 = vmatprep.subr.bf16.mxu1 %v15229_v59  ;;  %14155 = vmatprep.subr.bf16.mxu0 %v15230_v60 }
0x152a   :  { %14134 = vmatpush3.bf16.msra.mxu1 %v15231_v62  ;;  %14156 = vmatpush3.bf16.msra.mxu0 %v15232_v33 }
0x152b   :  { %14135 = vmatprep.subr.bf16.mxu1 %v15233_v34  ;;  %14157 = vmatprep.subr.bf16.mxu0 %v15234_v35 }
0x152e   :  { %14136 = vmatpush3.bf16.msra.mxu1 %v15235_v1  ;;  %14158 = vmatpush3.bf16.msra.mxu0 %v15236_v43 }
0x152f   :  { %14794 = vmatprep.subr.bf16.mxu1 %v15639_v0  ;;  %14802 = vmatprep.subr.bf16.mxu0 %v15639_v0 }
0x15dc   :  { %v14093_v44 = vpop.f32.mrb[124].mxu1  ;;  %v14115_v7 = vpop.f32.mrb[128].mxu0 }
0x15dd   :  { %v14094_v5 = vpop.f32.mrb[125].mxu1  ;;  %v14116_v38 = vpop.f32.mrb[129].mxu0 }
0x15de   :  { %v14095_v12 = vadd.f32 %v14094_v5, %v14093_v44  ;;  %v14117_v13 = vadd.f32 %v14116_v38, %v14115_v7  ;;  %v14096_v9 = vpop.f32.mrb[126].mxu1  ;;  %v14118_v14 = vpop.f32.mrb[130].mxu0 }
0x15df   :  { %v14097_v16 = vpop.f32.mrb[127].mxu1  ;;  %v14119_v19 = vpop.f32.mrb[131].mxu0 }
0x15e0   :  { %v5921_v18 = vadd.f32 %v14117_v13, %v14095_v12  ;;  %v14098_v46 = vadd.f32 %v14097_v16, %v14096_v9  ;;  %v14120_v8 = vadd.f32 %v14119_v19, %v14118_v14 }
0x15e2   :  { %v5927_v40 = vadd.f32 %v5921_v18, %v17267_v31  ;;  %v5924_v20 = vadd.f32 %v14120_v8, %v14098_v46 }
0x15e4   :  { %v5928_v30 = vadd.f32 %v5924_v20, %v17271_v29  ;;  %v6034_v28 = vpop.f32.mrb[128].mxu1  ;;  %v6077_v41 = vpop.f32.mrb[132].mxu0 }
0x15e5   :  { %v6035_v48 = vadd.f32 %v6034_v28, %v5943_v26  ;;  %v6078_v61 = vadd.f32 %v6077_v41, %v5951_v39  ;;  %v6036_v63 = vpop.f32.mrb[129].mxu1  ;;  %v6079_v11 = vpop.f32.mrb[133].mxu0 }
0x15e6   :  { %v6037_v2 = vadd.f32 %v6036_v63, %v5947_v21  ;;  %v6080_v47 = vadd.f32 %v6079_v11, %v5955_v22  ;;  %v6038_v6 = vpop.f32.mrb[130].mxu1  ;;  %v6081_v49 = vpop.f32.mrb[134].mxu0 }
0x15e7   :  { %v6039_v17 = vadd.f32 %v6038_v6, %v5943_v26  ;;  %v6082_v54 = vadd.f32 %v6081_v49, %v5951_v39  ;;  %v6040_v31 = vpop.f32.mrb[131].mxu1  ;;  %v6083_v55 = vpop.f32.mrb[135].mxu0  ;;  %v6086_v42 = vmax.f32 %v6035_v48, 0.0  ;;  %v6088_v45 = vmax.f32 %v6078_v61, 0.0 }
0x15e8   :  { %v6041_v23 = vadd.f32 %v6040_v31, %v5947_v21  ;;  %v6084_v52 = vadd.f32 %v6083_v55, %v5955_v22  ;;  %v6087_v37 = vmax.f32 %v6037_v2, 0.0  ;;  %v6089_v51 = vmax.f32 %v6080_v47, 0.0 }
0x15e9   :  { %v6090_v50 = vmax.f32 %v6039_v17, 0.0  ;;  %v6092_v29 = vmax.f32 %v6082_v54, 0.0 }
0x15ea   :  { %v6091_v32 = vmax.f32 %v6041_v23, 0.0  ;;  %v6093_v57 = vmax.f32 %v6084_v52, 0.0 }
0x15eb   :  { %v6094_v3 = vpack.c.bf16 %v6090_v50, %v6086_v42  ;;  %v6096_v4 = vpack.c.bf16 %v6092_v29, %v6088_v45 }
0x15ec   :  { %v6095_v58 = vpack.c.bf16 %v6091_v32, %v6087_v37  ;;  %v6097_v59 = vpack.c.bf16 %v6093_v57, %v6089_v51  ;;  %v12751_v51 = vld [vmem:[%s18882_s6 + $0x9] ss:$0 sm:$0xff] }
0x15ee   :  { %6386 = vmatprep.mubr.bf16.mxu1 %v6095_v58  ;;  %6427 = vmatprep.mubr.bf16.mxu0 %v6097_v59 }
0x15ef   :  { %6387 = vmatmul.mubr.bf16.vlgmr.msra.gmra.mrb[132].mxu1 %v6094_v3  ;;  %6428 = vmatmul.mubr.bf16.vlgmr.msra.gmra.mrb[136].mxu0 %v6096_v4 }
0x15f0   :  { %14798 = vmatprep.mubr.msk.bf16.mxu1 %vm15640_vm0, %v15639_v0  ;;  %14806 = vmatprep.mubr.msk.bf16.mxu0 %vm15640_vm0, %v15639_v0 }
0x16c2   :  { %v14137_v60 = vpop.f32.mrb[132].mxu1  ;;  %v14159_v62 = vpop.f32.mrb[136].mxu0 }
0x16c3   :  { %v14138_v33 = vpop.f32.mrb[133].mxu1  ;;  %v14160_v34 = vpop.f32.mrb[137].mxu0 }
0x16c4   :  { %v14139_v35 = vadd.f32 %v14138_v33, %v14137_v60  ;;  %v14161_v1 = vadd.f32 %v14160_v34, %v14159_v62  ;;  %v14140_v43 = vpop.f32.mrb[134].mxu1  ;;  %v14162_v44 = vpop.f32.mrb[138].mxu0 }
0x16c5   :  { %v14141_v7 = vpop.f32.mrb[135].mxu1  ;;  %v14163_v5 = vpop.f32.mrb[139].mxu0 }
0x16c6   :  { %v6430_v38 = vadd.f32 %v14161_v1, %v14139_v35  ;;  %v14142_v12 = vadd.f32 %v14141_v7, %v14140_v43  ;;  %v14164_v13 = vadd.f32 %v14163_v5, %v14162_v44  ;;  %v15237_v43 = vld [vmem:[%s18887_s9] sm:$0xff]   ;;  %v15238_v44 = vld [vmem:[%s18887_s9 + $0x8] sm:$0xff]  }
0x16c7   :  { %14795 = vmatpush3.bf16.msra.mxu1 %v15237_v43  ;;  %v15239_v7 = vld [vmem:[%s18880_s1 + $0x20] sm:$0xff]  }
0x16c8   :  { %v6436_v9 = vadd.f32 %v6430_v38, %v5927_v40  ;;  %v6433_v14 = vadd.f32 %v14164_v13, %v14142_v12  ;;  %14796 = vmatprep.subr.bf16.mxu1 %v15639_v0  ;;  %14803 = vmatpush3.bf16.msra.mxu0 %v15239_v7 }
0x16c9   :  { %14804 = vmatprep.subr.bf16.mxu0 %v15639_v0 }
0x16ca   :  { %v6438_v16 = vadd.f32 %v15636_v24, %v6436_v9  ;;  %v6437_v19 = vadd.f32 %v6433_v14, %v5928_v30 }
0x16cb   :  { %14797 = vmatpush3.bf16.msra.mxu1 %v15238_v44 }
0x16cc   :  { %v6439_v18 = vadd.f32 %v15636_v24, %v6437_v19  ;;  %v6440_v46 = vadd.f32 %v6438_v16, %v16878_v56  ;;  %v12752_v56 = vld [vmem:[%s18881_s7] ss:$0 sm:$0xff]  ;;  %14810 = vmatprep.subr.bf16.mxu1 %v15639_v0 }
0x16ce   :  { %v6441_v8 = vadd.f32 %v6439_v18, %v16880_v10  ;;  %v6451_v20 = vmul.f32 %v6440_v46, %v6440_v46  ;;  %v6443_v22 = vsel %vm124_vm2, %v6440_v46, 0.0 }
0x16d0   :  { %v6446_v26 = vsel %vm124_vm2, %v6441_v8, 0.0  ;;  %v6452_v39 = vmul.f32 %v6441_v8, %v6441_v8  ;;  %v6453_v40 = vsel %vm124_vm2, %v6451_v20, 0.0 }
0x16d1   :  { %6447 = vadd.xlane.f32.xlu1 %v6446_v26 }
0x16d2   :  { %v6456_v21 = vsel %vm124_vm2, %v6452_v39, 0.0 }
0x16d3   :  { %6457 = vadd.xlane.f32.xlu0 %v6456_v21 }
0x16d5   :  { %6454 = vadd.xlane.f32.xlu1 %v6453_v40 }
0x16d7   :  { %6444 = vadd.xlane.f32.xlu0 %v6443_v22 }
0x16ed   :  { %6475 = vrot.lane.b32.xlu0 %v15636_v24, %s15648_s21 }
0x16f1   :  { %6551 = vrot.lane.b32.xlu0 %v12752_v56, %s15648_s21 }
0x16f5   :  { %6583 = vrot.lane.b32.xlu0 %v12752_v56, %s15644_s13 }
0x175e   :  { %v6448_v10 = vpop.xlane.xlu1 %6447 }
0x175f   :  { %v6450_v30 = vmul.f32 0.03125, %v6448_v10 }
0x1760   :  { %v6458_v28 = vpop.xlane.xlu0 %6457 }
0x1761   :  { %v6462_v41 = vmul.f32 %v6450_v30, %v6450_v30  ;;  %v6460_v48 = vmul.f32 0.03125, %v6458_v28  ;;  %v6468_v23 = vsub.f32 %v6441_v8, %v6450_v30 }
0x1762   :  { %v6455_v63 = vpop.xlane.xlu1 %6454 }
0x1763   :  { %v6464_v61 = vsub.f32 %v6460_v48, %v6462_v41  ;;  %v6459_v49 = vmul.f32 0.03125, %v6455_v63 }
0x1764   :  { %v6445_v11 = vpop.xlane.xlu0 %6444 }
0x1765   :  { %v6466_v2 = vmax.f32 %v6464_v61, 0.0  ;;  %v6449_v47 = vmul.f32 0.03125, %v6445_v11 }
0x1767   :  { %v6470_v6 = vadd.f32 1e-05, %v6466_v2  ;;  %v6461_v17 = vmul.f32 %v6449_v47, %v6449_v47  ;;  %v6467_v50 = vsub.f32 %v6440_v46, %v6449_v47 }
0x1768   :  { %v6476_v45 = vpop.permute.xlu0 %6475 }
0x1769   :  { %15585 = vrsqrt.f32 %v6470_v6  ;;  %v6463_v54 = vsub.f32 %v6459_v49, %v6461_v17 }
0x176b   :  { %v6465_v31 = vmax.f32 %v6463_v54, 0.0 }
0x176c   :  { %v6552_v61 = vpop.permute.xlu0 %6551 }
0x176d   :  { %v6469_v55 = vadd.f32 1e-05, %v6465_v31 }
0x176f   :  { %15587 = vrsqrt.f32 %v6469_v55 }
0x1773   :  { %v15586_v52 = vpop.eup %15585 }
0x1774   :  { %v6474_v42 = vmul.f32 %v15586_v52, %v6468_v23 }
0x1776   :  { %v6479_v29 = vmul.f32 %v6476_v45, %v6474_v42 }
0x1778   :  { %v6485_v3 = vadd.f32 %v12751_v51, %v6479_v29 }
0x1779   :  { %v15588_v37 = vpop.eup %15587 }
0x177a   :  { %v6473_v32 = vmul.f32 %v15588_v37, %v6467_v50  ;;  %v6489_v59 = vrot.slane %v6485_v3, 7  ;;  %v6503_v60 = vmul.f32 %v6485_v3, %v6485_v3  ;;  %v6584_v50 = vpop.permute.xlu0 %6583 }
0x177c   :  { %v6478_v57 = vmul.f32 %v6476_v45, %v6473_v32  ;;  %v6497_v62 = vsel %vm6496_vm7, %v6489_v59, 0.0  ;;  %v6506_v33 = vrot.slane %v6503_v60, 7  ;;  %v15240_v45 = vld [vmem:[%s18880_s1 + $0x28] sm:$0xff]  }
0x177d   :  { %14805 = vmatpush3.bf16.msra.mxu0 %v15240_v45 }
0x177e   :  { %v6484_v4 = vadd.f32 %v12751_v51, %v6478_v57  ;;  %v6512_v34 = vsel %vm6496_vm7, %v6506_v33, 0.0  ;;  %14816 = vmatprep.subr.bf16.mxu0 %v15639_v0 }
0x1780   :  { %v6493_v58 = vsel %vm6492_vm6, %v6484_v4, 0.0  ;;  %v6502_v35 = vmul.f32 %v6484_v4, %v6484_v4 }
0x1781   :  { %6494 = vadd.xlane.f32.xlu1 %v6493_v58 }
0x1782   :  { %v6509_v1 = vsel %vm6492_vm6, %v6502_v35, 0.0 }
0x1785   :  { %6498 = vadd.xlane.f32.xlu1 %v6497_v62 }
0x1789   :  { %6513 = vadd.xlane.f32.xlu1 %v6512_v34 }
0x178d   :  { %6510 = vadd.xlane.f32.xlu1 %v6509_v1 }
0x179e   :  { %6546 = vrot.lane.b32.xlu1 %v12752_v56, %s15645_s14 }
0x180e   :  { %v6495_v5 = vpop.xlane.xlu1 %6494 }
0x180f   :  { %v6500_v9 = vmul.f32 0.03125, %v6495_v5 }
0x1811   :  { %v6517_v18 = vmul.f32 %v6500_v9, %v6500_v9  ;;  %v6528_v28 = vsub.f32 %v6484_v4, %v6500_v9  ;;  %v17456_v4 = vld [vmem:[%s18882_s6 + $0x2] ss:$0 sm:$0xff] }
0x1812   :  { %v6499_v38 = vpop.xlane.xlu1 %6498 }
0x1813   :  { %v6501_v12 = vmul.f32 0.03125, %v6499_v38 }
0x1815   :  { %v6518_v14 = vmul.f32 %v6501_v12, %v6501_v12  ;;  %v6525_v40 = vrot.slane %v6501_v12, 1 }
0x1816   :  { %v6514_v13 = vpop.xlane.xlu1 %6513 }
0x1817   :  { %v6516_v24 = vmul.f32 0.03125, %v6514_v13  ;;  %v6529_v56 = vsub.f32 %v6485_v3, %v6525_v40 }
0x1819   :  { %v6520_v16 = vsub.f32 %v6516_v24, %v6518_v14 }
0x181a   :  { %v6511_v19 = vpop.xlane.xlu1 %6510 }
0x181b   :  { %v6522_v46 = vmax.f32 %v6520_v16, 0.0  ;;  %v6515_v8 = vmul.f32 0.03125, %v6511_v19 }
0x181d   :  { %v6531_v26 = vadd.f32 1e-05, %v6522_v46  ;;  %v6519_v39 = vsub.f32 %v6515_v8, %v6517_v18 }
0x181e   :  { %v6547_v30 = vpop.permute.xlu1 %6546 }
0x181f   :  { %15589 = vrsqrt.f32 %v6531_v26  ;;  %v6521_v20 = vmax.f32 %v6519_v39, 0.0 }
0x1821   :  { %v6530_v21 = vadd.f32 1e-05, %v6521_v20 }
0x1823   :  { %15591 = vrsqrt.f32 %v6530_v21 }
0x1829   :  { %v15590_v22 = vpop.eup %15589 }
0x182a   :  { %v6536_v10 = vrot.slane %v15590_v22, 1 }
0x182c   :  { %v6540_v41 = vmul.f32 %v6536_v10, %v6529_v56 }
0x182d   :  { %v15592_v48 = vpop.eup %15591 }
0x182e   :  { %v6539_v63 = vmul.f32 %v15592_v48, %v6528_v28  ;;  %v6550_v11 = vmul.f32 %v6547_v30, %v6540_v41 }
0x1830   :  { %v6549_v2 = vmul.f32 %v6547_v30, %v6539_v63  ;;  %v6555_v47 = vadd.f32 %v6552_v61, %v6550_v11 }
0x1832   :  { %v6554_v6 = vadd.f32 %v6552_v61, %v6549_v2  ;;  %v6557_v49 = vpack.c.bf16 %v6555_v47, %v6555_v47 }
0x1834   :  { %v6556_v17 = vpack.c.bf16 %v6554_v6, %v6554_v6  ;;  %v6565_v54 = vunpack.c.l.b16 %v6557_v49 }
0x1836   :  { %v6564_v31 = vunpack.c.l.b16 %v6556_v17  ;;  %v6567_v23 = vrot.slane %v6565_v54, 6 }
0x1838   :  { %v6566_v55 = vrot.slane %v6564_v31, 7 }
0x183a   :  { %v6569_v52 = vsel %vm6568_vm8, %v6567_v23, %v6566_v55 }
0x183b   :  { %v6570_v42 = vpack.c.b16 %v6569_v52, %v6569_v52 }
0x183d   :  { %14799 = vmatmul.mubr.msk.bf16.vlgmr.msra.gmra.mrb[136].mxu1 %vm124_vm2, %v6570_v42 }
0x183e   :  { %14812 = vmatprep.mubr.msk.bf16.mxu1 %vm15640_vm0, %v15639_v0 }
0x1910   :  { %v6623_v29 = vpop.f32.mrb[136].mxu1 }
0x1911   :  { %v17446_v37 = vadd.f32 %v6623_v29, %v6584_v50  ;;  %v14800_v51 = vpop.f32.mrb[137].mxu1 }
0x1912   :  { %v6626_v32 = vpop.f32.mrb[138].mxu1 }
0x1913   :  { %v6629_v57 = vpack.c.bf16 %v17446_v37, %v17446_v37  ;;  %v14801_v3 = vpop.f32.mrb[139].mxu1 }
0x1915   :  { %14807 = vmatmul.mubr.msk.bf16.vlgmr.msra.gmra.mrb[140].mxu0 %vm124_vm2, %v6629_v57 }
0x1916   :  { %14818 = vmatprep.mubr.msk.bf16.mxu0 %vm15640_vm0, %v15639_v0 }
0x19e8   :  { %v6689_v58 = vpop.f32.mrb[140].mxu0 }
0x19e9   :  { %v6690_v59 = vadd.f32 %v17456_v4, %v6689_v58  ;;  %v14808_v60 = vpop.f32.mrb[141].mxu0 }
0x19ea   :  { %v6692_v62 = vpop.f32.mrb[142].mxu0 }
0x19eb   :  { %v17459_v33 = vpack.c.bf16 %v6690_v59, %v6690_v59  ;;  %v14809_v34 = vpop.f32.mrb[143].mxu0 }
0x19ed   :  { %6701 = vrot.lane.b32.xlu1 %v17459_v33, %s15643_s12  ;;  %6697 = vrot.lane.b32.xlu0 %v17459_v33, %s15642_s30 }
0x19f1   :  { %6699 = vrot.lane.b32.xlu0 %v17459_v33, %s15641_s29 }
0x19f5   :  { %6703 = vrot.lane.b32.xlu0 %v17459_v33, %s15644_s13 }
0x1a5f   :  { %v17469_v35 = vpop.permute.xlu0 %6697  ;;  %v17473_v1 = vpop.permute.xlu1 %6701 }
0x1a60   :  { %6751 = vrot.lane.b32.xlu1 %v17469_v35, %s15644_s13 }
0x1a63   :  { %v17475_v43 = vpop.permute.xlu0 %6699 }
0x1a64   :  { %6847 = vrot.lane.b32.xlu1 %v17473_v1, %s15644_s13  ;;  %6799 = vrot.lane.b32.xlu0 %v17475_v43, %s15644_s13 }
0x1a67   :  { %v6704_v44 = vpop.permute.xlu0 %6703 }
0x1a68   :  { %v6709_v7 = vsel %vm187_vm3, %v6704_v44, 0 }
0x1a69   :  { %14811 = vmatpush3.bf16.xpose.msra.mxu1 %v6709_v7 }
0x1a6a   :  { %14822 = vmatprep.subr.bf16.mxu1 %v15639_v0 }
0x1a70   :  { %14813 = vmatmul.mubr.msk.bf16.vlgmr.msra.gmra.mrb[140].mxu1 %vm187_vm3, %v17459_v33 }
0x1a71   :  { %14824 = vmatprep.mubr.msk.bf16.mxu1 %vm15640_vm0, %v15639_v0 }
0x1ad2   :  { %v6752_v5 = vpop.permute.xlu1 %6751 }
0x1ad3   :  { %v6757_v38 = vsel %vm187_vm3, %v6752_v5, 0 }
0x1ad4   :  { %14817 = vmatpush3.bf16.xpose.msra.mxu0 %v6757_v38 }
0x1ad5   :  { %14828 = vmatprep.subr.bf16.mxu0 %v15639_v0 }
0x1ad6   :  { %v6800_v12 = vpop.permute.xlu0 %6799  ;;  %v6848_v9 = vpop.permute.xlu1 %6847 }
0x1ad7   :  { %v6805_v13 = vsel %vm187_vm3, %v6800_v12, 0  ;;  %v6853_v14 = vsel %vm187_vm3, %v6848_v9, 0 }
0x1ad8   :  { %14823 = vmatpush3.bf16.xpose.msra.mxu1 %v6805_v13 }
0x1ad9   :  { %14834 = vmatprep.subr.bf16.mxu1 %v15639_v0 }
0x1adb   :  { %14819 = vmatmul.mubr.msk.bf16.vlgmr.msra.gmra.mrb[144].mxu0 %vm187_vm3, %v17469_v35 }
0x1adc   :  { %14829 = vmatpush3.bf16.xpose.msra.mxu0 %v6853_v14  ;;  %14830 = vmatprep.mubr.msk.bf16.mxu0 %vm15640_vm0, %v15639_v0 }
0x1add   :  { %14840 = vmatprep.subr.bf16.mxu0 %v15639_v0 }
0x1adf   :  { %14825 = vmatmul.mubr.msk.bf16.vlgmr.msra.gmra.mrb[144].mxu1 %vm187_vm3, %v17475_v43 }
0x1ae0   :  { %14836 = vmatprep.mubr.msk.bf16.mxu1 %vm15640_vm0, %v15639_v0 }
0x1ae3   :  { %14831 = vmatmul.mubr.msk.bf16.vlgmr.msra.gmra.mrb[148].mxu0 %vm187_vm3, %v17473_v1 }
0x1ae4   :  { %14842 = vmatprep.mubr.msk.bf16.mxu0 %vm15640_vm0, %v15639_v0 }
0x1b43   :  { %v6745_v24 = vpop.f32.mrb[140].mxu1 }
0x1b44   :  { %v6895_v16 = vmul.f32 0.35355338, %v6745_v24  ;;  %v14814_v19 = vpop.f32.mrb[141].mxu1 }
0x1b45   :  { %v6748_v18 = vpop.f32.mrb[142].mxu1 }
0x1b46   :  { %v14815_v46 = vpop.f32.mrb[143].mxu1  ;;  %v6900_v8 = vsel %vm6899_vm9, %v6895_v16, -inf }
0x1b47   :  { %6901 = vmax.xlane.f32.xlu0 %v6900_v8 }
0x1bae   :  { %v6793_v26 = vpop.f32.mrb[144].mxu0 }
0x1baf   :  { %v6896_v39 = vmul.f32 0.35355338, %v6793_v26  ;;  %v14820_v20 = vpop.f32.mrb[145].mxu0 }
0x1bb0   :  { %v6796_v21 = vpop.f32.mrb[146].mxu0 }
0x1bb1   :  { %v14821_v40 = vpop.f32.mrb[147].mxu0  ;;  %v6903_v22 = vsel %vm6899_vm9, %v6896_v39, -inf }
0x1bb2   :  { %v6841_v56 = vpop.f32.mrb[144].mxu1  ;;  %6904 = vmax.xlane.f32.xlu1 %v6903_v22 }
0x1bb3   :  { %v6897_v10 = vmul.f32 0.35355338, %v6841_v56  ;;  %v14826_v30 = vpop.f32.mrb[145].mxu1 }
0x1bb4   :  { %v6844_v28 = vpop.f32.mrb[146].mxu1 }
0x1bb5   :  { %v14827_v41 = vpop.f32.mrb[147].mxu1  ;;  %v6906_v48 = vsel %vm6899_vm9, %v6897_v10, -inf }
0x1bb6   :  { %6907 = vmax.xlane.f32.xlu0 %v6906_v48  ;;  %v6889_v61 = vpop.f32.mrb[148].mxu0  ;;  %v15241_v41 = vld [vmem:[%s18883_s2 + $0x20] sm:$0xff]   ;;  %v15242_v48 = vld [vmem:[%s18883_s2 + $0x28] sm:$0xff]  }
0x1bb7   :  { %v6898_v63 = vmul.f32 0.35355338, %v6889_v61  ;;  %v14832_v11 = vpop.f32.mrb[149].mxu0 }
0x1bb8   :  { %v6892_v2 = vpop.f32.mrb[150].mxu0 }
0x1bb9   :  { %v14833_v47 = vpop.f32.mrb[151].mxu0  ;;  %v6909_v6 = vsel %vm6899_vm9, %v6898_v63, -inf }
0x1bba   :  { %6910 = vmax.xlane.f32.xlu0 %v6909_v6 }
0x1bc3   :  { %6948 = vrot.lane.b32.xlu1 %v17459_v33, %s15645_s14 }
0x1bd4   :  { %v6902_v49 = vpop.xlane.xlu0 %6901 }
0x1bd5   :  { %v6912_v17 = vsub.f32 %v6895_v16, %v6902_v49 }
0x1bd7   :  { %v6916_v54 = vmul.f32 1.442695, %v6912_v17 }
0x1bd9   :  { %15593 = vpow2.f32 %v6916_v54 }
0x1be3   :  { %v15594_v31 = vpop.eup %15593 }
0x1be4   :  { %v6924_v55 = vsel %vm6899_vm9, %v15594_v31, 0.0 }
0x1be7   :  { %6925 = vadd.xlane.f32.xlu1 %v6924_v55 }
0x1c3f   :  { %v6905_v23 = vpop.xlane.xlu1 %6904 }
0x1c40   :  { %v6913_v52 = vsub.f32 %v6896_v39, %v6905_v23 }
0x1c42   :  { %v6918_v42 = vmul.f32 1.442695, %v6913_v52 }
0x1c43   :  { %v6908_v45 = vpop.xlane.xlu0 %6907  ;;  %v6949_v50 = vpop.permute.xlu1 %6948 }
0x1c44   :  { %15595 = vpow2.f32 %v6918_v42  ;;  %v6914_v29 = vsub.f32 %v6897_v10, %v6908_v45  ;;  %v6956_v51 = vsel %vm6954_vm10, %v6949_v50, 0 }
0x1c45   :  { %14835 = vmatpush3.bf16.msra.mxu1 %v6956_v51 }
0x1c46   :  { %v6920_v32 = vmul.f32 1.442695, %v6914_v29  ;;  %14846 = vmatprep.subr.bf16.mxu1 %v15639_v0 }
0x1c47   :  { %v6911_v57 = vpop.xlane.xlu0 %6910 }
0x1c48   :  { %15597 = vpow2.f32 %v6920_v32  ;;  %v6915_v3 = vsub.f32 %v6898_v63, %v6911_v57 }
0x1c4a   :  { %v6922_v58 = vmul.f32 1.442695, %v6915_v3 }
0x1c4c   :  { %15599 = vpow2.f32 %v6922_v58 }
0x1c4e   :  { %v15596_v59 = vpop.eup %15595 }
0x1c4f   :  { %v6927_v60 = vsel %vm6899_vm9, %v15596_v59, 0.0 }
0x1c50   :  { %6928 = vadd.xlane.f32.xlu0 %v6927_v60 }
0x1c52   :  { %v15598_v62 = vpop.eup %15597 }
0x1c53   :  { %v6930_v33 = vsel %vm6899_vm9, %v15598_v62, 0.0 }
0x1c54   :  { %6931 = vadd.xlane.f32.xlu1 %v6930_v33 }
0x1c56   :  { %v15600_v34 = vpop.eup %15599 }
0x1c57   :  { %v6933_v44 = vsel %vm6899_vm9, %v15600_v34, 0.0 }
0x1c58   :  { %6934 = vadd.xlane.f32.xlu0 %v6933_v44 }
0x1c65   :  { %7046 = vrot.lane.b32.xlu1 %v17475_v43, %s15645_s14 }
0x1c69   :  { %7094 = vrot.lane.b32.xlu1 %v17473_v1, %s15645_s14 }
0x1c6e   :  { %6998 = vrot.lane.b32.xlu0 %v17469_v35, %s15645_s14 }
0x1c74   :  { %v6926_v7 = vpop.xlane.xlu1 %6925 }
0x1c75   :  { %15601 = vrcp.f32 %v6926_v7  ;;  %v12780_v7 = vld [vmem:[%s18882_s6 + $0x6] ss:$0 sm:$0xff] }
0x1c7f   :  { %v15602_v5 = vpop.eup %15601 }
0x1c80   :  { %v6940_v38 = vmul.f32 %v15602_v5, %v15594_v31  ;;  %v12783_v5 = vld [vmem:[%s18884_s3 + $0x240] sm:$0xff] }
0x1c82   :  { %v6944_v12 = vpack.c.bf16 %v6940_v38, %v6940_v38  ;;  %v12782_v38 = vld [vmem:[%s18884_s3 + $0x208] sm:$0xff] }
0x1c84   :  { %14837 = vmatmul.mubr.msk.bf16.vlgmr.msra.gmra.mrb[148].mxu1 %vm6950_vm11, %v6944_v12 }
0x1c85   :  { %14848 = vmatprep.mubr.msk.bf16.mxu1 %vm15640_vm0, %v15639_v0 }
0x1cdd   :  { %v6929_v13 = vpop.xlane.xlu0 %6928 }
0x1cde   :  { %15603 = vrcp.f32 %v6929_v13 }
0x1ce1   :  { %v6932_v43 = vpop.xlane.xlu1 %6931 }
0x1ce2   :  { %15605 = vrcp.f32 %v6932_v43  ;;  %v12784_v43 = vld [vmem:[%s18884_s3 + $0x248] sm:$0xff] }
0x1ce5   :  { %v7047_v9 = vpop.permute.xlu1 %7046  ;;  %v6935_v1 = vpop.xlane.xlu0 %6934 }
0x1ce6   :  { %v7052_v14 = vsel %vm6954_vm10, %v7047_v9, 0  ;;  %15607 = vrcp.f32 %v6935_v1  ;;  %v12792_v9 = vcombine.low %v12782_v38, %v12784_v43  ;;  %v12793_v1 = vcombine.high %v12782_v38, %v12784_v43  ;;  %v15255_v38 = vld [vmem:[%s18885_s4 + $0x958] sm:$0xff]  }
0x1ce7   :  { %14847 = vmatpush3.bf16.msra.mxu1 %v7052_v14  ;;  %v12785_v14 = vld [vmem:[%s18884_s3 + $0x280] sm:$0xff]  ;;  %v15258_v43 = vld [vmem:[%s18885_s4 + $0x998] sm:$0xff]  }
0x1ce8   :  { %v15604_v35 = vpop.eup %15603  ;;  %14858 = vmatprep.subr.bf16.mxu1 %v15639_v0 }
0x1ce9   :  { %v6941_v24 = vmul.f32 %v15604_v35, %v15596_v59  ;;  %v6999_v16 = vpop.permute.xlu0 %6998  ;;  %v7095_v18 = vpop.permute.xlu1 %7094  ;;  %v12787_v35 = vld [vmem:[%s18884_s3 + $0x2c0] sm:$0xff] }
0x1cea   :  { %v7004_v19 = vsel %vm6954_vm10, %v6999_v16, 0  ;;  %v7100_v39 = vsel %vm6954_vm10, %v7095_v18, 0  ;;  %v12795_v16 = vcombine.high %v12785_v14, %v12787_v35  ;;  %v12794_v18 = vcombine.low %v12785_v14, %v12787_v35  ;;  %v15261_v14 = vld [vmem:[%s18885_s4 + $0x920] sm:$0xff]  }
0x1ceb   :  { %14841 = vmatpush3.bf16.msra.mxu0 %v7004_v19  ;;  %v6945_v46 = vpack.c.bf16 %v6941_v24, %v6941_v24  ;;  %v12786_v24 = vld [vmem:[%s18884_s3 + $0x288] sm:$0xff]  ;;  %v15262_v35 = vld [vmem:[%s18885_s4 + $0x9a0] sm:$0xff]  }
0x1cec   :  { %v15606_v8 = vpop.eup %15605  ;;  %14852 = vmatprep.subr.bf16.mxu0 %v15639_v0  ;;  %v12788_v19 = vld [vmem:[%s18884_s3 + $0x2c8] sm:$0xff] }
0x1ced   :  { %v6942_v26 = vmul.f32 %v15606_v8, %v15598_v62  ;;  %v12797_v8 = vcombine.high %v12786_v24, %v12788_v19 }
0x1cee   :  { %14843 = vmatmul.mubr.msk.bf16.vlgmr.msra.gmra.mrb[152].mxu0 %vm6950_vm11, %v6945_v46  ;;  %v12796_v46 = vcombine.low %v12786_v24, %v12788_v19  ;;  %v15263_v24 = vld [vmem:[%s18885_s4 + $0x968] sm:$0xff]  }
0x1cef   :  { %14853 = vmatpush3.bf16.msra.mxu0 %v7100_v39  ;;  %v6946_v20 = vpack.c.bf16 %v6942_v26, %v6942_v26  ;;  %14854 = vmatprep.mubr.msk.bf16.mxu0 %vm15640_vm0, %v15639_v0  ;;  %v12864_v26 = vld [vmem:[%s18884_s3 + $0x210] sm:$0xff]  ;;  %v15265_v19 = vld [vmem:[%s18885_s4 + $0x928] sm:$0xff]  }
0x1cf0   :  { %v15608_v21 = vpop.eup %15607  ;;  %v12866_v39 = vld [vmem:[%s18884_s3 + $0x250] sm:$0xff] }
0x1cf1   :  { %v6943_v40 = vmul.f32 %v15608_v21, %v15600_v34  ;;  %14849 = vmatmul.mubr.msk.bf16.vlgmr.msra.gmra.mrb[152].mxu1 %vm6950_vm11, %v6946_v20  ;;  %v12865_v20 = vld [vmem:[%s18884_s3 + $0x218] sm:$0xff]  ;;  %v12874_v21 = vcombine.high %v12864_v26, %v12866_v39 }
0x1cf2   :  { %14862 = vmatprep.mubr.msk.bf16.mxu1 %vm15640_vm0, %v15639_v0  ;;  %14859 = vmatpush3.bf16.msra.mxu1 %v15241_v41 }
0x1cf3   :  { %v6947_v22 = vpack.c.bf16 %v6943_v40, %v6943_v40  ;;  %14860 = vmatprep.subr.bf16.mxu1 %v15639_v0  ;;  %v12867_v40 = vld [vmem:[%s18884_s3 + $0x258] sm:$0xff] }
0x1cf6   :  { %14855 = vmatmul.mubr.msk.bf16.vlgmr.msra.gmra.mrb[156].mxu0 %vm6950_vm11, %v6947_v22  ;;  %14861 = vmatpush3.bf16.msra.mxu1 %v15242_v48  ;;  %v12873_v22 = vcombine.low %v12864_v26, %v12866_v39  ;;  %v15269_v26 = vld [vmem:[%s18885_s4 + $0x930] sm:$0xff]  }
0x1cf7   :  { %7367 = vmatprep.mubr.bf16.mxu0 %v15650_v36  ;;  %7376 = vmatprep.subr.bf16.mxu1 %v12793_v1  ;;  %v15260_v1 = vld [vmem:[%s18885_s4 + $0x9e0] sm:$0xff]   ;;  %v15270_v39 = vld [vmem:[%s18885_s4 + $0x9b0] sm:$0xff]  }
0x1d57   :  { %v6992_v56 = vpop.f32.mrb[148].mxu1 }
0x1d58   :  { %v14838_v10 = vpop.f32.mrb[149].mxu1 }
0x1d59   :  { %v6995_v30 = vpop.f32.mrb[150].mxu1  ;;  %v12876_v10 = vcombine.high %v12865_v20, %v12867_v40 }
0x1d5a   :  { %v14839_v28 = vpop.f32.mrb[151].mxu1 }
0x1dc1   :  { %v7040_v61 = vpop.f32.mrb[152].mxu0 }
0x1dc2   :  { %7143 = vrot.lane.b32.xlu0 %v7040_v61, %s15646_s15  ;;  %v14844_v63 = vpop.f32.mrb[153].mxu0 }
0x1dc3   :  { %v7043_v11 = vpop.f32.mrb[154].mxu0 }
0x1dc4   :  { %v14845_v2 = vpop.f32.mrb[155].mxu0  ;;  %v7088_v47 = vpop.f32.mrb[152].mxu1 }
0x1dc5   :  { %7147 = vrot.lane.b32.xlu1 %v7088_v47, %s15647_s20  ;;  %v14850_v6 = vpop.f32.mrb[153].mxu1 }
0x1dc6   :  { %v7091_v49 = vpop.f32.mrb[154].mxu1 }
0x1dc7   :  { %v14851_v17 = vpop.f32.mrb[155].mxu1 }
0x1dc9   :  { %v7136_v54 = vpop.f32.mrb[156].mxu0  ;;  %7181 = vrot.lane.b32.xlu1 %v17456_v4, %s15648_s21 }
0x1dca   :  { %7151 = vrot.lane.b32.xlu0 %v7136_v54, %s15649_s22  ;;  %v14856_v31 = vpop.f32.mrb[157].mxu0 }
0x1dcb   :  { %v7139_v55 = vpop.f32.mrb[158].mxu0 }
0x1dcc   :  { %v14857_v23 = vpop.f32.mrb[159].mxu0  ;;  %v12868_v55 = vld [vmem:[%s18884_s3 + $0x290] sm:$0xff] }
0x1dcd   :  { %v12870_v23 = vld [vmem:[%s18884_s3 + $0x2d0] sm:$0xff] }
0x1e34   :  { %v7144_v52 = vpop.permute.xlu0 %7143 }
0x1e35   :  { %v7154_v45 = vsel %vm187_vm3, %v6992_v56, %v7144_v52  ;;  %v12875_v56 = vcombine.low %v12865_v20, %v12867_v40  ;;  %v12869_v52 = vld [vmem:[%s18884_s3 + $0x298] sm:$0xff] }
0x1e36   :  { %v15271_v20 = vld [vmem:[%s18885_s4 + $0x978] sm:$0xff]  }
0x1e37   :  { %v7148_v42 = vpop.permute.xlu1 %7147  ;;  %v15273_v40 = vld [vmem:[%s18885_s4 + $0x938] sm:$0xff]  }
0x1e38   :  { %v7155_v50 = vsel %vm57_vm1, %v7154_v45, %v7148_v42  ;;  %v12871_v42 = vld [vmem:[%s18884_s3 + $0x2d8] sm:$0xff] }
0x1e3b   :  { %v7182_v4 = vpop.permute.xlu1 %7181 }
0x1e3c   :  { %v7152_v29 = vpop.permute.xlu0 %7151 }
0x1e3d   :  { %v7156_v51 = vsel %vm1087_vm5, %v7155_v50, %v7152_v29  ;;  %v12878_v29 = vcombine.high %v12868_v55, %v12870_v23 }
0x1e3e   :  { %v7157_v32 = vpack.c.bf16 %v7156_v51, %v7156_v51  ;;  %v12880_v51 = vcombine.high %v12869_v52, %v12871_v42 }
0x1e40   :  { %14863 = vmatmul.mubr.msk.bf16.vlgmr.msra.gmra.mrb[156].mxu1 %vm124_vm2, %v7157_v32  ;;  %v12877_v32 = vcombine.low %v12868_v55, %v12870_v23 }
0x1e41   :  { %7408 = vmatprep.mubr.bf16.mxu1 %v15650_v36  ;;  %7377 = vmatpush1.bf16.msra.mxu1 %v12792_v9  ;;  %v15259_v9 = vld [vmem:[%s18885_s4 + $0x960] sm:$0xff]  }
0x1e42   :  { %7378 = vmatprep.subr.bf16.mxu1 %v12797_v8  ;;  %v15268_v8 = vld [vmem:[%s18885_s4 + $0x9f0] sm:$0xff]  }
0x1e45   :  { %7379 = vmatpush1.bf16.msra.mxu1 %v12796_v46  ;;  %v15267_v46 = vld [vmem:[%s18885_s4 + $0x970] sm:$0xff]  }
0x1e46   :  { %7602 = vmatprep.subr.bf16.mxu1 %v12876_v10  ;;  %v15276_v10 = vld [vmem:[%s18885_s4 + $0x8c0] sm:$0xff]  }
0x1f13   :  { %v7221_v57 = vpop.f32.mrb[156].mxu1 }
0x1f14   :  { %v7222_v3 = vadd.f32 %v7221_v57, %v7182_v4  ;;  %v14864_v58 = vpop.f32.mrb[157].mxu1  ;;  %v12879_v4 = vcombine.low %v12869_v52, %v12871_v42  ;;  %v15243_v57 = vld [vmem:[%s18885_s4 + $0x940] sm:$0xff]  }
0x1f15   :  { %v7224_v59 = vpop.f32.mrb[158].mxu1  ;;  %v15245_v58 = vld [vmem:[%s18885_s4 + $0x900] sm:$0xff]  }
0x1f16   :  { %v7227_v60 = vadd.f32 %v7222_v3, %v17446_v37  ;;  %v14865_v62 = vpop.f32.mrb[159].mxu1  ;;  %v12781_v37 = vld [vmem:[%s18884_s3 + $0x200] sm:$0xff] }
0x1f17   :  { %v12790_v12 = vcombine.low %v12781_v37, %v12783_v5  ;;  %v12791_v13 = vcombine.high %v12781_v37, %v12783_v5  ;;  %v15244_v3 = vld [vmem:[%s18885_s4 + $0x9c0] sm:$0xff]   ;;  %v15248_v62 = vld [vmem:[%s18885_s4 + $0x9c8] sm:$0xff]   ;;  %v15253_v37 = vld [vmem:[%s18885_s4 + $0x910] sm:$0xff]  }
0x1f18   :  { %v7230_v33 = vsel %vm7229_vm12, %v7227_v60, 0.0  ;;  %v7234_v34 = vmul.f32 %v7227_v60, %v7227_v60  ;;  %v15246_v59 = vld [vmem:[%s18885_s4 + $0x980] sm:$0xff]   ;;  %v15254_v5 = vld [vmem:[%s18885_s4 + $0x990] sm:$0xff]  }
0x1f19   :  { %7231 = vadd.xlane.f32.xlu0 %v7230_v33  ;;  %7335 = vmatprep.subr.bf16.mxu0 %v12791_v13  ;;  %v15249_v33 = vld [vmem:[%s18885_s4 + $0x908] sm:$0xff]   ;;  %v15257_v13 = vld [vmem:[%s18885_s4 + $0x918] sm:$0xff]  }
0x1f1a   :  { %v7235_v44 = vsel %vm7229_vm12, %v7234_v34, 0.0  ;;  %7336 = vmatpush1.bf16.msra.mxu0 %v12790_v12  ;;  %v15250_v34 = vld [vmem:[%s18885_s4 + $0x988] sm:$0xff]   ;;  %v15256_v12 = vld [vmem:[%s18885_s4 + $0x9d8] sm:$0xff]  }
0x1f1b   :  { %7236 = vadd.xlane.f32.xlu1 %v7235_v44  ;;  %7337 = vmatprep.subr.bf16.mxu0 %v12795_v16  ;;  %v15251_v44 = vld [vmem:[%s18885_s4 + $0x950] sm:$0xff]   ;;  %v15264_v16 = vld [vmem:[%s18885_s4 + $0x9e8] sm:$0xff]  }
0x1f1e   :  { %7338 = vmatpush1.bf16.msra.mxu0 %v12794_v18  ;;  %v15266_v18 = vld [vmem:[%s18885_s4 + $0x9a8] sm:$0xff]  }
0x1f1f   :  { %7561 = vmatprep.subr.bf16.mxu0 %v12874_v21  ;;  %v15272_v21 = vld [vmem:[%s18885_s4 + $0x9f8] sm:$0xff]  }
0x1f2c   :  { %7255 = vrot.lane.b32.xlu1 %v12780_v7, %s15645_s14 }
0x1f2f   :  { %7251 = vrot.lane.b32.xlu0 %v12780_v7, %s15644_s13  ;;  %v15252_v7 = vld [vmem:[%s18885_s4 + $0x9d0] sm:$0xff]  }
0x1fa6   :  { %v7232_v30 = vpop.xlane.xlu0 %7231 }
0x1fa7   :  { %v7233_v28 = vmul.f32 0.03125, %v7232_v30 }
0x1fa8   :  { %v7237_v41 = vpop.xlane.xlu1 %7236 }
0x1fa9   :  { %v7239_v48 = vmul.f32 %v7233_v28, %v7233_v28  ;;  %v7238_v61 = vmul.f32 0.03125, %v7237_v41  ;;  %v7242_v47 = vsub.f32 %v7227_v60, %v7233_v28  ;;  %v15247_v60 = vld [vmem:[%s18885_s4 + $0x948] sm:$0xff]  }
0x1faa   :  { %v7252_v49 = vpop.permute.xlu0 %7251  ;;  %v17737_v41 = vld [vmem:[%s18886_s5 + $0x2] ss:$4 sm:$0xf] }
0x1fab   :  { %v7240_v63 = vsub.f32 %v7238_v61, %v7239_v48 }
0x1fac   :  { %v7256_v54 = vpop.permute.xlu1 %7255 }
0x1fad   :  { %v7241_v11 = vmax.f32 %v7240_v63, 0.0 }
0x1faf   :  { %v7243_v2 = vadd.f32 1e-05, %v7241_v11 }
0x1fb1   :  { %15609 = vrsqrt.f32 %v7243_v2  ;;  %v12872_v2 = vld [vmem:[%s18886_s5 + $0x12] ss:$4 sm:$0xf] }
0x1fb2   :  { %v7508_v55 = vrot.slane %v12872_v2, %v16158_v27  ;;  %v7516_v23 = vrot.slane %v12872_v2, %v16160_v15 }
0x1fbb   :  { %v15610_v6 = vpop.eup %15609 }
0x1fbc   :  { %v7245_v17 = vmul.f32 %v15610_v6, %v7242_v47 }
0x1fbe   :  { %v7254_v31 = vmul.f32 %v7252_v49, %v7245_v17  ;;  %v7279_v49 = vrot.slane %v17737_v41, %v16158_v27  ;;  %v7287_v17 = vrot.slane %v17737_v41, %v16160_v15 }
0x1fc0   :  { %v17612_v45 = vadd.f32 %v7256_v54, %v7254_v31  ;;  %v7504_v54 = vrot.slane %v12872_v2, %v16154_v53  ;;  %v7512_v31 = vrot.slane %v12872_v2, %v16156_v25  ;;  %v15295_v2 = vld [vmem:[%s18885_s4 + $0x868] sm:$0xff]  }
0x1fc2   :  { %v17616_v50 = vpack.c.bf16 %v17612_v45, %v17612_v45 }
0x1fc4   :  { %12798 = vmatmul.mubr.msk.bf16.vlgmr.msra.gmra.mrb[160].mxu0 %vm124_vm2, %v17616_v50  ;;  %12799 = vmatmul.mubr.msk.bf16.vlgmr.msra.gmra.mrb[160].mxu1 %vm124_vm2, %v17616_v50 }
0x1fc5   :  { %7562 = vmatpush1.bf16.msra.mxu0 %v12873_v22  ;;  %7603 = vmatpush1.bf16.msra.mxu1 %v12875_v56  ;;  %v15274_v22 = vld [vmem:[%s18885_s4 + $0x9b8] sm:$0xff]   ;;  %v15275_v56 = vld [vmem:[%s18885_s4 + $0x840] sm:$0xff]  }
0x1fc6   :  { %7563 = vmatprep.subr.bf16.mxu0 %v12878_v29  ;;  %7604 = vmatprep.subr.bf16.mxu1 %v12880_v51 }
0x1fc7   :  { %7593 = vmatprep.mubr.bf16.mxu0 %v15650_v36  ;;  %7634 = vmatprep.mubr.bf16.mxu1 %v15650_v36 }
0x1fc9   :  { %7564 = vmatpush1.bf16.msra.mxu0 %v12877_v32  ;;  %7605 = vmatpush1.bf16.msra.mxu1 %v12879_v4 }
0x1fca   :  { %14190 = vmatprep.subr.bf16.mxu0 %v15243_v57  ;;  %14212 = vmatprep.subr.bf16.mxu1 %v15244_v3 }
0x1fcc   :  { %12881 = vmatmul.mubr.msk.bf16.vlgmr.msra.gmra.mrb[164].mxu0 %vm124_vm2, %v17616_v50  ;;  %12882 = vmatmul.mubr.msk.bf16.vlgmr.msra.gmra.mrb[164].mxu1 %vm124_vm2, %v17616_v50 }
0x1fcd   :  { %14191 = vmatpush3.bf16.msra.mxu0 %v15245_v58  ;;  %14213 = vmatpush3.bf16.msra.mxu1 %v15246_v59 }
0x1fce   :  { %14192 = vmatprep.subr.bf16.mxu0 %v15247_v60  ;;  %14214 = vmatprep.subr.bf16.mxu1 %v15248_v62 }
0x1fd1   :  { %14193 = vmatpush3.bf16.msra.mxu0 %v15249_v33  ;;  %14215 = vmatpush3.bf16.msra.mxu1 %v15250_v34 }
0x1fd2   :  { %14194 = vmatprep.subr.bf16.mxu0 %v15251_v44  ;;  %14216 = vmatprep.subr.bf16.mxu1 %v15252_v7 }
0x1fd5   :  { %14195 = vmatpush3.bf16.msra.mxu0 %v15253_v37  ;;  %14217 = vmatpush3.bf16.msra.mxu1 %v15254_v5 }
0x1fd6   :  { %14196 = vmatprep.subr.bf16.mxu0 %v15255_v38  ;;  %14218 = vmatprep.subr.bf16.mxu1 %v15256_v12 }
0x1fd9   :  { %14197 = vmatpush3.bf16.msra.mxu0 %v15257_v13  ;;  %14219 = vmatpush3.bf16.msra.mxu1 %v15258_v43 }
0x1fda   :  { %14198 = vmatprep.subr.bf16.mxu0 %v15259_v9  ;;  %14220 = vmatprep.subr.bf16.mxu1 %v15260_v1  ;;  %v15277_v9 = vld [vmem:[%s18885_s4 + $0x800] sm:$0xff]  }
0x1fdb   :  { %v15278_v1 = vld [vmem:[%s18885_s4 + $0x880] sm:$0xff]  }
0x1fdd   :  { %14199 = vmatpush3.bf16.msra.mxu0 %v15261_v14  ;;  %14221 = vmatpush3.bf16.msra.mxu1 %v15262_v35 }
0x1fde   :  { %14200 = vmatprep.subr.bf16.mxu0 %v15263_v24  ;;  %14222 = vmatprep.subr.bf16.mxu1 %v15264_v16  ;;  %v15279_v24 = vld [vmem:[%s18885_s4 + $0x848] sm:$0xff]  }
0x1fdf   :  { %v15280_v16 = vld [vmem:[%s18885_s4 + $0x8c8] sm:$0xff]  }
0x1fe1   :  { %14201 = vmatpush3.bf16.msra.mxu0 %v15265_v19  ;;  %14223 = vmatpush3.bf16.msra.mxu1 %v15266_v18 }
0x1fe2   :  { %14202 = vmatprep.subr.bf16.mxu0 %v15267_v46  ;;  %14224 = vmatprep.subr.bf16.mxu1 %v15268_v8  ;;  %v15281_v46 = vld [vmem:[%s18885_s4 + $0x808] sm:$0xff]  }
0x1fe3   :  { %v15282_v8 = vld [vmem:[%s18885_s4 + $0x888] sm:$0xff]  }
0x1fe5   :  { %14203 = vmatpush3.bf16.msra.mxu0 %v15269_v26  ;;  %14225 = vmatpush3.bf16.msra.mxu1 %v15270_v39  ;;  %v15283_v26 = vld [vmem:[%s18885_s4 + $0x850] sm:$0xff]  }
0x1fe6   :  { %14204 = vmatprep.subr.bf16.mxu0 %v15271_v20  ;;  %14226 = vmatprep.subr.bf16.mxu1 %v15272_v21  ;;  %v15284_v39 = vld [vmem:[%s18885_s4 + $0x8d0] sm:$0xff]  }
0x1fe7   :  { %v15285_v20 = vld [vmem:[%s18885_s4 + $0x810] sm:$0xff]  }
0x1fe8   :  { %v15286_v21 = vld [vmem:[%s18885_s4 + $0x890] sm:$0xff]  }
0x1fe9   :  { %14205 = vmatpush3.bf16.msra.mxu0 %v15273_v40  ;;  %14227 = vmatpush3.bf16.msra.mxu1 %v15274_v22  ;;  %v15287_v40 = vld [vmem:[%s18885_s4 + $0x858] sm:$0xff]  }
0x1fea   :  { %14234 = vmatprep.subr.bf16.mxu0 %v15275_v56  ;;  %14256 = vmatprep.subr.bf16.mxu1 %v15276_v10  ;;  %v15288_v22 = vld [vmem:[%s18885_s4 + $0x8d8] sm:$0xff]  }
0x1feb   :  { %v15289_v56 = vld [vmem:[%s18885_s4 + $0x818] sm:$0xff]  }
0x1fec   :  { %v15290_v10 = vld [vmem:[%s18885_s4 + $0x898] sm:$0xff]  }
0x2097   :  { %v17730_v30 = vpop.f32.mrb[160].mxu0  ;;  %v17732_v28 = vpop.f32.mrb[160].mxu1 }
0x2098   :  { %v7371_v48 = vpop.f32.mrb[161].mxu0  ;;  %v7412_v61 = vpop.f32.mrb[161].mxu1 }
0x2099   :  { %v7373_v63 = vpop.f32.mrb[162].mxu0  ;;  %v7414_v11 = vpop.f32.mrb[162].mxu1  ;;  %v7372_v29 = vadd.f32 %v7371_v48, %v7279_v49  ;;  %v7413_v51 = vadd.f32 %v7412_v61, %v7287_v17  ;;  %v15291_v48 = vld [vmem:[%s18885_s4 + $0x860] sm:$0xff]   ;;  %v15298_v49 = vld [vmem:[%s18885_s4 + $0x8a8] sm:$0xff]   ;;  %v7275_v17 = vrot.slane %v17737_v41, %v16154_v53 }
0x209a   :  { %v7374_v47 = vpop.f32.mrb[163].mxu0  ;;  %v7415_v6 = vpop.f32.mrb[163].mxu1  ;;  %v15292_v61 = vld [vmem:[%s18885_s4 + $0x8e0] sm:$0xff]  }
0x209b   :  { %v7418_v38 = vmax.f32 %v7372_v29, 0.0  ;;  %v7420_v12 = vmax.f32 %v7413_v51, 0.0  ;;  %v15293_v63 = vld [vmem:[%s18885_s4 + $0x820] sm:$0xff]   ;;  %v15296_v47 = vld [vmem:[%s18885_s4 + $0x8e8] sm:$0xff]   ;;  %v15303_v29 = vld [vmem:[%s18885_s4 + $0x878] sm:$0xff]  }
0x209c   :  { %v15294_v11 = vld [vmem:[%s18885_s4 + $0x8a0] sm:$0xff]   ;;  %v15297_v6 = vld [vmem:[%s18885_s4 + $0x828] sm:$0xff]   ;;  %v15304_v51 = vld [vmem:[%s18885_s4 + $0x8f8] sm:$0xff]  }
0x209d   :  { %v7422_v19 = vpack.c.bf16 %v7418_v38, %v7418_v38  ;;  %v7424_v18 = vpack.c.bf16 %v7420_v12, %v7420_v12 }
0x209f   :  { %v7595_v52 = vpop.f32.mrb[164].mxu0  ;;  %v7636_v42 = vpop.f32.mrb[164].mxu1 }
0x20a0   :  { %v7596_v32 = vadd.f32 %v7595_v52, %v7504_v54  ;;  %v7637_v4 = vadd.f32 %v7636_v42, %v7512_v31  ;;  %v7597_v57 = vpop.f32.mrb[165].mxu0  ;;  %v7638_v3 = vpop.f32.mrb[165].mxu1  ;;  %v7283_v54 = vrot.slane %v17737_v41, %v16156_v25  ;;  %v15299_v31 = vld [vmem:[%s18885_s4 + $0x870] sm:$0xff]   ;;  %v7370_v52 = vadd.f32 %v17730_v30, %v7275_v17  ;;  %v13013_v30 = vld [vmem:[%s18884_s3 + $0x260] sm:$0xff] }
0x20a1   :  { %v7598_v58 = vadd.f32 %v7597_v57, %v7508_v55  ;;  %v7639_v59 = vadd.f32 %v7638_v3, %v7516_v23  ;;  %v7599_v60 = vpop.f32.mrb[166].mxu0  ;;  %v7640_v62 = vpop.f32.mrb[166].mxu1  ;;  %v15300_v55 = vld [vmem:[%s18885_s4 + $0x8f0] sm:$0xff]   ;;  %v15305_v57 = vld [vmem:[%s18885_s4 + $0x838] sm:$0xff]  }
0x20a2   :  { %v7643_v33 = vmax.f32 %v7596_v32, 0.0  ;;  %v7645_v34 = vmax.f32 %v7637_v4, 0.0  ;;  %v7600_v44 = vpop.f32.mrb[167].mxu0  ;;  %v7641_v7 = vpop.f32.mrb[167].mxu1  ;;  %v15301_v23 = vld [vmem:[%s18885_s4 + $0x830] sm:$0xff]   ;;  %v7411_v42 = vadd.f32 %v17732_v28, %v7283_v54  ;;  %v13011_v32 = vld [vmem:[%s18884_s3 + $0x220] sm:$0xff] }
0x20a3   :  { %v7644_v37 = vmax.f32 %v7598_v58, 0.0  ;;  %v7646_v5 = vmax.f32 %v7639_v59, 0.0  ;;  %v15302_v41 = vld [vmem:[%s18885_s4 + $0x8b0] sm:$0xff]   ;;  %v13012_v28 = vld [vmem:[%s18884_s3 + $0x228] sm:$0xff]  ;;  %v15306_v3 = vld [vmem:[%s18885_s4 + $0x8b8] sm:$0xff]   ;;  %v7417_v58 = vmax.f32 %v7370_v52, 0.0  ;;  %v13021_v60 = vcombine.high %v13011_v32, %v13013_v30 }
0x20a4   :  { %v7647_v14 = vpack.c.bf16 %v7643_v33, %v7643_v33  ;;  %v7649_v35 = vpack.c.bf16 %v7645_v34, %v7645_v34  ;;  %v13014_v4 = vld [vmem:[%s18884_s3 + $0x268] sm:$0xff]  ;;  %v7419_v59 = vmax.f32 %v7411_v42, 0.0  ;;  %v13015_v33 = vld [vmem:[%s18884_s3 + $0x2a0] sm:$0xff]  ;;  %v15331_v17 = vld [vmem:[%s18885_s4 + $0xa70] sm:$0xff]  }
0x20a5   :  { %v7648_v13 = vpack.c.bf16 %v7644_v37, %v7644_v37  ;;  %v7650_v43 = vpack.c.bf16 %v7646_v5, %v7646_v5  ;;  %v13023_v62 = vcombine.high %v13012_v28, %v13014_v4  ;;  %v13017_v34 = vld [vmem:[%s18884_s3 + $0x2e0] sm:$0xff]  ;;  %v13016_v44 = vld [vmem:[%s18884_s3 + $0x2a8] sm:$0xff]  ;;  %v13020_v37 = vcombine.low %v13011_v32, %v13013_v30  ;;  %v15332_v54 = vld [vmem:[%s18885_s4 + $0xaf0] sm:$0xff]  }
0x20a6   :  { %v13018_v7 = vld [vmem:[%s18884_s3 + $0x2e8] sm:$0xff]  ;;  %v13022_v5 = vcombine.low %v13012_v28, %v13014_v4  ;;  %v13025_v38 = vcombine.high %v13015_v33, %v13017_v34  ;;  %v7421_v12 = vpack.c.bf16 %v7417_v58, %v7417_v58  ;;  %v15337_v52 = vld [vmem:[%s18885_s4 + $0xa38] sm:$0xff]  }
0x20a7   :  { %7939 = vmatprep.mubr.bf16.mxu0 %v7648_v13  ;;  %7979 = vmatprep.mubr.bf16.mxu1 %v7650_v43  ;;  %v7423_v13 = vpack.c.bf16 %v7419_v59, %v7419_v59  ;;  %v13027_v43 = vcombine.high %v13016_v44, %v13018_v7  ;;  %v15338_v42 = vld [vmem:[%s18885_s4 + $0xab8] sm:$0xff]  }
0x20a8   :  { %7940 = vmatmul.mubr.bf16.vlgmr.msra.gmra.mrb[168].mxu0 %v7647_v14  ;;  %7980 = vmatmul.mubr.bf16.vlgmr.msra.gmra.mrb[168].mxu1 %v7649_v35  ;;  %v15307_v14 = vld [vmem:[%s18885_s4 + $0xa40] sm:$0xff]   ;;  %v17985_v32 = vld [vmem:[%s18884_s3 + $0x238] sm:$0xff] }
0x20a9   :  { %14235 = vmatpush3.bf16.msra.mxu0 %v15277_v9  ;;  %14257 = vmatpush3.bf16.msra.mxu1 %v15278_v1  ;;  %v13024_v9 = vcombine.low %v13015_v33, %v13017_v34  ;;  %v13026_v1 = vcombine.low %v13016_v44, %v13018_v7  ;;  %v15308_v35 = vld [vmem:[%s18885_s4 + $0xac0] sm:$0xff]   ;;  %v17992_v28 = vld [vmem:[%s18884_s3 + $0x278] sm:$0xff] }
0x20aa   :  { %8211 = vmatprep.mubr.bf16.mxu0 %v7422_v19  ;;  %8251 = vmatprep.mubr.bf16.mxu1 %v7424_v18  ;;  %v15311_v19 = vld [vmem:[%s18885_s4 + $0xa48] sm:$0xff]  }
0x20ab   :  { %14236 = vmatprep.subr.bf16.mxu0 %v15279_v24  ;;  %14258 = vmatprep.subr.bf16.mxu1 %v15280_v16  ;;  %v15309_v24 = vld [vmem:[%s18885_s4 + $0xa00] sm:$0xff]   ;;  %v15312_v18 = vld [vmem:[%s18885_s4 + $0xac8] sm:$0xff]  }
0x20ac   :  { %v15310_v16 = vld [vmem:[%s18885_s4 + $0xa80] sm:$0xff]  }
0x20ad   :  { %14237 = vmatpush3.bf16.msra.mxu0 %v15281_v46  ;;  %14259 = vmatpush3.bf16.msra.mxu1 %v15282_v8  ;;  %v15313_v46 = vld [vmem:[%s18885_s4 + $0xa08] sm:$0xff]  }
0x20ae   :  { %14238 = vmatprep.subr.bf16.mxu0 %v15283_v26  ;;  %14260 = vmatprep.subr.bf16.mxu1 %v15284_v39  ;;  %v15314_v8 = vld [vmem:[%s18885_s4 + $0xa88] sm:$0xff]   ;;  %v15315_v26 = vld [vmem:[%s18885_s4 + $0xa50] sm:$0xff]  }
0x20af   :  { %v15316_v39 = vld [vmem:[%s18885_s4 + $0xad0] sm:$0xff]  }
0x20b1   :  { %14239 = vmatpush3.bf16.msra.mxu0 %v15285_v20  ;;  %14261 = vmatpush3.bf16.msra.mxu1 %v15286_v21  ;;  %v15317_v20 = vld [vmem:[%s18885_s4 + $0xa10] sm:$0xff]  }
0x20b2   :  { %14240 = vmatprep.subr.bf16.mxu0 %v15287_v40  ;;  %14262 = vmatprep.subr.bf16.mxu1 %v15288_v22  ;;  %v15318_v21 = vld [vmem:[%s18885_s4 + $0xa90] sm:$0xff]   ;;  %v15319_v40 = vld [vmem:[%s18885_s4 + $0xa58] sm:$0xff]  }
0x20b3   :  { %v15320_v22 = vld [vmem:[%s18885_s4 + $0xad8] sm:$0xff]  }
0x20b5   :  { %14241 = vmatpush3.bf16.msra.mxu0 %v15289_v56  ;;  %14263 = vmatpush3.bf16.msra.mxu1 %v15290_v10  ;;  %v15321_v56 = vld [vmem:[%s18885_s4 + $0xa18] sm:$0xff]  }
0x20b6   :  { %14242 = vmatprep.subr.bf16.mxu0 %v15291_v48  ;;  %14264 = vmatprep.subr.bf16.mxu1 %v15292_v61  ;;  %v15322_v10 = vld [vmem:[%s18885_s4 + $0xa98] sm:$0xff]   ;;  %v15323_v48 = vld [vmem:[%s18885_s4 + $0xa60] sm:$0xff]  }
0x20b7   :  { %v15324_v61 = vld [vmem:[%s18885_s4 + $0xae0] sm:$0xff]  }
0x20b9   :  { %14243 = vmatpush3.bf16.msra.mxu0 %v15293_v63  ;;  %14265 = vmatpush3.bf16.msra.mxu1 %v15294_v11  ;;  %v15325_v63 = vld [vmem:[%s18885_s4 + $0xa20] sm:$0xff]  }
0x20ba   :  { %14244 = vmatprep.subr.bf16.mxu0 %v15295_v2  ;;  %14266 = vmatprep.subr.bf16.mxu1 %v15296_v47  ;;  %v15326_v11 = vld [vmem:[%s18885_s4 + $0xaa0] sm:$0xff]   ;;  %v15327_v2 = vld [vmem:[%s18885_s4 + $0xa68] sm:$0xff]  }
0x20bb   :  { %v15328_v47 = vld [vmem:[%s18885_s4 + $0xae8] sm:$0xff]  }
0x20bd   :  { %14245 = vmatpush3.bf16.msra.mxu0 %v15297_v6  ;;  %14267 = vmatpush3.bf16.msra.mxu1 %v15298_v49  ;;  %v15329_v6 = vld [vmem:[%s18885_s4 + $0xa28] sm:$0xff]  }
0x20be   :  { %14246 = vmatprep.subr.bf16.mxu0 %v15299_v31  ;;  %14268 = vmatprep.subr.bf16.mxu1 %v15300_v55  ;;  %v15330_v49 = vld [vmem:[%s18885_s4 + $0xaa8] sm:$0xff]   ;;  %v15333_v31 = vld [vmem:[%s18885_s4 + $0xa30] sm:$0xff]  }
0x20bf   :  { %v15334_v55 = vld [vmem:[%s18885_s4 + $0xab0] sm:$0xff]  }
0x20c1   :  { %14247 = vmatpush3.bf16.msra.mxu0 %v15301_v23  ;;  %14269 = vmatpush3.bf16.msra.mxu1 %v15302_v41  ;;  %v15335_v23 = vld [vmem:[%s18885_s4 + $0xa78] sm:$0xff]  }
0x20c2   :  { %14248 = vmatprep.subr.bf16.mxu0 %v15303_v29  ;;  %14270 = vmatprep.subr.bf16.mxu1 %v15304_v51  ;;  %v15336_v41 = vld [vmem:[%s18885_s4 + $0xaf8] sm:$0xff]   ;;  %v17975_v29 = vld [vmem:[%s18884_s3 + $0x230] sm:$0xff] }
0x20c3   :  { %v17980_v51 = vld [vmem:[%s18884_s3 + $0x270] sm:$0xff] }
0x20c4   :  { %v13136_v30 = vcombine.high %v17975_v29, %v17980_v51  ;;  %v13135_v4 = vcombine.low %v17975_v29, %v17980_v51 }
0x20c5   :  { %14249 = vmatpush3.bf16.msra.mxu0 %v15305_v57  ;;  %14271 = vmatpush3.bf16.msra.mxu1 %v15306_v3  ;;  %v13137_v57 = vcombine.low %v17985_v32, %v17992_v28  ;;  %v13138_v3 = vcombine.high %v17985_v32, %v17992_v28 }
0x20c6   :  { %8330 = vmatprep.subr.bf16.mxu0 %v13021_v60  ;;  %8371 = vmatprep.subr.bf16.mxu1 %v13023_v62 }
0x20c8   :  { %8212 = vmatmul.mubr.bf16.vlgmr.msra.gmra.mrb[172].mxu0 %v7421_v12  ;;  %8252 = vmatmul.mubr.bf16.vlgmr.msra.gmra.mrb[172].mxu1 %v7423_v13 }
0x20c9   :  { %8331 = vmatpush1.bf16.msra.mxu0 %v13020_v37  ;;  %8372 = vmatpush1.bf16.msra.mxu1 %v13022_v5 }
0x20ca   :  { %8332 = vmatprep.subr.bf16.mxu0 %v13025_v38  ;;  %8373 = vmatprep.subr.bf16.mxu1 %v13027_v43 }
0x20cb   :  { %8362 = vmatprep.mubr.bf16.mxu0 %v15650_v36  ;;  %8403 = vmatprep.mubr.bf16.mxu1 %v15650_v36 }
0x20cd   :  { %8333 = vmatpush1.bf16.msra.mxu0 %v13024_v9  ;;  %8374 = vmatpush1.bf16.msra.mxu1 %v13026_v1 }
0x20ce   :  { %14278 = vmatprep.subr.bf16.mxu0 %v15307_v14  ;;  %14300 = vmatprep.subr.bf16.mxu1 %v15308_v35 }
0x20d0   :  { %13028 = vmatmul.mubr.msk.bf16.vlgmr.msra.gmra.mrb[176].mxu0 %vm124_vm2, %v17616_v50  ;;  %13029 = vmatmul.mubr.msk.bf16.vlgmr.msra.gmra.mrb[176].mxu1 %vm124_vm2, %v17616_v50 }
0x20d1   :  { %14279 = vmatpush3.bf16.msra.mxu0 %v15309_v24  ;;  %14301 = vmatpush3.bf16.msra.mxu1 %v15310_v16  ;;  %v13019_v16 = vld [vmem:[%s18886_s5 + $0x22] ss:$4 sm:$0xf] }
0x20d2   :  { %14280 = vmatprep.subr.bf16.mxu0 %v15311_v19  ;;  %14302 = vmatprep.subr.bf16.mxu1 %v15312_v18 }
0x20d5   :  { %14281 = vmatpush3.bf16.msra.mxu0 %v15313_v46  ;;  %14303 = vmatpush3.bf16.msra.mxu1 %v15314_v8  ;;  %v8273_v8 = vrot.slane %v13019_v16, %v16154_v53 }
0x20d6   :  { %14282 = vmatprep.subr.bf16.mxu0 %v15315_v26  ;;  %14304 = vmatprep.subr.bf16.mxu1 %v15316_v39  ;;  %v8281_v26 = vrot.slane %v13019_v16, %v16156_v25 }
0x20d9   :  { %14283 = vmatpush3.bf16.msra.mxu0 %v15317_v20  ;;  %14305 = vmatpush3.bf16.msra.mxu1 %v15318_v21  ;;  %v8277_v20 = vrot.slane %v13019_v16, %v16158_v27  ;;  %v8285_v21 = vrot.slane %v13019_v16, %v16160_v15  ;;  %v15359_v16 = vld [vmem:[%s18885_s4 + $0xb68] sm:$0xff]  }
0x20da   :  { %14284 = vmatprep.subr.bf16.mxu0 %v15319_v40  ;;  %14306 = vmatprep.subr.bf16.mxu1 %v15320_v22 }
0x20dd   :  { %14285 = vmatpush3.bf16.msra.mxu0 %v15321_v56  ;;  %14307 = vmatpush3.bf16.msra.mxu1 %v15322_v10 }
0x20de   :  { %14286 = vmatprep.subr.bf16.mxu0 %v15323_v48  ;;  %14308 = vmatprep.subr.bf16.mxu1 %v15324_v61 }
0x20e1   :  { %14287 = vmatpush3.bf16.msra.mxu0 %v15325_v63  ;;  %14309 = vmatpush3.bf16.msra.mxu1 %v15326_v11 }
0x20e2   :  { %14288 = vmatprep.subr.bf16.mxu0 %v15327_v2  ;;  %14310 = vmatprep.subr.bf16.mxu1 %v15328_v47 }
0x20e5   :  { %14289 = vmatpush3.bf16.msra.mxu0 %v15329_v6  ;;  %14311 = vmatpush3.bf16.msra.mxu1 %v15330_v49 }
0x20e6   :  { %14290 = vmatprep.subr.bf16.mxu0 %v15331_v17  ;;  %14312 = vmatprep.subr.bf16.mxu1 %v15332_v54 }
0x20e9   :  { %14291 = vmatpush3.bf16.msra.mxu0 %v15333_v31  ;;  %14313 = vmatpush3.bf16.msra.mxu1 %v15334_v55  ;;  %v13130_v31 = vld [vmem:[%s18884_s3 + $0x2b0] sm:$0xff] }
0x20ea   :  { %14292 = vmatprep.subr.bf16.mxu0 %v15335_v23  ;;  %14314 = vmatprep.subr.bf16.mxu1 %v15336_v41  ;;  %v13132_v41 = vld [vmem:[%s18884_s3 + $0x2f0] sm:$0xff] }
0x20eb   :  { %v13140_v28 = vcombine.high %v13130_v31, %v13132_v41 }
0x20ed   :  { %14293 = vmatpush3.bf16.msra.mxu0 %v15337_v52  ;;  %14315 = vmatpush3.bf16.msra.mxu1 %v15338_v42  ;;  %v13131_v52 = vld [vmem:[%s18884_s3 + $0x2b8] sm:$0xff] }
0x20ee   :  { %8828 = vmatprep.subr.bf16.mxu0 %v13136_v30  ;;  %8869 = vmatprep.subr.bf16.mxu1 %v13138_v3  ;;  %v13133_v42 = vld [vmem:[%s18884_s3 + $0x2f8] sm:$0xff] }
0x20ef   :  { %v13142_v3 = vcombine.high %v13131_v52, %v13133_v42 }
0x217b   :  { %v14206_v58 = vpop.f32.mrb[168].mxu0  ;;  %v14228_v59 = vpop.f32.mrb[168].mxu1 }
0x217c   :  { %v14207_v60 = vpop.f32.mrb[169].mxu0  ;;  %v14229_v62 = vpop.f32.mrb[169].mxu1 }
0x217d   :  { %v14208_v33 = vadd.f32 %v14207_v60, %v14206_v58  ;;  %v14230_v34 = vadd.f32 %v14229_v62, %v14228_v59  ;;  %v14209_v44 = vpop.f32.mrb[170].mxu0  ;;  %v14231_v7 = vpop.f32.mrb[170].mxu1  ;;  %v13139_v58 = vcombine.low %v13130_v31, %v13132_v41  ;;  %v13141_v59 = vcombine.low %v13131_v52, %v13133_v42  ;;  %v15339_v60 = vld [vmem:[%s18885_s4 + $0xb40] sm:$0xff]  }
0x217e   :  { %v14210_v37 = vpop.f32.mrb[171].mxu0  ;;  %v14232_v5 = vpop.f32.mrb[171].mxu1  ;;  %v15340_v62 = vld [vmem:[%s18885_s4 + $0xbc0] sm:$0xff]   ;;  %v15345_v44 = vld [vmem:[%s18885_s4 + $0xb08] sm:$0xff]  }
0x217f   :  { %v7982_v38 = vadd.f32 %v14230_v34, %v14208_v33  ;;  %v15343_v33 = vld [vmem:[%s18885_s4 + $0xb48] sm:$0xff]   ;;  %v15347_v37 = vld [vmem:[%s18885_s4 + $0xb50] sm:$0xff]  }
0x2180   :  { %v15344_v34 = vld [vmem:[%s18885_s4 + $0xbc8] sm:$0xff]   ;;  %v15349_v5 = vld [vmem:[%s18885_s4 + $0xb10] sm:$0xff]  }
0x2181   :  { %v15346_v7 = vld [vmem:[%s18885_s4 + $0xb88] sm:$0xff]  }
0x219b   :  { %v14250_v12 = vpop.f32.mrb[172].mxu0  ;;  %v14272_v13 = vpop.f32.mrb[172].mxu1 }
0x219c   :  { %v14251_v43 = vpop.f32.mrb[173].mxu0  ;;  %v14273_v9 = vpop.f32.mrb[173].mxu1 }
0x219d   :  { %v14252_v1 = vadd.f32 %v14251_v43, %v14250_v12  ;;  %v14274_v14 = vadd.f32 %v14273_v9, %v14272_v13  ;;  %v14253_v35 = vpop.f32.mrb[174].mxu0  ;;  %v14275_v24 = vpop.f32.mrb[174].mxu1  ;;  %v15351_v12 = vld [vmem:[%s18885_s4 + $0xb58] sm:$0xff]  }
0x219e   :  { %v14254_v19 = vpop.f32.mrb[175].mxu0  ;;  %v14276_v18 = vpop.f32.mrb[175].mxu1  ;;  %v15352_v13 = vld [vmem:[%s18885_s4 + $0xbd8] sm:$0xff]   ;;  %v15357_v35 = vld [vmem:[%s18885_s4 + $0xb20] sm:$0xff]  }
0x219f   :  { %v8214_v46 = vadd.f32 %v14252_v1, %v7982_v38  ;;  %v15350_v38 = vld [vmem:[%s18885_s4 + $0xb90] sm:$0xff]   ;;  %v15353_v43 = vld [vmem:[%s18885_s4 + $0xb18] sm:$0xff]   ;;  %v15355_v1 = vld [vmem:[%s18885_s4 + $0xb60] sm:$0xff]  }
0x21a0   :  { %v15354_v9 = vld [vmem:[%s18885_s4 + $0xb98] sm:$0xff]   ;;  %v15358_v24 = vld [vmem:[%s18885_s4 + $0xba0] sm:$0xff]   ;;  %v15360_v19 = vld [vmem:[%s18885_s4 + $0xbe8] sm:$0xff]  }
0x21a1   :  { %v18005_v39 = vadd.f32 %v14274_v14, %v8214_v46  ;;  %v15356_v14 = vld [vmem:[%s18885_s4 + $0xbe0] sm:$0xff]   ;;  %v15361_v18 = vld [vmem:[%s18885_s4 + $0xb28] sm:$0xff]  }
0x21a2   :  { %v15362_v46 = vld [vmem:[%s18885_s4 + $0xba8] sm:$0xff]  }
0x21a3   :  { %v8364_v40 = vpop.f32.mrb[176].mxu0  ;;  %v8405_v22 = vpop.f32.mrb[176].mxu1 }
0x21a4   :  { %v8365_v56 = vadd.f32 %v8364_v40, %v8273_v8  ;;  %v8406_v10 = vadd.f32 %v8405_v22, %v8281_v26  ;;  %v8366_v48 = vpop.f32.mrb[177].mxu0  ;;  %v8407_v61 = vpop.f32.mrb[177].mxu1  ;;  %v15363_v8 = vld [vmem:[%s18885_s4 + $0xb70] sm:$0xff]   ;;  %v15367_v40 = vld [vmem:[%s18885_s4 + $0xb78] sm:$0xff]  }
0x21a5   :  { %v8367_v63 = vadd.f32 %v8366_v48, %v8277_v20  ;;  %v8408_v11 = vadd.f32 %v8407_v61, %v8285_v21  ;;  %v8368_v2 = vpop.f32.mrb[178].mxu0  ;;  %v8409_v47 = vpop.f32.mrb[178].mxu1  ;;  %v15364_v26 = vld [vmem:[%s18885_s4 + $0xbf0] sm:$0xff]   ;;  %v15368_v22 = vld [vmem:[%s18885_s4 + $0xbf8] sm:$0xff]  }
0x21a6   :  { %v8412_v6 = vmax.f32 %v8365_v56, 0.0  ;;  %v8414_v49 = vmax.f32 %v8406_v10, 0.0  ;;  %v8369_v17 = vpop.f32.mrb[179].mxu0  ;;  %v8410_v54 = vpop.f32.mrb[179].mxu1  ;;  %v15365_v20 = vld [vmem:[%s18885_s4 + $0xb30] sm:$0xff]   ;;  %v15369_v56 = vld [vmem:[%s18885_s4 + $0xb38] sm:$0xff]  }
0x21a7   :  { %v8413_v55 = vmax.f32 %v8367_v63, 0.0  ;;  %v8415_v23 = vmax.f32 %v8408_v11, 0.0  ;;  %v15366_v21 = vld [vmem:[%s18885_s4 + $0xbb0] sm:$0xff]   ;;  %v15370_v10 = vld [vmem:[%s18885_s4 + $0xbb8] sm:$0xff]  }
0x21a8   :  { %v8416_v32 = vpack.c.bf16 %v8412_v6, %v8412_v6  ;;  %v8418_v30 = vpack.c.bf16 %v8414_v49, %v8414_v49  ;;  %v13134_v17 = vld [vmem:[%s18886_s5 + $0x32] ss:$4 sm:$0xf] }
0x21a9   :  { %v8417_v29 = vpack.c.bf16 %v8413_v55, %v8413_v55  ;;  %v8419_v51 = vpack.c.bf16 %v8415_v23, %v8415_v23  ;;  %v8771_v23 = vrot.slane %v13134_v17, %v16154_v53  ;;  %v8779_v41 = vrot.slane %v13134_v17, %v16156_v25 }
0x21aa   :  { %v8775_v42 = vrot.slane %v13134_v17, %v16158_v27 }
0x21ab   :  { %8708 = vmatprep.mubr.bf16.mxu0 %v8417_v29  ;;  %8748 = vmatprep.mubr.bf16.mxu1 %v8419_v51  ;;  %v8783_v29 = vrot.slane %v13134_v17, %v16160_v15 }
0x21ac   :  { %8709 = vmatmul.mubr.bf16.vlgmr.msra.gmra.mrb[180].mxu0 %v8416_v32  ;;  %8749 = vmatmul.mubr.bf16.vlgmr.msra.gmra.mrb[180].mxu1 %v8418_v30 }
0x21ad   :  { %8829 = vmatpush1.bf16.msra.mxu0 %v13135_v4  ;;  %8870 = vmatpush1.bf16.msra.mxu1 %v13137_v57  ;;  %v15341_v4 = vld [vmem:[%s18885_s4 + $0xb00] sm:$0xff]  }
0x21ae   :  { %8830 = vmatprep.subr.bf16.mxu0 %v13140_v28  ;;  %8871 = vmatprep.subr.bf16.mxu1 %v13142_v3  ;;  %v15342_v57 = vld [vmem:[%s18885_s4 + $0xb80] sm:$0xff]  }
0x21af   :  { %8860 = vmatprep.mubr.bf16.mxu0 %v15650_v36  ;;  %8901 = vmatprep.mubr.bf16.mxu1 %v15650_v36 }
0x21b1   :  { %8831 = vmatpush1.bf16.msra.mxu0 %v13139_v58  ;;  %8872 = vmatpush1.bf16.msra.mxu1 %v13141_v59 }
0x21b2   :  { %14322 = vmatprep.subr.bf16.mxu0 %v15339_v60  ;;  %14344 = vmatprep.subr.bf16.mxu1 %v15340_v62 }
0x21b4   :  { %13143 = vmatmul.mubr.msk.bf16.vlgmr.msra.gmra.mrb[184].mxu0 %vm124_vm2, %v17616_v50  ;;  %13144 = vmatmul.mubr.msk.bf16.vlgmr.msra.gmra.mrb[184].mxu1 %vm124_vm2, %v17616_v50  ;;  %v15348_v50 = vld [vmem:[%s18885_s4 + $0xbd0] sm:$0xff]  }
0x21b5   :  { %14323 = vmatpush3.bf16.msra.mxu0 %v15341_v4  ;;  %14345 = vmatpush3.bf16.msra.mxu1 %v15342_v57 }
0x21b6   :  { %14324 = vmatprep.subr.bf16.mxu0 %v15343_v33  ;;  %14346 = vmatprep.subr.bf16.mxu1 %v15344_v34 }
0x21b9   :  { %14325 = vmatpush3.bf16.msra.mxu0 %v15345_v44  ;;  %14347 = vmatpush3.bf16.msra.mxu1 %v15346_v7 }
0x21ba   :  { %14326 = vmatprep.subr.bf16.mxu0 %v15347_v37  ;;  %14348 = vmatprep.subr.bf16.mxu1 %v15348_v50 }
0x21bd   :  { %14327 = vmatpush3.bf16.msra.mxu0 %v15349_v5  ;;  %14349 = vmatpush3.bf16.msra.mxu1 %v15350_v38 }
0x21be   :  { %14328 = vmatprep.subr.bf16.mxu0 %v15351_v12  ;;  %14350 = vmatprep.subr.bf16.mxu1 %v15352_v13 }
0x21c1   :  { %14329 = vmatpush3.bf16.msra.mxu0 %v15353_v43  ;;  %14351 = vmatpush3.bf16.msra.mxu1 %v15354_v9 }
0x21c2   :  { %14330 = vmatprep.subr.bf16.mxu0 %v15355_v1  ;;  %14352 = vmatprep.subr.bf16.mxu1 %v15356_v14 }
0x21c5   :  { %14331 = vmatpush3.bf16.msra.mxu0 %v15357_v35  ;;  %14353 = vmatpush3.bf16.msra.mxu1 %v15358_v24 }
0x21c6   :  { %14332 = vmatprep.subr.bf16.mxu0 %v15359_v16  ;;  %14354 = vmatprep.subr.bf16.mxu1 %v15360_v19 }
0x21c9   :  { %14333 = vmatpush3.bf16.msra.mxu0 %v15361_v18  ;;  %14355 = vmatpush3.bf16.msra.mxu1 %v15362_v46 }
0x21ca   :  { %14334 = vmatprep.subr.bf16.mxu0 %v15363_v8  ;;  %14356 = vmatprep.subr.bf16.mxu1 %v15364_v26  ;;  %v15637_v8 = vld [vmem:[%s18882_s6 + $0x6] ss:$0 sm:$0xff] }
0x21cd   :  { %14335 = vmatpush3.bf16.msra.mxu0 %v15365_v20  ;;  %14357 = vmatpush3.bf16.msra.mxu1 %v15366_v21 }
0x21ce   :  { %14336 = vmatprep.subr.bf16.mxu0 %v15367_v40  ;;  %14358 = vmatprep.subr.bf16.mxu1 %v15368_v22 }
0x21d1   :  { %14337 = vmatpush3.bf16.msra.mxu0 %v15369_v56  ;;  %14359 = vmatpush3.bf16.msra.mxu1 %v15370_v10  ;;  %v15371_v56 = vld [vmem:[%s18880_s1 + $0x30] sm:$0xff]  }
0x21d2   :  { %14866 = vmatprep.subr.bf16.mxu0 %v15639_v0  ;;  %14874 = vmatprep.subr.bf16.mxu1 %v15639_v0 }
0x227f   :  { %v14294_v48 = vpop.f32.mrb[180].mxu0  ;;  %v14316_v61 = vpop.f32.mrb[180].mxu1 }
0x2280   :  { %v14295_v63 = vpop.f32.mrb[181].mxu0  ;;  %v14317_v11 = vpop.f32.mrb[181].mxu1 }
0x2281   :  { %v14296_v2 = vadd.f32 %v14295_v63, %v14294_v48  ;;  %v14318_v47 = vadd.f32 %v14317_v11, %v14316_v61  ;;  %v14297_v6 = vpop.f32.mrb[182].mxu0  ;;  %v14319_v49 = vpop.f32.mrb[182].mxu1 }
0x2282   :  { %v14298_v54 = vpop.f32.mrb[183].mxu0  ;;  %v14320_v31 = vpop.f32.mrb[183].mxu1 }
0x2283   :  { %v8751_v55 = vadd.f32 %v14318_v47, %v14296_v2 }
0x2285   :  { %v8756_v52 = vadd.f32 %v8751_v55, %v18005_v39  ;;  %v13241_v55 = vld [vmem:[%s18882_s6 + $0xa] ss:$0 sm:$0xff] }
0x2287   :  { %v8862_v51 = vpop.f32.mrb[184].mxu0  ;;  %v8903_v32 = vpop.f32.mrb[184].mxu1 }
0x2288   :  { %v8863_v30 = vadd.f32 %v8862_v51, %v8771_v23  ;;  %v8904_v28 = vadd.f32 %v8903_v32, %v8779_v41  ;;  %v8864_v3 = vpop.f32.mrb[185].mxu0  ;;  %v8905_v58 = vpop.f32.mrb[185].mxu1 }
0x2289   :  { %v8865_v59 = vadd.f32 %v8864_v3, %v8775_v42  ;;  %v8906_v60 = vadd.f32 %v8905_v58, %v8783_v29  ;;  %v8866_v62 = vpop.f32.mrb[186].mxu0  ;;  %v8907_v4 = vpop.f32.mrb[186].mxu1  ;;  %v18165_v42 = vld [vmem:[%s18882_s6 + $0x3] ss:$0 sm:$0xff] }
0x228a   :  { %v8910_v57 = vmax.f32 %v8863_v30, 0.0  ;;  %v8912_v33 = vmax.f32 %v8904_v28, 0.0  ;;  %v8867_v34 = vpop.f32.mrb[187].mxu0  ;;  %v8908_v44 = vpop.f32.mrb[187].mxu1 }
0x228b   :  { %v8911_v7 = vmax.f32 %v8865_v59, 0.0  ;;  %v8913_v39 = vmax.f32 %v8906_v60, 0.0 }
0x228c   :  { %v8914_v5 = vpack.c.bf16 %v8910_v57, %v8910_v57  ;;  %v8916_v38 = vpack.c.bf16 %v8912_v33, %v8912_v33 }
0x228d   :  { %v8915_v37 = vpack.c.bf16 %v8911_v7, %v8911_v7  ;;  %v8917_v50 = vpack.c.bf16 %v8913_v39, %v8913_v39 }
0x228f   :  { %9206 = vmatprep.mubr.bf16.mxu0 %v8915_v37  ;;  %9246 = vmatprep.mubr.bf16.mxu1 %v8917_v50 }
0x2290   :  { %9207 = vmatmul.mubr.bf16.vlgmr.msra.gmra.mrb[188].mxu0 %v8914_v5  ;;  %9247 = vmatmul.mubr.bf16.vlgmr.msra.gmra.mrb[188].mxu1 %v8916_v38 }
0x2291   :  { %14870 = vmatprep.mubr.msk.bf16.mxu0 %vm15640_vm0, %v15639_v0  ;;  %14876 = vmatprep.mubr.msk.bf16.mxu1 %vm15640_vm0, %v15639_v0 }
0x2292   :  { %14867 = vmatpush3.bf16.msra.mxu0 %v15371_v56 }
0x2293   :  { %14868 = vmatprep.subr.bf16.mxu0 %v15639_v0 }
0x2363   :  { %v14338_v12 = vpop.f32.mrb[188].mxu0  ;;  %v14360_v13 = vpop.f32.mrb[188].mxu1 }
0x2364   :  { %v14339_v43 = vpop.f32.mrb[189].mxu0  ;;  %v14361_v9 = vpop.f32.mrb[189].mxu1 }
0x2365   :  { %v14340_v1 = vadd.f32 %v14339_v43, %v14338_v12  ;;  %v14362_v14 = vadd.f32 %v14361_v9, %v14360_v13  ;;  %v14341_v35 = vpop.f32.mrb[190].mxu0  ;;  %v14363_v24 = vpop.f32.mrb[190].mxu1 }
0x2366   :  { %v14342_v16 = vpop.f32.mrb[191].mxu0  ;;  %v14364_v19 = vpop.f32.mrb[191].mxu1 }
0x2367   :  { %v9249_v18 = vadd.f32 %v14362_v14, %v14340_v1 }
0x2369   :  { %v9254_v46 = vadd.f32 %v9249_v18, %v8756_v52 }
0x236b   :  { %v9255_v26 = vadd.f32 %v15637_v8, %v9254_v46 }
0x236d   :  { %v9256_v20 = vadd.f32 %v9255_v26, %v17612_v45  ;;  %v15372_v45 = vld [vmem:[%s18880_s1 + $0x38] sm:$0xff]  }
0x236e   :  { %14869 = vmatpush3.bf16.msra.mxu0 %v15372_v45 }
0x236f   :  { %v9258_v21 = vsel %vm7229_vm12, %v9256_v20, 0.0  ;;  %v9262_v40 = vmul.f32 %v9256_v20, %v9256_v20  ;;  %14880 = vmatprep.subr.bf16.mxu0 %v15639_v0 }
0x2370   :  { %9259 = vadd.xlane.f32.xlu0 %v9258_v21 }
0x2371   :  { %v9263_v22 = vsel %vm7229_vm12, %v9262_v40, 0.0 }
0x2372   :  { %9264 = vadd.xlane.f32.xlu1 %v9263_v22 }
0x2386   :  { %9274 = vrot.lane.b32.xlu0 %v15637_v8, %s15648_s21 }
0x23fd   :  { %v9260_v10 = vpop.xlane.xlu0 %9259 }
0x23fe   :  { %v9261_v48 = vmul.f32 0.03125, %v9260_v10 }
0x23ff   :  { %v9265_v61 = vpop.xlane.xlu1 %9264 }
0x2400   :  { %v9267_v63 = vmul.f32 %v9261_v48, %v9261_v48  ;;  %v9266_v11 = vmul.f32 0.03125, %v9265_v61  ;;  %v9270_v49 = vsub.f32 %v9256_v20, %v9261_v48 }
0x2401   :  { %v9275_v54 = vpop.permute.xlu0 %9274 }
0x2402   :  { %v9268_v2 = vsub.f32 %v9266_v11, %v9267_v63 }
0x2404   :  { %v9269_v47 = vmax.f32 %v9268_v2, 0.0 }
0x2406   :  { %v9271_v6 = vadd.f32 1e-05, %v9269_v47 }
0x2408   :  { %15611 = vrsqrt.f32 %v9271_v6 }
0x2412   :  { %v15612_v17 = vpop.eup %15611 }
0x2413   :  { %v9273_v31 = vmul.f32 %v15612_v17, %v9270_v49 }
0x2415   :  { %v9277_v23 = vmul.f32 %v9275_v54, %v9273_v31 }
0x2417   :  { %v18155_v41 = vadd.f32 %v13241_v55, %v9277_v23 }
0x2419   :  { %v9283_v52 = vpack.c.bf16 %v18155_v41, %v18155_v41 }
0x241b   :  { %14871 = vmatmul.mubr.msk.bf16.vlgmr.msra.gmra.mrb[192].mxu0 %vm124_vm2, %v9283_v52 }
0x241c   :  { %14882 = vmatprep.mubr.msk.bf16.mxu0 %vm15640_vm0, %v15639_v0 }
0x24ee   :  { %v9343_v29 = vpop.f32.mrb[192].mxu0 }
0x24ef   :  { %v9344_v51 = vadd.f32 %v18165_v42, %v9343_v29  ;;  %v14872_v32 = vpop.f32.mrb[193].mxu0 }
0x24f0   :  { %v9346_v30 = vpop.f32.mrb[194].mxu0 }
0x24f1   :  { %v18168_v28 = vpack.c.bf16 %v9344_v51, %v9344_v51  ;;  %v14873_v3 = vpop.f32.mrb[195].mxu0 }
0x24f3   :  { %9353 = vrot.lane.b32.xlu0 %v18168_v28, %s15641_s29  ;;  %9351 = vrot.lane.b32.xlu1 %v18168_v28, %s15642_s30 }
0x24f7   :  { %9357 = vrot.lane.b32.xlu0 %v18168_v28, %s15644_s13  ;;  %9355 = vrot.lane.b32.xlu1 %v18168_v28, %s15643_s12 }
0x2565   :  { %v18178_v58 = vpop.permute.xlu0 %9353  ;;  %v18180_v59 = vpop.permute.xlu1 %9351 }
0x2566   :  { %9453 = vrot.lane.b32.xlu0 %v18178_v58, %s15644_s13  ;;  %9405 = vrot.lane.b32.xlu1 %v18180_v59, %s15644_s13 }
0x2569   :  { %v9358_v60 = vpop.permute.xlu0 %9357  ;;  %v18186_v62 = vpop.permute.xlu1 %9355 }
0x256a   :  { %v9363_v4 = vsel %vm187_vm3, %v9358_v60, 0  ;;  %9501 = vrot.lane.b32.xlu1 %v18186_v62, %s15644_s13 }
0x256b   :  { %14875 = vmatpush3.bf16.xpose.msra.mxu1 %v9363_v4 }
0x256c   :  { %14886 = vmatprep.subr.bf16.mxu1 %v15639_v0 }
0x2572   :  { %14877 = vmatmul.mubr.msk.bf16.vlgmr.msra.gmra.mrb[192].mxu1 %vm187_vm3, %v18168_v28 }
0x2573   :  { %14888 = vmatprep.mubr.msk.bf16.mxu1 %vm15640_vm0, %v15639_v0 }
0x25d8   :  { %v9454_v57 = vpop.permute.xlu0 %9453  ;;  %v9406_v33 = vpop.permute.xlu1 %9405 }
0x25d9   :  { %v9459_v34 = vsel %vm187_vm3, %v9454_v57, 0  ;;  %v9411_v44 = vsel %vm187_vm3, %v9406_v33, 0 }
0x25da   :  { %14881 = vmatpush3.bf16.xpose.msra.mxu0 %v9411_v44  ;;  %14887 = vmatpush3.bf16.xpose.msra.mxu1 %v9459_v34 }
0x25db   :  { %14892 = vmatprep.subr.bf16.mxu0 %v15639_v0  ;;  %14898 = vmatprep.subr.bf16.mxu1 %v15639_v0 }
0x25dc   :  { %v9502_v7 = vpop.permute.xlu1 %9501 }
0x25dd   :  { %v9507_v39 = vsel %vm187_vm3, %v9502_v7, 0 }
0x25e1   :  { %14883 = vmatmul.mubr.msk.bf16.vlgmr.msra.gmra.mrb[196].mxu0 %vm187_vm3, %v18180_v59  ;;  %14889 = vmatmul.mubr.msk.bf16.vlgmr.msra.gmra.mrb[196].mxu1 %vm187_vm3, %v18178_v58 }
0x25e2   :  { %14893 = vmatpush3.bf16.xpose.msra.mxu0 %v9507_v39  ;;  %14894 = vmatprep.mubr.msk.bf16.mxu0 %vm15640_vm0, %v15639_v0 }
0x25e3   :  { %14900 = vmatprep.mubr.msk.bf16.mxu1 %vm15640_vm0, %v15639_v0  ;;  %14904 = vmatprep.subr.bf16.mxu0 %v15639_v0 }
0x25e9   :  { %14895 = vmatmul.mubr.msk.bf16.vlgmr.msra.gmra.mrb[200].mxu0 %vm187_vm3, %v18186_v62 }
0x25ea   :  { %14906 = vmatprep.mubr.msk.bf16.mxu0 %vm15640_vm0, %v15639_v0 }
0x2645   :  { %v9399_v37 = vpop.f32.mrb[192].mxu1 }
0x2646   :  { %v9549_v50 = vmul.f32 0.35355338, %v9399_v37  ;;  %v14878_v5 = vpop.f32.mrb[193].mxu1 }
0x2647   :  { %v9402_v38 = vpop.f32.mrb[194].mxu1 }
0x2648   :  { %v14879_v12 = vpop.f32.mrb[195].mxu1  ;;  %v9553_v13 = vsel %vm6899_vm9, %v9549_v50, -inf }
0x2649   :  { %9554 = vmax.xlane.f32.xlu0 %v9553_v13 }
0x26b4   :  { %v9447_v43 = vpop.f32.mrb[196].mxu0  ;;  %v9495_v9 = vpop.f32.mrb[196].mxu1 }
0x26b5   :  { %v9550_v1 = vmul.f32 0.35355338, %v9447_v43  ;;  %v9551_v14 = vmul.f32 0.35355338, %v9495_v9  ;;  %v14884_v35 = vpop.f32.mrb[197].mxu0  ;;  %v14890_v24 = vpop.f32.mrb[197].mxu1 }
0x26b6   :  { %v9450_v16 = vpop.f32.mrb[198].mxu0  ;;  %v9498_v19 = vpop.f32.mrb[198].mxu1 }
0x26b7   :  { %v14885_v18 = vpop.f32.mrb[199].mxu0  ;;  %v14891_v46 = vpop.f32.mrb[199].mxu1  ;;  %v9559_v8 = vsel %vm6899_vm9, %v9551_v14, -inf  ;;  %v9556_v26 = vsel %vm6899_vm9, %v9550_v1, -inf }
0x26b8   :  { %9560 = vmax.xlane.f32.xlu0 %v9559_v8  ;;  %9557 = vmax.xlane.f32.xlu1 %v9556_v26  ;;  %v15373_v8 = vld [vmem:[%s18883_s2 + $0x30] sm:$0xff]   ;;  %v15374_v26 = vld [vmem:[%s18883_s2 + $0x38] sm:$0xff]  }
0x26bc   :  { %v9543_v20 = vpop.f32.mrb[200].mxu0 }
0x26bd   :  { %v9552_v21 = vmul.f32 0.35355338, %v9543_v20  ;;  %v14896_v40 = vpop.f32.mrb[201].mxu0 }
0x26be   :  { %v9546_v22 = vpop.f32.mrb[202].mxu0 }
0x26bf   :  { %v14897_v56 = vpop.f32.mrb[203].mxu0  ;;  %v9562_v45 = vsel %vm6899_vm9, %v9552_v21, -inf }
0x26c0   :  { %9563 = vmax.xlane.f32.xlu0 %v9562_v45 }
0x26c9   :  { %9601 = vrot.lane.b32.xlu1 %v18168_v28, %s15645_s14 }
0x26d6   :  { %v9555_v10 = vpop.xlane.xlu0 %9554 }
0x26d7   :  { %v9565_v48 = vsub.f32 %v9549_v50, %v9555_v10 }
0x26d9   :  { %v9569_v61 = vmul.f32 1.442695, %v9565_v48 }
0x26db   :  { %15613 = vpow2.f32 %v9569_v61 }
0x26e5   :  { %v15614_v63 = vpop.eup %15613 }
0x26e6   :  { %v9577_v11 = vsel %vm6899_vm9, %v15614_v63, 0.0 }
0x26ed   :  { %9578 = vadd.xlane.f32.xlu1 %v9577_v11 }
0x2745   :  { %v9561_v2 = vpop.xlane.xlu0 %9560  ;;  %v9558_v47 = vpop.xlane.xlu1 %9557 }
0x2746   :  { %v9567_v6 = vsub.f32 %v9551_v14, %v9561_v2  ;;  %v9566_v49 = vsub.f32 %v9550_v1, %v9558_v47 }
0x2748   :  { %v9573_v17 = vmul.f32 1.442695, %v9567_v6  ;;  %v9571_v54 = vmul.f32 1.442695, %v9566_v49 }
0x2749   :  { %v9602_v31 = vpop.permute.xlu1 %9601 }
0x274a   :  { %15615 = vpow2.f32 %v9573_v17  ;;  %v9607_v55 = vsel %vm6954_vm10, %v9602_v31, 0 }
0x274b   :  { %15617 = vpow2.f32 %v9571_v54  ;;  %14899 = vmatpush3.bf16.msra.mxu1 %v9607_v55 }
0x274c   :  { %14910 = vmatprep.subr.bf16.mxu1 %v15639_v0 }
0x274d   :  { %v9564_v23 = vpop.xlane.xlu0 %9563 }
0x274e   :  { %v9568_v52 = vsub.f32 %v9552_v21, %v9564_v23 }
0x2750   :  { %v9575_v29 = vmul.f32 1.442695, %v9568_v52 }
0x2752   :  { %15619 = vpow2.f32 %v9575_v29 }
0x2754   :  { %v15616_v51 = vpop.eup %15615 }
0x2755   :  { %v15618_v32 = vpop.eup %15617  ;;  %v9583_v30 = vsel %vm6899_vm9, %v15616_v51, 0.0 }
0x2756   :  { %9584 = vadd.xlane.f32.xlu1 %v9583_v30  ;;  %v9580_v28 = vsel %vm6899_vm9, %v15618_v32, 0.0 }
0x2757   :  { %9581 = vadd.xlane.f32.xlu0 %v9580_v28 }
0x275c   :  { %v15620_v3 = vpop.eup %15619 }
0x275d   :  { %v9586_v60 = vsel %vm6899_vm9, %v15620_v3, 0.0 }
0x275e   :  { %9587 = vadd.xlane.f32.xlu0 %v9586_v60  ;;  %v13266_v60 = vld [vmem:[%s18882_s6 + $0x7] ss:$0 sm:$0xff] }
0x2767   :  { %9697 = vrot.lane.b32.xlu1 %v18178_v58, %s15645_s14 }
0x276b   :  { %9745 = vrot.lane.b32.xlu1 %v18186_v62, %s15645_s14 }
0x2774   :  { %9649 = vrot.lane.b32.xlu0 %v18180_v59, %s15645_s14 }
0x277a   :  { %v9579_v4 = vpop.xlane.xlu1 %9578 }
0x277b   :  { %15621 = vrcp.f32 %v9579_v4  ;;  %v13269_v4 = vld [vmem:[%s18884_s3 + $0x340] sm:$0xff] }
0x2785   :  { %v15622_v57 = vpop.eup %15621 }
0x2786   :  { %v9593_v33 = vmul.f32 %v15622_v57, %v15614_v63  ;;  %v13268_v57 = vld [vmem:[%s18884_s3 + $0x308] sm:$0xff] }
0x2788   :  { %v9597_v34 = vpack.c.bf16 %v9593_v33, %v9593_v33 }
0x278a   :  { %14901 = vmatmul.mubr.msk.bf16.vlgmr.msra.gmra.mrb[200].mxu1 %vm6950_vm11, %v9597_v34 }
0x278b   :  { %14912 = vmatprep.mubr.msk.bf16.mxu1 %vm15640_vm0, %v15639_v0 }
0x27e3   :  { %v9585_v44 = vpop.xlane.xlu1 %9584 }
0x27e4   :  { %15623 = vrcp.f32 %v9585_v44  ;;  %v9582_v7 = vpop.xlane.xlu0 %9581  ;;  %v13270_v44 = vld [vmem:[%s18884_s3 + $0x348] sm:$0xff] }
0x27e5   :  { %15625 = vrcp.f32 %v9582_v7  ;;  %v13278_v7 = vcombine.low %v13268_v57, %v13270_v44 }
0x27e7   :  { %v9698_v58 = vpop.permute.xlu1 %9697 }
0x27e8   :  { %v9703_v62 = vsel %vm6954_vm10, %v9698_v58, 0  ;;  %v13279_v58 = vcombine.high %v13268_v57, %v13270_v44  ;;  %v15388_v57 = vld [vmem:[%s18885_s4 + $0xdd8] sm:$0xff]   ;;  %v15391_v44 = vld [vmem:[%s18885_s4 + $0xd60] sm:$0xff]  }
0x27e9   :  { %14911 = vmatpush3.bf16.msra.mxu1 %v9703_v62  ;;  %v13271_v62 = vld [vmem:[%s18884_s3 + $0x380] sm:$0xff] }
0x27ea   :  { %14922 = vmatprep.subr.bf16.mxu1 %v15639_v0 }
0x27eb   :  { %v9588_v59 = vpop.xlane.xlu0 %9587  ;;  %v9746_v13 = vpop.permute.xlu1 %9745 }
0x27ec   :  { %15627 = vrcp.f32 %v9588_v59  ;;  %v9751_v1 = vsel %vm6954_vm10, %v9746_v13, 0  ;;  %v13273_v59 = vld [vmem:[%s18884_s3 + $0x3c0] sm:$0xff]  ;;  %v13350_v13 = vld [vmem:[%s18884_s3 + $0x310] sm:$0xff] }
0x27ee   :  { %v15624_v39 = vpop.eup %15623 }
0x27ef   :  { %v15626_v37 = vpop.eup %15625  ;;  %v9595_v50 = vmul.f32 %v15624_v39, %v15616_v51  ;;  %v9650_v5 = vpop.permute.xlu0 %9649  ;;  %v13272_v39 = vld [vmem:[%s18884_s3 + $0x388] sm:$0xff] }
0x27f0   :  { %v9594_v38 = vmul.f32 %v15626_v37, %v15618_v32  ;;  %v9655_v12 = vsel %vm6954_vm10, %v9650_v5, 0  ;;  %v13281_v37 = vcombine.high %v13271_v62, %v13273_v59  ;;  %v13280_v5 = vcombine.low %v13271_v62, %v13273_v59  ;;  %v15394_v62 = vld [vmem:[%s18885_s4 + $0xda0] sm:$0xff]   ;;  %v15395_v59 = vld [vmem:[%s18885_s4 + $0xd68] sm:$0xff]  }
0x27f1   :  { %14905 = vmatpush3.bf16.msra.mxu0 %v9655_v12  ;;  %v9599_v43 = vpack.c.bf16 %v9595_v50, %v9595_v50  ;;  %v13274_v50 = vld [vmem:[%s18884_s3 + $0x3c8] sm:$0xff] }
0x27f2   :  { %v9598_v9 = vpack.c.bf16 %v9594_v38, %v9594_v38  ;;  %14916 = vmatprep.subr.bf16.mxu0 %v15639_v0  ;;  %v13282_v38 = vcombine.low %v13272_v39, %v13274_v50  ;;  %v13283_v12 = vcombine.high %v13272_v39, %v13274_v50  ;;  %v15396_v39 = vld [vmem:[%s18885_s4 + $0xde8] sm:$0xff]  }
0x27f3   :  { %14913 = vmatmul.mubr.msk.bf16.vlgmr.msra.gmra.mrb[204].mxu1 %vm6950_vm11, %v9599_v43  ;;  %v13352_v43 = vld [vmem:[%s18884_s3 + $0x350] sm:$0xff]  ;;  %v15398_v50 = vld [vmem:[%s18885_s4 + $0xda8] sm:$0xff]  }
0x27f4   :  { %14907 = vmatmul.mubr.msk.bf16.vlgmr.msra.gmra.mrb[204].mxu0 %vm6950_vm11, %v9598_v9  ;;  %14926 = vmatprep.mubr.msk.bf16.mxu1 %vm15640_vm0, %v15639_v0  ;;  %v13351_v9 = vld [vmem:[%s18884_s3 + $0x318] sm:$0xff] }
0x27f5   :  { %14917 = vmatpush3.bf16.msra.mxu0 %v9751_v1  ;;  %14918 = vmatprep.mubr.msk.bf16.mxu0 %vm15640_vm0, %v15639_v0  ;;  %v13360_v1 = vcombine.high %v13350_v13, %v13352_v43 }
0x27f6   :  { %v15628_v14 = vpop.eup %15627  ;;  %14923 = vmatpush3.bf16.msra.mxu1 %v15373_v8 }
0x27f7   :  { %v9596_v35 = vmul.f32 %v15628_v14, %v15620_v3  ;;  %14924 = vmatprep.subr.bf16.mxu1 %v15639_v0  ;;  %v13353_v14 = vld [vmem:[%s18884_s3 + $0x358] sm:$0xff] }
0x27f9   :  { %v9600_v24 = vpack.c.bf16 %v9596_v35, %v9596_v35  ;;  %v13359_v35 = vcombine.low %v13350_v13, %v13352_v43  ;;  %v15402_v13 = vld [vmem:[%s18885_s4 + $0xdb0] sm:$0xff]   ;;  %v15403_v43 = vld [vmem:[%s18885_s4 + $0xd78] sm:$0xff]  }
0x27fa   :  { %14925 = vmatpush3.bf16.msra.mxu1 %v15374_v26 }
0x27fb   :  { %10026 = vmatprep.subr.bf16.mxu1 %v13279_v58  ;;  %v15393_v58 = vld [vmem:[%s18885_s4 + $0xd20] sm:$0xff]  }
0x27fc   :  { %14919 = vmatmul.mubr.msk.bf16.vlgmr.msra.gmra.mrb[208].mxu0 %vm6950_vm11, %v9600_v24  ;;  %v13361_v24 = vcombine.low %v13351_v9, %v13353_v14 }
0x27fd   :  { %10017 = vmatprep.mubr.bf16.mxu0 %v15650_v36 }
0x285d   :  { %v9643_v16 = vpop.f32.mrb[200].mxu1 }
0x285e   :  { %v14902_v19 = vpop.f32.mrb[201].mxu1 }
0x285f   :  { %v9646_v18 = vpop.f32.mrb[202].mxu1 }
0x2860   :  { %v14903_v46 = vpop.f32.mrb[203].mxu1 }
0x28c6   :  { %v9739_v20 = vpop.f32.mrb[204].mxu1 }
0x28c7   :  { %9798 = vrot.lane.b32.xlu1 %v9739_v20, %s15647_s20  ;;  %v9691_v21 = vpop.f32.mrb[204].mxu0  ;;  %v14914_v40 = vpop.f32.mrb[205].mxu1 }
0x28c8   :  { %v9742_v22 = vpop.f32.mrb[206].mxu1  ;;  %9794 = vrot.lane.b32.xlu0 %v9691_v21, %s15646_s15  ;;  %v14908_v56 = vpop.f32.mrb[205].mxu0 }
0x28c9   :  { %v9694_v45 = vpop.f32.mrb[206].mxu0  ;;  %v14915_v10 = vpop.f32.mrb[207].mxu1 }
0x28ca   :  { %v14909_v48 = vpop.f32.mrb[207].mxu0 }
0x28cb   :  { %9832 = vrot.lane.b32.xlu1 %v18165_v42, %s15648_s21 }
0x28cf   :  { %v9787_v0 = vpop.f32.mrb[208].mxu0 }
0x28d0   :  { %9802 = vrot.lane.b32.xlu0 %v9787_v0, %s15649_s22  ;;  %v14920_v61 = vpop.f32.mrb[209].mxu0 }
0x28d1   :  { %v9790_v63 = vpop.f32.mrb[210].mxu0  ;;  %v13354_v61 = vld [vmem:[%s18884_s3 + $0x390] sm:$0xff] }
0x28d2   :  { %v14921_v11 = vpop.f32.mrb[211].mxu0  ;;  %v13356_v63 = vld [vmem:[%s18884_s3 + $0x3d0] sm:$0xff] }
0x28d3   :  { %v13355_v11 = vld [vmem:[%s18884_s3 + $0x398] sm:$0xff] }
0x2939   :  { %v9799_v6 = vpop.permute.xlu1 %9798 }
0x293a   :  { %v9795_v2 = vpop.permute.xlu0 %9794 }
0x293b   :  { %v9805_v47 = vsel %vm187_vm3, %v9643_v16, %v9795_v2  ;;  %v13362_v16 = vcombine.high %v13351_v9, %v13353_v14  ;;  %v13357_v2 = vld [vmem:[%s18884_s3 + $0x3d8] sm:$0xff] }
0x293c   :  { %v9806_v49 = vsel %vm57_vm1, %v9805_v47, %v9799_v6  ;;  %v15404_v9 = vld [vmem:[%s18885_s4 + $0xdf8] sm:$0xff]  }
0x293d   :  { %v9833_v42 = vpop.permute.xlu1 %9832  ;;  %v15406_v14 = vld [vmem:[%s18885_s4 + $0xdb8] sm:$0xff]  }
0x2942   :  { %v9803_v17 = vpop.permute.xlu0 %9802 }
0x2943   :  { %v9807_v54 = vsel %vm1087_vm5, %v9806_v49, %v9803_v17  ;;  %v13364_v49 = vcombine.high %v13354_v61, %v13356_v63  ;;  %v13366_v17 = vcombine.high %v13355_v11, %v13357_v2 }
0x2944   :  { %v9808_v31 = vpack.c.bf16 %v9807_v54, %v9807_v54  ;;  %v13363_v54 = vcombine.low %v13354_v61, %v13356_v63 }
0x2946   :  { %14927 = vmatmul.mubr.msk.bf16.vlgmr.msra.gmra.mrb[208].mxu1 %vm124_vm2, %v9808_v31  ;;  %v13365_v31 = vcombine.low %v13355_v11, %v13357_v2 }
0x2947   :  { %10058 = vmatprep.mubr.bf16.mxu1 %v15650_v36  ;;  %10027 = vmatpush1.bf16.msra.mxu1 %v13278_v7  ;;  %v15392_v7 = vld [vmem:[%s18885_s4 + $0xde0] sm:$0xff]  }
0x2948   :  { %10028 = vmatprep.subr.bf16.mxu1 %v13283_v12  ;;  %v15401_v12 = vld [vmem:[%s18885_s4 + $0xd30] sm:$0xff]  }
0x294b   :  { %10029 = vmatpush1.bf16.msra.mxu1 %v13282_v38  ;;  %v15400_v38 = vld [vmem:[%s18885_s4 + $0xdf0] sm:$0xff]  }
0x294c   :  { %10252 = vmatprep.subr.bf16.mxu1 %v13362_v16 }
0x2a19   :  { %v9872_v55 = vpop.f32.mrb[208].mxu1 }
0x2a1a   :  { %v9873_v23 = vadd.f32 %v9872_v55, %v9833_v42  ;;  %v14928_v52 = vpop.f32.mrb[209].mxu1  ;;  %v15375_v42 = vld [vmem:[%s18885_s4 + $0xd40] sm:$0xff]  }
0x2a1b   :  { %v9875_v29 = vpop.f32.mrb[210].mxu1  ;;  %v15376_v55 = vld [vmem:[%s18885_s4 + $0xdc0] sm:$0xff]  }
0x2a1c   :  { %v9878_v51 = vadd.f32 %v9873_v23, %v18155_v41  ;;  %v14929_v32 = vpop.f32.mrb[211].mxu1  ;;  %v13267_v41 = vld [vmem:[%s18884_s3 + $0x300] sm:$0xff]  ;;  %v15379_v29 = vld [vmem:[%s18885_s4 + $0xd48] sm:$0xff]  }
0x2a1d   :  { %v13276_v33 = vcombine.low %v13267_v41, %v13269_v4  ;;  %v13277_v34 = vcombine.high %v13267_v41, %v13269_v4  ;;  %v15377_v23 = vld [vmem:[%s18885_s4 + $0xd00] sm:$0xff]   ;;  %v15381_v32 = vld [vmem:[%s18885_s4 + $0xd08] sm:$0xff]   ;;  %v15386_v41 = vld [vmem:[%s18885_s4 + $0xd90] sm:$0xff]  }
0x2a1e   :  { %v9880_v30 = vsel %vm7229_vm12, %v9878_v51, 0.0  ;;  %v9884_v28 = vmul.f32 %v9878_v51, %v9878_v51  ;;  %v15378_v52 = vld [vmem:[%s18885_s4 + $0xd80] sm:$0xff]   ;;  %v15387_v4 = vld [vmem:[%s18885_s4 + $0xd58] sm:$0xff]  }
0x2a1f   :  { %9881 = vadd.xlane.f32.xlu0 %v9880_v30  ;;  %9985 = vmatprep.subr.bf16.mxu0 %v13277_v34  ;;  %v15382_v30 = vld [vmem:[%s18885_s4 + $0xd88] sm:$0xff]   ;;  %v15390_v34 = vld [vmem:[%s18885_s4 + $0xd98] sm:$0xff]  }
0x2a20   :  { %v9885_v3 = vsel %vm7229_vm12, %v9884_v28, 0.0  ;;  %9986 = vmatpush1.bf16.msra.mxu0 %v13276_v33  ;;  %v15383_v28 = vld [vmem:[%s18885_s4 + $0xd50] sm:$0xff]   ;;  %v15389_v33 = vld [vmem:[%s18885_s4 + $0xd18] sm:$0xff]  }
0x2a21   :  { %9886 = vadd.xlane.f32.xlu1 %v9885_v3  ;;  %9987 = vmatprep.subr.bf16.mxu0 %v13281_v37  ;;  %v15384_v3 = vld [vmem:[%s18885_s4 + $0xdd0] sm:$0xff]   ;;  %v15397_v37 = vld [vmem:[%s18885_s4 + $0xd28] sm:$0xff]  }
0x2a24   :  { %9988 = vmatpush1.bf16.msra.mxu0 %v13280_v5  ;;  %v15399_v5 = vld [vmem:[%s18885_s4 + $0xd70] sm:$0xff]  }
0x2a25   :  { %10211 = vmatprep.subr.bf16.mxu0 %v13360_v1  ;;  %v15405_v1 = vld [vmem:[%s18885_s4 + $0xd38] sm:$0xff]  }
0x2a32   :  { %9905 = vrot.lane.b32.xlu1 %v13266_v60, %s15645_s14 }
0x2a35   :  { %9901 = vrot.lane.b32.xlu0 %v13266_v60, %s15644_s13  ;;  %v15385_v60 = vld [vmem:[%s18885_s4 + $0xd10] sm:$0xff]  }
0x2aac   :  { %v9882_v19 = vpop.xlane.xlu0 %9881 }
0x2aad   :  { %v9883_v18 = vmul.f32 0.03125, %v9882_v19 }
0x2aae   :  { %v9887_v46 = vpop.xlane.xlu1 %9886 }
0x2aaf   :  { %v9889_v8 = vmul.f32 %v9883_v18, %v9883_v18  ;;  %v9888_v26 = vmul.f32 0.03125, %v9887_v46  ;;  %v9892_v22 = vsub.f32 %v9878_v51, %v9883_v18  ;;  %v15380_v51 = vld [vmem:[%s18885_s4 + $0xdc8] sm:$0xff]  }
0x2ab0   :  { %v9902_v45 = vpop.permute.xlu0 %9901  ;;  %v18446_v18 = vld [vmem:[%s18886_s5 + $0x3] ss:$4 sm:$0xf] }
0x2ab1   :  { %v9890_v20 = vsub.f32 %v9888_v26, %v9889_v8 }
0x2ab2   :  { %v9906_v48 = vpop.permute.xlu1 %9905 }
0x2ab3   :  { %v9891_v21 = vmax.f32 %v9890_v20, 0.0 }
0x2ab5   :  { %v9893_v40 = vadd.f32 1e-05, %v9891_v21  ;;  %v13358_v21 = vld [vmem:[%s18886_s5 + $0x13] ss:$4 sm:$0xf] }
0x2ab6   :  { %v10166_v61 = vrot.slane %v13358_v21, %v16160_v15 }
0x2ab7   :  { %15629 = vrsqrt.f32 %v9893_v40 }
0x2ac1   :  { %v15630_v56 = vpop.eup %15629 }
0x2ac2   :  { %v9895_v10 = vmul.f32 %v15630_v56, %v9892_v22  ;;  %v9929_v56 = vrot.slane %v18446_v18, %v16158_v27 }
0x2ac4   :  { %v9904_v0 = vmul.f32 %v9902_v45, %v9895_v10  ;;  %v9937_v45 = vrot.slane %v18446_v18, %v16160_v15  ;;  %v10154_v10 = vrot.slane %v13358_v21, %v16154_v53 }
0x2ac6   :  { %v18321_v47 = vadd.f32 %v9906_v48, %v9904_v0  ;;  %v10162_v48 = vrot.slane %v13358_v21, %v16156_v25  ;;  %v10158_v0 = vrot.slane %v13358_v21, %v16158_v27  ;;  %v15428_v21 = vld [vmem:[%s18885_s4 + $0xce8] sm:$0xff]  }
0x2ac8   :  { %v18325_v6 = vpack.c.bf16 %v18321_v47, %v18321_v47 }
0x2aca   :  { %13284 = vmatmul.mubr.msk.bf16.vlgmr.msra.gmra.mrb[212].mxu0 %vm124_vm2, %v18325_v6  ;;  %13285 = vmatmul.mubr.msk.bf16.vlgmr.msra.gmra.mrb[212].mxu1 %vm124_vm2, %v18325_v6 }
0x2acb   :  { %10212 = vmatpush1.bf16.msra.mxu0 %v13359_v35  ;;  %10253 = vmatpush1.bf16.msra.mxu1 %v13361_v24  ;;  %v15407_v35 = vld [vmem:[%s18885_s4 + $0xc40] sm:$0xff]  }
0x2acc   :  { %10213 = vmatprep.subr.bf16.mxu0 %v13364_v49  ;;  %10254 = vmatprep.subr.bf16.mxu1 %v13366_v17  ;;  %v15408_v24 = vld [vmem:[%s18885_s4 + $0xcc0] sm:$0xff]  }
0x2acd   :  { %10243 = vmatprep.mubr.bf16.mxu0 %v15650_v36  ;;  %10284 = vmatprep.mubr.bf16.mxu1 %v15650_v36 }
0x2acf   :  { %10214 = vmatpush1.bf16.msra.mxu0 %v13363_v54  ;;  %10255 = vmatpush1.bf16.msra.mxu1 %v13365_v31 }
0x2ad0   :  { %14388 = vmatprep.subr.bf16.mxu0 %v15375_v42  ;;  %14410 = vmatprep.subr.bf16.mxu1 %v15376_v55 }
0x2ad2   :  { %13367 = vmatmul.mubr.msk.bf16.vlgmr.msra.gmra.mrb[216].mxu0 %vm124_vm2, %v18325_v6  ;;  %13368 = vmatmul.mubr.msk.bf16.vlgmr.msra.gmra.mrb[216].mxu1 %vm124_vm2, %v18325_v6 }
0x2ad3   :  { %14389 = vmatpush3.bf16.msra.mxu0 %v15377_v23  ;;  %14411 = vmatpush3.bf16.msra.mxu1 %v15378_v52 }
0x2ad4   :  { %14390 = vmatprep.subr.bf16.mxu0 %v15379_v29  ;;  %14412 = vmatprep.subr.bf16.mxu1 %v15380_v51 }
0x2ad7   :  { %14391 = vmatpush3.bf16.msra.mxu0 %v15381_v32  ;;  %14413 = vmatpush3.bf16.msra.mxu1 %v15382_v30 }
0x2ad8   :  { %14392 = vmatprep.subr.bf16.mxu0 %v15383_v28  ;;  %14414 = vmatprep.subr.bf16.mxu1 %v15384_v3 }
0x2adb   :  { %14393 = vmatpush3.bf16.msra.mxu0 %v15385_v60  ;;  %14415 = vmatpush3.bf16.msra.mxu1 %v15386_v41 }
0x2adc   :  { %14394 = vmatprep.subr.bf16.mxu0 %v15387_v4  ;;  %14416 = vmatprep.subr.bf16.mxu1 %v15388_v57 }
0x2adf   :  { %14395 = vmatpush3.bf16.msra.mxu0 %v15389_v33  ;;  %14417 = vmatpush3.bf16.msra.mxu1 %v15390_v34  ;;  %v15409_v34 = vld [vmem:[%s18885_s4 + $0xc00] sm:$0xff]  }
0x2ae0   :  { %14396 = vmatprep.subr.bf16.mxu0 %v15391_v44  ;;  %14418 = vmatprep.subr.bf16.mxu1 %v15392_v7  ;;  %v15410_v44 = vld [vmem:[%s18885_s4 + $0xc80] sm:$0xff]  }
0x2ae3   :  { %14397 = vmatpush3.bf16.msra.mxu0 %v15393_v58  ;;  %14419 = vmatpush3.bf16.msra.mxu1 %v15394_v62  ;;  %v15411_v62 = vld [vmem:[%s18885_s4 + $0xc48] sm:$0xff]  }
0x2ae4   :  { %14398 = vmatprep.subr.bf16.mxu0 %v15395_v59  ;;  %14420 = vmatprep.subr.bf16.mxu1 %v15396_v39  ;;  %v15412_v59 = vld [vmem:[%s18885_s4 + $0xcc8] sm:$0xff]  }
0x2ae7   :  { %14399 = vmatpush3.bf16.msra.mxu0 %v15397_v37  ;;  %14421 = vmatpush3.bf16.msra.mxu1 %v15398_v50  ;;  %v15413_v50 = vld [vmem:[%s18885_s4 + $0xc08] sm:$0xff]  }
0x2ae8   :  { %14400 = vmatprep.subr.bf16.mxu0 %v15399_v5  ;;  %14422 = vmatprep.subr.bf16.mxu1 %v15400_v38  ;;  %v15414_v5 = vld [vmem:[%s18885_s4 + $0xc88] sm:$0xff]   ;;  %v15415_v38 = vld [vmem:[%s18885_s4 + $0xc50] sm:$0xff]  }
0x2aeb   :  { %14401 = vmatpush3.bf16.msra.mxu0 %v15401_v12  ;;  %14423 = vmatpush3.bf16.msra.mxu1 %v15402_v13  ;;  %v15416_v12 = vld [vmem:[%s18885_s4 + $0xcd0] sm:$0xff]  }
0x2aec   :  { %14402 = vmatprep.subr.bf16.mxu0 %v15403_v43  ;;  %14424 = vmatprep.subr.bf16.mxu1 %v15404_v9  ;;  %v15417_v13 = vld [vmem:[%s18885_s4 + $0xc10] sm:$0xff]   ;;  %v15419_v9 = vld [vmem:[%s18885_s4 + $0xc58] sm:$0xff]  }
0x2aed   :  { %v15418_v43 = vld [vmem:[%s18885_s4 + $0xc90] sm:$0xff]  }
0x2aef   :  { %14403 = vmatpush3.bf16.msra.mxu0 %v15405_v1  ;;  %14425 = vmatpush3.bf16.msra.mxu1 %v15406_v14  ;;  %v15420_v1 = vld [vmem:[%s18885_s4 + $0xcd8] sm:$0xff]  }
0x2af0   :  { %14432 = vmatprep.subr.bf16.mxu0 %v15407_v35  ;;  %14454 = vmatprep.subr.bf16.mxu1 %v15408_v24  ;;  %v15421_v14 = vld [vmem:[%s18885_s4 + $0xc18] sm:$0xff]   ;;  %v15423_v24 = vld [vmem:[%s18885_s4 + $0xc60] sm:$0xff]  }
0x2af1   :  { %v15422_v35 = vld [vmem:[%s18885_s4 + $0xc98] sm:$0xff]  }
0x2b9d   :  { %v18439_v16 = vpop.f32.mrb[212].mxu0  ;;  %v18441_v19 = vpop.f32.mrb[212].mxu1 }
0x2b9e   :  { %v10021_v46 = vpop.f32.mrb[213].mxu0  ;;  %v10062_v8 = vpop.f32.mrb[213].mxu1 }
0x2b9f   :  { %v10023_v26 = vpop.f32.mrb[214].mxu0  ;;  %v10064_v20 = vpop.f32.mrb[214].mxu1  ;;  %v10022_v2 = vadd.f32 %v10021_v46, %v9929_v56  ;;  %v10063_v49 = vadd.f32 %v10062_v8, %v9937_v45  ;;  %v15424_v46 = vld [vmem:[%s18885_s4 + $0xce0] sm:$0xff]   ;;  %v9925_v56 = vrot.slane %v18446_v18, %v16154_v53  ;;  %v9933_v45 = vrot.slane %v18446_v18, %v16156_v25  ;;  %v15434_v18 = vld [vmem:[%s18885_s4 + $0xcb0] sm:$0xff]  }
0x2ba0   :  { %v10024_v40 = vpop.f32.mrb[215].mxu0  ;;  %v10065_v22 = vpop.f32.mrb[215].mxu1  ;;  %v15425_v8 = vld [vmem:[%s18885_s4 + $0xc20] sm:$0xff]   ;;  %v15427_v20 = vld [vmem:[%s18885_s4 + $0xc68] sm:$0xff]  }
0x2ba1   :  { %v10068_v41 = vmax.f32 %v10022_v2, 0.0  ;;  %v10070_v4 = vmax.f32 %v10063_v49, 0.0  ;;  %v15426_v26 = vld [vmem:[%s18885_s4 + $0xca0] sm:$0xff]   ;;  %v15429_v40 = vld [vmem:[%s18885_s4 + $0xc28] sm:$0xff]   ;;  %v15436_v2 = vld [vmem:[%s18885_s4 + $0xcf8] sm:$0xff]  }
0x2ba2   :  { %v15430_v22 = vld [vmem:[%s18885_s4 + $0xca8] sm:$0xff]   ;;  %v13497_v49 = vld [vmem:[%s18884_s3 + $0x320] sm:$0xff] }
0x2ba3   :  { %v10072_v39 = vpack.c.bf16 %v10068_v41, %v10068_v41  ;;  %v10074_v37 = vpack.c.bf16 %v10070_v4, %v10070_v4 }
0x2ba5   :  { %v10245_v63 = vpop.f32.mrb[216].mxu0  ;;  %v10286_v11 = vpop.f32.mrb[216].mxu1 }
0x2ba6   :  { %v10246_v17 = vadd.f32 %v10245_v63, %v10154_v10  ;;  %v10287_v54 = vadd.f32 %v10286_v11, %v10162_v48  ;;  %v10247_v31 = vpop.f32.mrb[217].mxu0  ;;  %v10288_v42 = vpop.f32.mrb[217].mxu1  ;;  %v15431_v10 = vld [vmem:[%s18885_s4 + $0xc70] sm:$0xff]   ;;  %v10061_v63 = vadd.f32 %v18441_v19, %v9933_v45  ;;  %v15435_v11 = vld [vmem:[%s18885_s4 + $0xc78] sm:$0xff]   ;;  %v13498_v19 = vld [vmem:[%s18884_s3 + $0x328] sm:$0xff] }
0x2ba7   :  { %v10248_v55 = vadd.f32 %v10247_v31, %v10158_v0  ;;  %v10289_v23 = vadd.f32 %v10288_v42, %v10166_v61  ;;  %v10249_v52 = vpop.f32.mrb[218].mxu0  ;;  %v10290_v29 = vpop.f32.mrb[218].mxu1  ;;  %v15432_v48 = vld [vmem:[%s18885_s4 + $0xcf0] sm:$0xff]   ;;  %v10020_v61 = vadd.f32 %v18439_v16, %v9925_v56  ;;  %v13499_v16 = vld [vmem:[%s18884_s3 + $0x360] sm:$0xff]  ;;  %v15438_v31 = vld [vmem:[%s18885_s4 + $0xcb8] sm:$0xff]  }
0x2ba8   :  { %v10293_v51 = vmax.f32 %v10246_v17, 0.0  ;;  %v10295_v32 = vmax.f32 %v10287_v54, 0.0  ;;  %v10250_v30 = vpop.f32.mrb[219].mxu0  ;;  %v10291_v28 = vpop.f32.mrb[219].mxu1  ;;  %v15433_v0 = vld [vmem:[%s18885_s4 + $0xc30] sm:$0xff]   ;;  %v13500_v17 = vld [vmem:[%s18884_s3 + $0x368] sm:$0xff] }
0x2ba9   :  { %v10294_v3 = vmax.f32 %v10248_v55, 0.0  ;;  %v10296_v60 = vmax.f32 %v10289_v23, 0.0  ;;  %v15437_v54 = vld [vmem:[%s18885_s4 + $0xc38] sm:$0xff]   ;;  %v10067_v42 = vmax.f32 %v10020_v61, 0.0  ;;  %v10069_v55 = vmax.f32 %v10061_v63, 0.0  ;;  %v13501_v29 = vld [vmem:[%s18884_s3 + $0x3a0] sm:$0xff] }
0x2baa   :  { %v10297_v7 = vpack.c.bf16 %v10293_v51, %v10293_v51  ;;  %v10299_v58 = vpack.c.bf16 %v10295_v32, %v10295_v32  ;;  %v13507_v23 = vcombine.high %v13497_v49, %v13499_v16  ;;  %v13509_v52 = vcombine.high %v13498_v19, %v13500_v17  ;;  %v13503_v51 = vld [vmem:[%s18884_s3 + $0x3e0] sm:$0xff]  ;;  %v13502_v32 = vld [vmem:[%s18884_s3 + $0x3a8] sm:$0xff]  ;;  %v15464_v56 = vld [vmem:[%s18885_s4 + $0xef0] sm:$0xff]  }
0x2bab   :  { %v10298_v57 = vpack.c.bf16 %v10294_v3, %v10294_v3  ;;  %v10300_v33 = vpack.c.bf16 %v10296_v60, %v10296_v60  ;;  %v13504_v30 = vld [vmem:[%s18884_s3 + $0x3e8] sm:$0xff]  ;;  %v13506_v28 = vcombine.low %v13497_v49, %v13499_v16  ;;  %v13508_v3 = vcombine.low %v13498_v19, %v13500_v17  ;;  %v15465_v45 = vld [vmem:[%s18885_s4 + $0xe30] sm:$0xff]   ;;  %v15470_v61 = vld [vmem:[%s18885_s4 + $0xeb8] sm:$0xff]  }
0x2bac   :  { %v13511_v60 = vcombine.high %v13501_v29, %v13503_v51  ;;  %v10071_v41 = vpack.c.bf16 %v10067_v42, %v10067_v42  ;;  %v10073_v4 = vpack.c.bf16 %v10069_v55, %v10069_v55  ;;  %v18684_v63 = vld [vmem:[%s18884_s3 + $0x330] sm:$0xff]  ;;  %v18701_v16 = vld [vmem:[%s18884_s3 + $0x378] sm:$0xff] }
0x2bad   :  { %10589 = vmatprep.mubr.bf16.mxu0 %v10298_v57  ;;  %10629 = vmatprep.mubr.bf16.mxu1 %v10300_v33  ;;  %v13513_v57 = vcombine.high %v13502_v32, %v13504_v30  ;;  %v13510_v33 = vcombine.low %v13501_v29, %v13503_v51 }
0x2bae   :  { %10590 = vmatmul.mubr.bf16.vlgmr.msra.gmra.mrb[220].mxu0 %v10297_v7  ;;  %10630 = vmatmul.mubr.bf16.vlgmr.msra.gmra.mrb[220].mxu1 %v10299_v58  ;;  %v15440_v7 = vld [vmem:[%s18885_s4 + $0xec0] sm:$0xff]  }
0x2baf   :  { %14433 = vmatpush3.bf16.msra.mxu0 %v15409_v34  ;;  %14455 = vmatpush3.bf16.msra.mxu1 %v15410_v44  ;;  %v13512_v34 = vcombine.low %v13502_v32, %v13504_v30  ;;  %v15439_v44 = vld [vmem:[%s18885_s4 + $0xe40] sm:$0xff]  }
0x2bb0   :  { %10861 = vmatprep.mubr.bf16.mxu0 %v10072_v39  ;;  %10901 = vmatprep.mubr.bf16.mxu1 %v10074_v37  ;;  %v15441_v58 = vld [vmem:[%s18885_s4 + $0xe00] sm:$0xff]   ;;  %v15444_v39 = vld [vmem:[%s18885_s4 + $0xec8] sm:$0xff]  }
0x2bb1   :  { %14434 = vmatprep.subr.bf16.mxu0 %v15411_v62  ;;  %14456 = vmatprep.subr.bf16.mxu1 %v15412_v59  ;;  %v15442_v62 = vld [vmem:[%s18885_s4 + $0xe80] sm:$0xff]   ;;  %v15443_v59 = vld [vmem:[%s18885_s4 + $0xe48] sm:$0xff]  }
0x2bb2   :  { %v15445_v37 = vld [vmem:[%s18885_s4 + $0xe08] sm:$0xff]  }
0x2bb3   :  { %14435 = vmatpush3.bf16.msra.mxu0 %v15413_v50  ;;  %14457 = vmatpush3.bf16.msra.mxu1 %v15414_v5  ;;  %v15446_v50 = vld [vmem:[%s18885_s4 + $0xe88] sm:$0xff]   ;;  %v15447_v5 = vld [vmem:[%s18885_s4 + $0xe50] sm:$0xff]  }
0x2bb4   :  { %14436 = vmatprep.subr.bf16.mxu0 %v15415_v38  ;;  %14458 = vmatprep.subr.bf16.mxu1 %v15416_v12  ;;  %v15448_v38 = vld [vmem:[%s18885_s4 + $0xed0] sm:$0xff]  }
0x2bb5   :  { %v15449_v12 = vld [vmem:[%s18885_s4 + $0xe10] sm:$0xff]  }
0x2bb7   :  { %14437 = vmatpush3.bf16.msra.mxu0 %v15417_v13  ;;  %14459 = vmatpush3.bf16.msra.mxu1 %v15418_v43  ;;  %v15450_v13 = vld [vmem:[%s18885_s4 + $0xe90] sm:$0xff]   ;;  %v15451_v43 = vld [vmem:[%s18885_s4 + $0xe58] sm:$0xff]  }
0x2bb8   :  { %14438 = vmatprep.subr.bf16.mxu0 %v15419_v9  ;;  %14460 = vmatprep.subr.bf16.mxu1 %v15420_v1  ;;  %v15452_v9 = vld [vmem:[%s18885_s4 + $0xed8] sm:$0xff]  }
0x2bb9   :  { %v15453_v1 = vld [vmem:[%s18885_s4 + $0xe18] sm:$0xff]  }
0x2bbb   :  { %14439 = vmatpush3.bf16.msra.mxu0 %v15421_v14  ;;  %14461 = vmatpush3.bf16.msra.mxu1 %v15422_v35  ;;  %v15454_v14 = vld [vmem:[%s18885_s4 + $0xe98] sm:$0xff]   ;;  %v15455_v35 = vld [vmem:[%s18885_s4 + $0xe60] sm:$0xff]  }
0x2bbc   :  { %14440 = vmatprep.subr.bf16.mxu0 %v15423_v24  ;;  %14462 = vmatprep.subr.bf16.mxu1 %v15424_v46  ;;  %v15456_v24 = vld [vmem:[%s18885_s4 + $0xee0] sm:$0xff]  }
0x2bbd   :  { %v15457_v46 = vld [vmem:[%s18885_s4 + $0xe20] sm:$0xff]  }
0x2bbf   :  { %14441 = vmatpush3.bf16.msra.mxu0 %v15425_v8  ;;  %14463 = vmatpush3.bf16.msra.mxu1 %v15426_v26  ;;  %v15458_v8 = vld [vmem:[%s18885_s4 + $0xea0] sm:$0xff]   ;;  %v15459_v26 = vld [vmem:[%s18885_s4 + $0xe68] sm:$0xff]  }
0x2bc0   :  { %14442 = vmatprep.subr.bf16.mxu0 %v15427_v20  ;;  %14464 = vmatprep.subr.bf16.mxu1 %v15428_v21  ;;  %v15460_v20 = vld [vmem:[%s18885_s4 + $0xee8] sm:$0xff]  }
0x2bc1   :  { %v15461_v21 = vld [vmem:[%s18885_s4 + $0xe28] sm:$0xff]  }
0x2bc3   :  { %14443 = vmatpush3.bf16.msra.mxu0 %v15429_v40  ;;  %14465 = vmatpush3.bf16.msra.mxu1 %v15430_v22  ;;  %v15462_v40 = vld [vmem:[%s18885_s4 + $0xea8] sm:$0xff]   ;;  %v15463_v22 = vld [vmem:[%s18885_s4 + $0xe70] sm:$0xff]  }
0x2bc4   :  { %14444 = vmatprep.subr.bf16.mxu0 %v15431_v10  ;;  %14466 = vmatprep.subr.bf16.mxu1 %v15432_v48  ;;  %v15466_v10 = vld [vmem:[%s18885_s4 + $0xeb0] sm:$0xff]   ;;  %v15467_v48 = vld [vmem:[%s18885_s4 + $0xe78] sm:$0xff]  }
0x2bc7   :  { %14445 = vmatpush3.bf16.msra.mxu0 %v15433_v0  ;;  %14467 = vmatpush3.bf16.msra.mxu1 %v15434_v18  ;;  %v15468_v0 = vld [vmem:[%s18885_s4 + $0xef8] sm:$0xff]  }
0x2bc8   :  { %14446 = vmatprep.subr.bf16.mxu0 %v15435_v11  ;;  %14468 = vmatprep.subr.bf16.mxu1 %v15436_v2  ;;  %v15469_v18 = vld [vmem:[%s18885_s4 + $0xe38] sm:$0xff]   ;;  %v18689_v11 = vld [vmem:[%s18884_s3 + $0x370] sm:$0xff] }
0x2bc9   :  { %v18694_v2 = vld [vmem:[%s18884_s3 + $0x338] sm:$0xff]  ;;  %v13622_v49 = vcombine.high %v18684_v63, %v18689_v11  ;;  %v13621_v19 = vcombine.low %v18684_v63, %v18689_v11 }
0x2bca   :  { %v13623_v17 = vcombine.low %v18694_v2, %v18701_v16 }
0x2bcb   :  { %14447 = vmatpush3.bf16.msra.mxu0 %v15437_v54  ;;  %14469 = vmatpush3.bf16.msra.mxu1 %v15438_v31  ;;  %v13624_v54 = vcombine.high %v18694_v2, %v18701_v16 }
0x2bcc   :  { %10980 = vmatprep.subr.bf16.mxu0 %v13507_v23  ;;  %11021 = vmatprep.subr.bf16.mxu1 %v13509_v52 }
0x2bce   :  { %10862 = vmatmul.mubr.bf16.vlgmr.msra.gmra.mrb[224].mxu0 %v10071_v41  ;;  %10902 = vmatmul.mubr.bf16.vlgmr.msra.gmra.mrb[224].mxu1 %v10073_v4 }
0x2bcf   :  { %10981 = vmatpush1.bf16.msra.mxu0 %v13506_v28  ;;  %11022 = vmatpush1.bf16.msra.mxu1 %v13508_v3 }
0x2bd0   :  { %10982 = vmatprep.subr.bf16.mxu0 %v13511_v60  ;;  %11023 = vmatprep.subr.bf16.mxu1 %v13513_v57 }
0x2bd1   :  { %11012 = vmatprep.mubr.bf16.mxu0 %v15650_v36  ;;  %11053 = vmatprep.mubr.bf16.mxu1 %v15650_v36 }
0x2bd3   :  { %10983 = vmatpush1.bf16.msra.mxu0 %v13510_v33  ;;  %11024 = vmatpush1.bf16.msra.mxu1 %v13512_v34 }
0x2bd4   :  { %14476 = vmatprep.subr.bf16.mxu0 %v15439_v44  ;;  %14498 = vmatprep.subr.bf16.mxu1 %v15440_v7 }
0x2bd6   :  { %13514 = vmatmul.mubr.msk.bf16.vlgmr.msra.gmra.mrb[228].mxu0 %vm124_vm2, %v18325_v6  ;;  %13515 = vmatmul.mubr.msk.bf16.vlgmr.msra.gmra.mrb[228].mxu1 %vm124_vm2, %v18325_v6 }
0x2bd7   :  { %14477 = vmatpush3.bf16.msra.mxu0 %v15441_v58  ;;  %14499 = vmatpush3.bf16.msra.mxu1 %v15442_v62  ;;  %v13505_v58 = vld [vmem:[%s18886_s5 + $0x23] ss:$4 sm:$0xf] }
0x2bd8   :  { %14478 = vmatprep.subr.bf16.mxu0 %v15443_v59  ;;  %14500 = vmatprep.subr.bf16.mxu1 %v15444_v39 }
0x2bdb   :  { %14479 = vmatpush3.bf16.msra.mxu0 %v15445_v37  ;;  %14501 = vmatpush3.bf16.msra.mxu1 %v15446_v50  ;;  %v10923_v37 = vrot.slane %v13505_v58, %v16154_v53  ;;  %v10931_v50 = vrot.slane %v13505_v58, %v16156_v25 }
0x2bdc   :  { %14480 = vmatprep.subr.bf16.mxu0 %v15447_v5  ;;  %14502 = vmatprep.subr.bf16.mxu1 %v15448_v38  ;;  %v10927_v38 = vrot.slane %v13505_v58, %v16158_v27 }
0x2bdf   :  { %14481 = vmatpush3.bf16.msra.mxu0 %v15449_v12  ;;  %14503 = vmatpush3.bf16.msra.mxu1 %v15450_v13  ;;  %v10935_v12 = vrot.slane %v13505_v58, %v16160_v15  ;;  %v15492_v58 = vld [vmem:[%s18885_s4 + $0xfe8] sm:$0xff]  }
0x2be0   :  { %14482 = vmatprep.subr.bf16.mxu0 %v15451_v43  ;;  %14504 = vmatprep.subr.bf16.mxu1 %v15452_v9 }
0x2be3   :  { %14483 = vmatpush3.bf16.msra.mxu0 %v15453_v1  ;;  %14505 = vmatpush3.bf16.msra.mxu1 %v15454_v14 }
0x2be4   :  { %14484 = vmatprep.subr.bf16.mxu0 %v15455_v35  ;;  %14506 = vmatprep.subr.bf16.mxu1 %v15456_v24 }
0x2be7   :  { %14485 = vmatpush3.bf16.msra.mxu0 %v15457_v46  ;;  %14507 = vmatpush3.bf16.msra.mxu1 %v15458_v8 }
0x2be8   :  { %14486 = vmatprep.subr.bf16.mxu0 %v15459_v26  ;;  %14508 = vmatprep.subr.bf16.mxu1 %v15460_v20 }
0x2beb   :  { %14487 = vmatpush3.bf16.msra.mxu0 %v15461_v21  ;;  %14509 = vmatpush3.bf16.msra.mxu1 %v15462_v40 }
0x2bec   :  { %14488 = vmatprep.subr.bf16.mxu0 %v15463_v22  ;;  %14510 = vmatprep.subr.bf16.mxu1 %v15464_v56  ;;  %v13616_v56 = vld [vmem:[%s18884_s3 + $0x3b0] sm:$0xff] }
0x2bef   :  { %14489 = vmatpush3.bf16.msra.mxu0 %v15465_v45  ;;  %14511 = vmatpush3.bf16.msra.mxu1 %v15466_v10 }
0x2bf0   :  { %14490 = vmatprep.subr.bf16.mxu0 %v15467_v48  ;;  %14512 = vmatprep.subr.bf16.mxu1 %v15468_v0  ;;  %v13618_v48 = vld [vmem:[%s18884_s3 + $0x3f0] sm:$0xff]  ;;  %v13617_v0 = vld [vmem:[%s18884_s3 + $0x3b8] sm:$0xff] }
0x2bf3   :  { %14491 = vmatpush3.bf16.msra.mxu0 %v15469_v18  ;;  %14513 = vmatpush3.bf16.msra.mxu1 %v15470_v61  ;;  %v13619_v18 = vld [vmem:[%s18884_s3 + $0x3f8] sm:$0xff] }
0x2bf4   :  { %11478 = vmatprep.subr.bf16.mxu0 %v13622_v49  ;;  %11519 = vmatprep.subr.bf16.mxu1 %v13624_v54  ;;  %v13626_v49 = vcombine.high %v13616_v56, %v13618_v48  ;;  %v13628_v16 = vcombine.high %v13617_v0, %v13619_v18  ;;  %v13625_v54 = vcombine.low %v13616_v56, %v13618_v48 }
0x2c81   :  { %v14404_v31 = vpop.f32.mrb[220].mxu0  ;;  %v14426_v42 = vpop.f32.mrb[220].mxu1 }
0x2c82   :  { %v14405_v55 = vpop.f32.mrb[221].mxu0  ;;  %v14427_v23 = vpop.f32.mrb[221].mxu1 }
0x2c83   :  { %v14406_v52 = vadd.f32 %v14405_v55, %v14404_v31  ;;  %v14428_v29 = vadd.f32 %v14427_v23, %v14426_v42  ;;  %v14407_v51 = vpop.f32.mrb[222].mxu0  ;;  %v14429_v32 = vpop.f32.mrb[222].mxu1  ;;  %v13627_v31 = vcombine.low %v13617_v0, %v13619_v18  ;;  %v15471_v42 = vld [vmem:[%s18885_s4 + $0xf40] sm:$0xff]   ;;  %v15475_v23 = vld [vmem:[%s18885_s4 + $0xf48] sm:$0xff]  }
0x2c84   :  { %v14408_v30 = vpop.f32.mrb[223].mxu0  ;;  %v14430_v28 = vpop.f32.mrb[223].mxu1  ;;  %v15472_v55 = vld [vmem:[%s18885_s4 + $0xfc0] sm:$0xff]   ;;  %v15478_v51 = vld [vmem:[%s18885_s4 + $0xf88] sm:$0xff]   ;;  %v15479_v32 = vld [vmem:[%s18885_s4 + $0xf50] sm:$0xff]  }
0x2c85   :  { %v10632_v3 = vadd.f32 %v14428_v29, %v14406_v52  ;;  %v15476_v52 = vld [vmem:[%s18885_s4 + $0xfc8] sm:$0xff]   ;;  %v15481_v30 = vld [vmem:[%s18885_s4 + $0xf10] sm:$0xff]  }
0x2c86   :  { %v15477_v29 = vld [vmem:[%s18885_s4 + $0xf08] sm:$0xff]   ;;  %v15482_v28 = vld [vmem:[%s18885_s4 + $0xf90] sm:$0xff]  }
0x2ca1   :  { %v14448_v60 = vpop.f32.mrb[224].mxu0  ;;  %v14470_v41 = vpop.f32.mrb[224].mxu1 }
0x2ca2   :  { %v14449_v4 = vpop.f32.mrb[225].mxu0  ;;  %v14471_v57 = vpop.f32.mrb[225].mxu1 }
0x2ca3   :  { %v14450_v33 = vadd.f32 %v14449_v4, %v14448_v60  ;;  %v14472_v34 = vadd.f32 %v14471_v57, %v14470_v41  ;;  %v14451_v44 = vpop.f32.mrb[226].mxu0  ;;  %v14473_v7 = vpop.f32.mrb[226].mxu1  ;;  %v15484_v60 = vld [vmem:[%s18885_s4 + $0xfd8] sm:$0xff]   ;;  %v15487_v57 = vld [vmem:[%s18885_s4 + $0xf60] sm:$0xff]  }
0x2ca4   :  { %v14452_v62 = vpop.f32.mrb[227].mxu0  ;;  %v14474_v59 = vpop.f32.mrb[227].mxu1  ;;  %v15485_v41 = vld [vmem:[%s18885_s4 + $0xf18] sm:$0xff]   ;;  %v15490_v44 = vld [vmem:[%s18885_s4 + $0xfa0] sm:$0xff]   ;;  %v15491_v7 = vld [vmem:[%s18885_s4 + $0xf68] sm:$0xff]  }
0x2ca5   :  { %v10864_v39 = vadd.f32 %v14450_v33, %v10632_v3  ;;  %v15483_v3 = vld [vmem:[%s18885_s4 + $0xf58] sm:$0xff]   ;;  %v15488_v33 = vld [vmem:[%s18885_s4 + $0xfe0] sm:$0xff]   ;;  %v15493_v62 = vld [vmem:[%s18885_s4 + $0xf28] sm:$0xff]  }
0x2ca6   :  { %v15486_v4 = vld [vmem:[%s18885_s4 + $0xf98] sm:$0xff]   ;;  %v15494_v59 = vld [vmem:[%s18885_s4 + $0xfa8] sm:$0xff]  }
0x2ca7   :  { %v18714_v5 = vadd.f32 %v14472_v34, %v10864_v39  ;;  %v15489_v34 = vld [vmem:[%s18885_s4 + $0xf20] sm:$0xff]   ;;  %v15495_v39 = vld [vmem:[%s18885_s4 + $0xf70] sm:$0xff]  }
0x2ca9   :  { %v11014_v13 = vpop.f32.mrb[228].mxu0  ;;  %v11055_v43 = vpop.f32.mrb[228].mxu1 }
0x2caa   :  { %v11015_v9 = vadd.f32 %v11014_v13, %v10923_v37  ;;  %v11056_v1 = vadd.f32 %v11055_v43, %v10931_v50  ;;  %v11016_v14 = vpop.f32.mrb[229].mxu0  ;;  %v11057_v35 = vpop.f32.mrb[229].mxu1  ;;  %v15496_v37 = vld [vmem:[%s18885_s4 + $0xff0] sm:$0xff]   ;;  %v15500_v13 = vld [vmem:[%s18885_s4 + $0xff8] sm:$0xff]  }
0x2cab   :  { %v11017_v24 = vadd.f32 %v11016_v14, %v10927_v38  ;;  %v11058_v46 = vadd.f32 %v11057_v35, %v10935_v12  ;;  %v11018_v8 = vpop.f32.mrb[230].mxu0  ;;  %v11059_v26 = vpop.f32.mrb[230].mxu1  ;;  %v15497_v50 = vld [vmem:[%s18885_s4 + $0xf30] sm:$0xff]   ;;  %v15499_v12 = vld [vmem:[%s18885_s4 + $0xf78] sm:$0xff]  }
0x2cac   :  { %v11062_v20 = vmax.f32 %v11015_v9, 0.0  ;;  %v11064_v21 = vmax.f32 %v11056_v1, 0.0  ;;  %v11019_v40 = vpop.f32.mrb[231].mxu0  ;;  %v11060_v22 = vpop.f32.mrb[231].mxu1  ;;  %v15498_v38 = vld [vmem:[%s18885_s4 + $0xfb0] sm:$0xff]   ;;  %v15501_v43 = vld [vmem:[%s18885_s4 + $0xf38] sm:$0xff]  }
0x2cad   :  { %v11063_v45 = vmax.f32 %v11017_v24, 0.0  ;;  %v11065_v10 = vmax.f32 %v11058_v46, 0.0  ;;  %v15502_v9 = vld [vmem:[%s18885_s4 + $0xfb8] sm:$0xff]  }
0x2cae   :  { %v11066_v11 = vpack.c.bf16 %v11062_v20, %v11062_v20  ;;  %v11068_v2 = vpack.c.bf16 %v11064_v21, %v11064_v21  ;;  %v13620_v21 = vld [vmem:[%s18886_s5 + $0x33] ss:$4 sm:$0xf] }
0x2caf   :  { %v11067_v61 = vpack.c.bf16 %v11063_v45, %v11063_v45  ;;  %v11069_v63 = vpack.c.bf16 %v11065_v10, %v11065_v10  ;;  %v11421_v45 = vrot.slane %v13620_v21, %v16154_v53  ;;  %v11429_v10 = vrot.slane %v13620_v21, %v16156_v25 }
0x2cb0   :  { %v11425_v0 = vrot.slane %v13620_v21, %v16158_v27  ;;  %v11433_v18 = vrot.slane %v13620_v21, %v16160_v15 }
0x2cb1   :  { %11358 = vmatprep.mubr.bf16.mxu0 %v11067_v61  ;;  %11398 = vmatprep.mubr.bf16.mxu1 %v11069_v63 }
0x2cb2   :  { %11359 = vmatmul.mubr.bf16.vlgmr.msra.gmra.mrb[232].mxu0 %v11066_v11  ;;  %11399 = vmatmul.mubr.bf16.vlgmr.msra.gmra.mrb[232].mxu1 %v11068_v2 }
0x2cb3   :  { %11479 = vmatpush1.bf16.msra.mxu0 %v13621_v19  ;;  %11520 = vmatpush1.bf16.msra.mxu1 %v13623_v17  ;;  %v15473_v19 = vld [vmem:[%s18885_s4 + $0xf00] sm:$0xff]  }
0x2cb4   :  { %11480 = vmatprep.subr.bf16.mxu0 %v13626_v49  ;;  %11521 = vmatprep.subr.bf16.mxu1 %v13628_v16  ;;  %v15474_v17 = vld [vmem:[%s18885_s4 + $0xf80] sm:$0xff]  }
0x2cb5   :  { %11510 = vmatprep.mubr.bf16.mxu0 %v15650_v36  ;;  %11551 = vmatprep.mubr.bf16.mxu1 %v15650_v36 }
0x2cb7   :  { %11481 = vmatpush1.bf16.msra.mxu0 %v13625_v54  ;;  %11522 = vmatpush1.bf16.msra.mxu1 %v13627_v31 }
0x2cb8   :  { %14520 = vmatprep.subr.bf16.mxu0 %v15471_v42  ;;  %14542 = vmatprep.subr.bf16.mxu1 %v15472_v55 }
0x2cba   :  { %13629 = vmatmul.mubr.msk.bf16.vlgmr.msra.gmra.mrb[236].mxu0 %vm124_vm2, %v18325_v6  ;;  %13630 = vmatmul.mubr.msk.bf16.vlgmr.msra.gmra.mrb[236].mxu1 %vm124_vm2, %v18325_v6  ;;  %v15480_v6 = vld [vmem:[%s18885_s4 + $0xfd0] sm:$0xff]  }
0x2cbb   :  { %14521 = vmatpush3.bf16.msra.mxu0 %v15473_v19  ;;  %14543 = vmatpush3.bf16.msra.mxu1 %v15474_v17 }
0x2cbc   :  { %14522 = vmatprep.subr.bf16.mxu0 %v15475_v23  ;;  %14544 = vmatprep.subr.bf16.mxu1 %v15476_v52 }
0x2cbf   :  { %14523 = vmatpush3.bf16.msra.mxu0 %v15477_v29  ;;  %14545 = vmatpush3.bf16.msra.mxu1 %v15478_v51 }
0x2cc0   :  { %14524 = vmatprep.subr.bf16.mxu0 %v15479_v32  ;;  %14546 = vmatprep.subr.bf16.mxu1 %v15480_v6 }
0x2cc3   :  { %14525 = vmatpush3.bf16.msra.mxu0 %v15481_v30  ;;  %14547 = vmatpush3.bf16.msra.mxu1 %v15482_v28 }
0x2cc4   :  { %14526 = vmatprep.subr.bf16.mxu0 %v15483_v3  ;;  %14548 = vmatprep.subr.bf16.mxu1 %v15484_v60 }
0x2cc7   :  { %14527 = vmatpush3.bf16.msra.mxu0 %v15485_v41  ;;  %14549 = vmatpush3.bf16.msra.mxu1 %v15486_v4 }
0x2cc8   :  { %14528 = vmatprep.subr.bf16.mxu0 %v15487_v57  ;;  %14550 = vmatprep.subr.bf16.mxu1 %v15488_v33 }
0x2ccb   :  { %14529 = vmatpush3.bf16.msra.mxu0 %v15489_v34  ;;  %14551 = vmatpush3.bf16.msra.mxu1 %v15490_v44 }
0x2ccc   :  { %14530 = vmatprep.subr.bf16.mxu0 %v15491_v7  ;;  %14552 = vmatprep.subr.bf16.mxu1 %v15492_v58  ;;  %v15638_v58 = vld [vmem:[%s18882_s6 + $0x7] ss:$0 sm:$0xff] }
0x2ccf   :  { %14531 = vmatpush3.bf16.msra.mxu0 %v15493_v62  ;;  %14553 = vmatpush3.bf16.msra.mxu1 %v15494_v59 }
0x2cd0   :  { %14532 = vmatprep.subr.bf16.mxu0 %v15495_v39  ;;  %14554 = vmatprep.subr.bf16.mxu1 %v15496_v37 }
0x2cd3   :  { %14533 = vmatpush3.bf16.msra.mxu0 %v15497_v50  ;;  %14555 = vmatpush3.bf16.msra.mxu1 %v15498_v38 }
0x2cd4   :  { %14534 = vmatprep.subr.bf16.mxu0 %v15499_v12  ;;  %14556 = vmatprep.subr.bf16.mxu1 %v15500_v13 }
0x2cd7   :  { %14535 = vmatpush3.bf16.msra.mxu0 %v15501_v43  ;;  %14557 = vmatpush3.bf16.msra.mxu1 %v15502_v9 }
0x2d85   :  { %v14492_v1 = vpop.f32.mrb[232].mxu0  ;;  %v14514_v14 = vpop.f32.mrb[232].mxu1 }
0x2d86   :  { %v14493_v35 = vpop.f32.mrb[233].mxu0  ;;  %v14515_v24 = vpop.f32.mrb[233].mxu1 }
0x2d87   :  { %v14494_v46 = vadd.f32 %v14493_v35, %v14492_v1  ;;  %v14516_v8 = vadd.f32 %v14515_v24, %v14514_v14  ;;  %v14495_v26 = vpop.f32.mrb[234].mxu0  ;;  %v14517_v20 = vpop.f32.mrb[234].mxu1 }
0x2d88   :  { %v14496_v40 = vpop.f32.mrb[235].mxu0  ;;  %v14518_v22 = vpop.f32.mrb[235].mxu1 }
0x2d89   :  { %v11401_v56 = vadd.f32 %v14516_v8, %v14494_v46  ;;  %v13727_v8 = vld [vmem:[%s18882_s6 + $0xb] ss:$0 sm:$0xff] }
0x2d8b   :  { %v11406_v48 = vadd.f32 %v11401_v56, %v18714_v5  ;;  %v13728_v56 = vld [vmem:[%s18881_s7 + $0x1] ss:$0 sm:$0xff] }
0x2d8d   :  { %v11512_v61 = vpop.f32.mrb[236].mxu0  ;;  %v11553_v63 = vpop.f32.mrb[236].mxu1 }
0x2d8e   :  { %v11513_v11 = vadd.f32 %v11512_v61, %v11421_v45  ;;  %v11554_v2 = vadd.f32 %v11553_v63, %v11429_v10  ;;  %v11514_v49 = vpop.f32.mrb[237].mxu0  ;;  %v11555_v16 = vpop.f32.mrb[237].mxu1  ;;  %v15503_v45 = vld [vmem:[%s18888_s10] ss:$8 sps:$4 sm:$0xff]   ;;  %v15505_v10 = vld [vmem:[%s18888_s10 + $0x4] ss:$8 sps:$4 sm:$0xff]  }
0x2d8f   :  { %v11515_v54 = vadd.f32 %v11514_v49, %v11425_v0  ;;  %v11556_v31 = vadd.f32 %v11555_v16, %v11433_v18  ;;  %v11516_v42 = vpop.f32.mrb[238].mxu0  ;;  %v11557_v55 = vpop.f32.mrb[238].mxu1  ;;  %12001 = vmatprep.subr.bf16.mxu0 %v15505_v10  ;;  %v15506_v0 = vld [vmem:[%s18888_s10 + $0x10] ss:$8 sps:$4 sm:$0xff]  }
0x2d90   :  { %v11560_v19 = vmax.f32 %v11513_v11, 0.0  ;;  %v11562_v17 = vmax.f32 %v11554_v2, 0.0  ;;  %v11517_v23 = vpop.f32.mrb[239].mxu0  ;;  %v11558_v25 = vpop.f32.mrb[239].mxu1 }
0x2d91   :  { %v11561_v52 = vmax.f32 %v11515_v54, 0.0  ;;  %v11563_v5 = vmax.f32 %v11556_v31, 0.0 }
0x2d92   :  { %v11564_v32 = vpack.c.bf16 %v11560_v19, %v11560_v19  ;;  %v11566_v15 = vpack.c.bf16 %v11562_v17, %v11562_v17 }
0x2d93   :  { %v11565_v29 = vpack.c.bf16 %v11561_v52, %v11561_v52  ;;  %v11567_v51 = vpack.c.bf16 %v11563_v5, %v11563_v5  ;;  %v11966_v52 = vld [vmem:[%s18881_s7 + $0x2] sm:$0x3] }
0x2d94   :  { %v11971_v5 = vrot.slane %v11966_v52, %v16154_v53 }
0x2d95   :  { %11856 = vmatprep.mubr.bf16.mxu0 %v11565_v29  ;;  %11896 = vmatprep.mubr.bf16.mxu1 %v11567_v51  ;;  %v11975_v29 = vrot.slane %v11966_v52, %v16158_v27 }
0x2d96   :  { %11857 = vmatmul.mubr.bf16.vlgmr.msra.gmra.mrb[240].mxu0 %v11564_v32  ;;  %11897 = vmatmul.mubr.bf16.vlgmr.msra.gmra.mrb[240].mxu1 %v11566_v15 }
0x2d97   :  { %12033 = vmatprep.mubr.bf16.mxu0 %v15650_v36  ;;  %12002 = vmatpush1.bf16.msra.mxu0 %v15503_v45 }
0x2e69   :  { %v14536_v6 = vpop.f32.mrb[240].mxu0  ;;  %v14558_v30 = vpop.f32.mrb[240].mxu1 }
0x2e6a   :  { %v14537_v28 = vpop.f32.mrb[241].mxu0  ;;  %v14559_v3 = vpop.f32.mrb[241].mxu1 }
0x2e6b   :  { %v14538_v60 = vadd.f32 %v14537_v28, %v14536_v6  ;;  %v14560_v41 = vadd.f32 %v14559_v3, %v14558_v30  ;;  %v14539_v4 = vpop.f32.mrb[242].mxu0  ;;  %v14561_v57 = vpop.f32.mrb[242].mxu1 }
0x2e6c   :  { %v14540_v33 = vpop.f32.mrb[243].mxu0  ;;  %v14562_v34 = vpop.f32.mrb[243].mxu1 }
0x2e6d   :  { %v11899_v44 = vadd.f32 %v14560_v41, %v14538_v60 }
0x2e6f   :  { %v11904_v7 = vadd.f32 %v11899_v44, %v11406_v48  ;;  %v15508_v48 = vld [vmem:[%s18888_s10 + $0x14] ss:$8 sps:$4 sm:$0xff]  }
0x2e70   :  { %12003 = vmatprep.subr.bf16.mxu0 %v15508_v48 }
0x2e71   :  { %v11905_v62 = vadd.f32 %v15638_v58, %v11904_v7  ;;  %12004 = vmatpush1.bf16.msra.mxu0 %v15506_v0 }
0x2e73   :  { %v11906_v59 = vadd.f32 %v11905_v62, %v18321_v47 }
0x2e75   :  { %v11908_v36 = vsel %vm7229_vm12, %v11906_v59, 0.0  ;;  %v11912_v39 = vmul.f32 %v11906_v59, %v11906_v59 }
0x2e76   :  { %11909 = vadd.xlane.f32.xlu0 %v11908_v36 }
0x2e77   :  { %v11913_v37 = vsel %vm7229_vm12, %v11912_v39, 0.0 }
0x2e78   :  { %11914 = vadd.xlane.f32.xlu1 %v11913_v37 }
0x2e8c   :  { %11924 = vrot.lane.b32.xlu0 %v15638_v58, %s15648_s21 }
0x2f03   :  { %v11910_v50 = vpop.xlane.xlu0 %11909 }
0x2f04   :  { %v11911_v38 = vmul.f32 0.03125, %v11910_v50 }
0x2f05   :  { %v11915_v12 = vpop.xlane.xlu1 %11914 }
0x2f06   :  { %v11917_v13 = vmul.f32 %v11911_v38, %v11911_v38  ;;  %v11916_v43 = vmul.f32 0.03125, %v11915_v12  ;;  %v11920_v35 = vsub.f32 %v11906_v59, %v11911_v38 }
0x2f07   :  { %v11925_v24 = vpop.permute.xlu0 %11924 }
0x2f08   :  { %v11918_v9 = vsub.f32 %v11916_v43, %v11917_v13 }
0x2f0a   :  { %v11919_v1 = vmax.f32 %v11918_v9, 0.0 }
0x2f0c   :  { %v11921_v14 = vadd.f32 1e-05, %v11919_v1 }
0x2f0e   :  { %15631 = vrsqrt.f32 %v11921_v14 }
0x2f18   :  { %v15632_v47 = vpop.eup %15631 }
0x2f19   :  { %v11923_v46 = vmul.f32 %v15632_v47, %v11920_v35 }
0x2f1b   :  { %v11927_v26 = vmul.f32 %v11925_v24, %v11923_v46 }
0x2f1d   :  { %v11932_v20 = vadd.f32 %v13727_v8, %v11927_v26 }
0x2f1f   :  { %v11934_v21 = vsel %vm7229_vm12, %v11932_v20, 0.0  ;;  %v11938_v40 = vmul.f32 %v11932_v20, %v11932_v20 }
0x2f20   :  { %11935 = vadd.xlane.f32.xlu1 %v11934_v21 }
0x2f21   :  { %v11939_v22 = vsel %vm7229_vm12, %v11938_v40, 0.0 }
0x2f24   :  { %11940 = vadd.xlane.f32.xlu1 %v11939_v22 }
0x2f35   :  { %11957 = vrot.lane.b32.xlu1 %v13728_v56, %s15644_s13 }
0x2fad   :  { %v11936_v18 = vpop.xlane.xlu1 %11935 }
0x2fae   :  { %v11937_v61 = vmul.f32 0.03125, %v11936_v18 }
0x2fb0   :  { %v11943_v11 = vmul.f32 %v11937_v61, %v11937_v61  ;;  %v11946_v31 = vsub.f32 %v11932_v20, %v11937_v61 }
0x2fb1   :  { %v11941_v63 = vpop.xlane.xlu1 %11940 }
0x2fb2   :  { %v11942_v2 = vmul.f32 0.03125, %v11941_v63 }
0x2fb4   :  { %v11944_v49 = vsub.f32 %v11942_v2, %v11943_v11 }
0x2fb5   :  { %v11958_v19 = vpop.permute.xlu1 %11957 }
0x2fb6   :  { %v11945_v16 = vmax.f32 %v11944_v49, 0.0 }
0x2fb8   :  { %v11947_v54 = vadd.f32 1e-05, %v11945_v16 }
0x2fba   :  { %15633 = vrsqrt.f32 %v11947_v54 }
0x2fc4   :  { %v15634_v42 = vpop.eup %15633 }
0x2fc5   :  { %v11949_v55 = vmul.f32 %v15634_v42, %v11946_v31 }
0x2fc7   :  { %v11956_v17 = vmul.f32 %v13728_v56, %v11949_v55 }
0x2fc9   :  { %v11960_v23 = vadd.f32 %v11958_v19, %v11956_v17 }
0x2fcb   :  { %v11961_v25 = vpack.c.bf16 %v11960_v23, %v11960_v23 }
0x2fcd   :  { %13733 = vmatmul.mubr.msk.bf16.vlgmr.msra.gmra.mrb[244].mxu0 %vm124_vm2, %v11961_v25 }
0x30a0   :  { %v12035_v51 = vpop.f32.mrb[244].mxu0 }
0x30a1   :  { %v12036_v32 = vadd.f32 %v12035_v51, %v11971_v5  ;;  %v12037_v15 = vpop.f32.mrb[245].mxu0 }
0x30a2   :  { %v12038_v6 = vadd.f32 %v12037_v15, %v11975_v29  ;;  %v12039_v30 = vpop.f32.mrb[246].mxu0 }
0x30a3   :  { %v12040_v28 = vpop.f32.mrb[247].mxu0 }
0x30a4   :  { %v12044_v3 = vcombine.low %v12036_v32, %v12038_v6 }
0x30a6   :  { %13734 = vst.sshfl [vmem:[%s18889_s11] sm:$0x33 pattern:$0x76325410] %v12044_v3 }

</bundles_post_ra>
